<compile_context>
chip_gen: v5e
topology: v5e:2x2
jax: 0.10.0
libtpu: 0.0.40
codegen_flags: <defaults>
</compile_context>

<pallas_src>
import functools

import jax
import jax.numpy as jnp
import numpy as np
from jax.experimental import pallas as pl
from jax.experimental.pallas import tpu as pltpu


# ----------------------------------------------------------------------------
# Pallas kernel: WB windows per grid step.
#   qkv projection -> per-head scaled attention + rel-pos bias -> softmax
#   -> attn @ v (into VMEM slab) -> output projection -> lane-dense store.
# ----------------------------------------------------------------------------
def _wmsa_kernel(x_ref, wqkv_ref, bqkv_ref, bias_ref, wproj_ref, bproj_ref,
                 o_ref, slab_ref):
    # x_ref:    (WB*N, C)       compute dtype (bf16 default, f32 optional)
    # wqkv_ref: (C, 3C)         compute dtype, qk scale pre-folded into Q columns
    # bqkv_ref: (1, 3C)         f32, scale pre-folded into first C entries
    # bias_ref: (H, N, N)       f32 relative position bias
    # wproj_ref:(C, C)          compute dtype
    # bproj_ref:(1, C)          f32
    # o_ref:    (WB*N/pack, pack*C) or (WB*N, C), out dtype
    # slab_ref: (WB*N, C)       f32 VMEM scratch (head outputs + repack staging)
    rows, C = x_ref.shape
    H, N, _ = bias_ref.shape
    WB = rows // N
    HD = C // H
    cdt = wqkv_ref.dtype

    x = x_ref[...]                                                   # (rows, C)

    # qkv projection on the MXU, f32 accumulation. Scale already folded into Q.
    qkv = jnp.dot(x, wqkv_ref[...], preferred_element_type=jnp.float32)
    qkv = qkv + bqkv_ref[...]                                        # (rows, 3C) f32
    # leading-dim split (layout-safe), then one cast for all attention operands
    qkv_c = qkv.reshape(WB, N, 3 * C).astype(cdt)                    # (WB, N, 3C)

    # Per-head attention with static lane slices (heads are contiguous lane
    # blocks of the qkv projection).  Head outputs go straight into the slab.
    for h in range(H):
        q_h = qkv_c[:, :, h * HD:(h + 1) * HD]                       # (WB, N, HD)
        k_h = qkv_c[:, :, C + h * HD:C + (h + 1) * HD]               # (WB, N, HD)
        v_h = qkv_c[:, :, 2 * C + h * HD:2 * C + (h + 1) * HD]       # (WB, N, HD)

        # logits: (WB, N, N) -- batched over the WB windows, f32 accumulation
        s = jax.lax.dot_general(
            q_h, k_h,
            dimension_numbers=(((2,), (2,)), ((0,), (0,))),
            preferred_element_type=jnp.float32)
        s = s + bias_ref[h]                                          # f32 bias add

        # numerically-stable softmax over keys (f32); EUP approx reciprocal
        s = s - jnp.max(s, axis=-1, keepdims=True)
        p = jnp.exp(s)
        inv = pl.reciprocal(jnp.sum(p, axis=-1, keepdims=True), approx=True)
        p = (p * inv).astype(cdt)                                    # bf16 for PV matmul

        # weighted values: (WB, N, HD), f32 accumulation
        o_h = jax.lax.dot_general(
            p, v_h,
            dimension_numbers=(((2,), (1,)), ((0,), (0,))),
            preferred_element_type=jnp.float32)
        slab_ref[:, h * HD:(h + 1) * HD] = o_h.reshape(rows, HD)

    # output projection (MXU), f32 accumulation
    attn_out = slab_ref[...]                                          # (rows, C) f32
    out = jnp.dot(attn_out.astype(cdt), wproj_ref[...],
                  preferred_element_type=jnp.float32)
    out = out + bproj_ref[...]                                        # (rows, C) f32

    o_rows, _ = o_ref.shape
    if o_rows == rows:
        # plain (rows, C) store (pack disabled / not applicable)
        o_ref[...] = out.astype(o_ref.dtype)
    else:
        # lane-dense repack: group `pack` consecutive rows into one 128-lane row.
        # Done through the slab with sublane-strided reads; the wrapper unpack is
        # a free row-major reshape.
        pack = rows // o_rows
        slab_ref[...] = out
        for j in range(pack):
            o_ref[:, j * C:(j + 1) * C] = slab_ref[
                pl.ds(j, o_rows, stride=pack), :].astype(o_ref.dtype)


# ----------------------------------------------------------------------------
# Blocking / VMEM budget helpers (all static Python math).
# ----------------------------------------------------------------------------
def _choose_blocking(B_, N, target_rows=2048, min_blocks=2):
    """Pick windows-per-block WB and number of grid steps.

    Large blocks (WB*N up to ~target_rows) amortise the ~0.35us/step pipeline
    overhead and feed the projection matmuls MXU-sized M.  WB is capped so at
    least `min_blocks` grid steps remain (v7x: 2 TensorCores share the
    "parallel" grid axis).  Awkward B_ is handled by padding up to
    num_blocks*WB windows.
    """
    wb = max(1, target_rows // N)
    if B_ >= min_blocks:
        wb = min(wb, -(-B_ // min_blocks))     # ceil(B_/min_blocks)
    wb = max(1, min(wb, B_))
    num_blocks = -(-B_ // wb)
    return wb, num_blocks


def _vmem_budget(rows, C, N, H, WB, compute_dtype, out_dtype, pack):
    """Explicit VMEM budget tied to the block choice, clamped under v7x's 64 MiB."""
    cb = jnp.dtype(compute_dtype).itemsize
    ob = jnp.dtype(out_dtype).itemsize
    blocks = rows * C * cb * 2                       # x, double buffered
    blocks += (rows // pack) * (pack * C) * ob * 2   # output, double buffered
    consts = (3 * C * C + C * C) * cb + 4 * C * 4 + H * N * N * 4  # single buffered
    scratch = rows * C * 4                           # f32 slab
    interm = rows * 3 * C * (4 + cb) + WB * N * N * 4 * 2 + rows * C * 4
    est = blocks + consts + scratch + interm
    return int(min(max(4 * est, 16 * (1 << 20)), 48 * (1 << 20)))


# ----------------------------------------------------------------------------
# One-time parameter prep (hoisted out of the forward path).
# ----------------------------------------------------------------------------
def prepare_wmsa_params(params, *, window_size, num_heads,
                        compute_dtype=jnp.bfloat16):
    """Rel-pos bias gather, weight transpose, qk-scale folding, dtype cast.

    Call once at init and reuse the result for every forward call.
    """
    Wh, Ww = window_size
    N = Wh * Ww
    C = params['w_qkv'].shape[1]
    head_dim = C // num_heads
    scale = head_dim ** (-0.5)

    # relative position bias gather (numpy, one-time)
    coords = np.stack(np.meshgrid(np.arange(Wh), np.arange(Ww), indexing='ij'))
    coords_flat = coords.reshape(2, -1)                               # (2, N)
    rel = coords_flat[:, :, None] - coords_flat[:, None, :]           # (2, N, N)
    rel = np.ascontiguousarray(rel.transpose(1, 2, 0))                # (N, N, 2)
    rel[:, :, 0] += Wh - 1
    rel[:, :, 1] += Ww - 1
    rel[:, :, 0] *= 2 * Ww - 1
    rel_index = rel.sum(-1)                                           # (N, N)

    table = np.asarray(params['rel_pos_table'], dtype=np.float32)     # ((2Wh-1)(2Ww-1), H)
    rel_bias = table[rel_index.reshape(-1)].reshape(N, N, num_heads)
    rel_bias = np.ascontiguousarray(rel_bias.transpose(2, 0, 1))      # (H, N, N)

    # transpose so kernel does x @ W; fold qk scale into Q columns (+ Q bias)
    w_qkv = np.asarray(params['w_qkv'], np.float32).T.copy()          # (C, 3C)
    b_qkv = np.asarray(params['b_qkv'], np.float32).copy()            # (3C,)
    w_qkv[:, :C] *= scale
    b_qkv[:C] *= scale

    return {
        'w_qkv': jnp.asarray(w_qkv, compute_dtype),                   # (C, 3C)
        'b_qkv': jnp.asarray(b_qkv.reshape(1, 3 * C), jnp.float32),   # (1, 3C)
        'rel_bias': jnp.asarray(rel_bias, jnp.float32),               # (H, N, N)
        'w_proj': jnp.asarray(np.asarray(params['w_proj'], np.float32).T,
                              compute_dtype),                         # (C, C)
        'b_proj': jnp.asarray(np.asarray(params['b_proj'], np.float32).reshape(1, C),
                              jnp.float32),                           # (1, C)
    }


# ----------------------------------------------------------------------------
# Forward wrapper.
# ----------------------------------------------------------------------------
@functools.partial(jax.jit,
                   static_argnames=("out_dtype", "pack_output",
                                    "target_rows", "min_blocks"))
def wmsa_forward(x, prep, *, out_dtype=jnp.float32, pack_output=True,
                 target_rows=2048, min_blocks=2):
    """x: (B_, N, C). prep: output of prepare_wmsa_params. Returns (B_, N, C)."""
    B_, N, C = x.shape
    H = prep['rel_bias'].shape[0]
    assert prep['rel_bias'].shape[1] == N
    assert C % H == 0
    compute_dtype = prep['w_qkv'].dtype

    WB, num_blocks = _choose_blocking(B_, N, target_rows=target_rows,
                                      min_blocks=min_blocks)
    rows = WB * N
    assert rows % 8 == 0, "WB * N must be a multiple of 8 (sublane tiling)"
    B_pad = WB * num_blocks

    xw = x
    if B_pad != B_:
        # pad windows; padded rows compute garbage that is sliced off below
        xw = jnp.pad(x, ((0, B_pad - B_), (0, 0), (0, 0)))
    x2d = xw.reshape(B_pad * N, C).astype(compute_dtype)

    # lane-dense packed output presentation (free unpack via row-major reshape)
    pack = 1
    if pack_output and C < 128 and (128 % C == 0):
        cand = 128 // C
        if rows % cand == 0 and (rows // cand) % 8 == 0:
            pack = cand
    out_rows_blk = rows // pack

    def _const_spec(shape):
        nd = len(shape)
        # grid-invariant operands: single-buffered (no re-DMA, half the VMEM)
        return pl.BlockSpec(shape, lambda b, _nd=nd: (0,) * _nd,
                            pipeline_mode=pl.Buffered(1))

    vmem_bytes = _vmem_budget(rows, C, N, H, WB, compute_dtype, out_dtype, pack)

    out = pl.pallas_call(
        _wmsa_kernel,
        out_shape=jax.ShapeDtypeStruct((num_blocks * out_rows_blk, pack * C),
                                       out_dtype),
        grid_spec=pltpu.PrefetchScalarGridSpec(
            num_scalar_prefetch=0,
            grid=(num_blocks,),
            in_specs=[
                pl.BlockSpec((rows, C), lambda b: (b, 0)),            # x (pipelined)
                _const_spec((C, 3 * C)),                              # w_qkv
                _const_spec((1, 3 * C)),                              # b_qkv
                _const_spec((H, N, N)),                               # rel bias
                _const_spec((C, C)),                                  # w_proj
                _const_spec((1, C)),                                  # b_proj
            ],
            out_specs=pl.BlockSpec((out_rows_blk, pack * C), lambda b: (b, 0)),
            scratch_shapes=[pltpu.VMEM((rows, C), jnp.float32)],      # head/repack slab
        ),
        compiler_params=pltpu.CompilerParams(
            dimension_semantics=("parallel",),
            vmem_limit_bytes=vmem_bytes,                              # < v7x 64 MiB phys
        ),
    )(x2d, prep['w_qkv'], prep['b_qkv'], prep['rel_bias'],
      prep['w_proj'], prep['b_proj'])

    # packed layout groups consecutive rows -> unpack is a pure metadata reshape
    out = out.reshape(B_pad * N, C)[:B_ * N].reshape(B_, N, C)
    return out


# ----------------------------------------------------------------------------
# Pure-JAX reference (mirrors the PyTorch forward, y=None, mask=None)
# ----------------------------------------------------------------------------
def wmsa_reference(x, params, *, window_size, num_heads):
    B_, N, C = x.shape
    head_dim = C // num_heads
    scale = head_dim ** (-0.5)

    qkv = x @ params['w_qkv'].T + params['b_qkv']             # (B_, N, 3C)
    qkv = qkv.reshape(B_, N, 3, num_heads, head_dim).transpose(2, 0, 3, 1, 4)
    q, k, v = qkv[0], qkv[1], qkv[2]                          # (B_, H, N, hd)
    q = q * scale
    attn = q @ jnp.swapaxes(k, -2, -1)                        # (B_, H, N, N)

    Wh, Ww = window_size
    coords = np.stack(np.meshgrid(np.arange(Wh), np.arange(Ww), indexing='ij'))
    coords_flat = coords.reshape(2, -1)
    rel = coords_flat[:, :, None] - coords_flat[:, None, :]
    rel = np.ascontiguousarray(rel.transpose(1, 2, 0))
    rel[:, :, 0] += Wh - 1
    rel[:, :, 1] += Ww - 1
    rel[:, :, 0] *= 2 * Ww - 1
    rel_index = rel.sum(-1)
    bias = params['rel_pos_table'][rel_index.reshape(-1)].reshape(N, N, num_heads)
    bias = jnp.transpose(bias, (2, 0, 1))[None]               # (1, H, N, N)

    attn = jax.nn.softmax(attn + bias, axis=-1)
    out = (attn @ v).transpose(0, 2, 1, 3).reshape(B_, N, C)
    out = out @ params['w_proj'].T + params['b_proj']
    return out


if __name__ == "__main__":
    # dim=32, window_size=(4,4) -> N=16, num_heads=4.
    # Main case: B_ = 32 windows -> WB=16 (rows=256), grid=(2,) (>=2 blocks for v7x).
    dim = 32
    window_size = (4, 4)
    num_heads = 4
    N = window_size[0] * window_size[1]

    key = jax.random.PRNGKey(0)
    k_x, k_t, k_w1, k_b1, k_w2, k_b2, k_x2 = jax.random.split(key, 7)

    params = {
        # trunc_normal_(std=0.02) ~ approximated with normal*0.02 (synthetic init)
        'rel_pos_table': 0.02 * jax.random.normal(
            k_t, ((2 * window_size[0] - 1) * (2 * window_size[1] - 1), num_heads),
            dtype=jnp.float32),
        'w_qkv': 0.05 * jax.random.normal(k_w1, (3 * dim, dim), dtype=jnp.float32),
        'b_qkv': 0.01 * jax.random.normal(k_b1, (3 * dim,), dtype=jnp.float32),
        'w_proj': 0.05 * jax.random.normal(k_w2, (dim, dim), dtype=jnp.float32),
        'b_proj': 0.01 * jax.random.normal(k_b2, (dim,), dtype=jnp.float32),
    }

    # one-time prep (hoisted out of the forward path)
    prep_bf16 = prepare_wmsa_params(params, window_size=window_size,
                                    num_heads=num_heads)                 # bf16 default
    prep_f32 = prepare_wmsa_params(params, window_size=window_size,
                                   num_heads=num_heads,
                                   compute_dtype=jnp.float32)

    # --- test 1: B_ = 32 windows ---
    B_ = 32
    x = jax.random.normal(k_x, (B_, N, dim), dtype=jnp.float32)
    ref = wmsa_reference(x, params, window_size=window_size, num_heads=num_heads)

    out_bf16 = jax.block_until_ready(wmsa_forward(x, prep_bf16))
    np.testing.assert_allclose(np.asarray(out_bf16), np.asarray(ref),
                               rtol=5e-2, atol=5e-2)

    # f32 matmul-input path (tighter check; approx softmax reciprocal ~1e-3 rel err)
    out_f32 = jax.block_until_ready(wmsa_forward(x, prep_f32))
    np.testing.assert_allclose(np.asarray(out_f32), np.asarray(ref),
                               rtol=1e-2, atol=1e-2)

    # --- test 2: awkward B_ (not divisible by chosen WB) exercises window padding ---
    B2 = 11
    x2 = jax.random.normal(k_x2, (B2, N, dim), dtype=jnp.float32)
    ref2 = wmsa_reference(x2, params, window_size=window_size, num_heads=num_heads)
    out2 = jax.block_until_ready(wmsa_forward(x2, prep_bf16))
    np.testing.assert_allclose(np.asarray(out2), np.asarray(ref2),
                               rtol=5e-2, atol=5e-2)

    print("KERNEL_OK")
</pallas_src>

<mosaic_0001>
module attributes {stable_mosaic.version = 11 : i64} {
  func.func @_wmsa_kernel(%arg0: i32, %arg1: memref<256x32xbf16, #tpu.memory_space<vmem>>, %arg2: memref<32x96xbf16, #tpu.memory_space<vmem>>, %arg3: memref<1x96xf32, #tpu.memory_space<vmem>>, %arg4: memref<4x16x16xf32, #tpu.memory_space<vmem>>, %arg5: memref<32x32xbf16, #tpu.memory_space<vmem>>, %arg6: memref<1x32xf32, #tpu.memory_space<vmem>>, %arg7: memref<64x128xf32, #tpu.memory_space<vmem>>, %arg8: memref<256x32xf32, #tpu.memory_space<vmem>>) attributes {dimension_semantics = [#tpu.dimension_semantics<parallel>], iteration_bounds = array<i64: 2>, scalar_prefetch = 0 : i64, scratch_operands = 1 : i64, tpu.core_type = #tpu.core_type<tc>, window_params = [{transform_indices = @transform_0, window_bounds = array<i64: 256, 32>}, {pipeline_mode = #tpu.pipeline_mode<synchronous>, transform_indices = @transform_1, window_bounds = array<i64: 32, 96>}, {pipeline_mode = #tpu.pipeline_mode<synchronous>, transform_indices = @transform_2, window_bounds = array<i64: 1, 96>}, {pipeline_mode = #tpu.pipeline_mode<synchronous>, transform_indices = @transform_3, window_bounds = array<i64: 4, 16, 16>}, {pipeline_mode = #tpu.pipeline_mode<synchronous>, transform_indices = @transform_4, window_bounds = array<i64: 32, 32>}, {pipeline_mode = #tpu.pipeline_mode<synchronous>, transform_indices = @transform_5, window_bounds = array<i64: 1, 32>}, {transform_indices = @transform_6, window_bounds = array<i64: 64, 128>}]} {
    %c0 = arith.constant 0 : index
    %c0_0 = arith.constant 0 : index
    %0 = vector.load %arg1[%c0, %c0_0] : memref<256x32xbf16, #tpu.memory_space<vmem>>, vector<256x32xbf16>
    %c0_1 = arith.constant 0 : index
    %c0_2 = arith.constant 0 : index
    %1 = vector.load %arg2[%c0_1, %c0_2] : memref<32x96xbf16, #tpu.memory_space<vmem>>, vector<32x96xbf16>
    %cst = arith.constant dense<0.000000e+00> : vector<256x96xf32>
    %2 = tpu.matmul %0, %1, %cst {dimension_numbers = #tpu.dot_dimension_numbers<[1], [0], [0], [1], [0, 0, 1, 1], [], []>} : vector<256x32xbf16>, vector<32x96xbf16>, vector<256x96xf32> -> vector<256x96xf32>
    %c0_3 = arith.constant 0 : index
    %c0_4 = arith.constant 0 : index
    %3 = vector.load %arg3[%c0_3, %c0_4] : memref<1x96xf32, #tpu.memory_space<vmem>>, vector<1x96xf32>
    %4 = vector.broadcast %3 : vector<1x96xf32> to vector<256x96xf32>
    %5 = arith.addf %2, %4 : vector<256x96xf32>
    %6 = vector.shape_cast %5 : vector<256x96xf32> to vector<16x16x96xf32>
    %7 = arith.truncf %6 : vector<16x16x96xf32> to vector<16x16x96xbf16>
    %8 = vector.extract_strided_slice %7 {offsets = [0, 0, 0], sizes = [16, 16, 8], strides = [1, 1, 1]} : vector<16x16x96xbf16> to vector<16x16x8xbf16>
    %9 = vector.extract_strided_slice %7 {offsets = [0, 0, 32], sizes = [16, 16, 8], strides = [1, 1, 1]} : vector<16x16x96xbf16> to vector<16x16x8xbf16>
    %10 = vector.extract_strided_slice %7 {offsets = [0, 0, 64], sizes = [16, 16, 8], strides = [1, 1, 1]} : vector<16x16x96xbf16> to vector<16x16x8xbf16>
    %cst_5 = arith.constant dense<0.000000e+00> : vector<16x16x16xf32>
    %11 = tpu.matmul %8, %9, %cst_5 {dimension_numbers = #tpu.dot_dimension_numbers<[2], [2], [1], [1], [0, 0, 0, 1, 1, 1], [0], [0]>} : vector<16x16x8xbf16>, vector<16x16x8xbf16>, vector<16x16x16xf32> -> vector<16x16x16xf32>
    %c0_6 = arith.constant 0 : index
    %c0_7 = arith.constant 0 : index
    %c0_8 = arith.constant 0 : index
    %12 = vector.load %arg4[%c0_6, %c0_7, %c0_8] : memref<4x16x16xf32, #tpu.memory_space<vmem>>, vector<1x16x16xf32>
    %13 = vector.shape_cast %12 : vector<1x16x16xf32> to vector<16x16xf32>
    %14 = vector.shape_cast %13 : vector<16x16xf32> to vector<1x16x16xf32>
    %15 = vector.broadcast %14 : vector<1x16x16xf32> to vector<16x16x16xf32>
    %16 = arith.addf %11, %15 : vector<16x16x16xf32>
    %cst_9 = arith.constant dense<0xFF800000> : vector<16x16xf32>
    %17 = vector.multi_reduction <maximumf>, %16, %cst_9 [2] : vector<16x16x16xf32> to vector<16x16xf32>
    %18 = vector.shape_cast %17 : vector<16x16xf32> to vector<16x16x1xf32>
    %19 = vector.broadcast %18 : vector<16x16x1xf32> to vector<16x16x16xf32>
    %20 = arith.subf %16, %19 : vector<16x16x16xf32>
    %21 = math.exp %20 : vector<16x16x16xf32>
    %cst_10 = arith.constant dense<0.000000e+00> : vector<16x16xf32>
    %22 = vector.multi_reduction <add>, %21, %cst_10 [2] : vector<16x16x16xf32> to vector<16x16xf32>
    %23 = vector.shape_cast %22 : vector<16x16xf32> to vector<16x16x1xf32>
    %24 = tpu.reciprocal %23 {approx = true} : vector<16x16x1xf32> -> vector<16x16x1xf32>
    %25 = vector.broadcast %24 : vector<16x16x1xf32> to vector<16x16x16xf32>
    %26 = arith.mulf %21, %25 : vector<16x16x16xf32>
    %27 = arith.truncf %26 : vector<16x16x16xf32> to vector<16x16x16xbf16>
    %cst_11 = arith.constant dense<0.000000e+00> : vector<16x16x8xf32>
    %28 = tpu.matmul %27, %10, %cst_11 {dimension_numbers = #tpu.dot_dimension_numbers<[2], [1], [1], [2], [0, 0, 0, 1, 1, 2], [0], [0]>} : vector<16x16x16xbf16>, vector<16x16x8xbf16>, vector<16x16x8xf32> -> vector<16x16x8xf32>
    %29 = vector.shape_cast %28 : vector<16x16x8xf32> to vector<256x8xf32>
    %c0_12 = arith.constant 0 : index
    %c0_13 = arith.constant 0 : index
    %30 = vector.load %arg8[%c0_12, %c0_13] : memref<256x32xf32, #tpu.memory_space<vmem>>, vector<256x8xf32>
    tpu.vector_store %arg8[%c0_12, %c0_13], %29 {strides = array<i32>} : memref<256x32xf32, #tpu.memory_space<vmem>>, vector<256x8xf32>,
    %31 = vector.extract_strided_slice %7 {offsets = [0, 0, 8], sizes = [16, 16, 8], strides = [1, 1, 1]} : vector<16x16x96xbf16> to vector<16x16x8xbf16>
    %32 = vector.extract_strided_slice %7 {offsets = [0, 0, 40], sizes = [16, 16, 8], strides = [1, 1, 1]} : vector<16x16x96xbf16> to vector<16x16x8xbf16>
    %33 = vector.extract_strided_slice %7 {offsets = [0, 0, 72], sizes = [16, 16, 8], strides = [1, 1, 1]} : vector<16x16x96xbf16> to vector<16x16x8xbf16>
    %cst_14 = arith.constant dense<0.000000e+00> : vector<16x16x16xf32>
    %34 = tpu.matmul %31, %32, %cst_14 {dimension_numbers = #tpu.dot_dimension_numbers<[2], [2], [1], [1], [0, 0, 0, 1, 1, 1], [0], [0]>} : vector<16x16x8xbf16>, vector<16x16x8xbf16>, vector<16x16x16xf32> -> vector<16x16x16xf32>
    %c1 = arith.constant 1 : index
    %c0_15 = arith.constant 0 : index
    %c0_16 = arith.constant 0 : index
    %35 = vector.load %arg4[%c1, %c0_15, %c0_16] : memref<4x16x16xf32, #tpu.memory_space<vmem>>, vector<1x16x16xf32>
    %36 = vector.shape_cast %35 : vector<1x16x16xf32> to vector<16x16xf32>
    %37 = vector.shape_cast %36 : vector<16x16xf32> to vector<1x16x16xf32>
    %38 = vector.broadcast %37 : vector<1x16x16xf32> to vector<16x16x16xf32>
    %39 = arith.addf %34, %38 : vector<16x16x16xf32>
    %cst_17 = arith.constant dense<0xFF800000> : vector<16x16xf32>
    %40 = vector.multi_reduction <maximumf>, %39, %cst_17 [2] : vector<16x16x16xf32> to vector<16x16xf32>
    %41 = vector.shape_cast %40 : vector<16x16xf32> to vector<16x16x1xf32>
    %42 = vector.broadcast %41 : vector<16x16x1xf32> to vector<16x16x16xf32>
    %43 = arith.subf %39, %42 : vector<16x16x16xf32>
    %44 = math.exp %43 : vector<16x16x16xf32>
    %cst_18 = arith.constant dense<0.000000e+00> : vector<16x16xf32>
    %45 = vector.multi_reduction <add>, %44, %cst_18 [2] : vector<16x16x16xf32> to vector<16x16xf32>
    %46 = vector.shape_cast %45 : vector<16x16xf32> to vector<16x16x1xf32>
    %47 = tpu.reciprocal %46 {approx = true} : vector<16x16x1xf32> -> vector<16x16x1xf32>
    %48 = vector.broadcast %47 : vector<16x16x1xf32> to vector<16x16x16xf32>
    %49 = arith.mulf %44, %48 : vector<16x16x16xf32>
    %50 = arith.truncf %49 : vector<16x16x16xf32> to vector<16x16x16xbf16>
    %cst_19 = arith.constant dense<0.000000e+00> : vector<16x16x8xf32>
    %51 = tpu.matmul %50, %33, %cst_19 {dimension_numbers = #tpu.dot_dimension_numbers<[2], [1], [1], [2], [0, 0, 0, 1, 1, 2], [0], [0]>} : vector<16x16x16xbf16>, vector<16x16x8xbf16>, vector<16x16x8xf32> -> vector<16x16x8xf32>
    %52 = vector.shape_cast %51 : vector<16x16x8xf32> to vector<256x8xf32>
    %c0_20 = arith.constant 0 : index
    %c8 = arith.constant 8 : index
    %53 = vector.load %arg8[%c0_20, %c8] : memref<256x32xf32, #tpu.memory_space<vmem>>, vector<256x8xf32>
    tpu.vector_store %arg8[%c0_20, %c8], %52 {strides = array<i32>} : memref<256x32xf32, #tpu.memory_space<vmem>>, vector<256x8xf32>,
    %54 = vector.extract_strided_slice %7 {offsets = [0, 0, 16], sizes = [16, 16, 8], strides = [1, 1, 1]} : vector<16x16x96xbf16> to vector<16x16x8xbf16>
    %55 = vector.extract_strided_slice %7 {offsets = [0, 0, 48], sizes = [16, 16, 8], strides = [1, 1, 1]} : vector<16x16x96xbf16> to vector<16x16x8xbf16>
    %56 = vector.extract_strided_slice %7 {offsets = [0, 0, 80], sizes = [16, 16, 8], strides = [1, 1, 1]} : vector<16x16x96xbf16> to vector<16x16x8xbf16>
    %cst_21 = arith.constant dense<0.000000e+00> : vector<16x16x16xf32>
    %57 = tpu.matmul %54, %55, %cst_21 {dimension_numbers = #tpu.dot_dimension_numbers<[2], [2], [1], [1], [0, 0, 0, 1, 1, 1], [0], [0]>} : vector<16x16x8xbf16>, vector<16x16x8xbf16>, vector<16x16x16xf32> -> vector<16x16x16xf32>
    %c2 = arith.constant 2 : index
    %c0_22 = arith.constant 0 : index
    %c0_23 = arith.constant 0 : index
    %58 = vector.load %arg4[%c2, %c0_22, %c0_23] : memref<4x16x16xf32, #tpu.memory_space<vmem>>, vector<1x16x16xf32>
    %59 = vector.shape_cast %58 : vector<1x16x16xf32> to vector<16x16xf32>
    %60 = vector.shape_cast %59 : vector<16x16xf32> to vector<1x16x16xf32>
    %61 = vector.broadcast %60 : vector<1x16x16xf32> to vector<16x16x16xf32>
    %62 = arith.addf %57, %61 : vector<16x16x16xf32>
    %cst_24 = arith.constant dense<0xFF800000> : vector<16x16xf32>
    %63 = vector.multi_reduction <maximumf>, %62, %cst_24 [2] : vector<16x16x16xf32> to vector<16x16xf32>
    %64 = vector.shape_cast %63 : vector<16x16xf32> to vector<16x16x1xf32>
    %65 = vector.broadcast %64 : vector<16x16x1xf32> to vector<16x16x16xf32>
    %66 = arith.subf %62, %65 : vector<16x16x16xf32>
    %67 = math.exp %66 : vector<16x16x16xf32>
    %cst_25 = arith.constant dense<0.000000e+00> : vector<16x16xf32>
    %68 = vector.multi_reduction <add>, %67, %cst_25 [2] : vector<16x16x16xf32> to vector<16x16xf32>
    %69 = vector.shape_cast %68 : vector<16x16xf32> to vector<16x16x1xf32>
    %70 = tpu.reciprocal %69 {approx = true} : vector<16x16x1xf32> -> vector<16x16x1xf32>
    %71 = vector.broadcast %70 : vector<16x16x1xf32> to vector<16x16x16xf32>
    %72 = arith.mulf %67, %71 : vector<16x16x16xf32>
    %73 = arith.truncf %72 : vector<16x16x16xf32> to vector<16x16x16xbf16>
    %cst_26 = arith.constant dense<0.000000e+00> : vector<16x16x8xf32>
    %74 = tpu.matmul %73, %56, %cst_26 {dimension_numbers = #tpu.dot_dimension_numbers<[2], [1], [1], [2], [0, 0, 0, 1, 1, 2], [0], [0]>} : vector<16x16x16xbf16>, vector<16x16x8xbf16>, vector<16x16x8xf32> -> vector<16x16x8xf32>
    %75 = vector.shape_cast %74 : vector<16x16x8xf32> to vector<256x8xf32>
    %c0_27 = arith.constant 0 : index
    %c16 = arith.constant 16 : index
    %76 = vector.load %arg8[%c0_27, %c16] : memref<256x32xf32, #tpu.memory_space<vmem>>, vector<256x8xf32>
    tpu.vector_store %arg8[%c0_27, %c16], %75 {strides = array<i32>} : memref<256x32xf32, #tpu.memory_space<vmem>>, vector<256x8xf32>,
    %77 = vector.extract_strided_slice %7 {offsets = [0, 0, 24], sizes = [16, 16, 8], strides = [1, 1, 1]} : vector<16x16x96xbf16> to vector<16x16x8xbf16>
    %78 = vector.extract_strided_slice %7 {offsets = [0, 0, 56], sizes = [16, 16, 8], strides = [1, 1, 1]} : vector<16x16x96xbf16> to vector<16x16x8xbf16>
    %79 = vector.extract_strided_slice %7 {offsets = [0, 0, 88], sizes = [16, 16, 8], strides = [1, 1, 1]} : vector<16x16x96xbf16> to vector<16x16x8xbf16>
    %cst_28 = arith.constant dense<0.000000e+00> : vector<16x16x16xf32>
    %80 = tpu.matmul %77, %78, %cst_28 {dimension_numbers = #tpu.dot_dimension_numbers<[2], [2], [1], [1], [0, 0, 0, 1, 1, 1], [0], [0]>} : vector<16x16x8xbf16>, vector<16x16x8xbf16>, vector<16x16x16xf32> -> vector<16x16x16xf32>
    %c3 = arith.constant 3 : index
    %c0_29 = arith.constant 0 : index
    %c0_30 = arith.constant 0 : index
    %81 = vector.load %arg4[%c3, %c0_29, %c0_30] : memref<4x16x16xf32, #tpu.memory_space<vmem>>, vector<1x16x16xf32>
    %82 = vector.shape_cast %81 : vector<1x16x16xf32> to vector<16x16xf32>
    %83 = vector.shape_cast %82 : vector<16x16xf32> to vector<1x16x16xf32>
    %84 = vector.broadcast %83 : vector<1x16x16xf32> to vector<16x16x16xf32>
    %85 = arith.addf %80, %84 : vector<16x16x16xf32>
    %cst_31 = arith.constant dense<0xFF800000> : vector<16x16xf32>
    %86 = vector.multi_reduction <maximumf>, %85, %cst_31 [2] : vector<16x16x16xf32> to vector<16x16xf32>
    %87 = vector.shape_cast %86 : vector<16x16xf32> to vector<16x16x1xf32>
    %88 = vector.broadcast %87 : vector<16x16x1xf32> to vector<16x16x16xf32>
    %89 = arith.subf %85, %88 : vector<16x16x16xf32>
    %90 = math.exp %89 : vector<16x16x16xf32>
    %cst_32 = arith.constant dense<0.000000e+00> : vector<16x16xf32>
    %91 = vector.multi_reduction <add>, %90, %cst_32 [2] : vector<16x16x16xf32> to vector<16x16xf32>
    %92 = vector.shape_cast %91 : vector<16x16xf32> to vector<16x16x1xf32>
    %93 = tpu.reciprocal %92 {approx = true} : vector<16x16x1xf32> -> vector<16x16x1xf32>
    %94 = vector.broadcast %93 : vector<16x16x1xf32> to vector<16x16x16xf32>
    %95 = arith.mulf %90, %94 : vector<16x16x16xf32>
    %96 = arith.truncf %95 : vector<16x16x16xf32> to vector<16x16x16xbf16>
    %cst_33 = arith.constant dense<0.000000e+00> : vector<16x16x8xf32>
    %97 = tpu.matmul %96, %79, %cst_33 {dimension_numbers = #tpu.dot_dimension_numbers<[2], [1], [1], [2], [0, 0, 0, 1, 1, 2], [0], [0]>} : vector<16x16x16xbf16>, vector<16x16x8xbf16>, vector<16x16x8xf32> -> vector<16x16x8xf32>
    %98 = vector.shape_cast %97 : vector<16x16x8xf32> to vector<256x8xf32>
    %c0_34 = arith.constant 0 : index
    %c24 = arith.constant 24 : index
    %99 = vector.load %arg8[%c0_34, %c24] : memref<256x32xf32, #tpu.memory_space<vmem>>, vector<256x8xf32>
    tpu.vector_store %arg8[%c0_34, %c24], %98 {strides = array<i32>} : memref<256x32xf32, #tpu.memory_space<vmem>>, vector<256x8xf32>,
    %c0_35 = arith.constant 0 : index
    %c0_36 = arith.constant 0 : index
    %100 = vector.load %arg8[%c0_35, %c0_36] : memref<256x32xf32, #tpu.memory_space<vmem>>, vector<256x32xf32>
    %101 = arith.truncf %100 : vector<256x32xf32> to vector<256x32xbf16>
    %c0_37 = arith.constant 0 : index
    %c0_38 = arith.constant 0 : index
    %102 = vector.load %arg5[%c0_37, %c0_38] : memref<32x32xbf16, #tpu.memory_space<vmem>>, vector<32x32xbf16>
    %cst_39 = arith.constant dense<0.000000e+00> : vector<256x32xf32>
    %103 = tpu.matmul %101, %102, %cst_39 {dimension_numbers = #tpu.dot_dimension_numbers<[1], [0], [0], [1], [0, 0, 1, 1], [], []>} : vector<256x32xbf16>, vector<32x32xbf16>, vector<256x32xf32> -> vector<256x32xf32>
    %c0_40 = arith.constant 0 : index
    %c0_41 = arith.constant 0 : index
    %104 = vector.load %arg6[%c0_40, %c0_41] : memref<1x32xf32, #tpu.memory_space<vmem>>, vector<1x32xf32>
    %105 = vector.broadcast %104 : vector<1x32xf32> to vector<256x32xf32>
    %106 = arith.addf %103, %105 : vector<256x32xf32>
    %c0_42 = arith.constant 0 : index
    %c0_43 = arith.constant 0 : index
    %107 = vector.load %arg8[%c0_42, %c0_43] : memref<256x32xf32, #tpu.memory_space<vmem>>, vector<256x32xf32>
    tpu.vector_store %arg8[%c0_42, %c0_43], %106 {strides = array<i32>} : memref<256x32xf32, #tpu.memory_space<vmem>>, vector<256x32xf32>,
    %c0_44 = arith.constant 0 : index
    %c0_45 = arith.constant 0 : index
    %108 = tpu.strided_load %arg8[%c0_44, %c0_45] {strides = array<i32: 4, 1>} : memref<256x32xf32, #tpu.memory_space<vmem>>, vector<64x32xf32>
    %c0_46 = arith.constant 0 : index
    %c0_47 = arith.constant 0 : index
    %109 = vector.load %arg7[%c0_46, %c0_47] : memref<64x128xf32, #tpu.memory_space<vmem>>, vector<64x32xf32>
    tpu.vector_store %arg7[%c0_46, %c0_47], %108 {strides = array<i32>} : memref<64x128xf32, #tpu.memory_space<vmem>>, vector<64x32xf32>,
    %c1_48 = arith.constant 1 : index
    %c0_49 = arith.constant 0 : index
    %110 = tpu.strided_load %arg8[%c1_48, %c0_49] {strides = array<i32: 4, 1>} : memref<256x32xf32, #tpu.memory_space<vmem>>, vector<64x32xf32>
    %c0_50 = arith.constant 0 : index
    %c32 = arith.constant 32 : index
    %111 = vector.load %arg7[%c0_50, %c32] : memref<64x128xf32, #tpu.memory_space<vmem>>, vector<64x32xf32>
    tpu.vector_store %arg7[%c0_50, %c32], %110 {strides = array<i32>} : memref<64x128xf32, #tpu.memory_space<vmem>>, vector<64x32xf32>,
    %c2_51 = arith.constant 2 : index
    %c0_52 = arith.constant 0 : index
    %112 = tpu.strided_load %arg8[%c2_51, %c0_52] {strides = array<i32: 4, 1>} : memref<256x32xf32, #tpu.memory_space<vmem>>, vector<64x32xf32>
    %c0_53 = arith.constant 0 : index
    %c64 = arith.constant 64 : index
    %113 = vector.load %arg7[%c0_53, %c64] : memref<64x128xf32, #tpu.memory_space<vmem>>, vector<64x32xf32>
    tpu.vector_store %arg7[%c0_53, %c64], %112 {strides = array<i32>} : memref<64x128xf32, #tpu.memory_space<vmem>>, vector<64x32xf32>,
    %c3_54 = arith.constant 3 : index
    %c0_55 = arith.constant 0 : index
    %114 = tpu.strided_load %arg8[%c3_54, %c0_55] {strides = array<i32: 4, 1>} : memref<256x32xf32, #tpu.memory_space<vmem>>, vector<64x32xf32>
    %c0_56 = arith.constant 0 : index
    %c96 = arith.constant 96 : index
    %115 = vector.load %arg7[%c0_56, %c96] : memref<64x128xf32, #tpu.memory_space<vmem>>, vector<64x32xf32>
    tpu.vector_store %arg7[%c0_56, %c96], %114 {strides = array<i32>} : memref<64x128xf32, #tpu.memory_space<vmem>>, vector<64x32xf32>,
    return
  }
  func.func @transform_0(%arg0: i32) -> (i32, i32) {
    %c0_i32 = arith.constant 0 : i32
    %c0_i32_0 = arith.constant 0 : i32
    return %arg0, %c0_i32 : i32, i32
  }
  func.func @transform_1(%arg0: i32) -> (i32, i32) {
    %c0_i32 = arith.constant 0 : i32
    %c0_i32_0 = arith.constant 0 : i32
    %c0_i32_1 = arith.constant 0 : i32
    return %c0_i32, %c0_i32_0 : i32, i32
  }
  func.func @transform_2(%arg0: i32) -> (i32, i32) {
    %c0_i32 = arith.constant 0 : i32
    %c0_i32_0 = arith.constant 0 : i32
    %c0_i32_1 = arith.constant 0 : i32
    return %c0_i32, %c0_i32_0 : i32, i32
  }
  func.func @transform_3(%arg0: i32) -> (i32, i32, i32) {
    %c0_i32 = arith.constant 0 : i32
    %c0_i32_0 = arith.constant 0 : i32
    %c0_i32_1 = arith.constant 0 : i32
    %c0_i32_2 = arith.constant 0 : i32
    return %c0_i32, %c0_i32_0, %c0_i32_1 : i32, i32, i32
  }
  func.func @transform_4(%arg0: i32) -> (i32, i32) {
    %c0_i32 = arith.constant 0 : i32
    %c0_i32_0 = arith.constant 0 : i32
    %c0_i32_1 = arith.constant 0 : i32
    return %c0_i32, %c0_i32_0 : i32, i32
  }
  func.func @transform_5(%arg0: i32) -> (i32, i32) {
    %c0_i32 = arith.constant 0 : i32
    %c0_i32_0 = arith.constant 0 : i32
    %c0_i32_1 = arith.constant 0 : i32
    return %c0_i32, %c0_i32_0 : i32, i32
  }
  func.func @transform_6(%arg0: i32) -> (i32, i32) {
    %c0_i32 = arith.constant 0 : i32
    %c0_i32_0 = arith.constant 0 : i32
    return %arg0, %c0_i32 : i32, i32
  }
}

</mosaic_0001>

<bundles_post_ra>
// kernel: wmsa_forward.1
= control target key start
LH: loop header
LB: loop body
LE: loop exit
PB: predicated region body
PF: predicated region fallthrough
CT: control target
= control target key end

     0   :  { %s7171_s21 = smov 0   ;;  %s10233_s0 = inlined_call_operand.vmem [shape: bf16[512,32], index: 0, kind: input, shape index: {}]   ;;  %s10234_s1 = inlined_call_operand.vmem [shape: bf16[32,96], index: 1, kind: input, shape index: {}]   ;;  %s10235_s2 = inlined_call_operand.vmem [shape: f32[1,96], index: 2, kind: input, shape index: {}]   ;;  %s10236_s3 = inlined_call_operand.vmem [shape: f32[4,16,16], index: 3, kind: input, shape index: {}]   ;;  %s10237_s4 = inlined_call_operand.vmem [shape: bf16[32,32], index: 4, kind: input, shape index: {}]   ;;  %s10238_s5 = inlined_call_operand.vmem [shape: f32[1,32], index: 5, kind: input, shape index: {}]   ;;  %s10239_s6 = inlined_call_operand.vmem [shape: f32[128,128], index: 6, kind: output, shape index: {}]  }
   0x1 LB: > { %s6293_s22 = sadd.s32 4294967295, %s7119_s21   ;;  %p6297_p0 = scmp.ge.s32.totalorder %s7119_s21, 1  ;;  %s7119_s21 = sphi %s7171_s21, %s16_s21  }
   0x2   : > { %p213_p1 = scmp.lt.s32.totalorder %s7119_s21, 3 }
   0x4   : > { %p214_p2 = pnand %p6297_p0, %p213_p1 }
   0x6   : > { %217 = sbr.rel (%p214_p2) target bundleno = 3185 (0xc71), region = 44 }
   0xb   : > { %v6567_v0 = vld [vmem:[%s10234_s1 + $0x8] sm:$0xff]  ;;  %s6298_s25 = sshll.u32 %s6293_s22, 5  ;;  %v6566_v1 = vld [vmem:[%s10234_s1] sm:$0xff]  ;;  %vm388_vm0 = vcmask 261120   ;;  %s7121_s10 = smov 96   ;;  %vm567_vm1 = vcmask 64512  }
   0xc   : > { %p244_p3 = scmp.lt.s32.totalorder %s6298_s25, 63  ;;  %443 = vmatpush.bf16.msra.mxu0 %v6567_v0  ;;  %6570 = vmatpush.bf16.msra.mxu1 %v6567_v0  ;;  %v7227_v20 = vld [vmem:[%s10235_s2] ss:$0 sm:$0xff]  ;;  %s7122_s11 = smov 88   ;;  %vm993_vm2 = vcmask 130048   ;;  %vm3109_vm3 = vcmask 130112  }
   0xd   : > { %6571 = vmatpush.bf16.msra.mxu2 %v6567_v0  ;;  %6572 = vmatpush.bf16.msra.mxu3 %v6567_v0  ;;  %s7123_s12 = smov 64   ;;  %s7124_s13 = smov 120   ;;  %vm4441_vm4 = vcmask 195712   ;;  %vm5773_vm5 = vcmask 261312   ;;  %vm6114_vm6 = vcmask 523520   ;;  %vm6171_vm7 = vcmask 785920  }
   0xe   : > { %s10550_s25 = smov (!%p244_p3, %s6298_s25), 63  ;;  %s7125_s14 = smov 56   ;;  %vm6228_vm8 = vcmask 1048320  }
   0xf   : > { %s6299_s28 = sshll.u32 %s10550_s25, 2  ;;  %s7126_s19 = smov 80  }
  0x10   : > { %444 = vmatpush.bf16.msra.mxu0 %v6566_v1  ;;  %6573 = vmatpush.bf16.msra.mxu1 %v6566_v1  ;;  %s7190_s7 = scalar_lea.vmem %s10233_s0, %s6299_s28  ;;  %s7127_s20 = smov 112  }
  0x11   : > { %v6550_v2 = vld [vmem:[%s7190_s7] sm:$0xff]  ;;  %6574 = vmatpush.bf16.msra.mxu2 %v6566_v1  ;;  %6575 = vmatpush.bf16.msra.mxu3 %v6566_v1  ;;  %v6551_v6 = vld [vmem:[%s7190_s7 + $0x8] sm:$0xff]  ;;  %v6552_v10 = vld [vmem:[%s7190_s7 + $0x10] sm:$0xff]  ;;  %s7128_s27 = smov 48   ;;  %s7129_s28 = smov 72  }
  0x12   : > { %v6554_v3 = vld [vmem:[%s7190_s7 + $0x20] sm:$0xff]  ;;  %v6555_v7 = vld [vmem:[%s7190_s7 + $0x28] sm:$0xff]  ;;  %v6556_v11 = vld [vmem:[%s7190_s7 + $0x30] sm:$0xff]  ;;  %s7130_s29 = smov 104   ;;  %s7132_s17 = smov 8  }
  0x13   : > { %v6558_v4 = vld [vmem:[%s7190_s7 + $0x40] sm:$0xff]  ;;  %6374 = vmatmul.msk.bf16.vlgmr.msra.gmra.mxu0 %vm388_vm0, %v6550_v2  ;;  %6378 = vmatmul.msk.bf16.vlgmr.msra.gmra.mxu1 %vm388_vm0, %v6554_v3  ;;  %v6559_v8 = vld [vmem:[%s7190_s7 + $0x48] sm:$0xff]  ;;  %v6560_v12 = vld [vmem:[%s7190_s7 + $0x50] sm:$0xff]  ;;  %s7133_s18 = smov 16   ;;  %s7135_s8 = smov 32  }
  0x14   : > { %v6562_v5 = vld [vmem:[%s7190_s7 + $0x60] sm:$0xff]  ;;  %6382 = vmatmul.msk.bf16.vlgmr.msra.gmra.mxu2 %vm388_vm0, %v6558_v4  ;;  %v6563_v9 = vld [vmem:[%s7190_s7 + $0x68] sm:$0xff]  ;;  %v6564_v13 = vld [vmem:[%s7190_s7 + $0x70] sm:$0xff] }
  0x15   : > { %6386 = vmatmul.msk.bf16.vlgmr.msra.gmra.mxu3 %vm388_vm0, %v6562_v5  ;;  %v6557_v14 = vld [vmem:[%s7190_s7 + $0x38] sm:$0xff] }
  0x16   : > { %v6553_v15 = vld [vmem:[%s7190_s7 + $0x18] sm:$0xff] }
  0x17   : > { %v6561_v16 = vld [vmem:[%s7190_s7 + $0x58] sm:$0xff] }
  0x18   : > { %v6565_v17 = vld [vmem:[%s7190_s7 + $0x78] sm:$0xff] }
  0x23   : > { %6375 = vmatmul.msk.bf16.gmra.mxu0 %vm388_vm0, %v6551_v6  ;;  %6379 = vmatmul.msk.bf16.gmra.mxu1 %vm388_vm0, %v6555_v7 }
  0x24   : > { %6383 = vmatmul.msk.bf16.gmra.mxu2 %vm388_vm0, %v6559_v8 }
  0x25   : > { %6387 = vmatmul.msk.bf16.gmra.mxu3 %vm388_vm0, %v6563_v9 }
  0x33   : > { %6376 = vmatmul.msk.bf16.gmra.mxu0 %vm388_vm0, %v6552_v10  ;;  %6380 = vmatmul.msk.bf16.gmra.mxu1 %vm388_vm0, %v6556_v11 }
  0x34   : > { %6384 = vmatmul.msk.bf16.gmra.mxu2 %vm388_vm0, %v6560_v12 }
  0x35   : > { %6388 = vmatmul.msk.bf16.gmra.mxu3 %vm388_vm0, %v6564_v13 }
  0x43   : > { %6381 = vmatmul.msk.bf16.gmra.mxu1 %vm388_vm0, %v6557_v14  ;;  %6377 = vmatmul.msk.bf16.gmra.mxu0 %vm388_vm0, %v6553_v15 }
  0x44   : > { %6385 = vmatmul.msk.bf16.gmra.mxu2 %vm388_vm0, %v6561_v16 }
  0x45   : > { %6389 = vmatmul.msk.bf16.gmra.mxu3 %vm388_vm0, %v6565_v17 }
  0x90   : > { %v446_v18 = vpop.f32.mrf.mxu0  ;;  %v466_v19 = vpop.f32.mrf.mxu1 }
  0x91   : > { %v467_v21 = vadd.f32 %v7227_v20, %v466_v19  ;;  %v447_v22 = vadd.f32 %v7227_v20, %v446_v18 }
  0x93   : > { %v534_v23 = vpack.c.bf16 %v467_v21, %v467_v21  ;;  %v526_v27 = vpack.c.bf16 %v447_v22, %v447_v22 }
  0x95   : > { %v671_v30 = vunpack.c.l.b16 %v534_v23  ;;  %v562_v34 = vunpack.c.l.b16 %v526_v27 }
  0x97   : > { %v486_v24 = vpop.f32.mrf.mxu2 }
  0x98   : > { %v448_v25 = vpop.f32.mrf.mxu0  ;;  %v468_v26 = vpop.f32.mrf.mxu1  ;;  %v487_v41 = vadd.f32 %v7227_v20, %v486_v24 }
  0x99   : > { %v449_v28 = vadd.f32 %v7227_v20, %v448_v25  ;;  %v469_v29 = vadd.f32 %v7227_v20, %v468_v26  ;;  %v506_v33 = vpop.f32.mrf.mxu3 }
  0x9a   : > { %v542_v45 = vpack.c.bf16 %v487_v41, %v487_v41  ;;  %v507_v48 = vadd.f32 %v7227_v20, %v506_v33 }
  0x9b   : > { %v527_v31 = vpack.c.bf16 %v449_v28, %v449_v28  ;;  %v535_v32 = vpack.c.bf16 %v469_v29, %v469_v29 }
  0x9c   : > { %v779_v50 = vunpack.c.l.b16 %v542_v45  ;;  %v550_v55 = vpack.c.bf16 %v507_v48, %v507_v48 }
  0x9d   : > { %v563_v35 = vunpack.c.l.b16 %v527_v31  ;;  %v672_v36 = vunpack.c.l.b16 %v535_v32 }
  0x9e   : > { %v887_v61 = vunpack.c.l.b16 %v550_v55 }
  0x9f   : > { %v7233_v37 = vpack.c.b16 %v563_v35, %v562_v34  ;;  %v7235_v38 = vpack.c.b16 %v672_v36, %v671_v30  ;;  %v488_v40 = vpop.f32.mrf.mxu2 }
  0xa0   : > { %v451_v39 = vpop.f32.mrf.mxu0  ;;  %v489_v42 = vadd.f32 %v7227_v20, %v488_v40  ;;  %v471_v44 = vpop.f32.mrf.mxu1 }
  0xa1   : > { %10257 = vst [vmem:[#allocation3_spill] sm:$0xff] %v7233_v37  ;;  %674 = vrot.lane.b32.xlu1 %v7235_v38, %s7121_s10  ;;  %1815 = vrot.lane.b32.xlu2 %v7233_v37, %s7122_s11  ;;  %v508_v43 = vpop.f32.mrf.mxu3  ;;  %v452_v51 = vadd.f32 %v7227_v20, %v451_v39  ;;  %v472_v1 = vadd.f32 %v7227_v20, %v471_v44 }
  0xa2   : > { %10258 = vst [vmem:[#allocation4_spill] sm:$0xff] %v7235_v38  ;;  %565 = vrot.lane.b32.xlu0 %v7233_v37, %s7121_s10  ;;  %v543_v46 = vpack.c.bf16 %v489_v42, %v489_v42  ;;  %v509_v49 = vadd.f32 %v7227_v20, %v508_v43 }
  0xa3   : > { %v528_v57 = vpack.c.bf16 %v452_v51, %v452_v51  ;;  %v536_v7 = vpack.c.bf16 %v472_v1, %v472_v1 }
  0xa4   : > { %v780_v52 = vunpack.c.l.b16 %v543_v46  ;;  %v551_v56 = vpack.c.bf16 %v509_v49, %v509_v49 }
  0xa5   : > { %v590_v63 = vunpack.c.l.b16 %v528_v57  ;;  %v698_v11 = vunpack.c.l.b16 %v536_v7 }
  0xa6   : > { %v7255_v58 = vpack.c.b16 %v780_v52, %v779_v50  ;;  %v888_v62 = vunpack.c.l.b16 %v551_v56 }
  0xa7   : > { %v491_v54 = vpop.f32.mrf.mxu2 }
  0xa8   : > { %v453_v47 = vpop.f32.mrf.mxu0  ;;  %v473_v60 = vpop.f32.mrf.mxu1  ;;  %v7265_v4 = vpack.c.b16 %v888_v62, %v887_v61  ;;  %v492_v9 = vadd.f32 %v7227_v20, %v491_v54 }
  0xa9   : > { %1911 = vrot.lane.b32.xlu2 %v7235_v38, %s7122_s11  ;;  %1383 = vrot.lane.b32.xlu1 %v7233_v37, %s7123_s12  ;;  %v454_v53 = vadd.f32 %v7227_v20, %v453_v47  ;;  %v474_v2 = vadd.f32 %v7227_v20, %v473_v60  ;;  %v511_v17 = vpop.f32.mrf.mxu3 }
  0xaa   : > { %1813 = vrot.lane.b32.xlu0 %v7233_v37, %s7124_s13  ;;  %v544_v14 = vpack.c.bf16 %v492_v9, %v492_v9  ;;  %v512_v33 = vadd.f32 %v7227_v20, %v511_v17 }
  0xab   : > { %v529_v59 = vpack.c.bf16 %v454_v53, %v454_v53  ;;  %v537_v8 = vpack.c.bf16 %v474_v2, %v474_v2 }
  0xac   : > { %v806_v19 = vunpack.c.l.b16 %v544_v14  ;;  %v552_v41 = vpack.c.bf16 %v512_v33, %v512_v33 }
  0xad   : > { %v591_v0 = vunpack.c.l.b16 %v529_v59  ;;  %v699_v12 = vunpack.c.l.b16 %v537_v8 }
  0xae   : > { %v914_v45 = vunpack.c.l.b16 %v552_v41 }
  0xaf   : > { %v493_v5 = vpop.f32.mrf.mxu2  ;;  %v7267_v6 = vpack.c.b16 %v591_v0, %v590_v63  ;;  %v7277_v18 = vpack.c.b16 %v699_v12, %v698_v11 }
  0xb0   : > { %v456_v3 = vpop.f32.mrf.mxu0  ;;  %v494_v10 = vadd.f32 %v7227_v20, %v493_v5  ;;  %v476_v13 = vpop.f32.mrf.mxu1 }
  0xb1   : > { %1583 = vrot.lane.b32.xlu2 %v7255_v58, %s7123_s12  ;;  %1483 = vrot.lane.b32.xlu1 %v7235_v38, %s7123_s12  ;;  %10259 = vst [vmem:[#allocation5_spill] sm:$0xff] %v7267_v6  ;;  %v457_v21 = vadd.f32 %v7227_v20, %v456_v3  ;;  %v513_v28 = vpop.f32.mrf.mxu3  ;;  %v477_v31 = vadd.f32 %v7227_v20, %v476_v13 }
  0xb2   : > { %782 = vrot.lane.b32.xlu0 %v7255_v58, %s7121_s10  ;;  %v545_v15 = vpack.c.bf16 %v494_v10, %v494_v10  ;;  %v514_v34 = vadd.f32 %v7227_v20, %v513_v28 }
  0xb3   : > { %v530_v24 = vpack.c.bf16 %v457_v21, %v457_v21  ;;  %v538_v39 = vpack.c.bf16 %v477_v31, %v477_v31 }
  0xb4   : > { %v807_v22 = vunpack.c.l.b16 %v545_v15  ;;  %v553_v42 = vpack.c.bf16 %v514_v34, %v514_v34 }
  0xb5   : > { %v617_v29 = vunpack.c.l.b16 %v530_v24  ;;  %v725_v43 = vunpack.c.l.b16 %v538_v39 }
  0xb6   : > { %v7287_v25 = vpack.c.b16 %v807_v22, %v806_v19  ;;  %v915_v46 = vunpack.c.l.b16 %v553_v42 }
  0xb7   : > { %v496_v35 = vpop.f32.mrf.mxu2 }
  0xb8   : > { %v458_v16 = vpop.f32.mrf.mxu0  ;;  %v478_v27 = vpop.f32.mrf.mxu1  ;;  %v7309_v50 = vpack.c.b16 %v915_v46, %v914_v45  ;;  %v497_v51 = vadd.f32 %v7227_v20, %v496_v35 }
  0xb9   : > { %1408 = vrot.lane.b32.xlu2 %v7267_v6, %s7123_s12  ;;  %890 = vrot.lane.b32.xlu1 %v7265_v4, %s7121_s10  ;;  %v459_v23 = vadd.f32 %v7227_v20, %v458_v16  ;;  %v479_v32 = vadd.f32 %v7227_v20, %v478_v27  ;;  %v516_v53 = vpop.f32.mrf.mxu3 }
  0xba   : > { %593 = vrot.lane.b32.xlu0 %v7267_v6, %s7121_s10  ;;  %10260 = vst [vmem:[#allocation6_spill] sm:$0xff] %v7309_v50  ;;  %v546_v55 = vpack.c.bf16 %v497_v51, %v497_v51  ;;  %v517_v11 = vadd.f32 %v7227_v20, %v516_v53 }
  0xbb   : > { %v531_v26 = vpack.c.bf16 %v459_v23, %v459_v23  ;;  %v539_v40 = vpack.c.bf16 %v479_v32, %v479_v32 }
  0xbc   : > { %v833_v59 = vunpack.c.l.b16 %v546_v55  ;;  %v554_v17 = vpack.c.bf16 %v517_v11, %v517_v11 }
  0xbd   : > { %v618_v30 = vunpack.c.l.b16 %v531_v26  ;;  %v726_v44 = vunpack.c.l.b16 %v539_v40 }
  0xbe   : > { %v941_v27 = vunpack.c.l.b16 %v554_v17 }
  0xbf   : > { %v7299_v36 = vpack.c.b16 %v618_v30, %v617_v29  ;;  %v7307_v48 = vpack.c.b16 %v726_v44, %v725_v43  ;;  %v498_v49 = vpop.f32.mrf.mxu2 }
  0xc0   : > { %v481_v47 = vpop.f32.mrf.mxu1  ;;  %v499_v52 = vadd.f32 %v7227_v20, %v498_v49  ;;  %v461_v54 = vpop.f32.mrf.mxu0 }
  0xc1   : > { %1508 = vrot.lane.b32.xlu2 %v7277_v18, %s7123_s12  ;;  %1683 = vrot.lane.b32.xlu1 %v7265_v4, %s7123_s12  ;;  %v482_v60 = vadd.f32 %v7227_v20, %v481_v47  ;;  %v518_v63 = vpop.f32.mrf.mxu3  ;;  %v462_v8 = vadd.f32 %v7227_v20, %v461_v54 }
  0xc2   : > { %701 = vrot.lane.b32.xlu0 %v7277_v18, %s7121_s10  ;;  %v547_v56 = vpack.c.bf16 %v499_v52, %v499_v52  ;;  %v519_v12 = vadd.f32 %v7227_v20, %v518_v63 }
  0xc3   : > { %v540_v0 = vpack.c.bf16 %v482_v60, %v482_v60  ;;  %v532_v14 = vpack.c.bf16 %v462_v8, %v462_v8 }
  0xc4   : > { %v834_v61 = vunpack.c.l.b16 %v547_v56  ;;  %v555_v19 = vpack.c.bf16 %v519_v12, %v519_v12 }
  0xc5   : > { %v752_v7 = vunpack.c.l.b16 %v540_v0  ;;  %v644_v22 = vunpack.c.l.b16 %v532_v14 }
  0xc6   : > { %v7327_v1 = vpack.c.b16 %v834_v61, %v833_v59  ;;  %v942_v28 = vunpack.c.l.b16 %v555_v19 }
  0xc7   : > { %v501_v3 = vpop.f32.mrf.mxu2 }
  0xc8   : > { %v483_v57 = vpop.f32.mrf.mxu1  ;;  %v463_v5 = vpop.f32.mrf.mxu0  ;;  %v502_v24 = vadd.f32 %v7227_v20, %v501_v3  ;;  %v7351_v33 = vpack.c.b16 %v942_v28, %v941_v27 }
  0xc9   : > { %1839 = vrot.lane.b32.xlu2 %v7267_v6, %s7122_s11  ;;  %809 = vrot.lane.b32.xlu1 %v7287_v25, %s7121_s10  ;;  %v484_v62 = vadd.f32 %v7227_v20, %v483_v57  ;;  %v464_v10 = vadd.f32 %v7227_v20, %v463_v5  ;;  %v521_v13 = vpop.f32.mrf.mxu3 }
  0xca   : > { %1935 = vrot.lane.b32.xlu0 %v7277_v18, %s7122_s11  ;;  %v548_v30 = vpack.c.bf16 %v502_v24, %v502_v24  ;;  %10261 = vst [vmem:[#allocation7_spill] sm:$0xff] %v7351_v33  ;;  %v522_v34 = vadd.f32 %v7227_v20, %v521_v13 }
  0xcb   : > { %v541_v2 = vpack.c.bf16 %v484_v62, %v484_v62  ;;  %v533_v16 = vpack.c.bf16 %v464_v10, %v464_v10 }
  0xcc   : > { %v860_v39 = vunpack.c.l.b16 %v548_v30  ;;  %v556_v42 = vpack.c.bf16 %v522_v34, %v522_v34 }
  0xcd   : > { %v753_v9 = vunpack.c.l.b16 %v541_v2  ;;  %v645_v23 = vunpack.c.l.b16 %v533_v16 }
  0xce   : > { %v968_v45 = vunpack.c.l.b16 %v556_v42 }
  0xcf   : > { %v7339_v15 = vpack.c.b16 %v753_v9, %v752_v7  ;;  %v503_v21 = vpop.f32.mrf.mxu2  ;;  %v7349_v29 = vpack.c.b16 %v645_v23, %v644_v22 }
  0xd0   : > { %v504_v26 = vadd.f32 %v7227_v20, %v503_v21 }
  0xd1   : > { %1837 = vrot.lane.b32.xlu2 %v7267_v6, %s7124_s13  ;;  %620 = vrot.lane.b32.xlu1 %v7299_v36, %s7121_s10  ;;  %v523_v32 = vpop.f32.mrf.mxu3 }
  0xd2   : > { %1933 = vrot.lane.b32.xlu0 %v7277_v18, %s7124_s13  ;;  %v549_v31 = vpack.c.bf16 %v504_v26, %v504_v26  ;;  %v524_v35 = vadd.f32 %v7227_v20, %v523_v32 }
  0xd4   : > { %v861_v40 = vunpack.c.l.b16 %v549_v31  ;;  %v557_v43 = vpack.c.bf16 %v524_v35, %v524_v35 }
  0xd6   : > { %v7363_v44 = vpack.c.b16 %v861_v40, %v860_v39  ;;  %v969_v46 = vunpack.c.l.b16 %v557_v43 }
  0xd8   : > { %v7373_v47 = vpack.c.b16 %v969_v46, %v968_v45 }
  0xd9   : > { %917 = vrot.lane.b32.xlu2 %v7309_v50, %s7121_s10  ;;  %728 = vrot.lane.b32.xlu1 %v7307_v48, %s7121_s10 }
  0xda   : > { %1608 = vrot.lane.b32.xlu0 %v7287_v25, %s7123_s12  ;;  %10264 = vst [vmem:[#allocation10_spill] sm:$0xff] %v7373_v47 }
  0xe1   : > { %1433 = vrot.lane.b32.xlu2 %v7299_v36, %s7123_s12  ;;  %1959 = vrot.lane.b32.xlu1 %v7307_v48, %s7122_s11 }
  0xe2   : > { %1708 = vrot.lane.b32.xlu0 %v7309_v50, %s7123_s12 }
  0xe9   : > { %1863 = vrot.lane.b32.xlu2 %v7299_v36, %s7122_s11  ;;  %1633 = vrot.lane.b32.xlu1 %v7327_v1, %s7123_s12 }
  0xea   : > { %1533 = vrot.lane.b32.xlu0 %v7307_v48, %s7123_s12 }
  0xf1   : > { %836 = vrot.lane.b32.xlu2 %v7327_v1, %s7121_s10  ;;  %1558 = vrot.lane.b32.xlu1 %v7339_v15, %s7123_s12 }
  0xf2   : > { %1861 = vrot.lane.b32.xlu0 %v7299_v36, %s7124_s13 }
  0xf9   : > { %944 = vrot.lane.b32.xlu2 %v7351_v33, %s7121_s10  ;;  %1887 = vrot.lane.b32.xlu1 %v7349_v29, %s7122_s11 }
  0xfa   : > { %1458 = vrot.lane.b32.xlu0 %v7349_v29, %s7123_s12 }
  0xfb   : > { %v7361_v41 = vpop.permute.xlu2 %1815 }
  0xfc   : > { %10262 = vst [vmem:[#allocation8_spill] sm:$0xff] %v7361_v41 }
 0x101   : > { %1733 = vrot.lane.b32.xlu2 %v7351_v33, %s7123_s12  ;;  %1885 = vrot.lane.b32.xlu1 %v7349_v29, %s7124_s13 }
 0x102   : > { %863 = vrot.lane.b32.xlu0 %v7363_v44, %s7121_s10 }
 0x103   : > { %v7371_v20 = vpop.permute.xlu2 %1911 }
 0x104   : > { %10263 = vst [vmem:[#allocation9_spill] sm:$0xff] %v7371_v20 }
 0x109   : > { %647 = vrot.lane.b32.xlu2 %v7349_v29, %s7121_s10  ;;  %1758 = vrot.lane.b32.xlu1 %v7373_v47, %s7123_s12 }
 0x10a   : > { %971 = vrot.lane.b32.xlu0 %v7373_v47, %s7121_s10 }
 0x10b   : > { %v7381_v49 = vpop.permute.xlu2 %1583 }
 0x111   : > { %755 = vrot.lane.b32.xlu2 %v7339_v15, %s7121_s10  ;;  %1957 = vrot.lane.b32.xlu1 %v7307_v48, %s7124_s13 }
 0x112   : > { %1658 = vrot.lane.b32.xlu0 %v7363_v44, %s7123_s12 }
 0x113   : > { %v675_v51 = vpop.permute.xlu1 %674  ;;  %v7389_v52 = vpop.permute.xlu2 %1408 }
 0x114   : > { %v566_v53 = vpop.permute.xlu0 %565  ;;  %v680_v3 = vsel %vm567_vm1, %v675_v51, 0 }
 0x115   : > { %v572_v54 = vsel %vm567_vm1, %v566_v53, 0 }
 0x116   : > { %581 = vmatpush.bf16.xpose.msrb.mxu1 %v572_v54 }
 0x119   : > { %1909 = vrot.lane.b32.xlu2 %v7235_v38, %s7124_s13  ;;  %2031 = vrot.lane.b32.xlu1 %v7287_v25, %s7122_s11 }
 0x11a   : > { %2007 = vrot.lane.b32.xlu0 %v7255_v58, %s7122_s11 }
 0x11b   : > { %v7398_v55 = vpop.permute.xlu2 %1508  ;;  %v7400_v56 = vpop.permute.xlu1 %1383 }
 0x11c   : > { %v7402_v57 = vpop.permute.xlu0 %1813 }
 0x11d   : > { %10265 = vst [vmem:[#allocation11_spill] sm:$0xff] %v7402_v57  ;;  %6390 = vmatmul.msk.bf16.vlgmr.msrb.gmra.mxu1 %vm567_vm1, %v7233_v37 }
 0x121   : > { %1983 = vrot.lane.b32.xlu2 %v7339_v15, %s7122_s11  ;;  %2029 = vrot.lane.b32.xlu1 %v7287_v25, %s7124_s13 }
 0x122   : > { %2005 = vrot.lane.b32.xlu0 %v7255_v58, %s7124_s13 }
 0x123   : > { %v7412_v59 = vpop.permute.xlu2 %1839  ;;  %v7414_v60 = vpop.permute.xlu1 %1483 }
 0x124   : > { %10266 = vst [vmem:[#allocation12_spill] sm:$0xff] %v7412_v59  ;;  %v783_v61 = vpop.permute.xlu0 %782 }
 0x125   : > { %v788_v21 = vsel %vm567_vm1, %v783_v61, 0 }
 0x129   : > { %1981 = vrot.lane.b32.xlu2 %v7339_v15, %s7124_s13  ;;  %2103 = vrot.lane.b32.xlu1 %v7265_v4, %s7122_s11 }
 0x12a   : > { %2079 = vrot.lane.b32.xlu0 %v7363_v44, %s7122_s11 }
 0x12b   : > { %v7422_v62 = vpop.permute.xlu2 %1837  ;;  %v7424_v63 = vpop.permute.xlu1 %890 }
 0x12c   : > { %10267 = vst [vmem:[#allocation13_spill] sm:$0xff] %v7422_v62  ;;  %v594_v0 = vpop.permute.xlu0 %593 }
 0x12d   : > { %v599_v2 = vsel %vm567_vm1, %v594_v0, 0  ;;  %v896_v0 = vsel %vm567_vm1, %v7424_v63, 0 }
 0x12e   : > { %608 = vmatpush.bf16.xpose.msrb.mxu2 %v599_v2 }
 0x131   : > { %2055 = vrot.lane.b32.xlu2 %v7327_v1, %s7122_s11  ;;  %2101 = vrot.lane.b32.xlu1 %v7265_v4, %s7124_s13 }
 0x132   : > { %2077 = vrot.lane.b32.xlu0 %v7363_v44, %s7124_s13 }
 0x133   : > { %v918_v5 = vpop.permute.xlu2 %917  ;;  %v7434_v7 = vpop.permute.xlu1 %1683 }
 0x134   : > { %10268 = vst [vmem:[#allocation14_spill] sm:$0xff] %v7434_v7  ;;  %v702_v8 = vpop.permute.xlu0 %701  ;;  %v923_v46 = vsel %vm567_vm1, %v918_v5, 0 }
 0x135   : > { %6391 = vmatmul.msk.bf16.vlgmr.msrb.gmra.mxu2 %vm567_vm1, %v7267_v6  ;;  %v707_v17 = vsel %vm567_vm1, %v702_v8, 0 }
 0x136   : > { %689 = vmatpush.bf16.xpose.msra.mxu2 %v680_v3 }
 0x139   : > { %2053 = vrot.lane.b32.xlu2 %v7327_v1, %s7124_s13  ;;  %2127 = vrot.lane.b32.xlu1 %v7309_v50, %s7122_s11 }
 0x13a   : > { %2151 = vrot.lane.b32.xlu0 %v7351_v33, %s7122_s11 }
 0x13b   : > { %v7444_v9 = vpop.permute.xlu2 %1433  ;;  %v810_v10 = vpop.permute.xlu1 %809 }
 0x13c   : > { %v7446_v11 = vpop.permute.xlu0 %1935  ;;  %v815_v39 = vsel %vm567_vm1, %v810_v10, 0 }
 0x13d   : > { %10269 = vst [vmem:[#allocation15_spill] sm:$0xff] %v7446_v11 }
 0x141   : > { %2149 = vrot.lane.b32.xlu2 %v7351_v33, %s7124_s13  ;;  %2175 = vrot.lane.b32.xlu1 %v7373_v47, %s7122_s11  ;;  %s7131_s11 = smov 40  }
 0x142   : > { %2125 = vrot.lane.b32.xlu0 %v7309_v50, %s7124_s13 }
 0x143   : > { %v7454_v12 = vpop.permute.xlu2 %1863  ;;  %v621_v13 = vpop.permute.xlu1 %620 }
 0x144   : > { %10270 = vst [vmem:[#allocation16_spill] sm:$0xff] %v7454_v12  ;;  %v7456_v14 = vpop.permute.xlu0 %1933  ;;  %v626_v16 = vsel %vm567_vm1, %v621_v13, 0 }
 0x145   : > { %10271 = vst [vmem:[#allocation17_spill] sm:$0xff] %v7456_v14  ;;  %6394 = vmatmul.msk.bf16.vlgmr.msra.gmra.mxu2 %vm567_vm1, %v7235_v38  ;;  %635 = vmatpush.bf16.xpose.msrb.mxu3 %v626_v16 }
 0x149   : > { %2173 = vrot.lane.b32.xlu2 %v7373_v47, %s7124_s13  ;;  %2636 = vrot.lane.b32.xlu1 %v7299_v36, %s7125_s14 }
 0x14a   : > { %2611 = vrot.lane.b32.xlu0 %v7267_v6, %s7125_s14 }
 0x14b   : > { %v837_v19 = vpop.permute.xlu2 %836  ;;  %v729_v28 = vpop.permute.xlu1 %728 }
 0x14c   : > { %v7469_v22 = vpop.permute.xlu0 %1608  ;;  %6392 = vmatmul.msk.bf16.vlgmr.msrb.gmra.mxu3 %vm567_vm1, %v7299_v36  ;;  %v734_v30 = vsel %vm567_vm1, %v729_v28, 0  ;;  %v842_v43 = vsel %vm567_vm1, %v837_v19, 0  ;;  %v7557_v28 = vld [vmem:[%s10236_s3 + $0x8] sm:$0xff] }
 0x14d   : > { %716 = vmatpush.bf16.xpose.msra.mxu3 %v707_v17 }
 0x151   : > { %2586 = vrot.lane.b32.xlu2 %v7233_v37, %s7125_s14 }
 0x152   : > { %2686 = vrot.lane.b32.xlu0 %v7235_v38, %s7125_s14 }
 0x153   : > { %v945_v23 = vpop.permute.xlu2 %944 }
 0x154   : > { %v7477_v24 = vpop.permute.xlu0 %1708  ;;  %v950_v54 = vsel %vm567_vm1, %v945_v23, 0 }
 0x155   : > { %797 = vmatpush.bf16.xpose.msrb.mxu3 %v788_v21  ;;  %v7549_v21 = vpop.permute.xlu1 %1959 }
 0x156   : > { %10284 = vst [vmem:[#allocation30_spill] sm:$0xff] %v7549_v21 }
 0x15b   : > { %v7479_v26 = vpop.permute.xlu2 %1733 }
 0x15c   : > { %10272 = vst [vmem:[#allocation18_spill] sm:$0xff] %v7479_v26  ;;  %v7481_v27 = vpop.permute.xlu0 %1533  ;;  %6395 = vmatmul.msk.bf16.vlgmr.msra.gmra.mxu3 %vm567_vm1, %v7277_v18 }
 0x163   : > { %v648_v31 = vpop.permute.xlu2 %647 }
 0x164   : > { %v653_v32 = vsel %vm567_vm1, %v648_v31, 0  ;;  %v7487_v34 = vpop.permute.xlu0 %1861 }
 0x165   : > { %10273 = vst [vmem:[#allocation19_spill] sm:$0xff] %v7487_v34  ;;  %662 = vmatpush.bf16.xpose.msra.mxu1 %v653_v32 }
 0x16b   : > { %v756_v35 = vpop.permute.xlu2 %755 }
 0x16c   : > { %v761_v40 = vsel %vm567_vm1, %v756_v35, 0  ;;  %v1459_v42 = vpop.permute.xlu0 %1458  ;;  %6393 = vmatmul.msk.bf16.vlgmr.msra.gmra.mxu1 %vm567_vm1, %v7349_v29  ;;  %6398 = vmatmul.msk.bf16.vlgmr.msrb.gmra.mxu3 %vm567_vm1, %v7255_v58 }
 0x16d   : > { %743 = vmatpush.bf16.xpose.msrb.mxu1 %v734_v30  ;;  %770 = vmatpush.bf16.xpose.msrb.mxu2 %v761_v40 }
 0x173   : > { %v7496_v45 = vpop.permute.xlu2 %1909 }
 0x174   : > { %10274 = vst [vmem:[#allocation20_spill] sm:$0xff] %v7496_v45  ;;  %v864_v51 = vpop.permute.xlu0 %863  ;;  %6397 = vmatmul.msk.bf16.vlgmr.msrb.gmra.mxu2 %vm567_vm1, %v7339_v15 }
 0x175   : > { %824 = vmatpush.bf16.xpose.msra.mxu1 %v815_v39  ;;  %851 = vmatpush.bf16.xpose.msra.mxu2 %v842_v43  ;;  %v869_v53 = vsel %vm567_vm1, %v864_v51, 0  ;;  %v7568_v39 = vpop.permute.xlu1 %1633 }
 0x176   : > { %878 = vmatpush.bf16.xpose.msra.mxu3 %v869_v53 }
 0x17b   : > { %v7503_v61 = vpop.permute.xlu2 %1983 }
 0x17c   : > { %10275 = vst [vmem:[#allocation21_spill] sm:$0xff] %v7503_v61  ;;  %v972_v2 = vpop.permute.xlu0 %971  ;;  %6396 = vmatmul.msk.bf16.vlgmr.msrb.gmra.mxu1 %vm567_vm1, %v7307_v48 }
 0x17d   : > { %932 = vmatpush.bf16.xpose.msrb.mxu2 %v923_v46  ;;  %6401 = vmatmul.msk.bf16.vlgmr.msra.gmra.mxu3 %vm567_vm1, %v7363_v44  ;;  %v977_v63 = vsel %vm567_vm1, %v972_v2, 0  ;;  %v7575_v43 = vpop.permute.xlu1 %1558 }
 0x17e   : > { %959 = vmatpush.bf16.xpose.msrb.mxu3 %v950_v54  ;;  %905 = vmatpush.bf16.xpose.msrb.mxu1 %v896_v0 }
 0x183   : > { %v7512_v3 = vpop.permute.xlu2 %1981 }
 0x184   : > { %10276 = vst [vmem:[#allocation22_spill] sm:$0xff] %v7512_v3  ;;  %v7514_v5 = vpop.permute.xlu0 %1658  ;;  %6400 = vmatmul.msk.bf16.vlgmr.msra.gmra.mxu2 %vm567_vm1, %v7327_v1 }
 0x185   : > { %10277 = vst [vmem:[#allocation23_spill] sm:$0xff] %v7514_v5  ;;  %1396 = vmatpush.bf16.msra.mxu2 %v7400_v56  ;;  %v7538_v56 = vld [vmem:[%s10236_s3] sm:$0xff]  ;;  %v7582_v54 = vpop.permute.xlu1 %1887 }
 0x186   : > { %1421 = vmatpush.bf16.msra.mxu3 %v7389_v52  ;;  %10289 = vst [vmem:[#allocation35_spill] sm:$0xff] %v7582_v54 }
 0x18b   : > { %v7520_v8 = vpop.permute.xlu2 %2055 }
 0x18c   : > { %10278 = vst [vmem:[#allocation24_spill] sm:$0xff] %v7520_v8  ;;  %v7522_v10 = vpop.permute.xlu0 %2007  ;;  %6399 = vmatmul.msk.bf16.vlgmr.msra.gmra.mxu1 %vm567_vm1, %v7287_v25 }
 0x18d   : > { %10279 = vst [vmem:[#allocation25_spill] sm:$0xff] %v7522_v10  ;;  %6404 = vmatmul.msk.bf16.vlgmr.msrb.gmra.mxu3 %vm567_vm1, %v7351_v33  ;;  %986 = vmatpush.bf16.xpose.msra.mxu1 %v977_v63 }
 0x18e   : > { %1496 = vmatpush.bf16.msrb.mxu3 %v7414_v60 }
 0x193   : > { %v7529_v52 = vpop.permute.xlu2 %2053 }
 0x194   : > { %10280 = vst [vmem:[#allocation26_spill] sm:$0xff] %v7529_v52  ;;  %v7531_v13 = vpop.permute.xlu0 %2005  ;;  %6403 = vmatmul.msk.bf16.vlgmr.msrb.gmra.mxu2 %vm567_vm1, %v7309_v50 }
 0x195   : > { %10281 = vst [vmem:[#allocation27_spill] sm:$0xff] %v7531_v13  ;;  %1471 = vmatpush.bf16.msrb.mxu2 %v1459_v42 }
 0x19a   : > { %v583_v16 = vpop.f32.mrf.mxu1 }
 0x19b   : > { %v7541_v17 = vadd.f32 %v583_v16, %v7538_v56  ;;  %v7543_v19 = vpop.permute.xlu2 %2149 }
 0x19c   : > { %10282 = vst [vmem:[#allocation28_spill] sm:$0xff] %v7543_v19  ;;  %v7545_v60 = vpop.permute.xlu0 %2079  ;;  %6402 = vmatmul.msk.bf16.vlgmr.msrb.gmra.mxu1 %vm567_vm1, %v7265_v4 }
 0x19d   : > { %10283 = vst [vmem:[#allocation29_spill] sm:$0xff] %v7545_v60  ;;  %1446 = vmatpush.bf16.msrb.mxu1 %v7444_v9  ;;  %v994_v23 = vsel %vm993_vm2, %v7541_v17, -inf }
 0x19e   : > { %995 = vmax.xlane.f32.xlu1 %v994_v23 }
 0x1a2   : > { %v585_v30 = vpop.f32.mrf.mxu1 }
 0x1a3   : > { %v7560_v31 = vadd.f32 %v585_v30, %v7557_v28  ;;  %v7562_v32 = vpop.permute.xlu2 %2173  ;;  %v7593_v30 = vpop.permute.xlu1 %1885 }
 0x1a4   : > { %10285 = vst [vmem:[#allocation31_spill] sm:$0xff] %v7562_v32  ;;  %v7564_v35 = vpop.permute.xlu0 %2077 }
 0x1a5   : > { %10286 = vst [vmem:[#allocation32_spill] sm:$0xff] %v7564_v35  ;;  %v997_v9 = vsel %vm993_vm2, %v7560_v31, -inf }
 0x1a6   : > { %998 = vmax.xlane.f32.xlu2 %v997_v9  ;;  %10291 = vst [vmem:[#allocation37_spill] sm:$0xff] %v7593_v30 }
 0x1ab   : > { %v2587_v40 = vpop.permute.xlu2 %2586 }
 0x1ac   : > { %v7570_v42 = vpop.permute.xlu0 %2151  ;;  %6405 = vmatmul.msk.bf16.vlgmr.msra.gmra.mxu1 %vm567_vm1, %v7373_v47  ;;  %2599 = vmatpush.bf16.msrb.mxu0 %v2587_v40 }
 0x1ad   : > { %10287 = vst [vmem:[#allocation33_spill] sm:$0xff] %v7570_v42  ;;  %1521 = vmatpush.bf16.msra.mxu1 %v7398_v55 }
 0x1b4   : > { %v7577_v46 = vpop.permute.xlu0 %2125 }
 0x1b5   : > { %10288 = vst [vmem:[#allocation34_spill] sm:$0xff] %v7577_v46 }
 0x1b8   : > { %v610_v51 = vpop.f32.mrf.mxu2 }
 0x1b9   : > { %v7580_v53 = vadd.f32 %v610_v51, %v7538_v56 }
 0x1bb   : > { %v1000_v0 = vsel %vm993_vm2, %v7580_v53, -inf }
 0x1bc   : > { %1001 = vmax.xlane.f32.xlu0 %v1000_v0  ;;  %v7586_v2 = vpop.permute.xlu0 %2611  ;;  %v7600_v0 = vpop.permute.xlu1 %1758 }
 0x1bd   : > { %10290 = vst [vmem:[#allocation36_spill] sm:$0xff] %v7586_v2 }
 0x1be   : > { %10292 = vst [vmem:[#allocation38_spill] sm:$0xff] %v7600_v0 }
 0x1c0   : > { %v612_v63 = vpop.f32.mrf.mxu2 }
 0x1c1   : > { %v7589_v16 = vadd.f32 %v612_v63, %v7557_v28 }
 0x1c3   : > { %v1003_v55 = vsel %vm993_vm2, %v7589_v16, -inf }
 0x1c4   : > { %1004 = vmax.xlane.f32.xlu2 %v1003_v55  ;;  %v2687_v23 = vpop.permute.xlu0 %2686  ;;  %v7615_v13 = vpop.permute.xlu1 %1957 }
 0x1c5   : > { %2699 = vmatpush.bf16.msra.mxu0 %v2687_v23  ;;  %10293 = vst [vmem:[#allocation39_spill] sm:$0xff] %v7615_v13 }
 0x1c8   : > { %v691_v9 = vpop.f32.mrf.mxu2 }
 0x1c9   : > { %v7596_v40 = vadd.f32 %v691_v9, %v7538_v56 }
 0x1cb   : > { %v1018_v51 = vsel %vm993_vm2, %v7596_v40, -inf }
 0x1cc   : > { %1019 = vmax.xlane.f32.xlu0 %v1018_v51  ;;  %v7624_v14 = vpop.permute.xlu1 %2031 }
 0x1cd   : > { %10294 = vst [vmem:[#allocation40_spill] sm:$0xff] %v7624_v14 }
 0x1cf   : > { %v637_v63 = vpop.f32.mrf.mxu3 }
 0x1d0   : > { %v7603_v19 = vadd.f32 %v637_v63, %v7538_v56  ;;  %v693_v35 = vpop.f32.mrf.mxu2 }
 0x1d1   : > { %v7606_v55 = vadd.f32 %v693_v35, %v7557_v28 }
 0x1d2   : > { %v1006_v23 = vsel %vm993_vm2, %v7603_v19, -inf }
 0x1d3   : > { %v1021_v9 = vsel %vm993_vm2, %v7606_v55, -inf  ;;  %1007 = vmax.xlane.f32.xlu2 %v1006_v23 }
 0x1d4   : > { %1022 = vmax.xlane.f32.xlu1 %v1021_v9  ;;  %v7631_v60 = vpop.permute.xlu1 %2029 }
 0x1d5   : > { %10295 = vst [vmem:[#allocation41_spill] sm:$0xff] %v7631_v60 }
 0x1d7   : > { %v639_v32 = vpop.f32.mrf.mxu3 }
 0x1d8   : > { %v7613_v51 = vadd.f32 %v639_v32, %v7557_v28 }
 0x1da   : > { %v1009_v63 = vsel %vm993_vm2, %v7613_v51, -inf }
 0x1db   : > { %1010 = vmax.xlane.f32.xlu0 %v1009_v63 }
 0x1df   : > { %v718_v35 = vpop.f32.mrf.mxu3 }
 0x1e0   : > { %v7620_v42 = vadd.f32 %v718_v35, %v7538_v56 }
 0x1e2   : > { %v1024_v46 = vsel %vm993_vm2, %v7620_v42, -inf }
 0x1e3   : > { %1025 = vmax.xlane.f32.xlu2 %v1024_v46  ;;  %v7638_v46 = vpop.permute.xlu1 %2103 }
 0x1e4   : > { %10296 = vst [vmem:[#allocation42_spill] sm:$0xff] %v7638_v46 }
 0x1e7   : > { %v720_v63 = vpop.f32.mrf.mxu3 }
 0x1e8   : > { %v7646_v60 = vadd.f32 %v720_v63, %v7557_v28 }
 0x1e9   : > { %v664_v23 = vpop.f32.mrf.mxu1 }
 0x1ea   : > { %v7627_v32 = vadd.f32 %v664_v23, %v7538_v56  ;;  %v1027_v45 = vsel %vm993_vm2, %v7646_v60, -inf }
 0x1ec   : > { %v1012_v9 = vsel %vm993_vm2, %v7627_v32, -inf }
 0x1ed   : > { %1013 = vmax.xlane.f32.xlu1 %v1012_v9 }
 0x1ef   : > { %v799_v3 = vpop.f32.mrf.mxu3 }
 0x1f1   : > { %v666_v2 = vpop.f32.mrf.mxu1 }
 0x1f2   : > { %v7634_v35 = vadd.f32 %v666_v2, %v7557_v28 }
 0x1f4   : > { %v1015_v52 = vsel %vm993_vm2, %v7634_v35, -inf }
 0x1f5   : > { %1016 = vmax.xlane.f32.xlu2 %v1015_v52  ;;  %v7651_v52 = vpop.permute.xlu1 %2101 }
 0x1f6   : > { %10297 = vst [vmem:[#allocation43_spill] sm:$0xff] %v7651_v52 }
 0x1f7   : > { %v772_v34 = vpop.f32.mrf.mxu2  ;;  %v801_v63 = vpop.f32.mrf.mxu3 }
 0x1f8   : > { %v7641_v23 = vadd.f32 %v772_v34, %v7538_v56 }
 0x1f9   : > { %v745_v10 = vpop.f32.mrf.mxu1 }
 0x1fa   : > { %v1036_v9 = vsel %vm993_vm2, %v7641_v23, -inf }
 0x1fb   : > { %1037 = vmax.xlane.f32.xlu0 %v1036_v9 }
 0x1fd   : > { %v7675_v14 = vpop.permute.xlu1 %2127 }
 0x1fe   : > { %10298 = vst [vmem:[#allocation44_spill] sm:$0xff] %v7675_v14 }
 0x1ff   : > { %v774_v2 = vpop.f32.mrf.mxu2 }
 0x200   : > { %v7649_v13 = vadd.f32 %v774_v2, %v7557_v28  ;;  %v7663_v2 = vadd.f32 %v745_v10, %v7538_v56 }
 0x201   : > { %v747_v46 = vpop.f32.mrf.mxu1 }
 0x202   : > { %v7654_v11 = vadd.f32 %v747_v46, %v7557_v28  ;;  %v1039_v34 = vsel %vm993_vm2, %v7649_v13, -inf  ;;  %v7666_v46 = vadd.f32 %v801_v63, %v7557_v28  ;;  %v7680_v63 = vadd.f32 %v799_v3, %v7538_v56 }
 0x203   : > { %1040 = vmax.xlane.f32.xlu1 %v1039_v34  ;;  %1028 = vmax.xlane.f32.xlu0 %v1027_v45  ;;  %v1030_v34 = vsel %vm993_vm2, %v7663_v2, -inf }
 0x204   : > { %v1033_v9 = vsel %vm993_vm2, %v7654_v11, -inf  ;;  %v1045_v10 = vsel %vm993_vm2, %v7666_v46, -inf  ;;  %v1042_v61 = vsel %vm993_vm2, %v7680_v63, -inf }
 0x205   : > { %1034 = vmax.xlane.f32.xlu2 %v1033_v9  ;;  %v7684_v57 = vpop.permute.xlu1 %2175 }
 0x206   : > { %10299 = vst [vmem:[#allocation45_spill] sm:$0xff] %v7684_v57 }
 0x207   : > { %v853_v52 = vpop.f32.mrf.mxu2 }
 0x208   : > { %v7669_v8 = vadd.f32 %v853_v52, %v7538_v56  ;;  %v880_v52 = vpop.f32.mrf.mxu3 }
 0x209   : > { %v826_v30 = vpop.f32.mrf.mxu1 }
 0x20a   : > { %v1054_v45 = vsel %vm993_vm2, %v7669_v8, -inf }
 0x20b   : > { %1031 = vmax.xlane.f32.xlu1 %v1030_v34  ;;  %1055 = vmax.xlane.f32.xlu0 %v1054_v45 }
 0x20d   : > { %1046 = vmax.xlane.f32.xlu2 %v1045_v10  ;;  %v7699_v57 = vpop.permute.xlu1 %2636 }
 0x20e   : > { %10300 = vst [vmem:[#allocation46_spill] sm:$0xff] %v7699_v57 }
 0x20f   : > { %v855_v9 = vpop.f32.mrf.mxu2 }
 0x210   : > { %v7687_v14 = vadd.f32 %v855_v9, %v7557_v28  ;;  %v882_v45 = vpop.f32.mrf.mxu3 }
 0x211   : > { %v828_v62 = vpop.f32.mrf.mxu1 }
 0x212   : > { %v1057_v3 = vsel %vm993_vm2, %v7687_v14, -inf  ;;  %v7702_v9 = vadd.f32 %v828_v62, %v7557_v28  ;;  %v7714_v62 = vadd.f32 %v880_v52, %v7538_v56 }
 0x213   : > { %1043 = vmax.xlane.f32.xlu1 %v1042_v61  ;;  %v7697_v61 = vadd.f32 %v826_v30, %v7538_v56 }
 0x214   : > { %v1051_v30 = vsel %vm993_vm2, %v7702_v9, -inf }
 0x215   : > { %v1048_v59 = vsel %vm993_vm2, %v7697_v61, -inf }
 0x217   : > { %v934_v34 = vpop.f32.mrf.mxu2 }
 0x218   : > { %v7690_v21 = vadd.f32 %v934_v34, %v7538_v56  ;;  %v961_v0 = vpop.f32.mrf.mxu3 }
 0x219   : > { %v907_v10 = vpop.f32.mrf.mxu1 }
 0x21a   : > { %v1072_v12 = vsel %vm993_vm2, %v7690_v21, -inf  ;;  %v7720_v57 = vadd.f32 %v907_v10, %v7538_v56 }
 0x21b   : > { %1058 = vmax.xlane.f32.xlu1 %v1057_v3  ;;  %1073 = vmax.xlane.f32.xlu2 %v1072_v12  ;;  %v996_v3 = vpop.xlane.xlu1 %995 }
 0x21c   : > { %v1090_v41 = vsub.f32 %v7541_v17, %v996_v3  ;;  %v1066_v52 = vsel %vm993_vm2, %v7720_v57, -inf  ;;  %v999_v17 = vpop.xlane.xlu2 %998 }
 0x21e   : > { %v1122_v10 = vmul.f32 1.442695, %v1090_v41 }
 0x21f   : > { %v936_v20 = vpop.f32.mrf.mxu2 }
 0x220   : > { %v7705_v34 = vadd.f32 %v936_v20, %v7557_v28  ;;  %v7717_v20 = vadd.f32 %v882_v45, %v7557_v28  ;;  %v963_v45 = vpop.f32.mrf.mxu3  ;;  %6601 = vpow2.f32 %v1122_v10 }
 0x221   : > { %v909_v54 = vpop.f32.mrf.mxu1  ;;  %v7733_v7 = vadd.f32 %v963_v45, %v7557_v28 }
 0x222   : > { %v1075_v12 = vsel %vm993_vm2, %v7705_v34, -inf }
 0x223   : > { %1049 = vmax.xlane.f32.xlu1 %v1048_v59  ;;  %1076 = vmax.xlane.f32.xlu0 %v1075_v12  ;;  %v1063_v59 = vsel %vm993_vm2, %v7717_v20, -inf  ;;  %v1060_v12 = vsel %vm993_vm2, %v7714_v62, -inf }
 0x224   : > { %1052 = vmax.xlane.f32.xlu2 %v1051_v30  ;;  %v7730_v30 = vadd.f32 %v961_v0, %v7538_v56  ;;  %v7745_v0 = vadd.f32 %v909_v54, %v7557_v28 }
 0x226   : > { %v1078_v26 = vsel %vm993_vm2, %v7730_v30, -inf  ;;  %v7747_v45 = vpop.eup %6601 }
 0x229   : > { %v988_v47 = vpop.f32.mrf.mxu1 }
 0x22a   : > { %v7756_v54 = vadd.f32 %v988_v47, %v7538_v56 }
 0x22b   : > { %1064 = vmax.xlane.f32.xlu0 %v1063_v59  ;;  %1061 = vmax.xlane.f32.xlu1 %v1060_v12  ;;  %v1081_v59 = vsel %vm993_vm2, %v7733_v7, -inf }
 0x22c   : > { %1067 = vmax.xlane.f32.xlu2 %v1066_v52 }
 0x22f   : > { %v1002_v12 = vpop.xlane.xlu0 %1001 }
 0x231   : > { %v990_v3 = vpop.f32.mrf.mxu1 }
 0x232   : > { %v7736_v6 = vadd.f32 %v990_v3, %v7557_v28  ;;  %v1091_v3 = vsub.f32 %v7560_v31, %v999_v17  ;;  %v1092_v31 = vsub.f32 %v7580_v53, %v1002_v12 }
 0x233   : > { %1079 = vmax.xlane.f32.xlu0 %v1078_v26  ;;  %v1069_v26 = vsel %vm993_vm2, %v7745_v0, -inf }
 0x234   : > { %1082 = vmax.xlane.f32.xlu2 %v1081_v59  ;;  %v1087_v41 = vsel %vm993_vm2, %v7736_v6, -inf  ;;  %v1186_v59 = vsel %vm993_vm2, %v7747_v45, 0.0  ;;  %v1124_v28 = vmul.f32 1.442695, %v1091_v3  ;;  %v1126_v47 = vmul.f32 1.442695, %v1092_v31 }
 0x235   : > { %1088 = vmax.xlane.f32.xlu1 %v1087_v41 }
 0x237   : > { %v1005_v52 = vpop.xlane.xlu2 %1004 }
 0x238   : > { %v1093_v10 = vsub.f32 %v7589_v16, %v1005_v52  ;;  %v1084_v52 = vsel %vm993_vm2, %v7756_v54, -inf }
 0x23a   : > { %v1128_v5 = vmul.f32 1.442695, %v1093_v10 }
 0x23b   : > { %1070 = vmax.xlane.f32.xlu0 %v1069_v26 }
 0x23c   : > { %6603 = vpow2.f32 %v1128_v5  ;;  %1187 = vadd.xlane.f32.xlu2 %v1186_v59 }
 0x23d   : > { %6605 = vpow2.f32 %v1124_v28 }
 0x23f   : > { %v1020_v41 = vpop.xlane.xlu0 %1019 }
 0x240   : > { %v1098_v38 = vsub.f32 %v7596_v40, %v1020_v41 }
 0x242   : > { %v7760_v16 = vpop.eup %6603  ;;  %v1138_v17 = vmul.f32 1.442695, %v1098_v38 }
 0x243   : > { %v1195_v5 = vsel %vm993_vm2, %v7760_v16, 0.0  ;;  %1085 = vmax.xlane.f32.xlu0 %v1084_v52  ;;  %v7766_v10 = vpop.eup %6605 }
 0x244   : > { %6607 = vpow2.f32 %v1138_v17  ;;  %1196 = vadd.xlane.f32.xlu1 %v1195_v5  ;;  %v1189_v38 = vsel %vm993_vm2, %v7766_v10, 0.0 }
 0x245   : > { %6609 = vpow2.f32 %v1126_v47 }
 0x246   : > { %v1008_v56 = vpop.xlane.xlu2 %1007 }
 0x247   : > { %v1094_v40 = vsub.f32 %v7603_v19, %v1008_v56  ;;  %v1023_v26 = vpop.xlane.xlu1 %1022 }
 0x248   : > { %v1099_v28 = vsub.f32 %v7606_v55, %v1023_v26 }
 0x249   : > { %v1130_v3 = vmul.f32 1.442695, %v1094_v40 }
 0x24a   : > { %v7769_v53 = vpop.eup %6607  ;;  %v1140_v41 = vmul.f32 1.442695, %v1099_v28 }
 0x24b   : > { %1190 = vadd.xlane.f32.xlu0 %v1189_v38  ;;  %v1210_v12 = vsel %vm993_vm2, %v7769_v53, 0.0  ;;  %v7775_v59 = vpop.eup %6609  ;;  %6611 = vpow2.f32 %v1130_v3 }
 0x24c   : > { %1211 = vadd.xlane.f32.xlu2 %v1210_v12  ;;  %v1192_v19 = vsel %vm993_vm2, %v7775_v59, 0.0  ;;  %6613 = vpow2.f32 %v1140_v41 }
 0x24e   : > { %v1011_v31 = vpop.xlane.xlu0 %1010 }
 0x24f   : > { %v1095_v52 = vsub.f32 %v7613_v51, %v1011_v31 }
 0x251   : > { %v7780_v17 = vpop.eup %6611  ;;  %v1132_v47 = vmul.f32 1.442695, %v1095_v52 }
 0x252   : > { %v1198_v5 = vsel %vm993_vm2, %v7780_v17, 0.0  ;;  %v7785_v56 = vpop.eup %6613 }
 0x253   : > { %1193 = vadd.xlane.f32.xlu0 %v1192_v19  ;;  %6615 = vpow2.f32 %v1132_v47  ;;  %v1213_v38 = vsel %vm993_vm2, %v7785_v56, 0.0 }
 0x256   : > { %v1026_v3 = vpop.xlane.xlu2 %1025 }
 0x257   : > { %v1100_v51 = vsub.f32 %v7620_v42, %v1026_v3 }
 0x259   : > { %v7790_v26 = vpop.eup %6615  ;;  %v1142_v19 = vmul.f32 1.442695, %v1100_v51 }
 0x25a   : > { %v1201_v28 = vsel %vm993_vm2, %v7790_v26, 0.0 }
 0x25b   : > { %1199 = vadd.xlane.f32.xlu0 %v1198_v5 }
 0x260   : > { %v1014_v55 = vpop.xlane.xlu1 %1013 }
 0x261   : > { %v1096_v40 = vsub.f32 %v7627_v32, %v1014_v55 }
 0x263   : > { %1214 = vadd.xlane.f32.xlu0 %v1213_v38  ;;  %v1134_v12 = vmul.f32 1.442695, %v1096_v40 }
 0x265   : > { %6617 = vpow2.f32 %v1134_v12 }
 0x266   : > { %6619 = vpow2.f32 %v1142_v19 }
 0x268   : > { %v1017_v41 = vpop.xlane.xlu2 %1016 }
 0x269   : > { %v1097_v5 = vsub.f32 %v7634_v35, %v1017_v41 }
 0x26b   : > { %1202 = vadd.xlane.f32.xlu0 %v1201_v28  ;;  %v7795_v52 = vpop.eup %6617  ;;  %v1136_v42 = vmul.f32 1.442695, %v1097_v5 }
 0x26c   : > { %v1204_v55 = vsel %vm993_vm2, %v7795_v52, 0.0  ;;  %v7801_v12 = vpop.eup %6619 }
 0x26d   : > { %v1216_v19 = vsel %vm993_vm2, %v7801_v12, 0.0 }
 0x26e   : > { %v1038_v31 = vpop.xlane.xlu0 %1037 }
 0x26f   : > { %v1104_v32 = vsub.f32 %v7641_v23, %v1038_v31 }
 0x271   : > { %v1150_v47 = vmul.f32 1.442695, %v1104_v32 }
 0x273   : > { %6621 = vpow2.f32 %v1150_v47  ;;  %1205 = vadd.xlane.f32.xlu0 %v1204_v55 }
 0x274   : > { %6623 = vpow2.f32 %v1136_v42 }
 0x276   : > { %v1041_v40 = vpop.xlane.xlu1 %1040  ;;  %v1029_v38 = vpop.xlane.xlu0 %1028 }
 0x277   : > { %v1105_v3 = vsub.f32 %v7649_v13, %v1041_v40  ;;  %v1101_v35 = vsub.f32 %v7646_v60, %v1029_v38 }
 0x278   : > { %v1035_v51 = vpop.xlane.xlu2 %1034 }
 0x279   : > { %v7804_v28 = vpop.eup %6621  ;;  %v1152_v23 = vmul.f32 1.442695, %v1105_v3  ;;  %v1144_v31 = vmul.f32 1.442695, %v1101_v35 }
 0x27a   : > { %v1228_v41 = vsel %vm993_vm2, %v7804_v28, 0.0  ;;  %v7811_v5 = vpop.eup %6623 }
 0x27b   : > { %6625 = vpow2.f32 %v1152_v23  ;;  %1217 = vadd.xlane.f32.xlu0 %v1216_v19  ;;  %1229 = vadd.xlane.f32.xlu1 %v1228_v41  ;;  %v1207_v40 = vsel %vm993_vm2, %v7811_v5, 0.0 }
 0x27c   : > { %6627 = vpow2.f32 %v1144_v31 }
 0x27e   : > { %v1032_v32 = vpop.xlane.xlu1 %1031  ;;  %v1056_v23 = vpop.xlane.xlu0 %1055 }
 0x27f   : > { %v1102_v55 = vsub.f32 %v7663_v2, %v1032_v32  ;;  %v1110_v2 = vsub.f32 %v7669_v8, %v1056_v23 }
 0x280   : > { %v1047_v13 = vpop.xlane.xlu2 %1046 }
 0x281   : > { %v7813_v47 = vpop.eup %6625  ;;  %v1107_v60 = vsub.f32 %v7666_v46, %v1047_v13  ;;  %v1146_v3 = vmul.f32 1.442695, %v1102_v55  ;;  %v1162_v55 = vmul.f32 1.442695, %v1110_v2 }
 0x282   : > { %v1231_v42 = vsel %vm993_vm2, %v7813_v47, 0.0  ;;  %v7821_v19 = vpop.eup %6627 }
 0x283   : > { %v1156_v38 = vmul.f32 1.442695, %v1107_v60  ;;  %1232 = vadd.xlane.f32.xlu2 %v1231_v42  ;;  %1208 = vadd.xlane.f32.xlu0 %v1207_v40  ;;  %v1219_v31 = vsel %vm993_vm2, %v7821_v19, 0.0 }
 0x285   : > { %6629 = vpow2.f32 %v1156_v38  ;;  %v1103_v38 = vsub.f32 %v7654_v11, %v1035_v51 }
 0x286   : > { %v1044_v35 = vpop.xlane.xlu1 %1043  ;;  %6631 = vpow2.f32 %v1146_v3 }
 0x287   : > { %v1106_v41 = vsub.f32 %v7680_v63, %v1044_v35 }
 0x289   : > { %v1154_v46 = vmul.f32 1.442695, %v1106_v41  ;;  %v1148_v41 = vmul.f32 1.442695, %v1103_v38 }
 0x28b   : > { %v7827_v32 = vpop.eup %6629  ;;  %6633 = vpow2.f32 %v1154_v46  ;;  %1220 = vadd.xlane.f32.xlu2 %v1219_v31 }
 0x28c   : > { %v1237_v13 = vsel %vm993_vm2, %v7827_v32, 0.0  ;;  %v7831_v40 = vpop.eup %6631  ;;  %6635 = vpow2.f32 %v1162_v55 }
 0x28d   : > { %1238 = vadd.xlane.f32.xlu1 %v1237_v13  ;;  %v1222_v35 = vsel %vm993_vm2, %v7831_v40, 0.0 }
 0x28e   : > { %v1059_v60 = vpop.xlane.xlu1 %1058  ;;  %v1074_v42 = vpop.xlane.xlu2 %1073 }
 0x28f   : > { %v1116_v63 = vsub.f32 %v7690_v21, %v1074_v42  ;;  %v1111_v51 = vsub.f32 %v7687_v14, %v1059_v60 }
 0x291   : > { %v7834_v8 = vpop.eup %6633  ;;  %v1174_v3 = vmul.f32 1.442695, %v1116_v63 }
 0x292   : > { %v1234_v23 = vsel %vm993_vm2, %v7834_v8, 0.0  ;;  %v7841_v31 = vpop.eup %6635 }
 0x293   : > { %1235 = vadd.xlane.f32.xlu0 %v1234_v23  ;;  %1223 = vadd.xlane.f32.xlu2 %v1222_v35  ;;  %6637 = vpow2.f32 %v1174_v3  ;;  %v1246_v3 = vsel %vm993_vm2, %v7841_v31, 0.0 }
 0x294   : > { %6639 = vpow2.f32 %v1148_v41 }
 0x296   : > { %v1050_v2 = vpop.xlane.xlu1 %1049  ;;  %v1077_v46 = vpop.xlane.xlu0 %1076 }
 0x297   : > { %v1108_v21 = vsub.f32 %v7697_v61, %v1050_v2  ;;  %v1053_v13 = vpop.xlane.xlu2 %1052  ;;  %v1164_v61 = vmul.f32 1.442695, %v1111_v51  ;;  %v1117_v60 = vsub.f32 %v7705_v34, %v1077_v46 }
 0x298   : > { %v1109_v11 = vsub.f32 %v7702_v9, %v1053_v13 }
 0x299   : > { %v1158_v55 = vmul.f32 1.442695, %v1108_v21  ;;  %v7846_v42 = vpop.eup %6637 }
 0x29a   : > { %v1160_v63 = vmul.f32 1.442695, %v1109_v11  ;;  %v1264_v38 = vsel %vm993_vm2, %v7846_v42, 0.0  ;;  %v7852_v35 = vpop.eup %6639 }
 0x29b   : > { %6641 = vpow2.f32 %v1158_v55  ;;  %1247 = vadd.xlane.f32.xlu2 %v1246_v3  ;;  %1265 = vadd.xlane.f32.xlu1 %v1264_v38  ;;  %v1225_v55 = vsel %vm993_vm2, %v7852_v35, 0.0 }
 0x29c   : > { %6643 = vpow2.f32 %v1160_v63 }
 0x29d   : > { %6645 = vpow2.f32 %v1164_v61 }
 0x29e   : > { %v1062_v23 = vpop.xlane.xlu1 %1061  ;;  %v1065_v9 = vpop.xlane.xlu0 %1064 }
 0x29f   : > { %v1112_v14 = vsub.f32 %v7714_v62, %v1062_v23  ;;  %v1068_v2 = vpop.xlane.xlu2 %1067  ;;  %v1113_v13 = vsub.f32 %v7717_v20, %v1065_v9  ;;  %v1176_v62 = vmul.f32 1.442695, %v1117_v60 }
 0x2a0   : > { %v1114_v20 = vsub.f32 %v7720_v57, %v1068_v2 }
 0x2a1   : > { %v7856_v41 = vpop.eup %6641  ;;  %v1166_v21 = vmul.f32 1.442695, %v1112_v14  ;;  %v1168_v46 = vmul.f32 1.442695, %v1113_v13 }
 0x2a2   : > { %v7859_v11 = vpop.eup %6643  ;;  %v1240_v51 = vsel %vm993_vm2, %v7856_v41, 0.0  ;;  %v1170_v60 = vmul.f32 1.442695, %v1114_v20 }
 0x2a3   : > { %6647 = vpow2.f32 %v1166_v21  ;;  %1241 = vadd.xlane.f32.xlu0 %v1240_v51  ;;  %v1243_v34 = vsel %vm993_vm2, %v7859_v11, 0.0  ;;  %1226 = vadd.xlane.f32.xlu2 %v1225_v55  ;;  %v7867_v3 = vpop.eup %6645 }
 0x2a4   : > { %1244 = vadd.xlane.f32.xlu1 %v1243_v34  ;;  %6649 = vpow2.f32 %v1176_v62  ;;  %v1249_v9 = vsel %vm993_vm2, %v7867_v3, 0.0 }
 0x2a5   : > { %6651 = vpow2.f32 %v1168_v46 }
 0x2a6   : > { %v1080_v63 = vpop.xlane.xlu0 %1079  ;;  %6653 = vpow2.f32 %v1170_v60 }
 0x2a7   : > { %v1118_v61 = vsub.f32 %v7730_v30, %v1080_v63  ;;  %v1083_v14 = vpop.xlane.xlu2 %1082 }
 0x2a8   : > { %v1119_v2 = vsub.f32 %v7733_v7, %v1083_v14  ;;  %v1089_v46 = vpop.xlane.xlu1 %1088 }
 0x2a9   : > { %v7870_v38 = vpop.eup %6647  ;;  %v1178_v21 = vmul.f32 1.442695, %v1118_v61 }
 0x2aa   : > { %v1252_v23 = vsel %vm993_vm2, %v7870_v38, 0.0  ;;  %v7877_v13 = vpop.eup %6649  ;;  %v1180_v62 = vmul.f32 1.442695, %v1119_v2 }
 0x2ab   : > { %1253 = vadd.xlane.f32.xlu0 %v1252_v23  ;;  %1250 = vadd.xlane.f32.xlu2 %v1249_v9  ;;  %v7879_v57 = vpop.eup %6651  ;;  %6655 = vpow2.f32 %v1178_v21  ;;  %v1267_v55 = vsel %vm993_vm2, %v7877_v13, 0.0 }
 0x2ac   : > { %v1255_v34 = vsel %vm993_vm2, %v7879_v57, 0.0  ;;  %v7887_v61 = vpop.eup %6653  ;;  %6657 = vpow2.f32 %v1180_v62 }
 0x2ad   : > { %v1258_v9 = vsel %vm993_vm2, %v7887_v61, 0.0 }
 0x2ae   : > { %v1071_v51 = vpop.xlane.xlu0 %1070 }
 0x2af   : > { %v1115_v30 = vsub.f32 %v7745_v0, %v1071_v51  ;;  %v1188_v63 = vpop.xlane.xlu2 %1187 }
 0x2b0   : > { %6659 = vrcp.f32 %v1188_v63 }
 0x2b1   : > { %v1172_v20 = vmul.f32 1.442695, %v1115_v30  ;;  %v7889_v7 = vpop.eup %6655 }
 0x2b2   : > { %v1270_v14 = vsel %vm993_vm2, %v7889_v7, 0.0  ;;  %v7896_v60 = vpop.eup %6657 }
 0x2b3   : > { %1268 = vadd.xlane.f32.xlu2 %v1267_v55  ;;  %1256 = vadd.xlane.f32.xlu0 %v1255_v34  ;;  %6661 = vpow2.f32 %v1172_v20  ;;  %10301 = vst [vmem:[#allocation47_spill] sm:$0xff] %v7896_v60  ;;  %v1273_v34 = vsel %vm993_vm2, %v7896_v60, 0.0 }
 0x2b6   : > { %v1086_v23 = vpop.xlane.xlu0 %1085  ;;  %v6660_v2 = vpop.eup %6659 }
 0x2b7   : > { %v1120_v0 = vsub.f32 %v7756_v54, %v1086_v23  ;;  %v1197_v21 = vpop.xlane.xlu1 %1196  ;;  %v1314_v54 = vmul.f32 %v6660_v2, %v7747_v45 }
 0x2b9   : > { %v1182_v51 = vmul.f32 1.442695, %v1120_v0  ;;  %v7900_v55 = vpop.eup %6661  ;;  %v1346_v23 = vpack.c.bf16 %v1314_v54, %v1314_v54 }
 0x2ba   : > { %10302 = vst [vmem:[#allocation48_spill] sm:$0xff] %v7900_v55  ;;  %v1261_v62 = vsel %vm993_vm2, %v7900_v55, 0.0 }
 0x2bb   : > { %1259 = vadd.xlane.f32.xlu2 %v1258_v9  ;;  %1271 = vadd.xlane.f32.xlu0 %v1270_v14 }
 0x2bd   : > { %2736 = vrot.lane.b32.xlu1 %v7307_v48, %s7125_s14 }
 0x2be   : > { %v1191_v30 = vpop.xlane.xlu0 %1190 }
 0x2bf   : > { %6663 = vrcp.f32 %v1191_v30  ;;  %v1212_v60 = vpop.xlane.xlu2 %1211 }
 0x2c0   : > { %6665 = vrcp.f32 %v1197_v21 }
 0x2c1   : > { %6667 = vpow2.f32 %v1182_v51  ;;  %v1380_v51 = vunpack.c.l.b16 %v1346_v23 }
 0x2c3   : > { %1274 = vadd.xlane.f32.xlu2 %v1273_v34  ;;  %1262 = vadd.xlane.f32.xlu0 %v1261_v62 }
 0x2c5   : > { %v6664_v63 = vpop.eup %6663 }
 0x2c6   : > { %v6666_v20 = vpop.eup %6665  ;;  %v1315_v0 = vmul.f32 %v6664_v63, %v7766_v10  ;;  %v1194_v9 = vpop.xlane.xlu0 %1193 }
 0x2c7   : > { %v7908_v14 = vpop.eup %6667  ;;  %6669 = vrcp.f32 %v1194_v9  ;;  %v1317_v45 = vmul.f32 %v6666_v20, %v7760_v16 }
 0x2c8   : > { %v1347_v21 = vpack.c.bf16 %v1315_v0, %v1315_v0  ;;  %v1276_v30 = vsel %vm993_vm2, %v7908_v14, 0.0  ;;  %6671 = vrcp.f32 %v1212_v60  ;;  %v1121_v0 = vsub.f32 %v7736_v6, %v1089_v46 }
 0x2c9   : > { %v1349_v55 = vpack.c.bf16 %v1317_v45, %v1317_v45 }
 0x2ca   : > { %v1381_v2 = vunpack.c.l.b16 %v1347_v21 }
 0x2cb   : > { %1277 = vadd.xlane.f32.xlu2 %v1276_v30  ;;  %v1406_v23 = vunpack.c.l.b16 %v1349_v55 }
 0x2cc   : > { %v1382_v34 = vpack.c.b16 %v1381_v2, %v1380_v51 }
 0x2cd   : > { %v6670_v62 = vpop.eup %6669 }
 0x2ce   : > { %v1316_v54 = vmul.f32 %v6670_v62, %v7775_v59  ;;  %6406 = vmatmul.msk.bf16.vlgmr.msra.gmra.mxu2 %vm993_vm2, %v1382_v34  ;;  %v1200_v10 = vpop.xlane.xlu0 %1199  ;;  %v6672_v21 = vpop.eup %6671  ;;  %v1184_v59 = vmul.f32 1.442695, %v1121_v0 }
 0x2cf   : > { %1546 = vmatpush.bf16.msra.mxu2 %v7481_v27  ;;  %v1322_v27 = vmul.f32 %v6672_v21, %v7769_v53 }
 0x2d0   : > { %v1348_v63 = vpack.c.bf16 %v1316_v54, %v1316_v54 }
 0x2d1   : > { %v1354_v55 = vpack.c.bf16 %v1322_v27, %v1322_v27 }
 0x2d2   : > { %v1405_v16 = vunpack.c.l.b16 %v1348_v63 }
 0x2d3   : > { %v1480_v45 = vunpack.c.l.b16 %v1354_v55 }
 0x2d4   : > { %v1407_v20 = vpack.c.b16 %v1406_v23, %v1405_v16 }
 0x2d6   : > { %6407 = vmatmul.msk.bf16.vlgmr.msra.gmra.mxu3 %vm993_vm2, %v1407_v20  ;;  %v1215_v9 = vpop.xlane.xlu0 %1214 }
 0x2d7   : > { %1571 = vmatpush.bf16.msra.mxu3 %v7575_v43  ;;  %6673 = vrcp.f32 %v1215_v9  ;;  %2661 = vrot.lane.b32.xlu0 %v7349_v29, %s7125_s14 }
 0x2d8   : > { %6675 = vrcp.f32 %v1200_v10 }
 0x2d9   : > { %6677 = vpow2.f32 %v1184_v59 }
 0x2dd   : > { %v6674_v60 = vpop.eup %6673 }
 0x2de   : > { %v1323_v51 = vmul.f32 %v6674_v60, %v7785_v56  ;;  %v1203_v6 = vpop.xlane.xlu0 %1202  ;;  %v6676_v46 = vpop.eup %6675 }
 0x2df   : > { %6679 = vrcp.f32 %v1203_v6  ;;  %2786 = vrot.lane.b32.xlu0 %v7255_v58, %s7125_s14  ;;  %v1318_v2 = vmul.f32 %v6676_v46, %v7780_v17  ;;  %v7926_v34 = vpop.eup %6677 }
 0x2e0   : > { %v1355_v43 = vpack.c.bf16 %v1323_v51, %v1323_v51  ;;  %v1279_v10 = vsel %vm993_vm2, %v7926_v34, 0.0 }
 0x2e1   : > { %v1350_v54 = vpack.c.bf16 %v1318_v2, %v1318_v2 }
 0x2e2   : > { %v1481_v30 = vunpack.c.l.b16 %v1355_v43 }
 0x2e3   : > { %2711 = vrot.lane.b32.xlu2 %v7277_v18, %s7125_s14  ;;  %v1430_v23 = vunpack.c.l.b16 %v1350_v54 }
 0x2e4   : > { %v1482_v53 = vpack.c.b16 %v1481_v30, %v1480_v45 }
 0x2e5   : > { %v6680_v62 = vpop.eup %6679 }
 0x2e6   : > { %v1319_v56 = vmul.f32 %v6680_v62, %v7790_v26  ;;  %6410 = vmatmul.msk.bf16.vlgmr.msrb.gmra.mxu3 %vm993_vm2, %v1482_v53  ;;  %v1206_v63 = vpop.xlane.xlu0 %1205 }
 0x2e7   : > { %1280 = vadd.xlane.f32.xlu1 %v1279_v10  ;;  %1646 = vmatpush.bf16.msrb.mxu3 %v7568_v39 }
 0x2e8   : > { %v1351_v17 = vpack.c.bf16 %v1319_v56, %v1319_v56  ;;  %2761 = vrot.lane.b32.xlu0 %v7339_v15, %s7125_s14 }
 0x2ea   : > { %v1431_v16 = vunpack.c.l.b16 %v1351_v17 }
 0x2eb   : > { %2836 = vrot.lane.b32.xlu2 %v7327_v1, %s7125_s14 }
 0x2ec   : > { %v1432_v20 = vpack.c.b16 %v1431_v16, %v1430_v23 }
 0x2ee   : > { %v1230_v26 = vpop.xlane.xlu1 %1229  ;;  %6408 = vmatmul.msk.bf16.vlgmr.msrb.gmra.mxu1 %vm993_vm2, %v1432_v20  ;;  %v1218_v0 = vpop.xlane.xlu0 %1217 }
 0x2ef   : > { %1596 = vmatpush.bf16.msrb.mxu1 %v7381_v49  ;;  %6681 = vrcp.f32 %v1230_v26  ;;  %v10303_v26 = vld [vmem:[#allocation4_spill] sm:$0xff] }
 0x2f0   : > { %2886 = vrot.lane.b32.xlu0 %v7265_v4, %s7125_s14  ;;  %6683 = vrcp.f32 %v1206_v63 }
 0x2f3   : > { %3147 = vrot.lane.b32.xlu2 %v7233_v37, %s7126_s19 }
 0x2f5   : > { %v6682_v21 = vpop.eup %6681 }
 0x2f6   : > { %v1233_v39 = vpop.xlane.xlu2 %1232  ;;  %v1209_v9 = vpop.xlane.xlu0 %1208  ;;  %v1328_v49 = vmul.f32 %v6682_v21, %v7804_v28 }
 0x2f7   : > { %6685 = vrcp.f32 %v1233_v39  ;;  %v6684_v59 = vpop.eup %6683 }
 0x2f8   : > { %6687 = vrcp.f32 %v1209_v9  ;;  %2861 = vrot.lane.b32.xlu0 %v7363_v44, %s7125_s14  ;;  %v1320_v27 = vmul.f32 %v6684_v59, %v7795_v52  ;;  %v1360_v51 = vpack.c.bf16 %v1328_v49, %v1328_v49 }
 0x2f9   : > { %6689 = vrcp.f32 %v1218_v0 }
 0x2fa   : > { %v1352_v45 = vpack.c.bf16 %v1320_v27, %v1320_v27  ;;  %v1555_v28 = vunpack.c.l.b16 %v1360_v51 }
 0x2fb   : > { %3193 = vrot.lane.b32.xlu2 %v7299_v36, %s7127_s20 }
 0x2fc   : > { %v1455_v54 = vunpack.c.l.b16 %v1352_v45 }
 0x2fd   : > { %v6686_v60 = vpop.eup %6685 }
 0x2fe   : > { %v6688_v55 = vpop.eup %6687  ;;  %v1329_v6 = vmul.f32 %v6686_v60, %v7813_v47  ;;  %v1221_v46 = vpop.xlane.xlu2 %1220 }
 0x2ff   : > { %v6690_v43 = vpop.eup %6689  ;;  %v1321_v2 = vmul.f32 %v6688_v55, %v7811_v5  ;;  %6691 = vrcp.f32 %v1221_v46 }
 0x300   : > { %v1361_v30 = vpack.c.bf16 %v1329_v6, %v1329_v6  ;;  %2811 = vrot.lane.b32.xlu1 %v7287_v25, %s7125_s14  ;;  %2911 = vrot.lane.b32.xlu0 %v7309_v50, %s7125_s14  ;;  %v1324_v53 = vmul.f32 %v6690_v43, %v7801_v12  ;;  %v1239_v63 = vpop.xlane.xlu1 %1238 }
 0x301   : > { %v1353_v52 = vpack.c.bf16 %v1321_v2, %v1321_v2 }
 0x302   : > { %v1556_v62 = vunpack.c.l.b16 %v1361_v30  ;;  %v1356_v17 = vpack.c.bf16 %v1324_v53, %v1324_v53 }
 0x303   : > { %v1456_v47 = vunpack.c.l.b16 %v1353_v52  ;;  %3267 = vrot.lane.b32.xlu2 %v7277_v18, %s7126_s19 }
 0x304   : > { %v1557_v56 = vpack.c.b16 %v1556_v62, %v1555_v28 }
 0x305   : > { %v6692_v5 = vpop.eup %6691  ;;  %v1457_v10 = vpack.c.b16 %v1456_v47, %v1455_v54  ;;  %v10305_v47 = vld [vmem:[#allocation18_spill] sm:$0xff] }
 0x306   : > { %v1325_v23 = vmul.f32 %v6692_v5, %v7821_v19  ;;  %v1224_v16 = vpop.xlane.xlu2 %1223  ;;  %6413 = vmatmul.msk.bf16.vlgmr.msra.gmra.mxu3 %vm993_vm2, %v1557_v56  ;;  %v1236_v20 = vpop.xlane.xlu0 %1235  ;;  %v1505_v19 = vunpack.c.l.b16 %v1356_v17  ;;  %v10306_v56 = vld [vmem:[#allocation5_spill] sm:$0xff] }
 0x307   : > { %6409 = vmatmul.msk.bf16.vlgmr.msrb.gmra.mxu2 %vm993_vm2, %v1457_v10  ;;  %1721 = vmatpush.bf16.msra.mxu3 %v7477_v24  ;;  %6693 = vrcp.f32 %v1236_v20 }
 0x308   : > { %v1357_v12 = vpack.c.bf16 %v1325_v23, %v1325_v23  ;;  %1621 = vmatpush.bf16.msrb.mxu2 %v7469_v22  ;;  %2936 = vrot.lane.b32.xlu1 %v7351_v33, %s7125_s14  ;;  %6695 = vrcp.f32 %v1239_v63  ;;  %v10304_v22 = vld [vmem:[#allocation23_spill] sm:$0xff] }
 0x309   : > { %3241 = vrot.lane.b32.xlu0 %v10303_v26, %s7127_s20  ;;  %6697 = vrcp.f32 %v1224_v16 }
 0x30a   : > { %v1506_v0 = vunpack.c.l.b16 %v1357_v12 }
 0x30b   : > { %3289 = vrot.lane.b32.xlu2 %v7307_v48, %s7127_s20 }
 0x30c   : > { %v1507_v39 = vpack.c.b16 %v1506_v0, %v1505_v19 }
 0x30d   : > { %v6694_v9 = vpop.eup %6693 }
 0x30e   : > { %v1248_v21 = vpop.xlane.xlu2 %1247  ;;  %6411 = vmatmul.msk.bf16.vlgmr.msra.gmra.mxu1 %vm993_vm2, %v1507_v39  ;;  %v6696_v24 = vpop.eup %6695  ;;  %v1330_v59 = vmul.f32 %v6694_v9, %v7834_v8  ;;  %v10307_v39 = vld [vmem:[#allocation14_spill] sm:$0xff] }
 0x30f   : > { %1671 = vmatpush.bf16.msra.mxu1 %v10304_v22  ;;  %v1266_v49 = vpop.xlane.xlu1 %1265  ;;  %v1331_v27 = vmul.f32 %v6696_v24, %v7827_v32  ;;  %v6698_v46 = vpop.eup %6697 }
 0x310   : > { %3145 = vrot.lane.b32.xlu1 %v7233_v37, %s7127_s20  ;;  %v1362_v60 = vpack.c.bf16 %v1330_v59, %v1330_v59  ;;  %v1326_v32 = vmul.f32 %v6698_v46, %v7831_v40 }
 0x311   : > { %3339 = vrot.lane.b32.xlu0 %v7255_v58, %s7126_s19  ;;  %v1363_v55 = vpack.c.bf16 %v1331_v27, %v1331_v27 }
 0x312   : > { %v1580_v8 = vunpack.c.l.b16 %v1362_v60  ;;  %v1358_v52 = vpack.c.bf16 %v1326_v32, %v1326_v32 }
 0x313   : > { %3315 = vrot.lane.b32.xlu2 %v7339_v15, %s7126_s19  ;;  %v1581_v43 = vunpack.c.l.b16 %v1363_v55 }
 0x314   : > { %v1530_v5 = vunpack.c.l.b16 %v1358_v52 }
 0x315   : > { %v1582_v2 = vpack.c.b16 %v1581_v43, %v1580_v8 }
 0x316   : > { %v1227_v51 = vpop.xlane.xlu2 %1226  ;;  %v1242_v6 = vpop.xlane.xlu0 %1241 }
 0x317   : > { %6699 = vrcp.f32 %v1227_v51  ;;  %v1245_v45 = vpop.xlane.xlu1 %1244  ;;  %v10308_v51 = vld [vmem:[#allocation8_spill] sm:$0xff] }
 0x318   : > { %3195 = vrot.lane.b32.xlu1 %v7299_v36, %s7126_s19  ;;  %6701 = vrcp.f32 %v1248_v21 }
 0x319   : > { %3265 = vrot.lane.b32.xlu0 %v7277_v18, %s7127_s20  ;;  %6703 = vrcp.f32 %v1245_v45 }
 0x31a   : > { %6705 = vrcp.f32 %v1242_v6  ;;  %v1821_v6 = vsel %vm567_vm1, %v10308_v51, 0 }
 0x31b   : > { %3435 = vrot.lane.b32.xlu2 %v7265_v4, %s7126_s19 }
 0x31d   : > { %v6700_v30 = vpop.eup %6699 }
 0x31e   : > { %v1327_v28 = vmul.f32 %v6700_v30, %v7852_v35  ;;  %v1251_v53 = vpop.xlane.xlu2 %1250  ;;  %6414 = vmatmul.msk.bf16.vlgmr.msrb.gmra.mxu1 %vm993_vm2, %v1582_v2  ;;  %v1254_v62 = vpop.xlane.xlu0 %1253  ;;  %v10309_v30 = vld [vmem:[#allocation10_spill] sm:$0xff] }
 0x31f   : > { %v6702_v54 = vpop.eup %6701  ;;  %6707 = vrcp.f32 %v1251_v53  ;;  %1746 = vmatpush.bf16.msrb.mxu1 %v10305_v47 }
 0x320   : > { %v1359_v40 = vpack.c.bf16 %v1327_v28, %v1327_v28  ;;  %3171 = vrot.lane.b32.xlu1 %v10306_v56, %s7126_s19  ;;  %v1334_v10 = vmul.f32 %v6702_v54, %v7841_v31  ;;  %6709 = vrcp.f32 %v1254_v62  ;;  %v6704_v63 = vpop.eup %6703 }
 0x321   : > { %3387 = vrot.lane.b32.xlu0 %v7327_v1, %s7126_s19  ;;  %v6706_v17 = vpop.eup %6705  ;;  %v1333_v9 = vmul.f32 %v6704_v63, %v7859_v11 }
 0x322   : > { %v1531_v35 = vunpack.c.l.b16 %v1359_v40  ;;  %v1366_v20 = vpack.c.bf16 %v1334_v10, %v1334_v10  ;;  %v1332_v21 = vmul.f32 %v6706_v17, %v7856_v41 }
 0x323   : > { %3361 = vrot.lane.b32.xlu2 %v7287_v25, %s7127_s20  ;;  %v1365_v27 = vpack.c.bf16 %v1333_v9, %v1333_v9 }
 0x324   : > { %v1532_v23 = vpack.c.b16 %v1531_v35, %v1530_v5  ;;  %v1364_v11 = vpack.c.bf16 %v1332_v21, %v1332_v21  ;;  %v10310_v35 = vld [vmem:[#allocation12_spill] sm:$0xff] }
 0x325   : > { %v6708_v16 = vpop.eup %6707  ;;  %v1845_v63 = vsel %vm567_vm1, %v10310_v35, 0 }
 0x326   : > { %v1335_v12 = vmul.f32 %v6708_v16, %v7867_v3  ;;  %v1269_v19 = vpop.xlane.xlu2 %1268  ;;  %6412 = vmatmul.msk.bf16.vlgmr.msra.gmra.mxu2 %vm993_vm2, %v1532_v23  ;;  %v1257_v0 = vpop.xlane.xlu0 %1256  ;;  %v1630_v3 = vunpack.c.l.b16 %v1366_v20  ;;  %v1605_v45 = vunpack.c.l.b16 %v1364_v11 }
 0x327   : > { %6711 = vrcp.f32 %v1269_v19  ;;  %1696 = vmatpush.bf16.msra.mxu2 %v10307_v39  ;;  %v6710_v31 = vpop.eup %6709 }
 0x328   : > { %v1367_v24 = vpack.c.bf16 %v1335_v12, %v1335_v12  ;;  %6713 = vrcp.f32 %v1257_v0  ;;  %3243 = vrot.lane.b32.xlu1 %v10303_v26, %s7126_s19  ;;  %v1336_v59 = vmul.f32 %v6710_v31, %v7870_v38  ;;  %v1606_v38 = vunpack.c.l.b16 %v1365_v27  ;;  %v10312_v31 = vld [vmem:[#allocation35_spill] sm:$0xff] }
 0x329   : > { %6715 = vrcp.f32 %v1266_v49  ;;  %3313 = vrot.lane.b32.xlu0 %v7339_v15, %s7127_s20  ;;  %v1893_v9 = vsel %vm567_vm1, %v10312_v31, 0 }
 0x32a   : > { %v1631_v22 = vunpack.c.l.b16 %v1367_v24  ;;  %v1368_v43 = vpack.c.bf16 %v1336_v59, %v1336_v59  ;;  %v10313_v24 = vld [vmem:[#allocation47_spill] sm:$0xff]  ;;  %v10314_v59 = vld [vmem:[#allocation48_spill] sm:$0xff] }
 0x32b   : > { %3483 = vrot.lane.b32.xlu2 %v7351_v33, %s7126_s19 }
 0x32c   : > { %v1632_v60 = vpack.c.b16 %v1631_v22, %v1630_v3  ;;  %v1655_v53 = vunpack.c.l.b16 %v1368_v43 }
 0x32d   : > { %v6712_v41 = vpop.eup %6711 }
 0x32e   : > { %v6714_v55 = vpop.eup %6713  ;;  %v1260_v46 = vpop.xlane.xlu2 %1259  ;;  %6416 = vmatmul.msk.bf16.vlgmr.msrb.gmra.mxu3 %vm993_vm2, %v1632_v60  ;;  %v1341_v2 = vmul.f32 %v6712_v41, %v7877_v13 }
 0x32f   : > { %v1272_v49 = vpop.xlane.xlu0 %1271  ;;  %v6716_v8 = vpop.eup %6715  ;;  %v1337_v32 = vmul.f32 %v6714_v55, %v7879_v57  ;;  %1830 = vmatpush.bf16.xpose.msrb.mxu3 %v1821_v6  ;;  %v1607_v57 = vpack.c.b16 %v1606_v38, %v1605_v45  ;;  %v10318_v45 = vld [vmem:[#allocation11_spill] sm:$0xff] }
 0x330   : > { %2961 = vrot.lane.b32.xlu1 %v10309_v30, %s7125_s14  ;;  %6717 = vrcp.f32 %v1272_v49  ;;  %v1340_v28 = vmul.f32 %v6716_v8, %v7846_v42  ;;  %v1373_v54 = vpack.c.bf16 %v1341_v2, %v1341_v2  ;;  %v10311_v42 = vld [vmem:[#allocation38_spill] sm:$0xff]  ;;  %v10316_v8 = vld [vmem:[#allocation16_spill] sm:$0xff] }
 0x331   : > { %v1369_v52 = vpack.c.bf16 %v1337_v32, %v1337_v32  ;;  %3433 = vrot.lane.b32.xlu0 %v7265_v4, %s7127_s20  ;;  %6719 = vrcp.f32 %v1260_v46  ;;  %v10315_v46 = vld [vmem:[#allocation9_spill] sm:$0xff]  ;;  %v1869_v43 = vsel %vm567_vm1, %v10316_v8, 0  ;;  %v10317_v32 = vld [vmem:[#allocation30_spill] sm:$0xff] }
 0x332   : > { %v1372_v13 = vpack.c.bf16 %v1340_v28, %v1340_v28  ;;  %v1706_v23 = vunpack.c.l.b16 %v1373_v54  ;;  %v1917_v49 = vsel %vm567_vm1, %v10315_v46, 0  ;;  %v1965_v38 = vsel %vm567_vm1, %v10317_v32, 0  ;;  %v10334_v8 = vld [vmem:[#allocation26_spill] sm:$0xff] }
 0x333   : > { %v1656_v62 = vunpack.c.l.b16 %v1369_v52  ;;  %3481 = vrot.lane.b32.xlu2 %v7351_v33, %s7127_s20  ;;  %v8058_v52 = vpop.permute.xlu1 %2736 }
 0x334   : > { %v1705_v16 = vunpack.c.l.b16 %v1372_v13 }
 0x335   : > { %v1657_v47 = vpack.c.b16 %v1656_v62, %v1655_v53  ;;  %v10319_v53 = vld [vmem:[#allocation21_spill] sm:$0xff] }
 0x336   : > { %v1275_v40 = vpop.xlane.xlu2 %1274  ;;  %6415 = vmatmul.msk.bf16.vlgmr.msrb.gmra.mxu2 %vm993_vm2, %v1607_v57  ;;  %v6718_v10 = vpop.eup %6717  ;;  %v1707_v19 = vpack.c.b16 %v1706_v23, %v1705_v16  ;;  %v1989_v62 = vsel %vm567_vm1, %v10319_v53, 0  ;;  %v10320_v57 = vld [vmem:[#allocation13_spill] sm:$0xff] }
 0x337   : > { %v1263_v5 = vpop.xlane.xlu0 %1262  ;;  %6721 = vrcp.f32 %v1275_v40  ;;  %6417 = vmatmul.msk.bf16.vlgmr.msra.gmra.mxu1 %vm993_vm2, %v1657_v47  ;;  %1771 = vmatpush.bf16.msrb.mxu2 %v10311_v42  ;;  %v6720_v17 = vpop.eup %6719  ;;  %v1342_v20 = vmul.f32 %v6718_v10, %v7889_v7  ;;  %v10337_v53 = vld [vmem:[#allocation17_spill] sm:$0xff] }
 0x338   : > { %1854 = vmatpush.bf16.xpose.msra.mxu1 %v1845_v63  ;;  %6723 = vrcp.f32 %v1263_v5  ;;  %3169 = vrot.lane.b32.xlu1 %v10306_v56, %s7127_s20  ;;  %v1338_v12 = vmul.f32 %v6720_v17, %v7887_v61  ;;  %v10321_v5 = vld [vmem:[#allocation40_spill] sm:$0xff]  ;;  %v10322_v63 = vld [vmem:[#allocation37_spill] sm:$0xff] }
 0x339   : > { %3459 = vrot.lane.b32.xlu0 %v7309_v50, %s7126_s19  ;;  %v1374_v21 = vpack.c.bf16 %v1342_v20, %v1342_v20  ;;  %v2037_v10 = vsel %vm567_vm1, %v10321_v5, 0 }
 0x33a   : > { %v1370_v22 = vpack.c.bf16 %v1338_v12, %v1338_v12 }
 0x33b   : > { %3505 = vrot.lane.b32.xlu2 %v10309_v30, %s7127_s20  ;;  %v1730_v11 = vunpack.c.l.b16 %v1374_v21  ;;  %v10325_v21 = vld [vmem:[#allocation15_spill] sm:$0xff] }
 0x33c   : > { %v1680_v41 = vunpack.c.l.b16 %v1370_v22 }
 0x33d   : > { %v6722_v0 = vpop.eup %6721 }
 0x33e   : > { %v6724_v39 = vpop.eup %6723  ;;  %v1343_v3 = vmul.f32 %v6722_v0, %v10313_v24  ;;  %6419 = vmatmul.msk.bf16.vlgmr.msra.gmra.mxu3 %vm993_vm2, %v1707_v19  ;;  %v1278_v28 = vpop.xlane.xlu2 %1277  ;;  %v10323_v0 = vld [vmem:[#allocation24_spill] sm:$0xff] }
 0x33f   : > { %v1339_v27 = vmul.f32 %v6724_v39, %v10314_v59  ;;  %1902 = vmatpush.bf16.xpose.msra.mxu3 %v1893_v9  ;;  %6725 = vrcp.f32 %v1278_v28  ;;  %v10324_v39 = vld [vmem:[#allocation20_spill] sm:$0xff]  ;;  %v10327_v59 = vld [vmem:[#allocation39_spill] sm:$0xff] }
 0x340   : > { %v1375_v7 = vpack.c.bf16 %v1343_v3, %v1343_v3  ;;  %3219 = vrot.lane.b32.xlu1 %v7349_v29, %s7126_s19  ;;  %v10326_v3 = vld [vmem:[#allocation42_spill] sm:$0xff] }
 0x341   : > { %v1371_v61 = vpack.c.bf16 %v1339_v27, %v1339_v27  ;;  %3457 = vrot.lane.b32.xlu0 %v7309_v50, %s7127_s20  ;;  %v2109_v22 = vsel %vm567_vm1, %v10326_v3, 0  ;;  %v10346_v3 = vld [vmem:[#allocation28_spill] sm:$0xff] }
 0x342   : > { %v1731_v60 = vunpack.c.l.b16 %v1375_v7 }
 0x343   : > { %v1681_v55 = vunpack.c.l.b16 %v1371_v61  ;;  %v10328_v61 = vld [vmem:[#allocation44_spill] sm:$0xff] }
 0x344   : > { %v1732_v51 = vpack.c.b16 %v1731_v60, %v1730_v11  ;;  %v2133_v11 = vsel %vm567_vm1, %v10328_v61, 0  ;;  %v10329_v60 = vld [vmem:[#allocation22_spill] sm:$0xff] }
 0x345   : > { %v1682_v6 = vpack.c.b16 %v1681_v55, %v1680_v41  ;;  %v6726_v40 = vpop.eup %6725  ;;  %v10330_v41 = vld [vmem:[#allocation25_spill] sm:$0xff] }
 0x346   : > { %v1344_v35 = vmul.f32 %v6726_v40, %v7908_v14  ;;  %v2061_v14 = vsel %vm567_vm1, %v10323_v0, 0  ;;  %v2013_v55 = vsel %vm567_vm1, %v10330_v41, 0  ;;  %v2712_v5 = vpop.permute.xlu2 %2711  ;;  %v10343_v0 = vld [vmem:[#allocation32_spill] sm:$0xff] }
 0x347   : > { %6418 = vmatmul.msk.bf16.vlgmr.msra.gmra.mxu2 %vm993_vm2, %v1682_v6  ;;  %6420 = vmatmul.msk.bf16.vlgmr.msrb.gmra.mxu1 %vm993_vm2, %v1732_v51  ;;  %v10331_v51 = vld [vmem:[#allocation19_spill] sm:$0xff]  ;;  %v10332_v6 = vld [vmem:[#allocation45_spill] sm:$0xff] }
 0x348   : > { %1878 = vmatpush.bf16.xpose.msra.mxu2 %v1869_v43  ;;  %1926 = vmatpush.bf16.xpose.msrb.mxu1 %v1917_v49  ;;  %v1376_v23 = vpack.c.bf16 %v1344_v35, %v1344_v35  ;;  %v2181_v46 = vsel %vm567_vm1, %v10332_v6, 0  ;;  %v10333_v49 = vld [vmem:[#allocation41_spill] sm:$0xff]  ;;  %v10335_v43 = vld [vmem:[#allocation36_spill] sm:$0xff] }
 0x349   : > { %3291 = vrot.lane.b32.xlu1 %v7307_v48, %s7126_s19  ;;  %v10340_v35 = vld [vmem:[#allocation33_spill] sm:$0xff] }
 0x34a   : > { %v1755_v12 = vunpack.c.l.b16 %v1376_v23 }
 0x34e   : > { %6424 = vmatmul.msk.bf16.vlgmr.msrb.gmra.mxu3 %vm567_vm1, %v10318_v45 }
 0x34f   : > { %1974 = vmatpush.bf16.xpose.msrb.mxu3 %v1965_v38  ;;  %v10336_v38 = vld [vmem:[#allocation29_spill] sm:$0xff] }
 0x350   : > { %v2085_v45 = vsel %vm567_vm1, %v10336_v38, 0 }
 0x351   : > { %3217 = vrot.lane.b32.xlu1 %v7349_v29, %s7127_s20  ;;  %v1398_v2 = vpop.f32.mrf.mxu2 }
 0x352   : > { %1778 = vst.msk [vmem:[#allocation2] sm:$0xff] %vm567_vm1, %v1398_v2  ;;  %v2662_v2 = vpop.permute.xlu0 %2661 }
 0x357   : > { %6425 = vmatmul.msk.bf16.vlgmr.msra.gmra.mxu1 %vm567_vm1, %v10320_v57  ;;  %v10338_v57 = vld [vmem:[#allocation43_spill] sm:$0xff] }
 0x358   : > { %1998 = vmatpush.bf16.xpose.msra.mxu1 %v1989_v62 }
 0x359   : > { %3337 = vrot.lane.b32.xlu1 %v7255_v58, %s7127_s20  ;;  %v1400_v54 = vpop.f32.mrf.mxu2  ;;  %v1423_v47 = vpop.f32.mrf.mxu3 }
 0x35a   : > { %v1281_v13 = vpop.xlane.xlu1 %1280  ;;  %1779 = vst.msk [vmem:[#allocation2 + $0x8] sm:$0xff] %vm567_vm1, %v1400_v54  ;;  %v8127_v40 = vpop.permute.xlu0 %2786 }
 0x35b   : > { %6727 = vrcp.f32 %v1281_v13  ;;  %1780 = vst.msk [vmem:[#allocation2 + $0x10] sm:$0xff] %vm567_vm1, %v1423_v47 }
 0x35e   : > { %6427 = vmatmul.msk.bf16.vlgmr.msra.gmra.mxu3 %vm567_vm1, %v10322_v63  ;;  %v2157_v63 = vsel %vm567_vm1, %v10340_v35, 0 }
 0x35f   : > { %2046 = vmatpush.bf16.xpose.msra.mxu3 %v2037_v10  ;;  %v10339_v10 = vld [vmem:[#allocation34_spill] sm:$0xff] }
 0x361   : > { %v6728_v42 = vpop.eup %6727  ;;  %3363 = vrot.lane.b32.xlu1 %v7287_v25, %s7126_s19  ;;  %v1425_v17 = vpop.f32.mrf.mxu3 }
 0x362   : > { %v1345_v16 = vmul.f32 %v6728_v42, %v7926_v34  ;;  %1781 = vst.msk [vmem:[#allocation2 + $0x18] sm:$0xff] %vm567_vm1, %v1425_v17  ;;  %v1941_v34 = vsel %vm567_vm1, %v10325_v21, 0  ;;  %v10341_v42 = vld [vmem:[#allocation27_spill] sm:$0xff]  ;;  %v2762_v23 = vpop.permute.xlu0 %2761 }
 0x364   : > { %v1377_v20 = vpack.c.bf16 %v1345_v16, %v1345_v16  ;;  %v10342_v16 = vld [vmem:[#allocation31_spill] sm:$0xff] }
 0x366   : > { %v1756_v19 = vunpack.c.l.b16 %v1377_v20 }
 0x367   : > { %6428 = vmatmul.msk.bf16.vlgmr.msrb.gmra.mxu1 %vm567_vm1, %v10324_v39 }
 0x368   : > { %v1757_v31 = vpack.c.b16 %v1756_v19, %v1755_v12  ;;  %2070 = vmatpush.bf16.xpose.msrb.mxu1 %v2061_v14  ;;  %v10344_v14 = vld [vmem:[#allocation46_spill] sm:$0xff] }
 0x369   : > { %3385 = vrot.lane.b32.xlu1 %v7327_v1, %s7127_s20  ;;  %v1498_v9 = vpop.f32.mrf.mxu3 }
 0x36a   : > { %1786 = vst.msk [vmem:[#allocation2 + $0x40] sm:$0xff] %vm567_vm1, %v1498_v9  ;;  %6421 = vmatmul.msk.bf16.vlgmr.msrb.gmra.mxu2 %vm993_vm2, %v1757_v31 }
 0x36b   : > { %1950 = vmatpush.bf16.xpose.msrb.mxu2 %v1941_v34  ;;  %v1448_v24 = vpop.f32.mrf.mxu1 }
 0x36c   : > { %1782 = vst.msk [vmem:[#allocation2 + $0x20] sm:$0xff] %vm567_vm1, %v1448_v24 }
 0x36e   : > { %6430 = vmatmul.msk.bf16.vlgmr.msrb.gmra.mxu3 %vm567_vm1, %v10327_v59 }
 0x36f   : > { %2118 = vmatpush.bf16.xpose.msrb.mxu3 %v2109_v22 }
 0x371   : > { %3411 = vrot.lane.b32.xlu1 %v7363_v44, %s7126_s19  ;;  %v1500_v27 = vpop.f32.mrf.mxu3 }
 0x372   : > { %1787 = vst.msk [vmem:[#allocation2 + $0x48] sm:$0xff] %vm567_vm1, %v1500_v27  ;;  %v8140_v12 = vpop.permute.xlu1 %2811 }
 0x373   : > { %v1450_v7 = vpop.f32.mrf.mxu1 }
 0x374   : > { %1783 = vst.msk [vmem:[#allocation2 + $0x28] sm:$0xff] %vm567_vm1, %v1450_v7 }
 0x377   : > { %6431 = vmatmul.msk.bf16.vlgmr.msra.gmra.mxu1 %vm567_vm1, %v10329_v60 }
 0x378   : > { %2142 = vmatpush.bf16.xpose.msra.mxu1 %v2133_v11 }
 0x379   : > { %3409 = vrot.lane.b32.xlu1 %v7363_v44, %s7127_s20 }
 0x37a   : > { %6426 = vmatmul.msk.bf16.vlgmr.msra.gmra.mxu2 %vm567_vm1, %v10331_v51  ;;  %v8146_v9 = vpop.permute.xlu1 %2936 }
 0x37b   : > { %2022 = vmatpush.bf16.xpose.msra.mxu2 %v2013_v55  ;;  %10345 = vst [vmem:[#allocation4_spill] sm:$0xff] %v8146_v9  ;;  %v8170_v55 = vld [vmem:[%s10236_s3 + $0x10] sm:$0xff] }
 0x37e   : > { %6433 = vmatmul.msk.bf16.vlgmr.msra.gmra.mxu3 %vm567_vm1, %v10333_v49 }
 0x37f   : > { %2190 = vmatpush.bf16.xpose.msra.mxu3 %v2181_v46 }
 0x381   : > { %3507 = vrot.lane.b32.xlu1 %v10309_v30, %s7126_s19  ;;  %s7134_s19 = smov 24  }
 0x382   : > { %v8156_v22 = vpop.permute.xlu1 %3145 }
 0x383   : > { %10347 = vst [vmem:[#allocation23_spill] sm:$0xff] %v8156_v22 }
 0x387   : > { %6434 = vmatmul.msk.bf16.vlgmr.msrb.gmra.mxu1 %vm567_vm1, %v10334_v8 }
 0x388   : > { %2624 = vmatpush.bf16.msrb.mxu1 %v10335_v43 }
 0x389   : > { %v1573_v32 = vpop.f32.mrf.mxu3 }
 0x38a   : > { %v1473_v28 = vpop.f32.mrf.mxu2  ;;  %1792 = vst.msk [vmem:[#allocation2 + $0x70] sm:$0xff] %vm567_vm1, %v1573_v32  ;;  %6429 = vmatmul.msk.bf16.vlgmr.msrb.gmra.mxu2 %vm567_vm1, %v10337_v53  ;;  %v8162_v11 = vpop.permute.xlu1 %3195  ;;  %v8183_v32 = vld [vmem:[%s10236_s3 + $0x18] sm:$0xff] }
 0x38b   : > { %1784 = vst.msk [vmem:[#allocation2 + $0x30] sm:$0xff] %vm567_vm1, %v1473_v28  ;;  %2094 = vmatpush.bf16.xpose.msrb.mxu2 %v2085_v45  ;;  %v1523_v62 = vpop.f32.mrf.mxu1  ;;  %v8190_v28 = vpop.permute.xlu0 %2886 }
 0x38c   : > { %1788 = vst.msk [vmem:[#allocation2 + $0x50] sm:$0xff] %vm567_vm1, %v1523_v62 }
 0x38d   : > { %10348 = vst [vmem:[#allocation18_spill] sm:$0xff] %v8162_v11 }
 0x38e   : > { %6436 = vmatmul.msk.bf16.vlgmr.msrb.gmra.mxu3 %vm567_vm1, %v10338_v57  ;;  %10351 = vst [vmem:[#allocation12_spill] sm:$0xff] %v8190_v28 }
 0x38f   : > { %2674 = vmatpush.bf16.msrb.mxu3 %v2662_v2 }
 0x391   : > { %v1575_v54 = vpop.f32.mrf.mxu3 }
 0x392   : > { %v1475_v47 = vpop.f32.mrf.mxu2  ;;  %1793 = vst.msk [vmem:[#allocation2 + $0x78] sm:$0xff] %vm567_vm1, %v1575_v54  ;;  %v8172_v51 = vpop.permute.xlu1 %3171 }
 0x393   : > { %1785 = vst.msk [vmem:[#allocation2 + $0x38] sm:$0xff] %vm567_vm1, %v1475_v47  ;;  %v1525_v13 = vpop.f32.mrf.mxu1 }
 0x394   : > { %1789 = vst.msk [vmem:[#allocation2 + $0x58] sm:$0xff] %vm567_vm1, %v1525_v13 }
 0x395   : > { %10349 = vst [vmem:[#allocation14_spill] sm:$0xff] %v8172_v51 }
 0x397   : > { %6437 = vmatmul.msk.bf16.vlgmr.msra.gmra.mxu1 %vm567_vm1, %v10339_v10 }
 0x398   : > { %2724 = vmatpush.bf16.msra.mxu1 %v2712_v5 }
 0x39a   : > { %6432 = vmatmul.msk.bf16.vlgmr.msra.gmra.mxu2 %vm567_vm1, %v10341_v42  ;;  %v8185_v45 = vpop.permute.xlu1 %3243 }
 0x39b   : > { %2166 = vmatpush.bf16.xpose.msra.mxu2 %v2157_v63  ;;  %v1598_v17 = vpop.f32.mrf.mxu1  ;;  %10350 = vst [vmem:[#allocation8_spill] sm:$0xff] %v8185_v45  ;;  %v8206_v63 = vpop.permute.xlu0 %2861 }
 0x39c   : > { %1794 = vst.msk [vmem:[#allocation2 + $0x80] sm:$0xff] %vm567_vm1, %v1598_v17 }
 0x39e   : > { %6439 = vmatmul.msk.bf16.vlgmr.msra.gmra.mxu3 %vm567_vm1, %v10342_v16  ;;  %v8214_v16 = vpop.permute.xlu2 %2836 }
 0x39f   : > { %2774 = vmatpush.bf16.msra.mxu3 %v2762_v23 }
 0x3a2   : > { %v8200_v13 = vpop.permute.xlu1 %2961 }
 0x3a3   : > { %v1600_v20 = vpop.f32.mrf.mxu1  ;;  %10352 = vst [vmem:[#allocation38_spill] sm:$0xff] %v8200_v13 }
 0x3a4   : > { %1795 = vst.msk [vmem:[#allocation2 + $0x88] sm:$0xff] %vm567_vm1, %v1600_v20 }
 0x3a9   : > { %v1548_v19 = vpop.f32.mrf.mxu2 }
 0x3aa   : > { %1790 = vst.msk [vmem:[#allocation2 + $0x60] sm:$0xff] %vm567_vm1, %v1548_v19  ;;  %6435 = vmatmul.msk.bf16.vlgmr.msrb.gmra.mxu2 %vm567_vm1, %v10343_v0 }
 0x3ab   : > { %2649 = vmatpush.bf16.msrb.mxu2 %v10344_v14 }
 0x3b1   : > { %v1550_v39 = vpop.f32.mrf.mxu2  ;;  %v1648_v31 = vpop.f32.mrf.mxu3 }
 0x3b2   : > { %1791 = vst.msk [vmem:[#allocation2 + $0x68] sm:$0xff] %vm567_vm1, %v1550_v39  ;;  %v8220_v39 = vpop.permute.xlu1 %3169 }
 0x3b3   : > { %1798 = vst.msk [vmem:[#allocation2 + $0xa0] sm:$0xff] %vm567_vm1, %v1648_v31  ;;  %v8223_v31 = vpop.permute.xlu0 %2911 }
 0x3b4   : > { %v1673_v21 = vpop.f32.mrf.mxu1  ;;  %10353 = vst [vmem:[#allocation35_spill] sm:$0xff] %v8220_v39 }
 0x3b5   : > { %1800 = vst.msk [vmem:[#allocation2 + $0xb0] sm:$0xff] %vm567_vm1, %v1673_v21 }
 0x3b6   : > { %10354 = vst [vmem:[#allocation47_spill] sm:$0xff] %v8223_v31 }
 0x3b9   : > { %v1623_v34 = vpop.f32.mrf.mxu2  ;;  %v1650_v24 = vpop.f32.mrf.mxu3 }
 0x3ba   : > { %1796 = vst.msk [vmem:[#allocation2 + $0x90] sm:$0xff] %vm567_vm1, %v1623_v34  ;;  %6438 = vmatmul.msk.bf16.vlgmr.msra.gmra.mxu2 %vm567_vm1, %v10346_v3 }
 0x3bb   : > { %1799 = vst.msk [vmem:[#allocation2 + $0xa8] sm:$0xff] %vm567_vm1, %v1650_v24  ;;  %2749 = vmatpush.bf16.msra.mxu2 %v8058_v52 }
 0x3bc   : > { %v1675_v59 = vpop.f32.mrf.mxu1 }
 0x3bd   : > { %1801 = vst.msk [vmem:[#allocation2 + $0xb8] sm:$0xff] %vm567_vm1, %v1675_v59 }
 0x3c1   : > { %v1625_v27 = vpop.f32.mrf.mxu2  ;;  %v1723_v7 = vpop.f32.mrf.mxu3 }
 0x3c2   : > { %1797 = vst.msk [vmem:[#allocation2 + $0x98] sm:$0xff] %vm567_vm1, %v1625_v27 }
 0x3c3   : > { %1804 = vst.msk [vmem:[#allocation2 + $0xd0] sm:$0xff] %vm567_vm1, %v1723_v7  ;;  %v8235_v7 = vpop.permute.xlu2 %3147 }
 0x3c4   : > { %v1748_v61 = vpop.f32.mrf.mxu1  ;;  %10355 = vst [vmem:[#allocation48_spill] sm:$0xff] %v8235_v7 }
 0x3c5   : > { %1806 = vst.msk [vmem:[#allocation2 + $0xe0] sm:$0xff] %vm567_vm1, %v1748_v61 }
 0x3c9   : > { %v1725_v60 = vpop.f32.mrf.mxu3 }
 0x3ca   : > { %v1698_v41 = vpop.f32.mrf.mxu2  ;;  %1805 = vst.msk [vmem:[#allocation2 + $0xd8] sm:$0xff] %vm567_vm1, %v1725_v60  ;;  %v8238_v60 = vpop.permute.xlu1 %3219 }
 0x3cb   : > { %1802 = vst.msk [vmem:[#allocation2 + $0xc0] sm:$0xff] %vm567_vm1, %v1698_v41 }
 0x3cc   : > { %v1750_v52 = vpop.f32.mrf.mxu1  ;;  %10356 = vst [vmem:[#allocation9_spill] sm:$0xff] %v8238_v60 }
 0x3cd   : > { %1807 = vst.msk [vmem:[#allocation2 + $0xe8] sm:$0xff] %vm567_vm1, %v1750_v52  ;;  %v8243_v52 = vpop.permute.xlu0 %3241 }
 0x3ce   : > { %10357 = vst [vmem:[#allocation16_spill] sm:$0xff] %v8243_v52 }
 0x3d1   : > { %v1832_v6 = vpop.f32.mrf.mxu3 }
 0x3d2   : > { %v1700_v46 = vpop.f32.mrf.mxu2  ;;  %v8175_v49 = vadd.f32 %v8170_v55, %v1832_v6 }
 0x3d3   : > { %1803 = vst.msk [vmem:[#allocation2 + $0xc8] sm:$0xff] %vm567_vm1, %v1700_v46 }
 0x3d4   : > { %v1856_v8 = vpop.f32.mrf.mxu1  ;;  %v2197_v43 = vsel %vm993_vm2, %v8175_v49, -inf }
 0x3d5   : > { %2198 = vmax.xlane.f32.xlu0 %v2197_v43  ;;  %v8195_v57 = vadd.f32 %v8170_v55, %v1856_v8 }
 0x3d7   : > { %v2203_v35 = vsel %vm993_vm2, %v8195_v57, -inf }
 0x3d9   : > { %v1834_v38 = vpop.f32.mrf.mxu3 }
 0x3da   : > { %v8188_v2 = vadd.f32 %v8183_v32, %v1834_v38  ;;  %v8250_v38 = vpop.permute.xlu2 %3193 }
 0x3db   : > { %10358 = vst [vmem:[#allocation30_spill] sm:$0xff] %v8250_v38 }
 0x3dc   : > { %v1858_v53 = vpop.f32.mrf.mxu1  ;;  %v2200_v62 = vsel %vm993_vm2, %v8188_v2, -inf }
 0x3dd   : > { %2201 = vmax.xlane.f32.xlu1 %v2200_v62  ;;  %v8209_v42 = vadd.f32 %v8183_v32, %v1858_v53 }
 0x3df   : > { %v2206_v19 = vsel %vm993_vm2, %v8209_v42, -inf }
 0x3e1   : > { %v1904_v54 = vpop.f32.mrf.mxu3 }
 0x3e2   : > { %v8198_v47 = vadd.f32 %v8170_v55, %v1904_v54 }
 0x3e4   : > { %v1928_v5 = vpop.f32.mrf.mxu1  ;;  %v2215_v10 = vsel %vm993_vm2, %v8198_v47, -inf }
 0x3e5   : > { %2216 = vmax.xlane.f32.xlu2 %v2215_v10  ;;  %2204 = vmax.xlane.f32.xlu1 %v2203_v35  ;;  %v8226_v21 = vadd.f32 %v8170_v55, %v1928_v5  ;;  %v8257_v5 = vpop.permute.xlu1 %3291  ;;  %v8259_v10 = vpop.permute.xlu0 %3339 }
 0x3e6   : > { %10359 = vst [vmem:[#allocation11_spill] sm:$0xff] %v8257_v5 }
 0x3e7   : > { %v2221_v3 = vsel %vm993_vm2, %v8226_v21, -inf  ;;  %10360 = vst [vmem:[#allocation21_spill] sm:$0xff] %v8259_v10 }
 0x3e9   : > { %v1906_v17 = vpop.f32.mrf.mxu3 }
 0x3ea   : > { %v8212_v23 = vadd.f32 %v8183_v32, %v1906_v17 }
 0x3ec   : > { %v2218_v20 = vsel %vm993_vm2, %v8212_v23, -inf  ;;  %v1930_v0 = vpop.f32.mrf.mxu1 }
 0x3ed   : > { %v1773_v14 = vpop.f32.mrf.mxu2  ;;  %2219 = vmax.xlane.f32.xlu0 %v2218_v20  ;;  %2207 = vmax.xlane.f32.xlu2 %v2206_v19  ;;  %v8241_v41 = vadd.f32 %v8183_v32, %v1930_v0 }
 0x3ee   : > { %1808 = vst.msk [vmem:[#allocation2 + $0xf0] sm:$0xff] %vm567_vm1, %v1773_v14 }
 0x3ef   : > { %v2224_v46 = vsel %vm993_vm2, %v8241_v41, -inf }
 0x3f1   : > { %v1976_v34 = vpop.f32.mrf.mxu3 }
 0x3f2   : > { %v8229_v24 = vadd.f32 %v8170_v55, %v1976_v34 }
 0x3f4   : > { %v2233_v59 = vsel %vm993_vm2, %v8229_v24, -inf  ;;  %v2000_v61 = vpop.f32.mrf.mxu1 }
 0x3f5   : > { %v1775_v27 = vpop.f32.mrf.mxu2  ;;  %2222 = vmax.xlane.f32.xlu0 %v2221_v3  ;;  %2234 = vmax.xlane.f32.xlu1 %v2233_v59  ;;  %v8253_v53 = vadd.f32 %v8170_v55, %v2000_v61  ;;  %v8273_v3 = vpop.permute.xlu2 %3267 }
 0x3f6   : > { %1809 = vst.msk [vmem:[#allocation2 + $0xf8] sm:$0xff] %vm567_vm1, %v1775_v27  ;;  %v8275_v27 = vpop.permute.xlu1 %3217 }
 0x3f7   : > { %v2239_v20 = vsel %vm993_vm2, %v8253_v53, -inf  ;;  %10361 = vst [vmem:[#allocation13_spill] sm:$0xff] %v8273_v3 }
 0x3f8   : > { %10362 = vst [vmem:[#allocation40_spill] sm:$0xff] %v8275_v27 }
 0x3f9   : > { %v1978_v6 = vpop.f32.mrf.mxu3 }
 0x3fa   : > { %v8262_v35 = vadd.f32 %v8183_v32, %v1978_v6 }
 0x3fc   : > { %v2002_v54 = vpop.f32.mrf.mxu1  ;;  %v2236_v34 = vsel %vm993_vm2, %v8262_v35, -inf }
 0x3fd   : > { %v1880_v8 = vpop.f32.mrf.mxu2  ;;  %2225 = vmax.xlane.f32.xlu1 %v2224_v46  ;;  %v8280_v46 = vpop.permute.xlu0 %3265 }
 0x3fe   : > { %v8248_v43 = vadd.f32 %v8170_v55, %v1880_v8  ;;  %10363 = vst [vmem:[#allocation37_spill] sm:$0xff] %v8280_v46 }
 0x400   : > { %v2209_v62 = vsel %vm993_vm2, %v8248_v43, -inf }
 0x401   : > { %2210 = vmax.xlane.f32.xlu2 %v2209_v62  ;;  %v2048_v17 = vpop.f32.mrf.mxu3 }
 0x402   : > { %v8278_v61 = vadd.f32 %v8170_v55, %v2048_v17 }
 0x404   : > { %v2072_v59 = vpop.f32.mrf.mxu1 }
 0x405   : > { %v1882_v19 = vpop.f32.mrf.mxu2  ;;  %2240 = vmax.xlane.f32.xlu1 %v2239_v20  ;;  %v8302_v52 = vpop.permute.xlu0 %3387 }
 0x406   : > { %v8267_v0 = vadd.f32 %v8183_v32, %v1882_v19  ;;  %v2251_v19 = vsel %vm993_vm2, %v8278_v61, -inf  ;;  %10366 = vst [vmem:[#allocation15_spill] sm:$0xff] %v8302_v52 }
 0x408   : > { %v2212_v14 = vsel %vm993_vm2, %v8267_v0, -inf }
 0x409   : > { %2213 = vmax.xlane.f32.xlu0 %v2212_v14  ;;  %2237 = vmax.xlane.f32.xlu2 %v2236_v34  ;;  %v2050_v8 = vpop.f32.mrf.mxu3  ;;  %v8289_v14 = vpop.permute.xlu2 %3289  ;;  %v8295_v34 = vadd.f32 %v8183_v32, %v2002_v54 }
 0x40a   : > { %10364 = vst [vmem:[#allocation24_spill] sm:$0xff] %v8289_v14  ;;  %v8292_v17 = vadd.f32 %v8183_v32, %v2050_v8 }
 0x40b   : > { %v2242_v54 = vsel %vm993_vm2, %v8295_v34, -inf }
 0x40c   : > { %v2074_v30 = vpop.f32.mrf.mxu1  ;;  %v2254_v8 = vsel %vm993_vm2, %v8292_v17, -inf }
 0x40d   : > { %v1952_v6 = vpop.f32.mrf.mxu2 }
 0x40e   : > { %v8283_v62 = vadd.f32 %v8170_v55, %v1952_v6  ;;  %v8297_v6 = vpop.permute.xlu1 %3337 }
 0x40f   : > { %10365 = vst [vmem:[#allocation20_spill] sm:$0xff] %v8297_v6 }
 0x410   : > { %v2227_v20 = vsel %vm993_vm2, %v8283_v62, -inf }
 0x411   : > { %2228 = vmax.xlane.f32.xlu0 %v2227_v20  ;;  %2252 = vmax.xlane.f32.xlu2 %v2251_v19  ;;  %v2120_v38 = vpop.f32.mrf.mxu3  ;;  %v8311_v19 = vadd.f32 %v8170_v55, %v2072_v59  ;;  %v8316_v14 = vpop.permute.xlu2 %3315 }
 0x412   : > { %10367 = vst [vmem:[#allocation42_spill] sm:$0xff] %v8316_v14 }
 0x414   : > { %v2144_v39 = vpop.f32.mrf.mxu1 }
 0x415   : > { %v1954_v27 = vpop.f32.mrf.mxu2 }
 0x416   : > { %v8300_v46 = vadd.f32 %v8183_v32, %v1954_v27  ;;  %v8314_v27 = vadd.f32 %v8170_v55, %v2120_v38  ;;  %v8321_v10 = vpop.permute.xlu1 %3363  ;;  %v8329_v38 = vpop.permute.xlu0 %3313 }
 0x417   : > { %10368 = vst [vmem:[#allocation39_spill] sm:$0xff] %v8321_v10 }
 0x418   : > { %v2230_v20 = vsel %vm993_vm2, %v8300_v46, -inf  ;;  %10369 = vst [vmem:[#allocation44_spill] sm:$0xff] %v8329_v38 }
 0x419   : > { %2231 = vmax.xlane.f32.xlu1 %v2230_v20  ;;  %2255 = vmax.xlane.f32.xlu0 %v2254_v8  ;;  %v2269_v20 = vsel %vm993_vm2, %v8314_v27, -inf  ;;  %v2257_v8 = vsel %vm993_vm2, %v8311_v19, -inf  ;;  %v8340_v5 = vpop.permute.xlu2 %3435 }
 0x41a   : > { %2243 = vmax.xlane.f32.xlu2 %v2242_v54  ;;  %v2122_v54 = vpop.f32.mrf.mxu3  ;;  %10370 = vst [vmem:[#allocation22_spill] sm:$0xff] %v8340_v5 }
 0x41b   : > { %v8335_v14 = vadd.f32 %v8183_v32, %v2122_v54 }
 0x41c   : > { %v2146_v38 = vpop.f32.mrf.mxu1 }
 0x41d   : > { %v2024_v6 = vpop.f32.mrf.mxu2  ;;  %v8356_v5 = vadd.f32 %v8183_v32, %v2146_v38 }
 0x41e   : > { %v8319_v52 = vadd.f32 %v8170_v55, %v2024_v6  ;;  %v8332_v6 = vadd.f32 %v8183_v32, %v2074_v30  ;;  %v2272_v30 = vsel %vm993_vm2, %v8335_v14, -inf  ;;  %v8350_v54 = vpop.permute.xlu0 %3433 }
 0x41f   : > { %10372 = vst [vmem:[#allocation19_spill] sm:$0xff] %v8350_v54 }
 0x420   : > { %v2245_v59 = vsel %vm993_vm2, %v8319_v52, -inf }
 0x421   : > { %2270 = vmax.xlane.f32.xlu1 %v2269_v20  ;;  %2258 = vmax.xlane.f32.xlu0 %v2257_v8  ;;  %v2260_v20 = vsel %vm993_vm2, %v8332_v6, -inf }
 0x422   : > { %2246 = vmax.xlane.f32.xlu2 %v2245_v59  ;;  %v8348_v59 = vpop.permute.xlu1 %3385 }
 0x423   : > { %10371 = vst [vmem:[#allocation25_spill] sm:$0xff] %v8348_v59 }
 0x425   : > { %v2026_v10 = vpop.f32.mrf.mxu2 }
 0x426   : > { %v8338_v22 = vadd.f32 %v8183_v32, %v2026_v10  ;;  %v8353_v10 = vadd.f32 %v8170_v55, %v2144_v39  ;;  %v8367_v39 = vpop.permute.xlu2 %3361  ;;  %v8374_v3 = vpop.permute.xlu0 %3459 }
 0x427   : > { %10373 = vst [vmem:[#allocation45_spill] sm:$0xff] %v8367_v39 }
 0x428   : > { %v2248_v8 = vsel %vm993_vm2, %v8338_v22, -inf  ;;  %v2275_v59 = vsel %vm993_vm2, %v8353_v10, -inf  ;;  %10375 = vst [vmem:[#allocation26_spill] sm:$0xff] %v8374_v3 }
 0x429   : > { %2261 = vmax.xlane.f32.xlu1 %v2260_v20  ;;  %2249 = vmax.xlane.f32.xlu0 %v2248_v8  ;;  %v2192_v20 = vpop.f32.mrf.mxu3  ;;  %v2278_v8 = vsel %vm993_vm2, %v8356_v5, -inf }
 0x42a   : > { %2273 = vmax.xlane.f32.xlu2 %v2272_v30  ;;  %v8369_v38 = vpop.permute.xlu1 %3411 }
 0x42b   : > { %10374 = vst [vmem:[#allocation41_spill] sm:$0xff] %v8369_v38 }
 0x42d   : > { %v2096_v60 = vpop.f32.mrf.mxu2 }
 0x42e   : > { %v8359_v45 = vadd.f32 %v8170_v55, %v2096_v60  ;;  %v8372_v60 = vadd.f32 %v8170_v55, %v2192_v20  ;;  %v8393_v38 = vpop.permute.xlu0 %3457 }
 0x42f   : > { %10378 = vst [vmem:[#allocation17_spill] sm:$0xff] %v8393_v38 }
 0x430   : > { %v2263_v30 = vsel %vm993_vm2, %v8359_v45, -inf }
 0x431   : > { %2279 = vmax.xlane.f32.xlu1 %v2278_v8  ;;  %2276 = vmax.xlane.f32.xlu0 %v2275_v59  ;;  %v2194_v7 = vpop.f32.mrf.mxu3  ;;  %v2287_v59 = vsel %vm993_vm2, %v8372_v60, -inf  ;;  %v8383_v8 = vpop.permute.xlu2 %3483 }
 0x432   : > { %2264 = vmax.xlane.f32.xlu2 %v2263_v30  ;;  %10376 = vst [vmem:[#allocation36_spill] sm:$0xff] %v8383_v8  ;;  %v8386_v20 = vadd.f32 %v8183_v32, %v2194_v7  ;;  %v8388_v39 = vpop.permute.xlu1 %3409 }
 0x433   : > { %10377 = vst [vmem:[#allocation29_spill] sm:$0xff] %v8388_v39 }
 0x434   : > { %v2290_v3 = vsel %vm993_vm2, %v8386_v20, -inf }
 0x435   : > { %v2098_v54 = vpop.f32.mrf.mxu2 }
 0x436   : > { %v8377_v11 = vadd.f32 %v8183_v32, %v2098_v54 }
 0x438   : > { %v2266_v51 = vsel %vm993_vm2, %v8377_v11, -inf }
 0x439   : > { %2267 = vmax.xlane.f32.xlu0 %v2266_v51  ;;  %v8399_v8 = vpop.permute.xlu2 %3481 }
 0x43a   : > { %2288 = vmax.xlane.f32.xlu2 %v2287_v59  ;;  %10379 = vst [vmem:[#allocation43_spill] sm:$0xff] %v8399_v8  ;;  %v8404_v39 = vpop.permute.xlu1 %3507 }
 0x43b   : > { %10380 = vst [vmem:[#allocation34_spill] sm:$0xff] %v8404_v39 }
 0x43d   : > { %v2168_v30 = vpop.f32.mrf.mxu2 }
 0x43e   : > { %v8391_v54 = vadd.f32 %v8170_v55, %v2168_v30 }
 0x440   : > { %v2281_v51 = vsel %vm993_vm2, %v8391_v54, -inf }
 0x441   : > { %2282 = vmax.xlane.f32.xlu1 %v2281_v51  ;;  %2291 = vmax.xlane.f32.xlu0 %v2290_v3  ;;  %v8409_v13 = vpop.permute.xlu2 %3505 }
 0x442   : > { %10381 = vst [vmem:[#allocation33_spill] sm:$0xff] %v8409_v13 }
 0x445   : > { %v2170_v59 = vpop.f32.mrf.mxu2 }
 0x446   : > { %v8402_v7 = vadd.f32 %v8183_v32, %v2170_v59 }
 0x448   : > { %v2284_v55 = vsel %vm993_vm2, %v8402_v7, -inf  ;;  %v2199_v30 = vpop.xlane.xlu0 %2198 }
 0x449   : > { %2285 = vmax.xlane.f32.xlu2 %v2284_v55  ;;  %v2293_v38 = vsub.f32 %v8175_v49, %v2199_v30 }
 0x44b   : > { %v2325_v31 = vmul.f32 1.442695, %v2293_v38 }
 0x44d   : > { %6729 = vpow2.f32 %v2325_v31 }
 0x450   : > { %v2202_v3 = vpop.xlane.xlu1 %2201 }
 0x451   : > { %v2294_v51 = vsub.f32 %v8188_v2, %v2202_v3 }
 0x453   : > { %v8412_v8 = vpop.eup %6729  ;;  %v2327_v32 = vmul.f32 1.442695, %v2294_v51 }
 0x454   : > { %v2389_v59 = vsel %vm993_vm2, %v8412_v8, 0.0 }
 0x455   : > { %6731 = vpow2.f32 %v2327_v32  ;;  %2390 = vadd.xlane.f32.xlu0 %v2389_v59 }
 0x458   : > { %v2217_v39 = vpop.xlane.xlu2 %2216  ;;  %v2205_v9 = vpop.xlane.xlu1 %2204 }
 0x459   : > { %v2299_v55 = vsub.f32 %v8198_v47, %v2217_v39  ;;  %v2295_v49 = vsub.f32 %v8195_v57, %v2205_v9 }
 0x45b   : > { %v8418_v31 = vpop.eup %6731  ;;  %v2337_v38 = vmul.f32 1.442695, %v2299_v55  ;;  %v2329_v30 = vmul.f32 1.442695, %v2295_v49 }
 0x45c   : > { %v2392_v2 = vsel %vm993_vm2, %v8418_v31, 0.0 }
 0x45d   : > { %6733 = vpow2.f32 %v2337_v38  ;;  %2393 = vadd.xlane.f32.xlu1 %v2392_v2 }
 0x45e   : > { %6735 = vpow2.f32 %v2329_v30 }
 0x460   : > { %v2208_v3 = vpop.xlane.xlu2 %2207  ;;  %v2220_v51 = vpop.xlane.xlu0 %2219 }
 0x461   : > { %v2296_v32 = vsub.f32 %v8209_v42, %v2208_v3  ;;  %v2300_v59 = vsub.f32 %v8212_v23, %v2220_v51 }
 0x463   : > { %v8424_v13 = vpop.eup %6733  ;;  %v2331_v47 = vmul.f32 1.442695, %v2296_v32  ;;  %v2339_v9 = vmul.f32 1.442695, %v2300_v59 }
 0x464   : > { %v8426_v57 = vpop.eup %6735  ;;  %v2407_v39 = vsel %vm993_vm2, %v8424_v13, 0.0 }
 0x465   : > { %6737 = vpow2.f32 %v2331_v47  ;;  %2408 = vadd.xlane.f32.xlu1 %v2407_v39  ;;  %v2395_v55 = vsel %vm993_vm2, %v8426_v57, 0.0 }
 0x466   : > { %6739 = vpow2.f32 %v2339_v9  ;;  %2396 = vadd.xlane.f32.xlu0 %v2395_v55 }
 0x468   : > { %v2235_v49 = vpop.xlane.xlu1 %2234  ;;  %v2223_v32 = vpop.xlane.xlu0 %2222 }
 0x469   : > { %v2305_v42 = vsub.f32 %v8229_v24, %v2235_v49  ;;  %v2301_v9 = vsub.f32 %v8226_v21, %v2223_v32 }
 0x46b   : > { %v8433_v23 = vpop.eup %6737  ;;  %v2349_v38 = vmul.f32 1.442695, %v2305_v42  ;;  %v2341_v49 = vmul.f32 1.442695, %v2301_v9 }
 0x46c   : > { %v8435_v30 = vpop.eup %6739  ;;  %v2398_v2 = vsel %vm993_vm2, %v8433_v23, 0.0 }
 0x46d   : > { %6741 = vpow2.f32 %v2349_v38  ;;  %2399 = vadd.xlane.f32.xlu1 %v2398_v2  ;;  %v2410_v3 = vsel %vm993_vm2, %v8435_v30, 0.0 }
 0x46e   : > { %2411 = vadd.xlane.f32.xlu0 %v2410_v3 }
 0x470   : > { %v2226_v55 = vpop.xlane.xlu1 %2225 }
 0x473   : > { %v8441_v51 = vpop.eup %6741 }
 0x474   : > { %10382 = vst [vmem:[#allocation27_spill] sm:$0xff] %v8441_v51  ;;  %v2211_v59 = vpop.xlane.xlu2 %2210  ;;  %v2425_v24 = vsel %vm993_vm2, %v8441_v51, 0.0 }
 0x475   : > { %v2297_v47 = vsub.f32 %v8248_v43, %v2211_v59  ;;  %2426 = vadd.xlane.f32.xlu2 %v2425_v24  ;;  %v2302_v43 = vsub.f32 %v8241_v41, %v2226_v55 }
 0x477   : > { %v2333_v39 = vmul.f32 1.442695, %v2297_v47  ;;  %v2343_v59 = vmul.f32 1.442695, %v2302_v43 }
 0x478   : > { %v2241_v32 = vpop.xlane.xlu1 %2240 }
 0x479   : > { %6743 = vpow2.f32 %v2333_v39  ;;  %v2307_v39 = vsub.f32 %v8253_v53, %v2241_v32 }
 0x47a   : > { %6745 = vpow2.f32 %v2341_v49 }
 0x47b   : > { %v2353_v53 = vmul.f32 1.442695, %v2307_v39 }
 0x47c   : > { %v2238_v42 = vpop.xlane.xlu2 %2237  ;;  %v2214_v38 = vpop.xlane.xlu0 %2213 }
 0x47d   : > { %v2306_v2 = vsub.f32 %v8262_v35, %v2238_v42  ;;  %v2298_v3 = vsub.f32 %v8267_v0, %v2214_v38 }
 0x47f   : > { %v8449_v28 = vpop.eup %6743  ;;  %v2351_v33 = vmul.f32 1.442695, %v2306_v2  ;;  %v2335_v51 = vmul.f32 1.442695, %v2298_v3 }
 0x480   : > { %v2401_v21 = vsel %vm993_vm2, %v8449_v28, 0.0  ;;  %v8454_v35 = vpop.eup %6745 }
 0x481   : > { %6747 = vpow2.f32 %v2351_v33  ;;  %2402 = vadd.xlane.f32.xlu0 %v2401_v21  ;;  %v2413_v55 = vsel %vm993_vm2, %v8454_v35, 0.0 }
 0x482   : > { %6749 = vpow2.f32 %v2335_v51 }
 0x483   : > { %6751 = vpow2.f32 %v2343_v59 }
 0x484   : > { %v2253_v24 = vpop.xlane.xlu2 %2252  ;;  %v2229_v47 = vpop.xlane.xlu0 %2228 }
 0x485   : > { %v2303_v0 = vsub.f32 %v8283_v62, %v2229_v47  ;;  %v2311_v33 = vsub.f32 %v8278_v61, %v2253_v24 }
 0x487   : > { %v8457_v9 = vpop.eup %6747  ;;  %v2345_v49 = vmul.f32 1.442695, %v2303_v0  ;;  %v2361_v42 = vmul.f32 1.442695, %v2311_v33 }
 0x488   : > { %v8460_v41 = vpop.eup %6749  ;;  %v2428_v51 = vsel %vm993_vm2, %v8457_v9, 0.0 }
 0x489   : > { %2429 = vadd.xlane.f32.xlu2 %v2428_v51  ;;  %2414 = vadd.xlane.f32.xlu0 %v2413_v55  ;;  %v2404_v62 = vsel %vm993_vm2, %v8460_v41, 0.0  ;;  %6753 = vpow2.f32 %v2345_v49  ;;  %v8470_v43 = vpop.eup %6751 }
 0x48a   : > { %2405 = vadd.xlane.f32.xlu1 %v2404_v62  ;;  %6755 = vpow2.f32 %v2353_v53  ;;  %v2416_v47 = vsel %vm993_vm2, %v8470_v43, 0.0 }
 0x48b   : > { %6757 = vpow2.f32 %v2361_v42 }
 0x48c   : > { %v2232_v38 = vpop.xlane.xlu1 %2231  ;;  %v2256_v2 = vpop.xlane.xlu0 %2255 }
 0x48d   : > { %v2244_v3 = vpop.xlane.xlu2 %2243  ;;  %v2312_v61 = vsub.f32 %v8292_v17, %v2256_v2  ;;  %v2304_v21 = vsub.f32 %v8300_v46, %v2232_v38 }
 0x48e   : > { %v2308_v24 = vsub.f32 %v8295_v34, %v2244_v3 }
 0x48f   : > { %v2363_v32 = vmul.f32 1.442695, %v2312_v61  ;;  %v8473_v59 = vpop.eup %6753  ;;  %v2347_v17 = vmul.f32 1.442695, %v2304_v21 }
 0x490   : > { %v2419_v0 = vsel %vm993_vm2, %v8473_v59, 0.0  ;;  %v2355_v39 = vmul.f32 1.442695, %v2308_v24  ;;  %v8480_v46 = vpop.eup %6755 }
 0x491   : > { %2420 = vadd.xlane.f32.xlu2 %v2419_v0  ;;  %6759 = vpow2.f32 %v2363_v32  ;;  %v8483_v62 = vpop.eup %6757  ;;  %v2431_v3 = vsel %vm993_vm2, %v8480_v46, 0.0 }
 0x492   : > { %2417 = vadd.xlane.f32.xlu1 %v2416_v47  ;;  %6761 = vpow2.f32 %v2347_v17  ;;  %v2443_v2 = vsel %vm993_vm2, %v8483_v62, 0.0 }
 0x493   : > { %6763 = vpow2.f32 %v2355_v39 }
 0x494   : > { %v2271_v49 = vpop.xlane.xlu1 %2270  ;;  %v2259_v33 = vpop.xlane.xlu0 %2258 }
 0x495   : > { %v2247_v51 = vpop.xlane.xlu2 %2246  ;;  %v2313_v55 = vsub.f32 %v8311_v19, %v2259_v33  ;;  %v2317_v34 = vsub.f32 %v8314_v27, %v2271_v49 }
 0x496   : > { %v2309_v42 = vsub.f32 %v8319_v52, %v2247_v51 }
 0x497   : > { %v2365_v53 = vmul.f32 1.442695, %v2313_v55  ;;  %v8487_v38 = vpop.eup %6759  ;;  %v2373_v61 = vmul.f32 1.442695, %v2317_v34 }
 0x498   : > { %v2446_v19 = vsel %vm993_vm2, %v8487_v38, 0.0  ;;  %v2357_v27 = vmul.f32 1.442695, %v2309_v42  ;;  %v8495_v52 = vpop.eup %6761 }
 0x499   : > { %2432 = vadd.xlane.f32.xlu2 %v2431_v3  ;;  %6765 = vpow2.f32 %v2365_v53  ;;  %2447 = vadd.xlane.f32.xlu0 %v2446_v19  ;;  %v8497_v47 = vpop.eup %6763  ;;  %v2422_v33 = vsel %vm993_vm2, %v8495_v52, 0.0 }
 0x49a   : > { %2444 = vadd.xlane.f32.xlu1 %v2443_v2  ;;  %6767 = vpow2.f32 %v2373_v61  ;;  %v2434_v49 = vsel %vm993_vm2, %v8497_v47, 0.0 }
 0x49b   : > { %6769 = vpow2.f32 %v2357_v27 }
 0x49c   : > { %v2262_v21 = vpop.xlane.xlu1 %2261  ;;  %v2250_v32 = vpop.xlane.xlu0 %2249 }
 0x49d   : > { %v2274_v24 = vpop.xlane.xlu2 %2273  ;;  %v2310_v39 = vsub.f32 %v8338_v22, %v2250_v32  ;;  %v2314_v32 = vsub.f32 %v8332_v6, %v2262_v21 }
 0x49e   : > { %v2318_v0 = vsub.f32 %v8335_v14, %v2274_v24 }
 0x49f   : > { %v8500_v17 = vpop.eup %6765  ;;  %v2359_v42 = vmul.f32 1.442695, %v2310_v39 }
 0x4a0   : > { %v2449_v51 = vsel %vm993_vm2, %v8500_v17, 0.0  ;;  %v2375_v55 = vmul.f32 1.442695, %v2318_v0  ;;  %v8509_v14 = vpop.eup %6767 }
 0x4a1   : > { %2423 = vadd.xlane.f32.xlu2 %v2422_v33  ;;  %2450 = vadd.xlane.f32.xlu0 %v2449_v51  ;;  %v8511_v22 = vpop.eup %6769  ;;  %v2461_v0 = vsel %vm993_vm2, %v8509_v14, 0.0 }
 0x4a2   : > { %2435 = vadd.xlane.f32.xlu1 %v2434_v49  ;;  %6771 = vpow2.f32 %v2375_v55  ;;  %v2437_v24 = vsel %vm993_vm2, %v8511_v22, 0.0 }
 0x4a3   : > { %6773 = vpow2.f32 %v2359_v42 }
 0x4a4   : > { %v2280_v34 = vpop.xlane.xlu1 %2279  ;;  %v2277_v53 = vpop.xlane.xlu0 %2276 }
 0x4a5   : > { %v2265_v2 = vpop.xlane.xlu2 %2264  ;;  %v2320_v19 = vsub.f32 %v8356_v5, %v2280_v34  ;;  %v2319_v27 = vsub.f32 %v8353_v10, %v2277_v53  ;;  %v2367_v5 = vmul.f32 1.442695, %v2314_v32 }
 0x4a6   : > { %v2315_v3 = vsub.f32 %v8359_v45, %v2265_v2 }
 0x4a7   : > { %v2379_v39 = vmul.f32 1.442695, %v2320_v19  ;;  %v2377_v45 = vmul.f32 1.442695, %v2319_v27 }
 0x4a8   : > { %v2369_v61 = vmul.f32 1.442695, %v2315_v3  ;;  %v8521_v51 = vpop.eup %6771 }
 0x4a9   : > { %2462 = vadd.xlane.f32.xlu2 %v2461_v0  ;;  %v8523_v10 = vpop.eup %6773  ;;  %v2464_v55 = vsel %vm993_vm2, %v8521_v51, 0.0 }
 0x4aa   : > { %6775 = vpow2.f32 %v2369_v61  ;;  %2438 = vadd.xlane.f32.xlu1 %v2437_v24  ;;  %v2440_v53 = vsel %vm993_vm2, %v8523_v10, 0.0 }
 0x4ab   : > { %6777 = vpow2.f32 %v2379_v39 }
 0x4ac   : > { %v2268_v49 = vpop.xlane.xlu0 %2267  ;;  %6779 = vpow2.f32 %v2377_v45 }
 0x4ad   : > { %v2289_v33 = vpop.xlane.xlu2 %2288  ;;  %6781 = vpow2.f32 %v2367_v5  ;;  %v2316_v39 = vsub.f32 %v8377_v11, %v2268_v49 }
 0x4ae   : > { %v2323_v21 = vsub.f32 %v8372_v60, %v2289_v33 }
 0x4b0   : > { %v8525_v6 = vpop.eup %6775  ;;  %v2385_v42 = vmul.f32 1.442695, %v2323_v21 }
 0x4b1   : > { %v2455_v34 = vsel %vm993_vm2, %v8525_v6, 0.0  ;;  %2441 = vadd.xlane.f32.xlu2 %v2440_v53  ;;  %v8534_v19 = vpop.eup %6777 }
 0x4b2   : > { %2465 = vadd.xlane.f32.xlu1 %v2464_v55  ;;  %2456 = vadd.xlane.f32.xlu0 %v2455_v34  ;;  %v8538_v27 = vpop.eup %6779  ;;  %6783 = vpow2.f32 %v2385_v42  ;;  %v2470_v45 = vsel %vm993_vm2, %v8534_v19, 0.0 }
 0x4b3   : > { %v8540_v32 = vpop.eup %6781  ;;  %v2467_v5 = vsel %vm993_vm2, %v8538_v27, 0.0 }
 0x4b4   : > { %v2283_v2 = vpop.xlane.xlu1 %2282  ;;  %v2292_v3 = vpop.xlane.xlu0 %2291 }
 0x4b5   : > { %v2321_v60 = vsub.f32 %v8391_v54, %v2283_v2  ;;  %v2324_v61 = vsub.f32 %v8386_v20, %v2292_v3  ;;  %v2452_v20 = vsel %vm993_vm2, %v8540_v32, 0.0  ;;  %v2371_v54 = vmul.f32 1.442695, %v2316_v39 }
 0x4b7   : > { %v2381_v24 = vmul.f32 1.442695, %v2321_v60  ;;  %v2387_v0 = vmul.f32 1.442695, %v2324_v61 }
 0x4b8   : > { %v8549_v33 = vpop.eup %6783 }
 0x4b9   : > { %6785 = vpow2.f32 %v2381_v24  ;;  %2453 = vadd.xlane.f32.xlu2 %v2452_v20  ;;  %v2479_v42 = vsel %vm993_vm2, %v8549_v33, 0.0 }
 0x4ba   : > { %6787 = vpow2.f32 %v2387_v0  ;;  %2471 = vadd.xlane.f32.xlu1 %v2470_v45  ;;  %2468 = vadd.xlane.f32.xlu0 %v2467_v5 }
 0x4bb   : > { %6789 = vpow2.f32 %v2371_v54 }
 0x4bc   : > { %v2286_v21 = vpop.xlane.xlu2 %2285 }
 0x4bd   : > { %v2322_v34 = vsub.f32 %v8402_v7, %v2286_v21 }
 0x4bf   : > { %v8551_v55 = vpop.eup %6785  ;;  %v2383_v2 = vmul.f32 1.442695, %v2322_v34 }
 0x4c0   : > { %v8553_v11 = vpop.eup %6787  ;;  %v2473_v49 = vsel %vm993_vm2, %v8551_v55, 0.0 }
 0x4c1   : > { %v2482_v53 = vsel %vm993_vm2, %v8553_v11, 0.0  ;;  %2480 = vadd.xlane.f32.xlu2 %v2479_v42  ;;  %v8562_v3 = vpop.eup %6789  ;;  %6791 = vpow2.f32 %v2383_v2 }
 0x4c2   : > { %2474 = vadd.xlane.f32.xlu1 %v2473_v49  ;;  %2483 = vadd.xlane.f32.xlu0 %v2482_v53  ;;  %v2458_v61 = vsel %vm993_vm2, %v8562_v3, 0.0 }
 0x4c7   : > { %v8566_v7 = vpop.eup %6791 }
 0x4c8   : > { %v2391_v60 = vpop.xlane.xlu0 %2390  ;;  %v2476_v39 = vsel %vm993_vm2, %v8566_v7, 0.0 }
 0x4c9   : > { %2459 = vadd.xlane.f32.xlu2 %v2458_v61  ;;  %6793 = vrcp.f32 %v2391_v60 }
 0x4cf   : > { %v6794_v0 = vpop.eup %6793 }
 0x4d0   : > { %v2394_v24 = vpop.xlane.xlu1 %2393  ;;  %v2517_v45 = vmul.f32 %v6794_v0, %v8412_v8 }
 0x4d1   : > { %6795 = vrcp.f32 %v2394_v24  ;;  %2477 = vadd.xlane.f32.xlu2 %v2476_v39 }
 0x4d2   : > { %v2549_v20 = vpack.c.bf16 %v2517_v45, %v2517_v45 }
 0x4d4   : > { %v2583_v53 = vunpack.c.l.b16 %v2549_v20 }
 0x4d6   : > { %3943 = vrot.lane.b32.xlu0 %v10306_v56, %s7128_s27 }
 0x4d7   : > { %v6796_v5 = vpop.eup %6795 }
 0x4d8   : > { %v2518_v54 = vmul.f32 %v6796_v5, %v8418_v31  ;;  %v2409_v21 = vpop.xlane.xlu1 %2408 }
 0x4d9   : > { %v2397_v49 = vpop.xlane.xlu0 %2396 }
 0x4da   : > { %v2550_v34 = vpack.c.bf16 %v2518_v54, %v2518_v54  ;;  %6797 = vrcp.f32 %v2397_v49 }
 0x4db   : > { %3918 = vrot.lane.b32.xlu1 %v7233_v37, %s7128_s27  ;;  %6799 = vrcp.f32 %v2409_v21 }
 0x4dc   : > { %v2584_v42 = vunpack.c.l.b16 %v2550_v34 }
 0x4de   : > { %4118 = vrot.lane.b32.xlu0 %v7255_v58, %s7128_s27  ;;  %v2585_v8 = vpack.c.b16 %v2584_v42, %v2583_v53 }
 0x4e0   : > { %v2400_v2 = vpop.xlane.xlu1 %2399  ;;  %6440 = vmatmul.msk.bf16.vlgmr.msrb.gmra.mxu0 %vm993_vm2, %v2585_v8  ;;  %v6798_v60 = vpop.eup %6797 }
 0x4e1   : > { %6801 = vrcp.f32 %v2400_v2  ;;  %2799 = vmatpush.bf16.msrb.mxu0 %v8127_v40  ;;  %v2412_v31 = vpop.xlane.xlu0 %2411  ;;  %v6800_v61 = vpop.eup %6799  ;;  %v2519_v24 = vmul.f32 %v6798_v60, %v8426_v57 }
 0x4e2   : > { %6803 = vrcp.f32 %v2412_v31  ;;  %v2523_v0 = vmul.f32 %v6800_v61, %v8424_v13 }
 0x4e3   : > { %3968 = vrot.lane.b32.xlu1 %v7299_v36, %s7128_s27  ;;  %v2551_v5 = vpack.c.bf16 %v2519_v24, %v2519_v24 }
 0x4e4   : > { %v2555_v54 = vpack.c.bf16 %v2523_v0, %v2523_v0 }
 0x4e5   : > { %v2608_v13 = vunpack.c.l.b16 %v2551_v5 }
 0x4e6   : > { %4218 = vrot.lane.b32.xlu0 %v7265_v4, %s7128_s27  ;;  %v2658_v34 = vunpack.c.l.b16 %v2555_v54 }
 0x4e7   : > { %v6802_v39 = vpop.eup %6801 }
 0x4e8   : > { %v6804_v45 = vpop.eup %6803  ;;  %v2520_v20 = vmul.f32 %v6802_v39, %v8433_v23 }
 0x4e9   : > { %v2524_v40 = vmul.f32 %v6804_v45, %v8435_v30  ;;  %4018 = vrot.lane.b32.xlu2 %v10303_v26, %s7128_s27  ;;  %v2427_v30 = vpop.xlane.xlu2 %2426 }
 0x4ea   : > { %v2552_v21 = vpack.c.bf16 %v2520_v20, %v2520_v20 }
 0x4eb   : > { %v2556_v49 = vpack.c.bf16 %v2524_v40, %v2524_v40  ;;  %3993 = vrot.lane.b32.xlu1 %v7349_v29, %s7128_s27 }
 0x4ec   : > { %v2609_v57 = vunpack.c.l.b16 %v2552_v21 }
 0x4ed   : > { %v2659_v53 = vunpack.c.l.b16 %v2556_v49 }
 0x4ee   : > { %v2610_v42 = vpack.c.b16 %v2609_v57, %v2608_v13  ;;  %4479 = vrot.lane.b32.xlu0 %v7233_v37, %s7129_s28 }
 0x4ef   : > { %v2660_v23 = vpack.c.b16 %v2659_v53, %v2658_v34 }
 0x4f0   : > { %6441 = vmatmul.msk.bf16.vlgmr.msrb.gmra.mxu1 %vm993_vm2, %v2610_v42 }
 0x4f1   : > { %6443 = vmatmul.msk.bf16.vlgmr.msrb.gmra.mxu3 %vm993_vm2, %v2660_v23  ;;  %2824 = vmatpush.bf16.msrb.mxu1 %v8140_v12 }
 0x4f2   : > { %2874 = vmatpush.bf16.msrb.mxu3 %v8206_v63  ;;  %4043 = vrot.lane.b32.xlu2 %v7277_v18, %s7128_s27 }
 0x4f3   : > { %4093 = vrot.lane.b32.xlu1 %v7339_v15, %s7128_s27 }
 0x4f4   : > { %v2403_v8 = vpop.xlane.xlu0 %2402 }
 0x4f5   : > { %6805 = vrcp.f32 %v2403_v8 }
 0x4f6   : > { %4243 = vrot.lane.b32.xlu0 %v7309_v50, %s7128_s27 }
 0x4fa   : > { %4068 = vrot.lane.b32.xlu2 %v7307_v48, %s7128_s27 }
 0x4fb   : > { %4477 = vrot.lane.b32.xlu1 %v7233_v37, %s7130_s29  ;;  %v6806_v60 = vpop.eup %6805 }
 0x4fc   : > { %v2430_v12 = vpop.xlane.xlu2 %2429  ;;  %v2415_v2 = vpop.xlane.xlu0 %2414  ;;  %v2521_v31 = vmul.f32 %v6806_v60, %v8449_v28 }
 0x4fd   : > { %v2406_v63 = vpop.xlane.xlu1 %2405 }
 0x4fe   : > { %6807 = vrcp.f32 %v2406_v63  ;;  %4193 = vrot.lane.b32.xlu0 %v7363_v44, %s7128_s27  ;;  %v2553_v24 = vpack.c.bf16 %v2521_v31, %v2521_v31 }
 0x4ff   : > { %6809 = vrcp.f32 %v2415_v2 }
 0x500   : > { %6811 = vrcp.f32 %v2430_v12  ;;  %v2633_v54 = vunpack.c.l.b16 %v2553_v24 }
 0x502   : > { %4143 = vrot.lane.b32.xlu2 %v7287_v25, %s7128_s27 }
 0x504   : > { %v6808_v61 = vpop.eup %6807  ;;  %v2421_v45 = vpop.xlane.xlu2 %2420 }
 0x505   : > { %v2522_v0 = vmul.f32 %v6808_v61, %v8460_v41  ;;  %v2418_v39 = vpop.xlane.xlu1 %2417  ;;  %v6810_v5 = vpop.eup %6809 }
 0x506   : > { %6813 = vrcp.f32 %v2418_v39  ;;  %v2525_v21 = vmul.f32 %v6810_v5, %v8454_v35  ;;  %v6812_v49 = vpop.eup %6811  ;;  %v10383_v35 = vld [vmem:[#allocation27_spill] sm:$0xff] }
 0x507   : > { %v2554_v20 = vpack.c.bf16 %v2522_v0, %v2522_v0  ;;  %6815 = vrcp.f32 %v2427_v30  ;;  %v2530_v23 = vmul.f32 %v6812_v49, %v8457_v9  ;;  %v10385_v9 = vld [vmem:[#allocation12_spill] sm:$0xff] }
 0x508   : > { %v2557_v57 = vpack.c.bf16 %v2525_v21, %v2525_v21 }
 0x509   : > { %v2634_v40 = vunpack.c.l.b16 %v2554_v20  ;;  %v2562_v60 = vpack.c.bf16 %v2530_v23, %v2530_v23  ;;  %v10386_v23 = vld [vmem:[#allocation4_spill] sm:$0xff] }
 0x50a   : > { %4168 = vrot.lane.b32.xlu2 %v7327_v1, %s7128_s27  ;;  %v2683_v12 = vunpack.c.l.b16 %v2557_v57 }
 0x50b   : > { %v2635_v28 = vpack.c.b16 %v2634_v40, %v2633_v54  ;;  %v2734_v5 = vunpack.c.l.b16 %v2562_v60 }
 0x50c   : > { %v6814_v13 = vpop.eup %6813  ;;  %v2433_v53 = vpop.xlane.xlu2 %2432 }
 0x50d   : > { %v2526_v34 = vmul.f32 %v6814_v13, %v8470_v43  ;;  %v2445_v41 = vpop.xlane.xlu1 %2444  ;;  %6442 = vmatmul.msk.bf16.vlgmr.msrb.gmra.mxu2 %vm993_vm2, %v2635_v28  ;;  %v6816_v42 = vpop.eup %6815  ;;  %6817 = vrcp.f32 %v2433_v53  ;;  %v10384_v43 = vld [vmem:[#allocation7_spill] sm:$0xff] }
 0x50e   : > { %2849 = vmatpush.bf16.msrb.mxu2 %v8214_v16  ;;  %v2529_v8 = vmul.f32 %v6816_v42, %v10383_v35  ;;  %6819 = vrcp.f32 %v2421_v45  ;;  %v2448_v2 = vpop.xlane.xlu0 %2447 }
 0x50f   : > { %v2558_v30 = vpack.c.bf16 %v2526_v34, %v2526_v34 }
 0x510   : > { %v2561_v61 = vpack.c.bf16 %v2529_v8, %v2529_v8 }
 0x511   : > { %v2684_v63 = vunpack.c.l.b16 %v2558_v30 }
 0x512   : > { %4268 = vrot.lane.b32.xlu2 %v10384_v43, %s7128_s27  ;;  %v2733_v20 = vunpack.c.l.b16 %v2561_v61 }
 0x513   : > { %v2685_v31 = vpack.c.b16 %v2684_v63, %v2683_v12  ;;  %v6818_v16 = vpop.eup %6817 }
 0x514   : > { %v2424_v0 = vpop.xlane.xlu2 %2423  ;;  %v6820_v39 = vpop.eup %6819  ;;  %v2531_v45 = vmul.f32 %v6818_v16, %v8480_v46  ;;  %v2735_v40 = vpack.c.b16 %v2734_v5, %v2733_v20  ;;  %v10388_v16 = vld [vmem:[#allocation47_spill] sm:$0xff] }
 0x515   : > { %v2436_v24 = vpop.xlane.xlu1 %2435  ;;  %6444 = vmatmul.msk.bf16.vlgmr.msra.gmra.mxu0 %vm993_vm2, %v2685_v31  ;;  %v2527_v54 = vmul.f32 %v6820_v39, %v8473_v59 }
 0x516   : > { %6821 = vrcp.f32 %v2436_v24  ;;  %2899 = vmatpush.bf16.msra.mxu0 %v10385_v9  ;;  %v2451_v49 = vpop.xlane.xlu0 %2450  ;;  %v2563_v13 = vpack.c.bf16 %v2531_v45, %v2531_v45 }
 0x517   : > { %6823 = vrcp.f32 %v2424_v0  ;;  %v2559_v42 = vpack.c.bf16 %v2527_v54, %v2527_v54 }
 0x518   : > { %6825 = vrcp.f32 %v2445_v41  ;;  %v2758_v35 = vunpack.c.l.b16 %v2563_v13 }
 0x519   : > { %6827 = vrcp.f32 %v2448_v2  ;;  %v2708_v12 = vunpack.c.l.b16 %v2559_v42  ;;  %v10387_v2 = vld [vmem:[#allocation38_spill] sm:$0xff] }
 0x51a   : > { %4503 = vrot.lane.b32.xlu2 %v10306_v56, %s7129_s28 }
 0x51c   : > { %v6822_v21 = vpop.eup %6821  ;;  %v2463_v53 = vpop.xlane.xlu2 %2462 }
 0x51d   : > { %v6824_v28 = vpop.eup %6823  ;;  %v2532_v57 = vmul.f32 %v6822_v21, %v8497_v47  ;;  %v2439_v34 = vpop.xlane.xlu1 %2438  ;;  %6446 = vmatmul.msk.bf16.vlgmr.msra.gmra.mxu2 %vm993_vm2, %v2735_v40 }
 0x51e   : > { %v2528_v46 = vmul.f32 %v6824_v28, %v8495_v52  ;;  %2949 = vmatpush.bf16.msra.mxu2 %v10386_v23  ;;  %6829 = vrcp.f32 %v2439_v34  ;;  %v6826_v47 = vpop.eup %6825 }
 0x51f   : > { %v2564_v59 = vpack.c.bf16 %v2532_v57, %v2532_v57  ;;  %v6828_v61 = vpop.eup %6827  ;;  %v2535_v9 = vmul.f32 %v6826_v47, %v8483_v62 }
 0x520   : > { %v2560_v30 = vpack.c.bf16 %v2528_v46, %v2528_v46  ;;  %v2536_v39 = vmul.f32 %v6828_v61, %v8487_v38 }
 0x521   : > { %v2759_v8 = vunpack.c.l.b16 %v2564_v59  ;;  %v2567_v20 = vpack.c.bf16 %v2535_v9, %v2535_v9 }
 0x522   : > { %v2709_v63 = vunpack.c.l.b16 %v2560_v30  ;;  %4527 = vrot.lane.b32.xlu2 %v7299_v36, %s7129_s28  ;;  %v2568_v45 = vpack.c.bf16 %v2536_v39, %v2536_v39 }
 0x523   : > { %v2760_v60 = vpack.c.b16 %v2759_v8, %v2758_v35  ;;  %v2808_v38 = vunpack.c.l.b16 %v2567_v20 }
 0x524   : > { %v2710_v31 = vpack.c.b16 %v2709_v63, %v2708_v12  ;;  %v2442_v24 = vpop.xlane.xlu2 %2441  ;;  %v6830_v0 = vpop.eup %6829 }
 0x525   : > { %v2466_v41 = vpop.xlane.xlu1 %2465  ;;  %6447 = vmatmul.msk.bf16.vlgmr.msra.gmra.mxu3 %vm993_vm2, %v2760_v60  ;;  %v2457_v52 = vpop.xlane.xlu0 %2456  ;;  %6831 = vrcp.f32 %v2442_v24  ;;  %v2533_v5 = vmul.f32 %v6830_v0, %v8511_v22  ;;  %v10390_v60 = vld [vmem:[#allocation14_spill] sm:$0xff] }
 0x526   : > { %6445 = vmatmul.msk.bf16.vlgmr.msra.gmra.mxu1 %vm993_vm2, %v2710_v31  ;;  %2974 = vmatpush.bf16.msra.mxu3 %v10387_v2  ;;  %6833 = vrcp.f32 %v2451_v49  ;;  %v2809_v49 = vunpack.c.l.b16 %v2568_v45  ;;  %v3177_v47 = vsel %vm567_vm1, %v10390_v60, 0 }
 0x527   : > { %2924 = vmatpush.bf16.msra.mxu1 %v10388_v16  ;;  %6835 = vrcp.f32 %v2466_v41  ;;  %v2565_v28 = vpack.c.bf16 %v2533_v5, %v2533_v5 }
 0x528   : > { %v2810_v30 = vpack.c.b16 %v2809_v49, %v2808_v38 }
 0x529   : > { %v2783_v42 = vunpack.c.l.b16 %v2565_v28 }
 0x52a   : > { %4501 = vrot.lane.b32.xlu2 %v10306_v56, %s7130_s29 }
 0x52b   : > { %v6832_v54 = vpop.eup %6831 }
 0x52c   : > { %v2534_v13 = vmul.f32 %v6832_v54, %v8523_v10  ;;  %v2454_v57 = vpop.xlane.xlu2 %2453  ;;  %v6834_v62 = vpop.eup %6833  ;;  %v10389_v10 = vld [vmem:[#allocation48_spill] sm:$0xff]  ;;  %v10391_v54 = vld [vmem:[#allocation18_spill] sm:$0xff] }
 0x52d   : > { %v2472_v40 = vpop.xlane.xlu1 %2471  ;;  %v2469_v21 = vpop.xlane.xlu0 %2468  ;;  %v2537_v22 = vmul.f32 %v6834_v62, %v8500_v17  ;;  %v3153_v63 = vsel %vm567_vm1, %v10389_v10, 0 }
 0x52e   : > { %6837 = vrcp.f32 %v2472_v40  ;;  %v2566_v34 = vpack.c.bf16 %v2534_v13, %v2534_v13  ;;  %v6836_v23 = vpop.eup %6835  ;;  %v3201_v40 = vsel %vm567_vm1, %v10391_v54, 0 }
 0x52f   : > { %6839 = vrcp.f32 %v2454_v57  ;;  %v2569_v31 = vpack.c.bf16 %v2537_v22, %v2537_v22  ;;  %v2542_v41 = vmul.f32 %v6836_v23, %v8521_v51  ;;  %v10392_v22 = vld [vmem:[#allocation13_spill] sm:$0xff] }
 0x530   : > { %6841 = vrcp.f32 %v2469_v21  ;;  %v2784_v46 = vunpack.c.l.b16 %v2566_v34 }
 0x531   : > { %6843 = vrcp.f32 %v2463_v53  ;;  %v2833_v16 = vunpack.c.l.b16 %v2569_v31  ;;  %v2574_v39 = vpack.c.bf16 %v2542_v41, %v2542_v41 }
 0x532   : > { %v2785_v35 = vpack.c.b16 %v2784_v46, %v2783_v42  ;;  %6845 = vrcp.f32 %v2457_v52  ;;  %v3273_v42 = vsel %vm567_vm1, %v10392_v22, 0  ;;  %v10393_v46 = vld [vmem:[#allocation8_spill] sm:$0xff]  ;;  %v10406_v22 = vld [vmem:[#allocation37_spill] sm:$0xff] }
 0x533   : > { %v3249_v23 = vsel %vm567_vm1, %v10393_v46, 0 }
 0x534   : > { %v6838_v59 = vpop.eup %6837  ;;  %v2481_v53 = vpop.xlane.xlu2 %2480  ;;  %6448 = vmatmul.msk.bf16.vlgmr.msrb.gmra.mxu0 %vm993_vm2, %v2785_v35 }
 0x535   : > { %v6840_v8 = vpop.eup %6839  ;;  %3162 = vmatpush.bf16.xpose.msrb.mxu0 %v3153_v63  ;;  %v2544_v24 = vmul.f32 %v6838_v59, %v8534_v19  ;;  %v2475_v28 = vpop.xlane.xlu1 %2474 }
 0x536   : > { %v6842_v12 = vpop.eup %6841  ;;  %v2538_v61 = vmul.f32 %v6840_v8, %v8540_v32  ;;  %6449 = vmatmul.msk.bf16.vlgmr.msrb.gmra.mxu1 %vm993_vm2, %v2810_v30  ;;  %v2484_v62 = vpop.xlane.xlu0 %2483 }
 0x537   : > { %v6844_v17 = vpop.eup %6843  ;;  %3186 = vmatpush.bf16.xpose.msrb.mxu1 %v3177_v47  ;;  %v2543_v0 = vmul.f32 %v6842_v12, %v8538_v27  ;;  %v2576_v5 = vpack.c.bf16 %v2544_v24, %v2544_v24  ;;  %v2884_v27 = vunpack.c.l.b16 %v2574_v39 }
 0x538   : > { %v2570_v2 = vpack.c.bf16 %v2538_v61, %v2538_v61  ;;  %v2541_v9 = vmul.f32 %v6844_v17, %v8509_v14  ;;  %v6846_v19 = vpop.eup %6845 }
 0x539   : > { %v2575_v45 = vpack.c.bf16 %v2543_v0, %v2543_v0  ;;  %v2909_v52 = vunpack.c.l.b16 %v2576_v5  ;;  %v2539_v57 = vmul.f32 %v6846_v19, %v8525_v6  ;;  %v10395_v5 = vld [vmem:[#allocation11_spill] sm:$0xff]  ;;  %v10400_v19 = vld [vmem:[#allocation42_spill] sm:$0xff] }
 0x53a   : > { %v2834_v32 = vunpack.c.l.b16 %v2570_v2  ;;  %v2573_v21 = vpack.c.bf16 %v2541_v9, %v2541_v9 }
 0x53b   : > { %v2908_v13 = vunpack.c.l.b16 %v2575_v45  ;;  %v2571_v59 = vpack.c.bf16 %v2539_v57, %v2539_v57  ;;  %v10396_v45 = vld [vmem:[#allocation23_spill] sm:$0xff]  ;;  %v10403_v57 = vld [vmem:[#allocation16_spill] sm:$0xff] }
 0x53c   : > { %v2835_v20 = vpack.c.b16 %v2834_v32, %v2833_v16  ;;  %v2460_v51 = vpop.xlane.xlu2 %2459  ;;  %v2883_v14 = vunpack.c.l.b16 %v2573_v21 }
 0x53d   : > { %6847 = vrcp.f32 %v2460_v51  ;;  %v2910_v49 = vpack.c.b16 %v2909_v52, %v2908_v13  ;;  %v2858_v12 = vunpack.c.l.b16 %v2571_v59  ;;  %v10401_v52 = vld [vmem:[#allocation15_spill] sm:$0xff]  ;;  %v10409_v59 = vld [vmem:[#allocation36_spill] sm:$0xff] }
 0x53e   : > { %6450 = vmatmul.msk.bf16.vlgmr.msrb.gmra.mxu2 %vm993_vm2, %v2835_v20  ;;  %6849 = vrcp.f32 %v2475_v28  ;;  %v2885_v38 = vpack.c.b16 %v2884_v27, %v2883_v14  ;;  %v3297_v20 = vsel %vm567_vm1, %v10395_v5, 0  ;;  %v3321_v27 = vsel %vm567_vm1, %v10400_v19, 0  ;;  %v10402_v14 = vld [vmem:[#allocation30_spill] sm:$0xff] }
 0x53f   : > { %3210 = vmatpush.bf16.xpose.msrb.mxu2 %v3201_v40  ;;  %6851 = vrcp.f32 %v2481_v53  ;;  %v10394_v53 = vld [vmem:[#allocation9_spill] sm:$0xff]  ;;  %v10399_v40 = vld [vmem:[#allocation35_spill] sm:$0xff]  ;;  %v3393_v13 = vsel %vm567_vm1, %v10401_v52, 0 }
 0x540   : > { %6853 = vrcp.f32 %v2484_v62  ;;  %v10404_v62 = vld [vmem:[#allocation22_spill] sm:$0xff] }
 0x543   : > { %v6848_v34 = vpop.eup %6847 }
 0x544   : > { %v2540_v30 = vmul.f32 %v6848_v34, %v8562_v3  ;;  %v2478_v35 = vpop.xlane.xlu2 %2477  ;;  %6452 = vmatmul.msk.bf16.vlgmr.msra.gmra.mxu0 %vm993_vm2, %v2885_v38  ;;  %v6850_v6 = vpop.eup %6849  ;;  %v3225_v3 = vsel %vm567_vm1, %v10394_v53, 0  ;;  %v3441_v38 = vsel %vm567_vm1, %v10404_v62, 0  ;;  %v10415_v53 = vld [vmem:[#allocation25_spill] sm:$0xff] }
 0x545   : > { %6855 = vrcp.f32 %v2478_v35  ;;  %3258 = vmatpush.bf16.xpose.msra.mxu0 %v3249_v23  ;;  %v2545_v10 = vmul.f32 %v6850_v6, %v8551_v55  ;;  %v6852_v60 = vpop.eup %6851  ;;  %v10408_v23 = vld [vmem:[#allocation40_spill] sm:$0xff] }
 0x546   : > { %6453 = vmatmul.msk.bf16.vlgmr.msra.gmra.mxu1 %vm993_vm2, %v2910_v49  ;;  %v2572_v8 = vpack.c.bf16 %v2540_v30, %v2540_v30  ;;  %v6854_v47 = vpop.eup %6853  ;;  %v2547_v24 = vmul.f32 %v6852_v60, %v8549_v33  ;;  %v10398_v33 = vld [vmem:[#allocation39_spill] sm:$0xff]  ;;  %v10405_v49 = vld [vmem:[#allocation26_spill] sm:$0xff]  ;;  %v3489_v30 = vsel %vm567_vm1, %v10409_v59, 0  ;;  %v10410_v35 = vld [vmem:[#allocation24_spill] sm:$0xff] }
 0x547   : > { %3282 = vmatpush.bf16.xpose.msra.mxu1 %v3273_v42  ;;  %v2577_v17 = vpack.c.bf16 %v2545_v10, %v2545_v10  ;;  %v2548_v2 = vmul.f32 %v6854_v47, %v8553_v11  ;;  %v3369_v11 = vsel %vm567_vm1, %v10398_v33, 0  ;;  %v3465_v34 = vsel %vm567_vm1, %v10405_v49, 0  ;;  %v10407_v42 = vld [vmem:[#allocation41_spill] sm:$0xff]  ;;  %v10411_v6 = vld [vmem:[#allocation20_spill] sm:$0xff]  ;;  %v10413_v60 = vld [vmem:[#allocation34_spill] sm:$0xff] }
 0x548   : > { %v2859_v63 = vunpack.c.l.b16 %v2572_v8  ;;  %v2579_v9 = vpack.c.bf16 %v2547_v24, %v2547_v24  ;;  %v3417_v46 = vsel %vm567_vm1, %v10407_v42, 0  ;;  %v3944_v8 = vpop.permute.xlu0 %3943  ;;  %v10412_v10 = vld [vmem:[#allocation45_spill] sm:$0xff]  ;;  %v3513_v47 = vsel %vm567_vm1, %v10413_v60, 0  ;;  %v8787_v59 = vld [vmem:[%s10236_s3 + $0x20] sm:$0xff] }
 0x549   : > { %v2933_v55 = vunpack.c.l.b16 %v2577_v17  ;;  %v2580_v32 = vpack.c.bf16 %v2548_v2, %v2548_v2  ;;  %v10418_v2 = vld [vmem:[#allocation29_spill] sm:$0xff] }
 0x54a   : > { %v2860_v31 = vpack.c.b16 %v2859_v63, %v2858_v12  ;;  %v2958_v21 = vunpack.c.l.b16 %v2579_v9  ;;  %v10421_v9 = vld [vmem:[#allocation43_spill] sm:$0xff] }
 0x54b   : > { %v6856_v61 = vpop.eup %6855  ;;  %v2959_v28 = vunpack.c.l.b16 %v2580_v32 }
 0x54c   : > { %v2546_v41 = vmul.f32 %v6856_v61, %v8566_v7  ;;  %6451 = vmatmul.msk.bf16.vlgmr.msrb.gmra.mxu3 %vm993_vm2, %v2860_v31  ;;  %v10397_v7 = vld [vmem:[#allocation21_spill] sm:$0xff]  ;;  %v4019_v63 = vpop.permute.xlu2 %4018  ;;  %v10414_v31 = vld [vmem:[#allocation44_spill] sm:$0xff] }
 0x54d   : > { %3234 = vmatpush.bf16.xpose.msrb.mxu3 %v3225_v3  ;;  %v3345_v54 = vsel %vm567_vm1, %v10397_v7, 0  ;;  %v2960_v51 = vpack.c.b16 %v2959_v28, %v2958_v21  ;;  %v3919_v12 = vpop.permute.xlu1 %3918  ;;  %v10416_v3 = vld [vmem:[#allocation19_spill] sm:$0xff] }
 0x54e   : > { %v2578_v0 = vpack.c.bf16 %v2546_v41, %v2546_v41  ;;  %v10417_v41 = vld [vmem:[#allocation17_spill] sm:$0xff] }
 0x550   : > { %v2934_v16 = vunpack.c.l.b16 %v2578_v0 }
 0x552   : > { %v2935_v39 = vpack.c.b16 %v2934_v16, %v2933_v55 }
 0x554   : > { %6454 = vmatmul.msk.bf16.vlgmr.msra.gmra.mxu2 %vm993_vm2, %v2935_v39  ;;  %6458 = vmatmul.msk.bf16.vlgmr.msrb.gmra.mxu0 %vm567_vm1, %v10396_v45  ;;  %v4044_v17 = vpop.permute.xlu2 %4043 }
 0x555   : > { %3306 = vmatpush.bf16.xpose.msra.mxu2 %v3297_v20  ;;  %3354 = vmatpush.bf16.xpose.msrb.mxu0 %v3345_v54  ;;  %v3969_v61 = vpop.permute.xlu1 %3968  ;;  %v10424_v20 = vld [vmem:[#allocation33_spill] sm:$0xff] }
 0x556   : > { %6459 = vmatmul.msk.bf16.vlgmr.msrb.gmra.mxu1 %vm567_vm1, %v10399_v40 }
 0x557   : > { %3378 = vmatpush.bf16.xpose.msrb.mxu1 %v3369_v11 }
 0x55c   : > { %6455 = vmatmul.msk.bf16.vlgmr.msra.gmra.mxu3 %vm993_vm2, %v2960_v51  ;;  %v4069_v16 = vpop.permute.xlu2 %4068 }
 0x55d   : > { %3330 = vmatpush.bf16.xpose.msra.mxu3 %v3321_v27  ;;  %v3994_v24 = vpop.permute.xlu1 %3993  ;;  %v8726_v0 = vpop.f32.mrf.mxu0 }
 0x55e   : > { %10419 = vst [vmem:[#allocation31_spill] sm:$0xff] %v8726_v0 }
 0x564   : > { %6460 = vmatmul.msk.bf16.vlgmr.msrb.gmra.mxu2 %vm567_vm1, %v10402_v14  ;;  %6462 = vmatmul.msk.bf16.vlgmr.msra.gmra.mxu0 %vm567_vm1, %v10403_v57 }
 0x565   : > { %3402 = vmatpush.bf16.xpose.msrb.mxu2 %v3393_v13  ;;  %3450 = vmatpush.bf16.xpose.msra.mxu0 %v3441_v38  ;;  %v8732_v32 = vpop.f32.mrf.mxu0  ;;  %v4094_v5 = vpop.permute.xlu1 %4093 }
 0x566   : > { %6463 = vmatmul.msk.bf16.vlgmr.msra.gmra.mxu1 %vm567_vm1, %v10406_v22  ;;  %10422 = vst [vmem:[#allocation46_spill] sm:$0xff] %v8732_v32 }
 0x567   : > { %3474 = vmatpush.bf16.xpose.msra.mxu1 %v3465_v34 }
 0x56c   : > { %6461 = vmatmul.msk.bf16.vlgmr.msrb.gmra.mxu3 %vm567_vm1, %v10408_v23 }
 0x56d   : > { %3426 = vmatpush.bf16.xpose.msrb.mxu3 %v3417_v46  ;;  %v8728_v55 = vpop.f32.mrf.mxu1 }
 0x56e   : > { %10420 = vst [vmem:[#allocation32_spill] sm:$0xff] %v8728_v55 }
 0x574   : > { %6464 = vmatmul.msk.bf16.vlgmr.msra.gmra.mxu2 %vm567_vm1, %v10410_v35  ;;  %6466 = vmatmul.msk.bf16.vlgmr.msrb.gmra.mxu0 %vm567_vm1, %v10411_v6  ;;  %v8750_v21 = vpop.f32.mrf.mxu3 }
 0x575   : > { %3498 = vmatpush.bf16.xpose.msra.mxu2 %v3489_v30  ;;  %3931 = vmatpush.bf16.msrb.mxu0 %v3919_v12  ;;  %v8734_v39 = vpop.f32.mrf.mxu1  ;;  %10431 = vst [vmem:[#allocation48_spill] sm:$0xff] %v8750_v21 }
 0x576   : > { %6467 = vmatmul.msk.bf16.vlgmr.msrb.gmra.mxu1 %vm567_vm1, %v10412_v10  ;;  %10423 = vst [vmem:[#allocation28_spill] sm:$0xff] %v8734_v39 }
 0x577   : > { %3956 = vmatpush.bf16.msrb.mxu1 %v3944_v8 }
 0x57c   : > { %6465 = vmatmul.msk.bf16.vlgmr.msra.gmra.mxu3 %vm567_vm1, %v10414_v31  ;;  %v8758_v27 = vpop.f32.mrf.mxu3 }
 0x57d   : > { %3522 = vmatpush.bf16.xpose.msra.mxu3 %v3513_v47  ;;  %10435 = vst [vmem:[#allocation8_spill] sm:$0xff] %v8758_v27  ;;  %v8806_v47 = vld [vmem:[%s10236_s3 + $0x28] sm:$0xff] }
 0x584   : > { %6468 = vmatmul.msk.bf16.vlgmr.msrb.gmra.mxu2 %vm567_vm1, %v10415_v53  ;;  %6470 = vmatmul.msk.bf16.vlgmr.msra.gmra.mxu0 %vm567_vm1, %v10416_v3 }
 0x585   : > { %3981 = vmatpush.bf16.msrb.mxu2 %v3969_v61  ;;  %4031 = vmatpush.bf16.msra.mxu0 %v4019_v63 }
 0x586   : > { %6471 = vmatmul.msk.bf16.vlgmr.msra.gmra.mxu1 %vm567_vm1, %v10417_v41 }
 0x587   : > { %4056 = vmatpush.bf16.msra.mxu1 %v4044_v17 }
 0x58c   : > { %6469 = vmatmul.msk.bf16.vlgmr.msrb.gmra.mxu3 %vm567_vm1, %v10418_v2 }
 0x58d   : > { %4006 = vmatpush.bf16.msrb.mxu3 %v3994_v24 }
 0x590   : > { %v8738_v45 = vpop.f32.mrf.mxu2 }
 0x591   : > { %10425 = vst [vmem:[#allocation27_spill] sm:$0xff] %v8738_v45 }
 0x592   : > { %v8740_v7 = vpop.f32.mrf.mxu0 }
 0x593   : > { %10426 = vst [vmem:[#allocation7_spill] sm:$0xff] %v8740_v7 }
 0x594   : > { %6472 = vmatmul.msk.bf16.vlgmr.msra.gmra.mxu2 %vm567_vm1, %v10421_v9 }
 0x595   : > { %4081 = vmatpush.bf16.msra.mxu2 %v4069_v16 }
 0x598   : > { %v8744_v33 = vpop.f32.mrf.mxu2 }
 0x599   : > { %10428 = vst [vmem:[#allocation4_spill] sm:$0xff] %v8744_v33 }
 0x59a   : > { %v8746_v11 = vpop.f32.mrf.mxu0 }
 0x59b   : > { %10429 = vst [vmem:[#allocation38_spill] sm:$0xff] %v8746_v11 }
 0x59c   : > { %6473 = vmatmul.msk.bf16.vlgmr.msra.gmra.mxu3 %vm567_vm1, %v10424_v20 }
 0x59d   : > { %4106 = vmatpush.bf16.msra.mxu3 %v4094_v5 }
 0x5a0   : > { %v8756_v19 = vpop.f32.mrf.mxu2 }
 0x5a1   : > { %10434 = vst [vmem:[#allocation13_spill] sm:$0xff] %v8756_v19 }
 0x5a3   : > { %v8742_v54 = vpop.f32.mrf.mxu1 }
 0x5a4   : > { %10427 = vst [vmem:[#allocation12_spill] sm:$0xff] %v8742_v54  ;;  %v8925_v54 = vpop.permute.xlu0 %4118 }
 0x5a8   : > { %v8764_v14 = vpop.f32.mrf.mxu2  ;;  %v8766_v57 = vpop.f32.mrf.mxu3 }
 0x5a9   : > { %10438 = vst [vmem:[#allocation23_spill] sm:$0xff] %v8764_v14 }
 0x5aa   : > { %10439 = vst [vmem:[#allocation21_spill] sm:$0xff] %v8766_v57 }
 0x5ab   : > { %v8748_v40 = vpop.f32.mrf.mxu1 }
 0x5ac   : > { %10430 = vst [vmem:[#allocation47_spill] sm:$0xff] %v8748_v40  ;;  %v8941_v11 = vpop.permute.xlu0 %4218 }
 0x5b0   : > { %v8774_v34 = vpop.f32.mrf.mxu3 }
 0x5b1   : > { %v8752_v28 = vpop.f32.mrf.mxu0  ;;  %10443 = vst [vmem:[#allocation15_spill] sm:$0xff] %v8774_v34 }
 0x5b2   : > { %10432 = vst [vmem:[#allocation14_spill] sm:$0xff] %v8752_v28 }
 0x5b3   : > { %v8754_v51 = vpop.f32.mrf.mxu1 }
 0x5b4   : > { %10433 = vst [vmem:[#allocation18_spill] sm:$0xff] %v8754_v51 }
 0x5b9   : > { %v8760_v52 = vpop.f32.mrf.mxu0 }
 0x5ba   : > { %10436 = vst [vmem:[#allocation9_spill] sm:$0xff] %v8760_v52 }
 0x5bb   : > { %v8762_v13 = vpop.f32.mrf.mxu1 }
 0x5bc   : > { %10437 = vst [vmem:[#allocation11_spill] sm:$0xff] %v8762_v13 }
 0x5c1   : > { %v8768_v62 = vpop.f32.mrf.mxu0  ;;  %v8772_v49 = vpop.f32.mrf.mxu2 }
 0x5c2   : > { %10440 = vst [vmem:[#allocation39_spill] sm:$0xff] %v8768_v62 }
 0x5c3   : > { %v8770_v38 = vpop.f32.mrf.mxu1  ;;  %10442 = vst [vmem:[#allocation42_spill] sm:$0xff] %v8772_v49 }
 0x5c4   : > { %10441 = vst [vmem:[#allocation35_spill] sm:$0xff] %v8770_v38 }
 0x5c9   : > { %v8776_v22 = vpop.f32.mrf.mxu0  ;;  %v8780_v46 = vpop.f32.mrf.mxu2 }
 0x5ca   : > { %10444 = vst [vmem:[#allocation30_spill] sm:$0xff] %v8776_v22 }
 0x5cb   : > { %v8778_v42 = vpop.f32.mrf.mxu1  ;;  %10446 = vst [vmem:[#allocation22_spill] sm:$0xff] %v8780_v46 }
 0x5cc   : > { %10445 = vst [vmem:[#allocation16_spill] sm:$0xff] %v8778_v42 }
 0x5cf   : > { %v8782_v23 = vpop.f32.mrf.mxu3 }
 0x5d0   : > { %10447 = vst [vmem:[#allocation26_spill] sm:$0xff] %v8782_v23 }
 0x5d1   : > { %v3164_v30 = vpop.f32.mrf.mxu0 }
 0x5d2   : > { %v8790_v35 = vadd.f32 %v8787_v59, %v3164_v30 }
 0x5d3   : > { %v3188_v6 = vpop.f32.mrf.mxu1 }
 0x5d4   : > { %v8793_v8 = vadd.f32 %v8787_v59, %v3188_v6  ;;  %v3529_v12 = vsel %vm993_vm2, %v8790_v35, -inf }
 0x5d5   : > { %3530 = vmax.xlane.f32.xlu0 %v3529_v12 }
 0x5d6   : > { %v3535_v10 = vsel %vm993_vm2, %v8793_v8, -inf }
 0x5d7   : > { %3536 = vmax.xlane.f32.xlu2 %v3535_v10  ;;  %v8799_v63 = vpop.f32.mrf.mxu3  ;;  %v8801_v60 = vpop.f32.mrf.mxu2 }
 0x5d8   : > { %10448 = vst [vmem:[#allocation37_spill] sm:$0xff] %v8799_v63 }
 0x5d9   : > { %10449 = vst [vmem:[#allocation41_spill] sm:$0xff] %v8801_v60  ;;  %v3166_v31 = vpop.f32.mrf.mxu0 }
 0x5da   : > { %v8809_v61 = vadd.f32 %v8806_v47, %v3166_v31 }
 0x5db   : > { %v3190_v53 = vpop.f32.mrf.mxu1 }
 0x5dc   : > { %v8812_v3 = vadd.f32 %v8806_v47, %v3190_v53  ;;  %v3532_v17 = vsel %vm993_vm2, %v8809_v61, -inf }
 0x5dd   : > { %3533 = vmax.xlane.f32.xlu1 %v3532_v17 }
 0x5de   : > { %v3538_v41 = vsel %vm993_vm2, %v8812_v3, -inf }
 0x5df   : > { %3539 = vmax.xlane.f32.xlu0 %v3538_v41  ;;  %v8818_v24 = vpop.f32.mrf.mxu2  ;;  %v8820_v2 = vpop.f32.mrf.mxu3 }
 0x5e0   : > { %10450 = vst [vmem:[#allocation40_spill] sm:$0xff] %v8818_v24 }
 0x5e1   : > { %10451 = vst [vmem:[#allocation36_spill] sm:$0xff] %v8820_v2  ;;  %v3260_v16 = vpop.f32.mrf.mxu0 }
 0x5e2   : > { %v8823_v9 = vadd.f32 %v8787_v59, %v3260_v16 }
 0x5e3   : > { %v3284_v5 = vpop.f32.mrf.mxu1 }
 0x5e4   : > { %v8826_v20 = vadd.f32 %v8787_v59, %v3284_v5  ;;  %v3553_v30 = vsel %vm993_vm2, %v8823_v9, -inf }
 0x5e5   : > { %3554 = vmax.xlane.f32.xlu1 %v3553_v30 }
 0x5e6   : > { %v3559_v6 = vsel %vm993_vm2, %v8826_v20, -inf }
 0x5e7   : > { %3560 = vmax.xlane.f32.xlu2 %v3559_v6  ;;  %v8832_v12 = vpop.f32.mrf.mxu3  ;;  %v3212_v10 = vpop.f32.mrf.mxu2 }
 0x5e8   : > { %10452 = vst [vmem:[#allocation24_spill] sm:$0xff] %v8832_v12  ;;  %v8835_v31 = vadd.f32 %v8787_v59, %v3212_v10 }
 0x5e9   : > { %v3262_v53 = vpop.f32.mrf.mxu0 }
 0x5ea   : > { %v8838_v17 = vadd.f32 %v8806_v47, %v3262_v53  ;;  %v3541_v41 = vsel %vm993_vm2, %v8835_v31, -inf }
 0x5eb   : > { %3542 = vmax.xlane.f32.xlu0 %v3541_v41  ;;  %v3286_v16 = vpop.f32.mrf.mxu1 }
 0x5ec   : > { %v3556_v5 = vsel %vm993_vm2, %v8838_v17, -inf }
 0x5ef   : > { %3557 = vmax.xlane.f32.xlu2 %v3556_v5  ;;  %v3214_v30 = vpop.f32.mrf.mxu2  ;;  %v3236_v6 = vpop.f32.mrf.mxu3  ;;  %v8855_v5 = vadd.f32 %v8806_v47, %v3286_v16 }
 0x5f0   : > { %v8845_v2 = vadd.f32 %v8806_v47, %v3214_v30  ;;  %v8848_v10 = vadd.f32 %v8787_v59, %v3236_v6 }
 0x5f1   : > { %v3356_v41 = vpop.f32.mrf.mxu0 }
 0x5f2   : > { %v3544_v53 = vsel %vm993_vm2, %v8845_v2, -inf  ;;  %v3547_v12 = vsel %vm993_vm2, %v8848_v10, -inf  ;;  %v8870_v16 = vadd.f32 %v8787_v59, %v3356_v41 }
 0x5f3   : > { %3545 = vmax.xlane.f32.xlu1 %v3544_v53  ;;  %3548 = vmax.xlane.f32.xlu0 %v3547_v12  ;;  %v3380_v60 = vpop.f32.mrf.mxu1  ;;  %v3562_v12 = vsel %vm993_vm2, %v8855_v5, -inf }
 0x5f7   : > { %v3238_v24 = vpop.f32.mrf.mxu3  ;;  %v3308_v38 = vpop.f32.mrf.mxu2 }
 0x5f8   : > { %v8858_v30 = vadd.f32 %v8806_v47, %v3238_v24  ;;  %v8861_v6 = vadd.f32 %v8787_v59, %v3308_v38 }
 0x5f9   : > { %v3358_v24 = vpop.f32.mrf.mxu0 }
 0x5fa   : > { %v3565_v62 = vsel %vm993_vm2, %v8861_v6, -inf  ;;  %v3550_v53 = vsel %vm993_vm2, %v8858_v30, -inf }
 0x5fb   : > { %3566 = vmax.xlane.f32.xlu2 %v3565_v62  ;;  %3551 = vmax.xlane.f32.xlu1 %v3550_v53  ;;  %v3382_v38 = vpop.f32.mrf.mxu1  ;;  %v3577_v53 = vsel %vm993_vm2, %v8870_v16, -inf }
 0x5fc   : > { %3563 = vmax.xlane.f32.xlu0 %v3562_v12  ;;  %v8885_v12 = vadd.f32 %v8787_v59, %v3380_v60 }
 0x5ff   : > { %v3310_v42 = vpop.f32.mrf.mxu2  ;;  %v3332_v23 = vpop.f32.mrf.mxu3 }
 0x600   : > { %v8873_v22 = vadd.f32 %v8806_v47, %v3310_v42  ;;  %v8876_v49 = vadd.f32 %v8787_v59, %v3332_v23  ;;  %v8888_v42 = vadd.f32 %v8806_v47, %v3358_v24  ;;  %v8900_v24 = vadd.f32 %v8806_v47, %v3382_v38 }
 0x601   : > { %v3452_v51 = vpop.f32.mrf.mxu0 }
 0x602   : > { %v3571_v62 = vsel %vm993_vm2, %v8876_v49, -inf  ;;  %v3568_v41 = vsel %vm993_vm2, %v8873_v22, -inf  ;;  %v3580_v28 = vsel %vm993_vm2, %v8888_v42, -inf  ;;  %v8908_v13 = vadd.f32 %v8787_v59, %v3452_v51 }
 0x603   : > { %3572 = vmax.xlane.f32.xlu2 %v3571_v62  ;;  %3578 = vmax.xlane.f32.xlu1 %v3577_v53  ;;  %v3476_v46 = vpop.f32.mrf.mxu1  ;;  %v3583_v62 = vsel %vm993_vm2, %v8885_v12, -inf  ;;  %v3586_v52 = vsel %vm993_vm2, %v8900_v24, -inf }
 0x604   : > { %3569 = vmax.xlane.f32.xlu0 %v3568_v41  ;;  %v3601_v38 = vsel %vm993_vm2, %v8908_v13, -inf }
 0x607   : > { %v3334_v23 = vpop.f32.mrf.mxu3  ;;  %v3404_v60 = vpop.f32.mrf.mxu2 }
 0x608   : > { %v8891_v63 = vadd.f32 %v8806_v47, %v3334_v23  ;;  %v8903_v41 = vadd.f32 %v8787_v59, %v3404_v60  ;;  %v8905_v23 = vpop.permute.xlu2 %4143  ;;  %v8917_v60 = vadd.f32 %v8787_v59, %v3476_v46 }
 0x60a   : > { %v3574_v53 = vsel %vm993_vm2, %v8891_v63, -inf }
 0x60b   : > { %3581 = vmax.xlane.f32.xlu2 %v3580_v28  ;;  %3584 = vmax.xlane.f32.xlu1 %v3583_v62  ;;  %v3589_v28 = vsel %vm993_vm2, %v8903_v41, -inf  ;;  %v3454_v62 = vpop.f32.mrf.mxu0 }
 0x60c   : > { %3575 = vmax.xlane.f32.xlu0 %v3574_v53  ;;  %v3478_v53 = vpop.f32.mrf.mxu1  ;;  %v8920_v51 = vadd.f32 %v8806_v47, %v3454_v62 }
 0x60d   : > { %v8923_v19 = vadd.f32 %v8806_v47, %v3478_v53 }
 0x60f   : > { %v3428_v57 = vpop.f32.mrf.mxu3  ;;  %v3406_v14 = vpop.f32.mrf.mxu2  ;;  %v3610_v46 = vsel %vm993_vm2, %v8923_v19, -inf }
 0x610   : > { %v8936_v62 = vadd.f32 %v8787_v59, %v3428_v57  ;;  %v8950_v57 = vadd.f32 %v8806_v47, %v3406_v14  ;;  %v8964_v14 = vpop.permute.xlu0 %4479 }
 0x611   : > { %10454 = vst [vmem:[#allocation45_spill] sm:$0xff] %v8964_v14 }
 0x612   : > { %v3595_v27 = vsel %vm993_vm2, %v8936_v62, -inf  ;;  %v3592_v21 = vsel %vm993_vm2, %v8950_v57, -inf }
 0x613   : > { %3587 = vmax.xlane.f32.xlu2 %v3586_v52  ;;  %3590 = vmax.xlane.f32.xlu1 %v3589_v28  ;;  %v8927_v52 = vpop.permute.xlu2 %4168  ;;  %v3607_v28 = vsel %vm993_vm2, %v8917_v60, -inf }
 0x614   : > { %3602 = vmax.xlane.f32.xlu0 %v3601_v38  ;;  %v3604_v38 = vsel %vm993_vm2, %v8920_v51, -inf }
 0x617   : > { %v3430_v34 = vpop.f32.mrf.mxu3  ;;  %v3500_v7 = vpop.f32.mrf.mxu2 }
 0x618   : > { %v8939_v53 = vadd.f32 %v8806_v47, %v3430_v34 }
 0x61b   : > { %3608 = vmax.xlane.f32.xlu2 %v3607_v28  ;;  %3605 = vmax.xlane.f32.xlu1 %v3604_v38  ;;  %v8945_v33 = vpop.permute.xlu2 %4268  ;;  %v3598_v28 = vsel %vm993_vm2, %v8939_v53, -inf }
 0x61c   : > { %3611 = vmax.xlane.f32.xlu0 %v3610_v46  ;;  %10453 = vst [vmem:[#allocation20_spill] sm:$0xff] %v8945_v33 }
 0x61f   : > { %v3524_v40 = vpop.f32.mrf.mxu3  ;;  %v3502_v45 = vpop.f32.mrf.mxu2 }
 0x620   : > { %v8953_v34 = vadd.f32 %v8787_v59, %v3524_v40  ;;  %v8972_v55 = vadd.f32 %v8806_v47, %v3502_v45 }
 0x623   : > { %3596 = vmax.xlane.f32.xlu2 %v3595_v27  ;;  %v8966_v40 = vpop.permute.xlu2 %4503 }
 0x624   : > { %3599 = vmax.xlane.f32.xlu0 %v3598_v28  ;;  %v3619_v28 = vsel %vm993_vm2, %v8953_v34, -inf  ;;  %10455 = vst [vmem:[#allocation34_spill] sm:$0xff] %v8966_v40 }
 0x627   : > { %v3526_v38 = vpop.f32.mrf.mxu3 }
 0x628   : > { %v8956_v46 = vadd.f32 %v8806_v47, %v3526_v38  ;;  %v8969_v38 = vadd.f32 %v8787_v59, %v3500_v7  ;;  %v8986_v7 = vpop.permute.xlu1 %4477 }
 0x629   : > { %10458 = vst [vmem:[#allocation19_spill] sm:$0xff] %v8986_v7 }
 0x62a   : > { %v3622_v27 = vsel %vm993_vm2, %v8956_v46, -inf  ;;  %v3613_v32 = vsel %vm993_vm2, %v8969_v38, -inf }
 0x62b   : > { %3593 = vmax.xlane.f32.xlu2 %v3592_v21  ;;  %3623 = vmax.xlane.f32.xlu1 %v3622_v27  ;;  %v3616_v21 = vsel %vm993_vm2, %v8972_v55, -inf  ;;  %v8978_v27 = vpop.permute.xlu0 %4243  ;;  %v8980_v39 = vpop.permute.xlu2 %4527 }
 0x62c   : > { %3620 = vmax.xlane.f32.xlu0 %v3619_v28  ;;  %10456 = vst [vmem:[#allocation44_spill] sm:$0xff] %v8980_v39 }
 0x633   : > { %3614 = vmax.xlane.f32.xlu2 %v3613_v32  ;;  %v8982_v28 = vpop.permute.xlu0 %4193  ;;  %v8984_v0 = vpop.permute.xlu2 %4501 }
 0x634   : > { %3617 = vmax.xlane.f32.xlu0 %v3616_v21  ;;  %10457 = vst [vmem:[#allocation25_spill] sm:$0xff] %v8984_v0 }
 0x648   : > { %v3531_v45 = vpop.xlane.xlu0 %3530 }
 0x649   : > { %v3625_v47 = vsub.f32 %v8790_v35, %v3531_v45 }
 0x64a   : > { %v3537_v59 = vpop.xlane.xlu2 %3536 }
 0x64b   : > { %v3627_v32 = vsub.f32 %v8793_v8, %v3537_v59  ;;  %v3657_v37 = vmul.f32 1.442695, %v3625_v47 }
 0x64d   : > { %v3661_v14 = vmul.f32 1.442695, %v3627_v32  ;;  %6857 = vpow2.f32 %v3657_v37 }
 0x64f   : > { %6859 = vpow2.f32 %v3661_v14 }
 0x650   : > { %v3534_v21 = vpop.xlane.xlu1 %3533 }
 0x651   : > { %v3626_v56 = vsub.f32 %v8809_v61, %v3534_v21 }
 0x652   : > { %v3540_v39 = vpop.xlane.xlu0 %3539 }
 0x653   : > { %v3628_v40 = vsub.f32 %v8812_v3, %v3540_v39  ;;  %v8992_v50 = vpop.eup %6857  ;;  %v3659_v0 = vmul.f32 1.442695, %v3626_v56 }
 0x654   : > { %v3721_v35 = vsel %vm993_vm2, %v8992_v50, 0.0 }
 0x655   : > { %v8994_v7 = vpop.eup %6859  ;;  %v3663_v33 = vmul.f32 1.442695, %v3628_v40  ;;  %6861 = vpow2.f32 %v3659_v0  ;;  %3722 = vadd.xlane.f32.xlu0 %v3721_v35 }
 0x656   : > { %v3727_v37 = vsel %vm993_vm2, %v8994_v7, 0.0 }
 0x657   : > { %6863 = vpow2.f32 %v3663_v33  ;;  %3728 = vadd.xlane.f32.xlu2 %v3727_v37 }
 0x658   : > { %v3555_v8 = vpop.xlane.xlu1 %3554 }
 0x659   : > { %v3633_v61 = vsub.f32 %v8823_v9, %v3555_v8 }
 0x65a   : > { %v3561_v39 = vpop.xlane.xlu2 %3560 }
 0x65b   : > { %v3635_v3 = vsub.f32 %v8826_v20, %v3561_v39  ;;  %v9002_v56 = vpop.eup %6861  ;;  %v3673_v14 = vmul.f32 1.442695, %v3633_v61 }
 0x65c   : > { %v3724_v0 = vsel %vm993_vm2, %v9002_v56, 0.0 }
 0x65d   : > { %v9004_v40 = vpop.eup %6863  ;;  %v3677_v45 = vmul.f32 1.442695, %v3635_v3  ;;  %6865 = vpow2.f32 %v3673_v14  ;;  %3725 = vadd.xlane.f32.xlu1 %v3724_v0 }
 0x65e   : > { %v3730_v33 = vsel %vm993_vm2, %v9004_v40, 0.0  ;;  %v3543_v9 = vpop.xlane.xlu0 %3542 }
 0x65f   : > { %6867 = vpow2.f32 %v3677_v45  ;;  %3731 = vadd.xlane.f32.xlu0 %v3730_v33  ;;  %v3629_v59 = vsub.f32 %v8835_v31, %v3543_v9 }
 0x661   : > { %v3665_v20 = vmul.f32 1.442695, %v3629_v59 }
 0x662   : > { %v3558_v47 = vpop.xlane.xlu2 %3557 }
 0x663   : > { %v3634_v32 = vsub.f32 %v8838_v17, %v3558_v47  ;;  %v9012_v21 = vpop.eup %6865  ;;  %6869 = vpow2.f32 %v3665_v20 }
 0x664   : > { %v3745_v8 = vsel %vm993_vm2, %v9012_v21, 0.0 }
 0x665   : > { %v9014_v35 = vpop.eup %6867  ;;  %v3675_v37 = vmul.f32 1.442695, %v3634_v32  ;;  %3746 = vadd.xlane.f32.xlu1 %v3745_v8 }
 0x666   : > { %v3751_v61 = vsel %vm993_vm2, %v9014_v35, 0.0  ;;  %v3546_v31 = vpop.xlane.xlu1 %3545  ;;  %v3549_v39 = vpop.xlane.xlu0 %3548 }
 0x667   : > { %6871 = vpow2.f32 %v3675_v37  ;;  %3752 = vadd.xlane.f32.xlu2 %v3751_v61  ;;  %v3630_v3 = vsub.f32 %v8845_v2, %v3546_v31  ;;  %v3631_v17 = vsub.f32 %v8848_v10, %v3549_v39 }
 0x669   : > { %v9022_v14 = vpop.eup %6869  ;;  %v3667_v45 = vmul.f32 1.442695, %v3630_v3  ;;  %v3669_v0 = vmul.f32 1.442695, %v3631_v17 }
 0x66a   : > { %v3733_v33 = vsel %vm993_vm2, %v9022_v14, 0.0 }
 0x66b   : > { %6873 = vpow2.f32 %v3667_v45  ;;  %3734 = vadd.xlane.f32.xlu0 %v3733_v33 }
 0x66c   : > { %6875 = vpow2.f32 %v3669_v0 }
 0x66d   : > { %v9026_v9 = vpop.eup %6871 }
 0x66e   : > { %v3748_v59 = vsel %vm993_vm2, %v9026_v9, 0.0  ;;  %v3567_v20 = vpop.xlane.xlu2 %3566  ;;  %v3552_v2 = vpop.xlane.xlu1 %3551 }
 0x66f   : > { %3749 = vadd.xlane.f32.xlu2 %v3748_v59  ;;  %v3637_v10 = vsub.f32 %v8861_v6, %v3567_v20  ;;  %v3632_v47 = vsub.f32 %v8858_v30, %v3552_v2  ;;  %v3564_v32 = vpop.xlane.xlu0 %3563 }
 0x670   : > { %v3636_v37 = vsub.f32 %v8855_v5, %v3564_v32 }
 0x671   : > { %v9033_v8 = vpop.eup %6873  ;;  %v3681_v61 = vmul.f32 1.442695, %v3637_v10  ;;  %v3671_v31 = vmul.f32 1.442695, %v3632_v47 }
 0x672   : > { %v9035_v39 = vpop.eup %6875  ;;  %v3679_v3 = vmul.f32 1.442695, %v3636_v37  ;;  %v3736_v30 = vsel %vm993_vm2, %v9033_v8, 0.0 }
 0x673   : > { %6877 = vpow2.f32 %v3681_v61  ;;  %v3739_v17 = vsel %vm993_vm2, %v9035_v39, 0.0 }
 0x674   : > { %6879 = vpow2.f32 %v3671_v31  ;;  %3740 = vadd.xlane.f32.xlu0 %v3739_v17 }
 0x675   : > { %6881 = vpow2.f32 %v3679_v3 }
 0x676   : > { %v3573_v6 = vpop.xlane.xlu2 %3572  ;;  %v3579_v5 = vpop.xlane.xlu1 %3578 }
 0x677   : > { %3737 = vadd.xlane.f32.xlu2 %v3736_v30  ;;  %v3639_v45 = vsub.f32 %v8876_v49, %v3573_v6  ;;  %v3641_v0 = vsub.f32 %v8870_v16, %v3579_v5  ;;  %v3570_v33 = vpop.xlane.xlu0 %3569 }
 0x678   : > { %v3638_v47 = vsub.f32 %v8873_v22, %v3570_v33 }
 0x679   : > { %v9043_v59 = vpop.eup %6877  ;;  %v3685_v20 = vmul.f32 1.442695, %v3639_v45  ;;  %v3689_v2 = vmul.f32 1.442695, %v3641_v0 }
 0x67a   : > { %v9045_v10 = vpop.eup %6879  ;;  %v3757_v16 = vsel %vm993_vm2, %v9043_v59, 0.0  ;;  %v3683_v61 = vmul.f32 1.442695, %v3638_v47 }
 0x67b   : > { %v9048_v32 = vpop.eup %6881  ;;  %6883 = vpow2.f32 %v3685_v20  ;;  %v3742_v37 = vsel %vm993_vm2, %v9045_v10, 0.0 }
 0x67c   : > { %6885 = vpow2.f32 %v3689_v2  ;;  %3743 = vadd.xlane.f32.xlu0 %v3742_v37  ;;  %v3754_v49 = vsel %vm993_vm2, %v9048_v32, 0.0 }
 0x67d   : > { %3755 = vadd.xlane.f32.xlu1 %v3754_v49  ;;  %6887 = vpow2.f32 %v3683_v61 }
 0x67e   : > { %v3582_v31 = vpop.xlane.xlu2 %3581  ;;  %v3585_v3 = vpop.xlane.xlu1 %3584 }
 0x67f   : > { %3758 = vadd.xlane.f32.xlu2 %v3757_v16  ;;  %v3643_v22 = vsub.f32 %v8885_v12, %v3585_v3  ;;  %v3576_v17 = vpop.xlane.xlu0 %3575  ;;  %v3642_v6 = vsub.f32 %v8888_v42, %v3582_v31 }
 0x680   : > { %v3640_v0 = vsub.f32 %v8891_v63, %v3576_v17 }
 0x681   : > { %v9057_v30 = vpop.eup %6883  ;;  %v3693_v5 = vmul.f32 1.442695, %v3643_v22  ;;  %v3691_v12 = vmul.f32 1.442695, %v3642_v6 }
 0x682   : > { %v9060_v45 = vpop.eup %6885  ;;  %v3763_v33 = vsel %vm993_vm2, %v9057_v30, 0.0  ;;  %v3687_v2 = vmul.f32 1.442695, %v3640_v0 }
 0x683   : > { %v3769_v20 = vsel %vm993_vm2, %v9060_v45, 0.0  ;;  %6889 = vpow2.f32 %v3693_v5  ;;  %v9068_v16 = vpop.eup %6887 }
 0x684   : > { %3764 = vadd.xlane.f32.xlu0 %v3763_v33  ;;  %6891 = vpow2.f32 %v3691_v12  ;;  %v3760_v17 = vsel %vm993_vm2, %v9068_v16, 0.0 }
 0x685   : > { %3770 = vadd.xlane.f32.xlu1 %v3769_v20  ;;  %6893 = vpow2.f32 %v3687_v2 }
 0x686   : > { %v3588_v47 = vpop.xlane.xlu2 %3587  ;;  %v3591_v37 = vpop.xlane.xlu1 %3590 }
 0x687   : > { %v3644_v42 = vsub.f32 %v8900_v24, %v3588_v47  ;;  %v3603_v49 = vpop.xlane.xlu0 %3602  ;;  %v3645_v61 = vsub.f32 %v8903_v41, %v3591_v37 }
 0x688   : > { %v3649_v3 = vsub.f32 %v8908_v13, %v3603_v49 }
 0x689   : > { %v3695_v63 = vmul.f32 1.442695, %v3644_v42  ;;  %v9071_v31 = vpop.eup %6889  ;;  %v3697_v24 = vmul.f32 1.442695, %v3645_v61 }
 0x68a   : > { %v3775_v22 = vsel %vm993_vm2, %v9071_v31, 0.0  ;;  %v3705_v6 = vmul.f32 1.442695, %v3649_v3  ;;  %v9078_v0 = vpop.eup %6891 }
 0x68b   : > { %6895 = vpow2.f32 %v3695_v63  ;;  %v9081_v20 = vpop.eup %6893 }
 0x68c   : > { %3761 = vadd.xlane.f32.xlu0 %v3760_v17  ;;  %6897 = vpow2.f32 %v3697_v24  ;;  %v3766_v37 = vsel %vm993_vm2, %v9081_v20, 0.0 }
 0x68d   : > { %3776 = vadd.xlane.f32.xlu1 %v3775_v22  ;;  %6899 = vpow2.f32 %v3705_v6 }
 0x68e   : > { %v3609_v5 = vpop.xlane.xlu2 %3608  ;;  %v3606_v61 = vpop.xlane.xlu1 %3605 }
 0x68f   : > { %v3651_v41 = vsub.f32 %v8917_v60, %v3609_v5  ;;  %v3612_v33 = vpop.xlane.xlu0 %3611  ;;  %v3772_v60 = vsel %vm993_vm2, %v9078_v0, 0.0  ;;  %v3650_v24 = vsub.f32 %v8920_v51, %v3606_v61 }
 0x690   : > { %v3652_v2 = vsub.f32 %v8923_v19, %v3612_v33 }
 0x691   : > { %v9083_v13 = vpop.eup %6895  ;;  %v3709_v12 = vmul.f32 1.442695, %v3651_v41  ;;  %v3707_v33 = vmul.f32 1.442695, %v3650_v24 }
 0x692   : > { %v3778_v47 = vsel %vm993_vm2, %v9083_v13, 0.0  ;;  %v3711_v42 = vmul.f32 1.442695, %v3652_v2  ;;  %v9092_v63 = vpop.eup %6897 }
 0x693   : > { %6901 = vpow2.f32 %v3709_v12  ;;  %3779 = vadd.xlane.f32.xlu2 %v3778_v47  ;;  %v9095_v3 = vpop.eup %6899 }
 0x694   : > { %3767 = vadd.xlane.f32.xlu0 %v3766_v37  ;;  %6903 = vpow2.f32 %v3711_v42  ;;  %v3793_v41 = vsel %vm993_vm2, %v9095_v3, 0.0 }
 0x695   : > { %3773 = vadd.xlane.f32.xlu1 %v3772_v60 }
 0x696   : > { %v3597_v49 = vpop.xlane.xlu2 %3596 }
 0x697   : > { %v3647_v19 = vsub.f32 %v8936_v62, %v3597_v49  ;;  %v3600_v5 = vpop.xlane.xlu0 %3599  ;;  %v3781_v62 = vsel %vm993_vm2, %v9092_v63, 0.0 }
 0x698   : > { %v3648_v60 = vsub.f32 %v8939_v53, %v3600_v5 }
 0x699   : > { %v9097_v22 = vpop.eup %6901  ;;  %v3701_v17 = vmul.f32 1.442695, %v3647_v19 }
 0x69a   : > { %v3799_v6 = vsel %vm993_vm2, %v9097_v22, 0.0  ;;  %v9107_v47 = vpop.eup %6903 }
 0x69b   : > { %6905 = vpow2.f32 %v3701_v17  ;;  %3800 = vadd.xlane.f32.xlu2 %v3799_v6  ;;  %v3802_v19 = vsel %vm993_vm2, %v9107_v47, 0.0 }
 0x69c   : > { %3794 = vadd.xlane.f32.xlu0 %v3793_v41  ;;  %6907 = vpow2.f32 %v3707_v33 }
 0x69d   : > { %3782 = vadd.xlane.f32.xlu1 %v3781_v62 }
 0x69e   : > { %v3594_v12 = vpop.xlane.xlu2 %3593  ;;  %v3624_v51 = vpop.xlane.xlu1 %3623 }
 0x69f   : > { %v3646_v2 = vsub.f32 %v8950_v57, %v3594_v12  ;;  %v3656_v49 = vsub.f32 %v8956_v46, %v3624_v51  ;;  %v3703_v57 = vmul.f32 1.442695, %v3648_v60  ;;  %v3621_v17 = vpop.xlane.xlu0 %3620 }
 0x6a0   : > { %v3655_v62 = vsub.f32 %v8953_v34, %v3621_v17 }
 0x6a1   : > { %v9109_v37 = vpop.eup %6905  ;;  %v3699_v42 = vmul.f32 1.442695, %v3646_v2  ;;  %v3719_v24 = vmul.f32 1.442695, %v3656_v49 }
 0x6a2   : > { %v3787_v61 = vsel %vm993_vm2, %v9109_v37, 0.0  ;;  %v9118_v53 = vpop.eup %6907  ;;  %v3717_v2 = vmul.f32 1.442695, %v3655_v62 }
 0x6a3   : > { %6909 = vpow2.f32 %v3699_v42  ;;  %v3796_v12 = vsel %vm993_vm2, %v9118_v53, 0.0 }
 0x6a4   : > { %3803 = vadd.xlane.f32.xlu0 %v3802_v19  ;;  %6911 = vpow2.f32 %v3703_v57 }
 0x6a5   : > { %3788 = vadd.xlane.f32.xlu1 %v3787_v61  ;;  %6913 = vpow2.f32 %v3719_v24 }
 0x6a6   : > { %v3615_v6 = vpop.xlane.xlu2 %3614 }
 0x6a7   : > { %v3653_v41 = vsub.f32 %v8969_v38, %v3615_v6  ;;  %v3618_v51 = vpop.xlane.xlu0 %3617 }
 0x6a8   : > { %v3654_v34 = vsub.f32 %v8972_v55, %v3618_v51 }
 0x6a9   : > { %v9120_v5 = vpop.eup %6909  ;;  %v3713_v46 = vmul.f32 1.442695, %v3653_v41 }
 0x6aa   : > { %v3784_v33 = vsel %vm993_vm2, %v9120_v5, 0.0  ;;  %v9127_v38 = vpop.eup %6911  ;;  %v3715_v57 = vmul.f32 1.442695, %v3654_v34 }
 0x6ab   : > { %6915 = vpow2.f32 %v3713_v46  ;;  %v9129_v60 = vpop.eup %6913  ;;  %v3790_v61 = vsel %vm993_vm2, %v9127_v38, 0.0 }
 0x6ac   : > { %3785 = vadd.xlane.f32.xlu0 %v3784_v33  ;;  %10459 = vst [vmem:[#allocation17_spill] sm:$0xff] %v9129_v60  ;;  %6917 = vpow2.f32 %v3717_v2  ;;  %v3814_v19 = vsel %vm993_vm2, %v9129_v60, 0.0 }
 0x6ad   : > { %3797 = vadd.xlane.f32.xlu1 %v3796_v12  ;;  %6919 = vpow2.f32 %v3715_v57 }
 0x6b1   : > { %v9131_v42 = vpop.eup %6915 }
 0x6b2   : > { %v3805_v49 = vsel %vm993_vm2, %v9131_v42, 0.0  ;;  %v9140_v17 = vpop.eup %6917 }
 0x6b3   : > { %3806 = vadd.xlane.f32.xlu2 %v3805_v49  ;;  %v3811_v24 = vsel %vm993_vm2, %v9140_v17, 0.0  ;;  %v9144_v55 = vpop.eup %6919 }
 0x6b4   : > { %3791 = vadd.xlane.f32.xlu0 %v3790_v61  ;;  %v3808_v6 = vsel %vm993_vm2, %v9144_v55, 0.0 }
 0x6b5   : > { %3815 = vadd.xlane.f32.xlu1 %v3814_v19 }
 0x6bc   : > { %3812 = vadd.xlane.f32.xlu0 %v3811_v24  ;;  %v10460_v24 = vld [vmem:[#allocation10_spill] sm:$0xff] }
 0x6c4   : > { %3809 = vadd.xlane.f32.xlu0 %v3808_v6 }
 0x6c8   : > { %v3723_v41 = vpop.xlane.xlu0 %3722 }
 0x6c9   : > { %6921 = vrcp.f32 %v3723_v41 }
 0x6ca   : > { %v3729_v46 = vpop.xlane.xlu2 %3728 }
 0x6cb   : > { %4525 = vrot.lane.b32.xlu2 %v7299_v36, %s7130_s29  ;;  %6923 = vrcp.f32 %v3729_v46 }
 0x6ce   : > { %4551 = vrot.lane.b32.xlu1 %v7349_v29, %s7129_s28 }
 0x6cf   : > { %v6922_v33 = vpop.eup %6921 }
 0x6d0   : > { %v3726_v62 = vpop.xlane.xlu1 %3725  ;;  %v3849_v51 = vmul.f32 %v6922_v33, %v8992_v50 }
 0x6d1   : > { %6925 = vrcp.f32 %v3726_v62  ;;  %v6924_v2 = vpop.eup %6923 }
 0x6d2   : > { %v3732_v12 = vpop.xlane.xlu0 %3731  ;;  %v3851_v34 = vmul.f32 %v6924_v2, %v8994_v7  ;;  %v3881_v19 = vpack.c.bf16 %v3849_v51, %v3849_v51 }
 0x6d3   : > { %6927 = vrcp.f32 %v3732_v12  ;;  %4549 = vrot.lane.b32.xlu2 %v7349_v29, %s7130_s29 }
 0x6d4   : > { %v3883_v6 = vpack.c.bf16 %v3851_v34, %v3851_v34  ;;  %v3915_v7 = vunpack.c.l.b16 %v3881_v19 }
 0x6d6   : > { %4621 = vrot.lane.b32.xlu1 %v7307_v48, %s7130_s29  ;;  %v3940_v2 = vunpack.c.l.b16 %v3883_v6 }
 0x6d7   : > { %v6926_v49 = vpop.eup %6925 }
 0x6d8   : > { %v3850_v57 = vmul.f32 %v6926_v49, %v9002_v56  ;;  %4293 = vrot.lane.b32.xlu0 %v10460_v24, %s7128_s27  ;;  %v3747_v62 = vpop.xlane.xlu1 %3746 }
 0x6d9   : > { %v6928_v61 = vpop.eup %6927  ;;  %6929 = vrcp.f32 %v3747_v62 }
 0x6da   : > { %v3852_v41 = vmul.f32 %v6928_v61, %v9004_v40  ;;  %v3753_v46 = vpop.xlane.xlu2 %3752  ;;  %v3882_v12 = vpack.c.bf16 %v3850_v57, %v3850_v57 }
 0x6db   : > { %4575 = vrot.lane.b32.xlu2 %v10303_v26, %s7129_s28 }
 0x6dc   : > { %v3884_v50 = vpack.c.bf16 %v3852_v41, %v3852_v41  ;;  %v3916_v33 = vunpack.c.l.b16 %v3882_v12 }
 0x6de   : > { %v3941_v51 = vunpack.c.l.b16 %v3884_v50  ;;  %v3917_v60 = vpack.c.b16 %v3916_v33, %v3915_v7  ;;  %4671 = vrot.lane.b32.xlu1 %v7255_v58, %s7129_s28  ;;  %v3735_v56 = vpop.xlane.xlu0 %3734 }
 0x6df   : > { %v6930_v49 = vpop.eup %6929 }
 0x6e0   : > { %v3942_v34 = vpack.c.b16 %v3941_v51, %v3940_v2  ;;  %4573 = vrot.lane.b32.xlu0 %v10303_v26, %s7130_s29  ;;  %6474 = vmatmul.msk.bf16.vlgmr.msrb.gmra.mxu0 %vm993_vm2, %v3917_v60  ;;  %v3857_v61 = vmul.f32 %v6930_v49, %v9012_v21 }
 0x6e1   : > { %4131 = vmatpush.bf16.msrb.mxu0 %v8925_v54 }
 0x6e2   : > { %v3750_v40 = vpop.xlane.xlu2 %3749  ;;  %6475 = vmatmul.msk.bf16.vlgmr.msrb.gmra.mxu1 %vm993_vm2, %v3942_v34  ;;  %v3889_v57 = vpack.c.bf16 %v3857_v61, %v3857_v61 }
 0x6e3   : > { %6931 = vrcp.f32 %v3750_v40  ;;  %4156 = vmatpush.bf16.msrb.mxu1 %v8905_v23  ;;  %4599 = vrot.lane.b32.xlu2 %v7277_v18, %s7129_s28 }
 0x6e4   : > { %6933 = vrcp.f32 %v3735_v56  ;;  %v4015_v21 = vunpack.c.l.b16 %v3889_v57 }
 0x6e6   : > { %4719 = vrot.lane.b32.xlu1 %v7327_v1, %s7129_s28 }
 0x6e7   : > { %v3741_v19 = vpop.xlane.xlu0 %3740 }
 0x6e8   : > { %4623 = vrot.lane.b32.xlu0 %v7307_v48, %s7129_s28  ;;  %6935 = vrcp.f32 %v3741_v19 }
 0x6e9   : > { %v6932_v60 = vpop.eup %6931 }
 0x6ea   : > { %v3858_v54 = vmul.f32 %v6932_v60, %v9026_v9  ;;  %v3738_v6 = vpop.xlane.xlu2 %3737  ;;  %v6934_v23 = vpop.eup %6933 }
 0x6eb   : > { %6937 = vrcp.f32 %v3738_v6  ;;  %4597 = vrot.lane.b32.xlu2 %v7277_v18, %s7130_s29  ;;  %v3853_v62 = vmul.f32 %v6934_v23, %v9022_v14 }
 0x6ec   : > { %6939 = vrcp.f32 %v3753_v46  ;;  %v3890_v41 = vpack.c.bf16 %v3858_v54, %v3858_v54 }
 0x6ed   : > { %v3885_v51 = vpack.c.bf16 %v3853_v62, %v3853_v62 }
 0x6ee   : > { %v4016_v12 = vunpack.c.l.b16 %v3890_v41  ;;  %4743 = vrot.lane.b32.xlu1 %v7363_v44, %s7129_s28  ;;  %v6936_v50 = vpop.eup %6935 }
 0x6ef   : > { %v3744_v33 = vpop.xlane.xlu0 %3743  ;;  %v3855_v14 = vmul.f32 %v6936_v50, %v9035_v39  ;;  %v3965_v49 = vunpack.c.l.b16 %v3885_v51 }
 0x6f0   : > { %v4017_v7 = vpack.c.b16 %v4016_v12, %v4015_v21  ;;  %v3756_v2 = vpop.xlane.xlu1 %3755  ;;  %6941 = vrcp.f32 %v3744_v33  ;;  %4647 = vrot.lane.b32.xlu0 %v7339_v15, %s7129_s28 }
 0x6f1   : > { %v6938_v9 = vpop.eup %6937  ;;  %6943 = vrcp.f32 %v3756_v2  ;;  %v3887_v60 = vpack.c.bf16 %v3855_v14, %v3855_v14 }
 0x6f2   : > { %v6940_v46 = vpop.eup %6939  ;;  %v3854_v56 = vmul.f32 %v6938_v9, %v9033_v8  ;;  %6478 = vmatmul.msk.bf16.vlgmr.msra.gmra.mxu0 %vm993_vm2, %v4017_v7 }
 0x6f3   : > { %4231 = vmatpush.bf16.msra.mxu0 %v8941_v11  ;;  %4645 = vrot.lane.b32.xlu2 %v7339_v15, %s7130_s29  ;;  %v3859_v40 = vmul.f32 %v6940_v46, %v9014_v35  ;;  %v3759_v11 = vpop.xlane.xlu2 %3758  ;;  %v3990_v62 = vunpack.c.l.b16 %v3887_v60 }
 0x6f4   : > { %v3886_v34 = vpack.c.bf16 %v3854_v56, %v3854_v56  ;;  %6945 = vrcp.f32 %v3759_v11 }
 0x6f5   : > { %v3891_v39 = vpack.c.bf16 %v3859_v40, %v3859_v40 }
 0x6f6   : > { %v3966_v61 = vunpack.c.l.b16 %v3886_v34  ;;  %v6942_v19 = vpop.eup %6941  ;;  %4765 = vrot.lane.b32.xlu1 %v7265_v4, %s7130_s29 }
 0x6f7   : > { %v6944_v8 = vpop.eup %6943  ;;  %v3856_v54 = vmul.f32 %v6942_v19, %v9045_v10  ;;  %v3765_v6 = vpop.xlane.xlu0 %3764  ;;  %v4040_v10 = vunpack.c.l.b16 %v3891_v39 }
 0x6f8   : > { %v3967_v57 = vpack.c.b16 %v3966_v61, %v3965_v49  ;;  %v3860_v23 = vmul.f32 %v6944_v8, %v9048_v32  ;;  %v3771_v41 = vpop.xlane.xlu1 %3770  ;;  %4669 = vrot.lane.b32.xlu0 %v7255_v58, %s7130_s29 }
 0x6f9   : > { %v3888_v35 = vpack.c.bf16 %v3856_v54, %v3856_v54 }
 0x6fa   : > { %6476 = vmatmul.msk.bf16.vlgmr.msrb.gmra.mxu2 %vm993_vm2, %v3967_v57  ;;  %v3892_v21 = vpack.c.bf16 %v3860_v23, %v3860_v23  ;;  %v6946_v9 = vpop.eup %6945 }
 0x6fb   : > { %4181 = vmatpush.bf16.msrb.mxu2 %v8927_v52  ;;  %v3991_v12 = vunpack.c.l.b16 %v3888_v35  ;;  %4695 = vrot.lane.b32.xlu2 %v7287_v25, %s7129_s28  ;;  %v3861_v52 = vmul.f32 %v6946_v9, %v9043_v59 }
 0x6fc   : > { %v4041_v50 = vunpack.c.l.b16 %v3892_v21 }
 0x6fd   : > { %v3992_v7 = vpack.c.b16 %v3991_v12, %v3990_v62  ;;  %v3893_v56 = vpack.c.bf16 %v3861_v52, %v3861_v52 }
 0x6fe   : > { %v4042_v32 = vpack.c.b16 %v4041_v50, %v4040_v10  ;;  %4815 = vrot.lane.b32.xlu1 %v10384_v43, %s7129_s28  ;;  %v10461_v10 = vld [vmem:[#allocation20_spill] sm:$0xff] }
 0x6ff   : > { %6477 = vmatmul.msk.bf16.vlgmr.msrb.gmra.mxu3 %vm993_vm2, %v3992_v7  ;;  %v3762_v33 = vpop.xlane.xlu0 %3761  ;;  %v4065_v19 = vunpack.c.l.b16 %v3893_v56 }
 0x700   : > { %v3777_v2 = vpop.xlane.xlu1 %3776  ;;  %6479 = vmatmul.msk.bf16.vlgmr.msra.gmra.mxu1 %vm993_vm2, %v4042_v32  ;;  %4206 = vmatpush.bf16.msrb.mxu3 %v8982_v28  ;;  %6947 = vrcp.f32 %v3762_v33 }
 0x701   : > { %6949 = vrcp.f32 %v3777_v2  ;;  %4256 = vmatpush.bf16.msra.mxu1 %v8978_v27  ;;  %4693 = vrot.lane.b32.xlu0 %v7287_v25, %s7130_s29 }
 0x702   : > { %6951 = vrcp.f32 %v3765_v6 }
 0x703   : > { %6953 = vrcp.f32 %v3771_v41  ;;  %4717 = vrot.lane.b32.xlu2 %v7327_v1, %s7130_s29 }
 0x706   : > { %v6948_v46 = vpop.eup %6947  ;;  %4839 = vrot.lane.b32.xlu1 %v10460_v24, %s7129_s28  ;;  %v3780_v51 = vpop.xlane.xlu2 %3779 }
 0x707   : > { %v6950_v28 = vpop.eup %6949  ;;  %v3862_v14 = vmul.f32 %v6948_v46, %v9068_v16  ;;  %6955 = vrcp.f32 %v3780_v51  ;;  %v3768_v27 = vpop.xlane.xlu0 %3767  ;;  %v10463_v51 = vld [vmem:[#allocation34_spill] sm:$0xff] }
 0x708   : > { %v6952_v34 = vpop.eup %6951  ;;  %v3774_v40 = vpop.xlane.xlu1 %3773  ;;  %6957 = vrcp.f32 %v3768_v27  ;;  %v3867_v61 = vmul.f32 %v6950_v28, %v9071_v31  ;;  %v4509_v28 = vsel %vm567_vm1, %v10463_v51, 0 }
 0x709   : > { %v6954_v49 = vpop.eup %6953  ;;  %v3894_v59 = vpack.c.bf16 %v3862_v14, %v3862_v14  ;;  %6959 = vrcp.f32 %v3774_v40  ;;  %4767 = vrot.lane.b32.xlu0 %v7265_v4, %s7129_s28  ;;  %v3863_v8 = vmul.f32 %v6952_v34, %v9057_v30  ;;  %v10464_v14 = vld [vmem:[#allocation5_spill] sm:$0xff] }
 0x70a   : > { %v3865_v16 = vmul.f32 %v6954_v49, %v9060_v45  ;;  %v3899_v6 = vpack.c.bf16 %v3867_v61, %v3867_v61  ;;  %v10465_v40 = vld [vmem:[#allocation45_spill] sm:$0xff]  ;;  %v10466_v61 = vld [vmem:[#allocation3_spill] sm:$0xff] }
 0x70b   : > { %v4066_v60 = vunpack.c.l.b16 %v3894_v59  ;;  %4741 = vrot.lane.b32.xlu2 %v7363_v44, %s7130_s29  ;;  %v3895_v31 = vpack.c.bf16 %v3863_v8, %v3863_v8  ;;  %v4485_v49 = vsel %vm567_vm1, %v10465_v40, 0  ;;  %v10468_v40 = vld [vmem:[#allocation25_spill] sm:$0xff] }
 0x70c   : > { %v3897_v21 = vpack.c.bf16 %v3865_v16, %v3865_v16  ;;  %v4140_v7 = vunpack.c.l.b16 %v3899_v6 }
 0x70d   : > { %v6956_v57 = vpop.eup %6955  ;;  %v4067_v54 = vpack.c.b16 %v4066_v60, %v4065_v19 }
 0x70e   : > { %v6958_v11 = vpop.eup %6957  ;;  %v3868_v39 = vmul.f32 %v6956_v57, %v9083_v13  ;;  %4837 = vrot.lane.b32.xlu1 %v10460_v24, %s7130_s29  ;;  %v3801_v30 = vpop.xlane.xlu2 %3800  ;;  %v10462_v13 = vld [vmem:[#allocation6_spill] sm:$0xff]  ;;  %v4115_v2 = vunpack.c.l.b16 %v3897_v21 }
 0x70f   : > { %v6960_v23 = vpop.eup %6959  ;;  %v3864_v41 = vmul.f32 %v6958_v11, %v9081_v20  ;;  %6480 = vmatmul.msk.bf16.vlgmr.msra.gmra.mxu2 %vm993_vm2, %v4067_v54  ;;  %v3795_v35 = vpop.xlane.xlu0 %3794  ;;  %6961 = vrcp.f32 %v3801_v30  ;;  %v4090_v20 = vunpack.c.l.b16 %v3895_v31 }
 0x710   : > { %v3900_v62 = vpack.c.bf16 %v3868_v39, %v3868_v39  ;;  %v3866_v45 = vmul.f32 %v6960_v23, %v9078_v0  ;;  %v3783_v12 = vpop.xlane.xlu1 %3782  ;;  %4281 = vmatpush.bf16.msra.mxu2 %v10461_v10 }
 0x711   : > { %v3896_v50 = vpack.c.bf16 %v3864_v41, %v3864_v41  ;;  %4789 = vrot.lane.b32.xlu0 %v10462_v13, %s7130_s29 }
 0x712   : > { %v4141_v32 = vunpack.c.l.b16 %v3900_v62  ;;  %v3898_v33 = vpack.c.bf16 %v3866_v45, %v3866_v45 }
 0x713   : > { %v4091_v9 = vunpack.c.l.b16 %v3896_v50  ;;  %4791 = vrot.lane.b32.xlu2 %v10462_v13, %s7129_s28  ;;  %s6300_s28 = sshll.u32 %s6293_s22, 3 }
 0x714   : > { %v4142_v52 = vpack.c.b16 %v4141_v32, %v4140_v7  ;;  %v4116_v46 = vunpack.c.l.b16 %v3898_v33  ;;  %p250_p4 = scmp.lt.s32.totalorder %s6300_s28, 15 }
 0x715   : > { %v4092_v0 = vpack.c.b16 %v4091_v9, %v4090_v20  ;;  %v6962_v34 = vpop.eup %6961 }
 0x716   : > { %v4117_v56 = vpack.c.b16 %v4116_v46, %v4115_v2  ;;  %5275 = vrot.lane.b32.xlu1 %v10464_v14, %s7131_s11  ;;  %6483 = vmatmul.msk.bf16.vlgmr.msrb.gmra.mxu1 %vm993_vm2, %v4142_v52  ;;  %v3875_v19 = vmul.f32 %v6962_v34, %v9097_v22  ;;  %v10467_v46 = vld [vmem:[#allocation44_spill] sm:$0xff]  ;;  %s10552_s28 = smov (!%p250_p4, %s6300_s28), 15 }
 0x717   : > { %6481 = vmatmul.msk.bf16.vlgmr.msra.gmra.mxu3 %vm993_vm2, %v4092_v0  ;;  %4518 = vmatpush.bf16.xpose.msrb.mxu1 %v4509_v28  ;;  %v3804_v27 = vpop.xlane.xlu0 %3803  ;;  %v4533_v0 = vsel %vm567_vm1, %v10467_v46, 0  ;;  %s6301_s22 = sshll.u32 %s10552_s28, 3 }
 0x718   : > { %v3789_v59 = vpop.xlane.xlu1 %3788  ;;  %6482 = vmatmul.msk.bf16.vlgmr.msrb.gmra.mxu0 %vm993_vm2, %v4117_v56  ;;  %6963 = vrcp.f32 %v3804_v27  ;;  %v3907_v60 = vpack.c.bf16 %v3875_v19, %v3875_v19  ;;  %s10033_s7 = scalar_lea.vmem %s10239_s6, %s6301_s22 }
 0x719   : > { %4494 = vmatpush.bf16.xpose.msrb.mxu0 %v4485_v49  ;;  %5250 = vrot.lane.b32.xlu0 %v10466_v61, %s7131_s11  ;;  %6965 = vrcp.f32 %v3783_v12 }
 0x71a   : > { %6967 = vrcp.f32 %v3795_v35  ;;  %v4240_v22 = vunpack.c.l.b16 %v3907_v60 }
 0x71b   : > { %4813 = vrot.lane.b32.xlu2 %v10384_v43, %s7130_s29 }
 0x71e   : > { %v6964_v8 = vpop.eup %6963 }
 0x71f   : > { %v3876_v16 = vmul.f32 %v6964_v8, %v9107_v47  ;;  %v3786_v57 = vpop.xlane.xlu0 %3785  ;;  %v6966_v54 = vpop.eup %6965 }
 0x720   : > { %v3798_v11 = vpop.xlane.xlu1 %3797  ;;  %6969 = vrcp.f32 %v3786_v57  ;;  %v6968_v6 = vpop.eup %6967  ;;  %v3869_v23 = vmul.f32 %v6966_v54, %v9092_v63 }
 0x721   : > { %v3908_v39 = vpack.c.bf16 %v3876_v16, %v3876_v16  ;;  %6971 = vrcp.f32 %v3798_v11  ;;  %5325 = vrot.lane.b32.xlu0 %v7349_v29, %s7131_s11  ;;  %v3873_v47 = vmul.f32 %v6968_v6, %v9095_v3 }
 0x722   : > { %6973 = vrcp.f32 %v3789_v59  ;;  %v3901_v62 = vpack.c.bf16 %v3869_v23, %v3869_v23  ;;  %v10470_v23 = vld [vmem:[#allocation17_spill] sm:$0xff] }
 0x723   : > { %v4241_v31 = vunpack.c.l.b16 %v3908_v39  ;;  %5300 = vrot.lane.b32.xlu2 %v7299_v36, %s7131_s11  ;;  %v3905_v10 = vpack.c.bf16 %v3873_v47, %v3873_v47  ;;  %v10469_v39 = vld [vmem:[#allocation19_spill] sm:$0xff] }
 0x724   : > { %v4165_v36 = vunpack.c.l.b16 %v3901_v62 }
 0x725   : > { %v4242_v41 = vpack.c.b16 %v4241_v31, %v4240_v22  ;;  %v4215_v33 = vunpack.c.l.b16 %v3905_v10 }
 0x726   : > { %v6970_v30 = vpop.eup %6969  ;;  %v3807_v35 = vpop.xlane.xlu2 %3806 }
 0x727   : > { %v6972_v21 = vpop.eup %6971  ;;  %v3870_v45 = vmul.f32 %v6970_v30, %v9120_v5  ;;  %6487 = vmatmul.msk.bf16.vlgmr.msra.gmra.mxu1 %vm993_vm2, %v4242_v41  ;;  %v3792_v29 = vpop.xlane.xlu0 %3791 }
 0x728   : > { %v6974_v12 = vpop.eup %6973  ;;  %v3874_v63 = vmul.f32 %v6972_v21, %v9118_v53  ;;  %6975 = vrcp.f32 %v3792_v29  ;;  %v3816_v27 = vpop.xlane.xlu1 %3815 }
 0x729   : > { %v3902_v50 = vpack.c.bf16 %v3870_v45, %v3870_v45  ;;  %v3871_v3 = vmul.f32 %v6974_v12, %v9109_v37  ;;  %6977 = vrcp.f32 %v3807_v35 }
 0x72a   : > { %v3906_v7 = vpack.c.bf16 %v3874_v63, %v3874_v63 }
 0x72b   : > { %v4166_v32 = vunpack.c.l.b16 %v3902_v50  ;;  %5350 = vrot.lane.b32.xlu2 %v10303_v26, %s7131_s11  ;;  %v3903_v53 = vpack.c.bf16 %v3871_v3, %v3871_v3 }
 0x72c   : > { %v4216_v20 = vunpack.c.l.b16 %v3906_v7 }
 0x72d   : > { %v4167_v5 = vpack.c.b16 %v4166_v32, %v4165_v36  ;;  %v4190_v26 = vunpack.c.l.b16 %v3903_v53 }
 0x72e   : > { %v6976_v9 = vpop.eup %6975  ;;  %v4217_v2 = vpack.c.b16 %v4216_v20, %v4215_v33  ;;  %v4526_v52 = vpop.permute.xlu2 %4525 }
 0x72f   : > { %v3872_v51 = vmul.f32 %v6976_v9, %v9127_v38  ;;  %6484 = vmatmul.msk.bf16.vlgmr.msrb.gmra.mxu2 %vm993_vm2, %v4167_v5  ;;  %v3813_v28 = vpop.xlane.xlu0 %3812  ;;  %v6978_v49 = vpop.eup %6977 }
 0x730   : > { %6486 = vmatmul.msk.bf16.vlgmr.msra.gmra.mxu0 %vm993_vm2, %v4217_v2  ;;  %4542 = vmatpush.bf16.xpose.msrb.mxu2 %v4533_v0  ;;  %6979 = vrcp.f32 %v3813_v28  ;;  %v3877_v59 = vmul.f32 %v6978_v49, %v9131_v42 }
 0x731   : > { %v3904_v37 = vpack.c.bf16 %v3872_v51, %v3872_v51 }
 0x732   : > { %v3909_v16 = vpack.c.bf16 %v3877_v59, %v3877_v59 }
 0x733   : > { %v4191_v56 = vunpack.c.l.b16 %v3904_v37 }
 0x734   : > { %v4265_v42 = vunpack.c.l.b16 %v3909_v16 }
 0x735   : > { %v4192_v14 = vpack.c.b16 %v4191_v56, %v4190_v26 }
 0x736   : > { %v4550_v34 = vpop.permute.xlu2 %4549  ;;  %v6980_v61 = vpop.eup %6979 }
 0x737   : > { %6485 = vmatmul.msk.bf16.vlgmr.msrb.gmra.mxu3 %vm993_vm2, %v4192_v14  ;;  %6493 = vmatmul.msk.bf16.vlgmr.msrb.gmra.mxu1 %vm567_vm1, %v10468_v40  ;;  %v3810_v38 = vpop.xlane.xlu0 %3809  ;;  %v3879_v11 = vmul.f32 %v6980_v61, %v9140_v17 }
 0x738   : > { %6981 = vrcp.f32 %v3810_v38 }
 0x739   : > { %6983 = vrcp.f32 %v3816_v27  ;;  %v3911_v41 = vpack.c.bf16 %v3879_v11, %v3879_v11 }
 0x73b   : > { %v4290_v62 = vunpack.c.l.b16 %v3911_v41 }
 0x73e   : > { %v6982_v19 = vpop.eup %6981  ;;  %v4576_v8 = vpop.permute.xlu2 %4575 }
 0x73f   : > { %v6984_v60 = vpop.eup %6983  ;;  %v3878_v57 = vmul.f32 %v6982_v19, %v9144_v55  ;;  %v4581_v54 = vsel %vm567_vm1, %v4576_v8, 0 }
 0x740   : > { %v4552_v6 = vpop.permute.xlu1 %4551  ;;  %6492 = vmatmul.msk.bf16.vlgmr.msrb.gmra.mxu0 %vm567_vm1, %v10469_v39  ;;  %v3880_v31 = vmul.f32 %v6984_v60, %v10470_v23 }
 0x741   : > { %v3910_v22 = vpack.c.bf16 %v3878_v57, %v3878_v57  ;;  %4590 = vmatpush.bf16.xpose.msra.mxu0 %v4581_v54  ;;  %v4557_v12 = vsel %vm567_vm1, %v4552_v6, 0 }
 0x742   : > { %v3912_v35 = vpack.c.bf16 %v3880_v31, %v3880_v31 }
 0x743   : > { %v4266_v47 = vunpack.c.l.b16 %v3910_v22 }
 0x744   : > { %v4291_v45 = vunpack.c.l.b16 %v3912_v35 }
 0x745   : > { %v4267_v30 = vpack.c.b16 %v4266_v47, %v4265_v42 }
 0x746   : > { %v4600_v21 = vpop.permute.xlu2 %4599  ;;  %v4292_v10 = vpack.c.b16 %v4291_v45, %v4290_v62 }
 0x747   : > { %v4605_v55 = vsel %vm567_vm1, %v4600_v21, 0  ;;  %6488 = vmatmul.msk.bf16.vlgmr.msra.gmra.mxu2 %vm993_vm2, %v4267_v30 }
 0x748   : > { %v4622_v17 = vpop.permute.xlu1 %4621  ;;  %4614 = vmatpush.bf16.xpose.msra.mxu1 %v4605_v55 }
 0x74a   : > { %v4294_v29 = vpop.permute.xlu0 %4293 }
 0x74b   : > { %4306 = vmatpush.bf16.msra.mxu3 %v4294_v29 }
 0x74e   : > { %6489 = vmatmul.msk.bf16.vlgmr.msra.gmra.mxu3 %vm993_vm2, %v4292_v10  ;;  %v4598_v63 = vpop.permute.xlu2 %4597 }
 0x74f   : > { %4566 = vmatpush.bf16.xpose.msrb.mxu3 %v4557_v12  ;;  %6497 = vmatmul.msk.bf16.vlgmr.msra.gmra.mxu1 %vm567_vm1, %v4598_v63 }
 0x750   : > { %v4672_v50 = vpop.permute.xlu1 %4671 }
 0x751   : > { %v4677_v7 = vsel %vm567_vm1, %v4672_v50, 0 }
 0x752   : > { %4686 = vmatpush.bf16.xpose.msrb.mxu0 %v4677_v7  ;;  %v4574_v36 = vpop.permute.xlu0 %4573 }
 0x753   : > { %6496 = vmatmul.msk.bf16.vlgmr.msra.gmra.mxu0 %vm567_vm1, %v4574_v36 }
 0x756   : > { %v4646_v3 = vpop.permute.xlu2 %4645 }
 0x757   : > { %6494 = vmatmul.msk.bf16.vlgmr.msrb.gmra.mxu2 %vm567_vm1, %v4526_v52 }
 0x758   : > { %v4720_v32 = vpop.permute.xlu1 %4719 }
 0x759   : > { %v4725_v5 = vsel %vm567_vm1, %v4720_v32, 0  ;;  %v9353_v32 = vld [vmem:[%s10236_s3 + $0x30] sm:$0xff] }
 0x75a   : > { %v4624_v33 = vpop.permute.xlu0 %4623 }
 0x75b   : > { %v4629_v20 = vsel %vm567_vm1, %v4624_v33, 0 }
 0x75c   : > { %4638 = vmatpush.bf16.xpose.msra.mxu2 %v4629_v20 }
 0x75d   : > { %v9298_v40 = vpop.f32.mrf.mxu0 }
 0x75e   : > { %6495 = vmatmul.msk.bf16.vlgmr.msrb.gmra.mxu3 %vm567_vm1, %v4550_v34  ;;  %v4696_v9 = vpop.permute.xlu2 %4695 }
 0x75f   : > { %v4701_v2 = vsel %vm567_vm1, %v4696_v9, 0  ;;  %v9295_v56 = vpop.f32.mrf.mxu1 }
 0x760   : > { %v4744_v46 = vpop.permute.xlu1 %4743  ;;  %4710 = vmatpush.bf16.xpose.msrb.mxu1 %v4701_v2 }
 0x761   : > { %v4749_v52 = vsel %vm567_vm1, %v4744_v46, 0 }
 0x762   : > { %v4648_v0 = vpop.permute.xlu0 %4647 }
 0x763   : > { %v4653_v53 = vsel %vm567_vm1, %v4648_v0, 0 }
 0x764   : > { %4734 = vmatpush.bf16.xpose.msrb.mxu2 %v4725_v5  ;;  %4662 = vmatpush.bf16.xpose.msra.mxu3 %v4653_v53 }
 0x765   : > { %v9307_v16 = vpop.f32.mrf.mxu0 }
 0x766   : > { %v4718_v51 = vpop.permute.xlu2 %4717 }
 0x767   : > { %6498 = vmatmul.msk.bf16.vlgmr.msra.gmra.mxu2 %vm567_vm1, %v4622_v17  ;;  %v9303_v61 = vpop.f32.mrf.mxu1 }
 0x768   : > { %v4766_v28 = vpop.permute.xlu1 %4765 }
 0x76a   : > { %v4670_v37 = vpop.permute.xlu0 %4669 }
 0x76b   : > { %6500 = vmatmul.msk.bf16.vlgmr.msrb.gmra.mxu0 %vm567_vm1, %v4670_v37 }
 0x76c   : > { %4758 = vmatpush.bf16.xpose.msrb.mxu3 %v4749_v52 }
 0x76e   : > { %6499 = vmatmul.msk.bf16.vlgmr.msra.gmra.mxu3 %vm567_vm1, %v4646_v3  ;;  %v4742_v26 = vpop.permute.xlu2 %4741 }
 0x76f   : > { %v9315_v22 = vpop.f32.mrf.mxu0 }
 0x770   : > { %v4816_v14 = vpop.permute.xlu1 %4815 }
 0x771   : > { %v4821_v27 = vsel %vm567_vm1, %v4816_v14, 0 }
 0x772   : > { %4830 = vmatpush.bf16.xpose.msra.mxu2 %v4821_v27 }
 0x773   : > { %v4694_v34 = vpop.permute.xlu0 %4693 }
 0x774   : > { %6501 = vmatmul.msk.bf16.vlgmr.msrb.gmra.mxu1 %vm567_vm1, %v4694_v34 }
 0x776   : > { %v4792_v38 = vpop.permute.xlu2 %4791 }
 0x777   : > { %v4797_v49 = vsel %vm567_vm1, %v4792_v38, 0  ;;  %6502 = vmatmul.msk.bf16.vlgmr.msrb.gmra.mxu2 %vm567_vm1, %v4718_v51  ;;  %v9320_v41 = vpop.f32.mrf.mxu0 }
 0x778   : > { %v4840_v59 = vpop.permute.xlu1 %4839  ;;  %4806 = vmatpush.bf16.xpose.msra.mxu1 %v4797_v49  ;;  %10473 = vst [vmem:[#allocation33_spill] sm:$0xff] %v9320_v41 }
 0x779   : > { %v4845_v19 = vsel %vm567_vm1, %v4840_v59, 0 }
 0x77a   : > { %4854 = vmatpush.bf16.xpose.msra.mxu3 %v4845_v19 }
 0x77b   : > { %v4768_v8 = vpop.permute.xlu0 %4767 }
 0x77c   : > { %v4773_v60 = vsel %vm567_vm1, %v4768_v8, 0 }
 0x77d   : > { %4782 = vmatpush.bf16.xpose.msra.mxu0 %v4773_v60  ;;  %v9310_v11 = vpop.f32.mrf.mxu1  ;;  %v9324_v21 = vpop.f32.mrf.mxu2 }
 0x77e   : > { %6503 = vmatmul.msk.bf16.vlgmr.msrb.gmra.mxu3 %vm567_vm1, %v4742_v26  ;;  %v4814_v57 = vpop.permute.xlu2 %4813  ;;  %10471 = vst [vmem:[#allocation29_spill] sm:$0xff] %v9310_v11 }
 0x780   : > { %v4838_v54 = vpop.permute.xlu1 %4837 }
 0x782   : > { %v9326_v55 = vpop.f32.mrf.mxu3 }
 0x783   : > { %v4790_v6 = vpop.permute.xlu0 %4789 }
 0x784   : > { %6504 = vmatmul.msk.bf16.vlgmr.msra.gmra.mxu0 %vm567_vm1, %v4766_v28  ;;  %6505 = vmatmul.msk.bf16.vlgmr.msra.gmra.mxu1 %vm567_vm1, %v4790_v6  ;;  %v9376_v28 = vld [vmem:[%s10236_s3 + $0x38] sm:$0xff] }
 0x785   : > { %v9317_v31 = vpop.f32.mrf.mxu1  ;;  %v9332_v45 = vpop.f32.mrf.mxu2 }
 0x786   : > { %v5301_v39 = vpop.permute.xlu2 %5300  ;;  %10472 = vst [vmem:[#allocation43_spill] sm:$0xff] %v9317_v31 }
 0x787   : > { %6506 = vmatmul.msk.bf16.vlgmr.msra.gmra.mxu2 %vm567_vm1, %v4814_v57 }
 0x788   : > { %v5276_v23 = vpop.permute.xlu1 %5275  ;;  %5313 = vmatpush.bf16.msrb.mxu2 %v5301_v39 }
 0x789   : > { %5288 = vmatpush.bf16.msrb.mxu1 %v5276_v23 }
 0x78a   : > { %v9336_v12 = vpop.f32.mrf.mxu3 }
 0x78b   : > { %v5251_v42 = vpop.permute.xlu0 %5250 }
 0x78c   : > { %5263 = vmatpush.bf16.msrb.mxu0 %v5251_v42 }
 0x78e   : > { %6507 = vmatmul.msk.bf16.vlgmr.msra.gmra.mxu3 %vm567_vm1, %v4838_v54  ;;  %v5351_v47 = vpop.permute.xlu2 %5350 }
 0x790   : > { %5363 = vmatpush.bf16.msra.mxu0 %v5351_v47 }
 0x792   : > { %v9340_v63 = vpop.f32.mrf.mxu2 }
 0x793   : > { %v5326_v30 = vpop.permute.xlu0 %5325  ;;  %v9322_v35 = vpop.f32.mrf.mxu1  ;;  %10479 = vst [vmem:[#allocation45_spill] sm:$0xff] %v9340_v63 }
 0x794   : > { %10474 = vst [vmem:[#allocation10_spill] sm:$0xff] %v9322_v35  ;;  %5338 = vmatpush.bf16.msrb.mxu3 %v5326_v30 }
 0x795   : > { %v9328_v62 = vpop.f32.mrf.mxu0 }
 0x796   : > { %10475 = vst [vmem:[#allocation20_spill] sm:$0xff] %v9328_v62 }
 0x79a   : > { %v9344_v7 = vpop.f32.mrf.mxu3  ;;  %v9348_v3 = vpop.f32.mrf.mxu2 }
 0x79b   : > { %v9330_v17 = vpop.f32.mrf.mxu1  ;;  %10481 = vst [vmem:[#allocation44_spill] sm:$0xff] %v9344_v7 }
 0x79c   : > { %10476 = vst [vmem:[#allocation6_spill] sm:$0xff] %v9330_v17 }
 0x79d   : > { %v9338_v10 = vpop.f32.mrf.mxu0  ;;  %10483 = vst [vmem:[#allocation19_spill] sm:$0xff] %v9348_v3 }
 0x79e   : > { %10478 = vst [vmem:[#allocation5_spill] sm:$0xff] %v9338_v10 }
 0x7a2   : > { %v9360_v9 = vpop.f32.mrf.mxu3 }
 0x7a3   : > { %10485 = vst [vmem:[#allocation49_spill] sm:$0xff] %v9360_v9 }
 0x7a4   : > { %v9334_v29 = vpop.f32.mrf.mxu1 }
 0x7a5   : > { %10477 = vst [vmem:[#allocation34_spill] sm:$0xff] %v9334_v29 }
 0x7ac   : > { %v9342_v50 = vpop.f32.mrf.mxu1 }
 0x7ad   : > { %10480 = vst [vmem:[#allocation3_spill] sm:$0xff] %v9342_v50  ;;  %v9346_v36 = vpop.f32.mrf.mxu0 }
 0x7ae   : > { %10482 = vst [vmem:[#allocation25_spill] sm:$0xff] %v9346_v36 }
 0x7b2   : > { %v9364_v46 = vpop.f32.mrf.mxu2 }
 0x7b3   : > { %10486 = vst [vmem:[#allocation50_spill] sm:$0xff] %v9364_v46 }
 0x7b4   : > { %v4520_v33 = vpop.f32.mrf.mxu1 }
 0x7b5   : > { %v9355_v20 = vpop.f32.mrf.mxu0  ;;  %v9358_v5 = vadd.f32 %v9353_v32, %v4520_v33 }
 0x7b6   : > { %10484 = vst [vmem:[#allocation17_spill] sm:$0xff] %v9355_v20 }
 0x7b7   : > { %v4867_v2 = vsel %vm993_vm2, %v9358_v5, -inf }
 0x7b8   : > { %4868 = vmax.xlane.f32.xlu1 %v4867_v2 }
 0x7ba   : > { %v9369_v52 = vpop.f32.mrf.mxu3  ;;  %v9378_v26 = vpop.f32.mrf.mxu2 }
 0x7bb   : > { %10487 = vst [vmem:[#allocation51_spill] sm:$0xff] %v9369_v52 }
 0x7bc   : > { %v4522_v37 = vpop.f32.mrf.mxu1  ;;  %10488 = vst [vmem:[#allocation52_spill] sm:$0xff] %v9378_v26 }
 0x7bd   : > { %v4496_v0 = vpop.f32.mrf.mxu0  ;;  %v9381_v14 = vadd.f32 %v9376_v28, %v4522_v37 }
 0x7be   : > { %v9367_v53 = vadd.f32 %v9353_v32, %v4496_v0 }
 0x7bf   : > { %v4870_v49 = vsel %vm993_vm2, %v9381_v14, -inf }
 0x7c0   : > { %v4861_v51 = vsel %vm993_vm2, %v9367_v53, -inf }
 0x7c1   : > { %4862 = vmax.xlane.f32.xlu0 %v4861_v51 }
 0x7c2   : > { %v9390_v59 = vpop.f32.mrf.mxu3 }
 0x7c3   : > { %10489 = vst [vmem:[#allocation53_spill] sm:$0xff] %v9390_v59 }
 0x7c5   : > { %v4498_v27 = vpop.f32.mrf.mxu0 }
 0x7c6   : > { %v9384_v34 = vadd.f32 %v9376_v28, %v4498_v27 }
 0x7c8   : > { %v4864_v38 = vsel %vm993_vm2, %v9384_v34, -inf }
 0x7c9   : > { %4865 = vmax.xlane.f32.xlu2 %v4864_v38  ;;  %4871 = vmax.xlane.f32.xlu0 %v4870_v49 }
 0x7ca   : > { %v9392_v19 = vpop.f32.mrf.mxu2 }
 0x7cb   : > { %10490 = vst [vmem:[#allocation54_spill] sm:$0xff] %v9392_v19 }
 0x7cc   : > { %v4616_v54 = vpop.f32.mrf.mxu1 }
 0x7cd   : > { %v9404_v23 = vadd.f32 %v9353_v32, %v4616_v54 }
 0x7cf   : > { %v4891_v51 = vsel %vm993_vm2, %v9404_v23, -inf }
 0x7d0   : > { %v4592_v8 = vpop.f32.mrf.mxu0 }
 0x7d1   : > { %v9395_v60 = vadd.f32 %v9353_v32, %v4592_v8  ;;  %v9397_v57 = vpop.f32.mrf.mxu3 }
 0x7d2   : > { %10491 = vst [vmem:[#allocation55_spill] sm:$0xff] %v9397_v57  ;;  %v9399_v6 = vpop.f32.mrf.mxu2 }
 0x7d3   : > { %10492 = vst [vmem:[#allocation56_spill] sm:$0xff] %v9399_v6  ;;  %v4885_v39 = vsel %vm993_vm2, %v9395_v60, -inf }
 0x7d4   : > { %4886 = vmax.xlane.f32.xlu0 %v4885_v39  ;;  %v4618_v37 = vpop.f32.mrf.mxu1 }
 0x7d5   : > { %v9421_v38 = vadd.f32 %v9376_v28, %v4618_v37 }
 0x7d7   : > { %v4894_v39 = vsel %vm993_vm2, %v9421_v38, -inf }
 0x7d8   : > { %v4594_v42 = vpop.f32.mrf.mxu0 }
 0x7d9   : > { %v9407_v47 = vadd.f32 %v9376_v28, %v4594_v42  ;;  %v9409_v30 = vpop.f32.mrf.mxu3 }
 0x7da   : > { %10493 = vst [vmem:[#allocation57_spill] sm:$0xff] %v9409_v30  ;;  %v4544_v33 = vpop.f32.mrf.mxu2 }
 0x7db   : > { %v9412_v2 = vadd.f32 %v9353_v32, %v4544_v33  ;;  %v4888_v0 = vsel %vm993_vm2, %v9407_v47, -inf }
 0x7dc   : > { %4889 = vmax.xlane.f32.xlu2 %v4888_v0  ;;  %4892 = vmax.xlane.f32.xlu0 %v4891_v51 }
 0x7dd   : > { %v4873_v27 = vsel %vm993_vm2, %v9412_v2, -inf }
 0x7de   : > { %4874 = vmax.xlane.f32.xlu1 %v4873_v27 }
 0x7e1   : > { %v4568_v49 = vpop.f32.mrf.mxu3 }
 0x7e2   : > { %v9424_v8 = vadd.f32 %v9353_v32, %v4568_v49  ;;  %v4546_v54 = vpop.f32.mrf.mxu2 }
 0x7e4   : > { %4895 = vmax.xlane.f32.xlu2 %v4894_v39  ;;  %v4879_v42 = vsel %vm993_vm2, %v9424_v8, -inf }
 0x7e5   : > { %4880 = vmax.xlane.f32.xlu0 %v4879_v42 }
 0x7e8   : > { %v4688_v33 = vpop.f32.mrf.mxu0 }
 0x7e9   : > { %v9431_v0 = vadd.f32 %v9353_v32, %v4688_v33  ;;  %v4570_v51 = vpop.f32.mrf.mxu3 }
 0x7ea   : > { %v9434_v37 = vadd.f32 %v9376_v28, %v4570_v51  ;;  %v4640_v39 = vpop.f32.mrf.mxu2 }
 0x7eb   : > { %v4909_v27 = vsel %vm993_vm2, %v9431_v0, -inf  ;;  %v9441_v30 = vadd.f32 %v9353_v32, %v4640_v39  ;;  %v9456_v39 = vadd.f32 %v9376_v28, %v4546_v54 }
 0x7ec   : > { %4910 = vmax.xlane.f32.xlu1 %v4909_v27  ;;  %v4882_v49 = vsel %vm993_vm2, %v9434_v37, -inf }
 0x7ed   : > { %4883 = vmax.xlane.f32.xlu2 %v4882_v49  ;;  %v4897_v49 = vsel %vm993_vm2, %v9441_v30, -inf }
 0x7f0   : > { %v4690_v42 = vpop.f32.mrf.mxu0 }
 0x7f1   : > { %v9444_v33 = vadd.f32 %v9376_v28, %v4690_v42  ;;  %v4712_v57 = vpop.f32.mrf.mxu1  ;;  %v4664_v50 = vpop.f32.mrf.mxu3 }
 0x7f2   : > { %v9447_v51 = vadd.f32 %v9353_v32, %v4712_v57  ;;  %v9466_v20 = vadd.f32 %v9353_v32, %v4664_v50  ;;  %v4642_v59 = vpop.f32.mrf.mxu2 }
 0x7f3   : > { %v4912_v6 = vsel %vm993_vm2, %v9444_v33, -inf  ;;  %v9476_v29 = vadd.f32 %v9376_v28, %v4642_v59 }
 0x7f4   : > { %4913 = vmax.xlane.f32.xlu1 %v4912_v6  ;;  %v4915_v27 = vsel %vm993_vm2, %v9447_v51, -inf  ;;  %v4876_v6 = vsel %vm993_vm2, %v9456_v39, -inf }
 0x7f5   : > { %4916 = vmax.xlane.f32.xlu0 %v4915_v27  ;;  %4898 = vmax.xlane.f32.xlu2 %v4897_v49  ;;  %v4903_v49 = vsel %vm993_vm2, %v9466_v20, -inf  ;;  %v4900_v50 = vsel %vm993_vm2, %v9476_v29, -inf }
 0x7f9   : > { %v4714_v42 = vpop.f32.mrf.mxu1 }
 0x7fa   : > { %v9459_v19 = vadd.f32 %v9376_v28, %v4714_v42 }
 0x7fc   : > { %v4918_v57 = vsel %vm993_vm2, %v9459_v19, -inf }
 0x7fd   : > { %4919 = vmax.xlane.f32.xlu1 %v4918_v57  ;;  %4877 = vmax.xlane.f32.xlu0 %v4876_v6  ;;  %v4666_v57 = vpop.f32.mrf.mxu3 }
 0x7fe   : > { %v9481_v6 = vadd.f32 %v9376_v28, %v4666_v57 }
 0x800   : > { %v4906_v26 = vsel %vm993_vm2, %v9481_v6, -inf }
 0x801   : > { %v4784_v27 = vpop.f32.mrf.mxu0 }
 0x802   : > { %v9469_v54 = vadd.f32 %v9353_v32, %v4784_v27 }
 0x804   : > { %v4933_v42 = vsel %vm993_vm2, %v9469_v54, -inf }
 0x805   : > { %4904 = vmax.xlane.f32.xlu0 %v4903_v49  ;;  %4934 = vmax.xlane.f32.xlu2 %v4933_v42  ;;  %v4760_v27 = vpop.f32.mrf.mxu3 }
 0x806   : > { %v9488_v49 = vadd.f32 %v9353_v32, %v4760_v27 }
 0x808   : > { %v4927_v59 = vsel %vm993_vm2, %v9488_v49, -inf }
 0x80d   : > { %4901 = vmax.xlane.f32.xlu2 %v4900_v50  ;;  %v4762_v42 = vpop.f32.mrf.mxu3  ;;  %v4786_v50 = vpop.f32.mrf.mxu0 }
 0x80e   : > { %v9495_v57 = vadd.f32 %v9376_v28, %v4762_v42  ;;  %v9500_v27 = vadd.f32 %v9376_v28, %v4786_v50 }
 0x810   : > { %v4936_v36 = vsel %vm993_vm2, %v9500_v27, -inf }
 0x815   : > { %4907 = vmax.xlane.f32.xlu2 %v4906_v26  ;;  %v4930_v26 = vsel %vm993_vm2, %v9495_v57, -inf }
 0x816   : > { %5400 = vrot.lane.b32.xlu1 %v7307_v48, %s7131_s11 }
 0x819   : > { %5375 = vrot.lane.b32.xlu0 %v7277_v18, %s7131_s11  ;;  %v4736_v18 = vpop.f32.mrf.mxu2 }
 0x81d   : > { %4928 = vmax.xlane.f32.xlu2 %v4927_v59  ;;  %v9507_v59 = vadd.f32 %v9353_v32, %v4736_v18 }
 0x81f   : > { %v4921_v52 = vsel %vm993_vm2, %v9507_v59, -inf }
 0x821   : > { %v4738_v50 = vpop.f32.mrf.mxu2 }
 0x825   : > { %4931 = vmax.xlane.f32.xlu2 %v4930_v26 }
 0x82b   : > { %v4869_v9 = vpop.xlane.xlu1 %4868 }
 0x834   : > { %v4863_v48 = vpop.xlane.xlu0 %4862 }
 0x835   : > { %v4957_v17 = vsub.f32 %v9367_v53, %v4863_v48 }
 0x837   : > { %v4989_v10 = vmul.f32 1.442695, %v4957_v17  ;;  %v4959_v17 = vsub.f32 %v9358_v5, %v4869_v9 }
 0x839   : > { %6985 = vpow2.f32 %v4989_v10  ;;  %v4993_v31 = vmul.f32 1.442695, %v4959_v17 }
 0x83c   : > { %v4872_v42 = vpop.xlane.xlu0 %4871  ;;  %v4866_v26 = vpop.xlane.xlu2 %4865 }
 0x83d   : > { %5425 = vrot.lane.b32.xlu2 %v7339_v15, %s7131_s11  ;;  %v9513_v15 = vadd.f32 %v9376_v28, %v4738_v50 }
 0x83f   : > { %v4924_v35 = vsel %vm993_vm2, %v9513_v15, -inf  ;;  %v9519_v62 = vpop.eup %6985 }
 0x840   : > { %4937 = vmax.xlane.f32.xlu1 %v4936_v36  ;;  %v4960_v36 = vsub.f32 %v9381_v14, %v4872_v42  ;;  %v5053_v50 = vsel %vm993_vm2, %v9519_v62, 0.0 }
 0x842   : > { %v4995_v48 = vmul.f32 1.442695, %v4960_v36  ;;  %v4958_v36 = vsub.f32 %v9384_v34, %v4866_v26 }
 0x847   : > { %v4887_v46 = vpop.xlane.xlu0 %4886 }
 0x848   : > { %4922 = vmax.xlane.f32.xlu1 %v4921_v52  ;;  %v4965_v10 = vsub.f32 %v9395_v60, %v4887_v46  ;;  %v4991_v46 = vmul.f32 1.442695, %v4958_v36 }
 0x84f   : > { %v4890_v18 = vpop.xlane.xlu2 %4889  ;;  %v4893_v52 = vpop.xlane.xlu0 %4892 }
 0x850   : > { %v4966_v53 = vsub.f32 %v9407_v47, %v4890_v18  ;;  %4925 = vmax.xlane.f32.xlu1 %v4924_v35  ;;  %v5005_v35 = vmul.f32 1.442695, %v4965_v10  ;;  %v4967_v9 = vsub.f32 %v9404_v23, %v4893_v52 }
 0x851   : > { %v4875_v14 = vpop.xlane.xlu1 %4874 }
 0x852   : > { %v5007_v3 = vmul.f32 1.442695, %v4966_v53  ;;  %v5009_v17 = vmul.f32 1.442695, %v4967_v9  ;;  %v4961_v23 = vsub.f32 %v9412_v2, %v4875_v14 }
 0x854   : > { %6987 = vpow2.f32 %v5007_v3  ;;  %v4997_v9 = vmul.f32 1.442695, %v4961_v23 }
 0x855   : > { %6989 = vpow2.f32 %v4995_v48 }
 0x856   : > { %6991 = vpow2.f32 %v4993_v31 }
 0x857   : > { %v4896_v42 = vpop.xlane.xlu2 %4895  ;;  %6993 = vpow2.f32 %v5005_v35 }
 0x858   : > { %5054 = vadd.xlane.f32.xlu1 %v5053_v50  ;;  %v4881_v53 = vpop.xlane.xlu0 %4880  ;;  %6995 = vpow2.f32 %v4991_v46 }
 0x85a   : > { %v9525_v47 = vpop.eup %6987 }
 0x85b   : > { %v5080_v5 = vsel %vm993_vm2, %v9525_v47, 0.0  ;;  %v9530_v3 = vpop.eup %6989 }
 0x85c   : > { %5081 = vadd.xlane.f32.xlu0 %v5080_v5  ;;  %v5062_v18 = vsel %vm993_vm2, %v9530_v3, 0.0  ;;  %v9536_v26 = vpop.eup %6991 }
 0x85d   : > { %v9539_v50 = vpop.eup %6993  ;;  %v5059_v52 = vsel %vm993_vm2, %v9536_v26, 0.0 }
 0x85e   : > { %v5077_v5 = vsel %vm993_vm2, %v9539_v50, 0.0  ;;  %v9549_v46 = vpop.eup %6995 }
 0x85f   : > { %v4911_v60 = vpop.xlane.xlu1 %4910 }
 0x860   : > { %v4973_v48 = vsub.f32 %v9431_v0, %v4911_v60  ;;  %5063 = vadd.xlane.f32.xlu1 %v5062_v18  ;;  %v4884_v34 = vpop.xlane.xlu2 %4883  ;;  %v4968_v0 = vsub.f32 %v9421_v38, %v4896_v42  ;;  %v5056_v18 = vsel %vm993_vm2, %v9549_v46, 0.0 }
 0x861   : > { %v4964_v31 = vsub.f32 %v9434_v37, %v4884_v34 }
 0x862   : > { %v5021_v10 = vmul.f32 1.442695, %v4973_v48  ;;  %v5011_v14 = vmul.f32 1.442695, %v4968_v0  ;;  %v4963_v48 = vsub.f32 %v9424_v8, %v4881_v53 }
 0x863   : > { %v5003_v35 = vmul.f32 1.442695, %v4964_v31 }
 0x864   : > { %6997 = vpow2.f32 %v5021_v10 }
 0x865   : > { %6999 = vpow2.f32 %v5009_v17 }
 0x866   : > { %5060 = vadd.xlane.f32.xlu2 %v5059_v52  ;;  %7001 = vpow2.f32 %v5003_v35  ;;  %v5001_v52 = vmul.f32 1.442695, %v4963_v48 }
 0x867   : > { %v4914_v36 = vpop.xlane.xlu1 %4913  ;;  %7003 = vpow2.f32 %v4997_v9 }
 0x868   : > { %5078 = vadd.xlane.f32.xlu1 %v5077_v5  ;;  %v9547_v37 = vpop.xlane.xlu0 %4916  ;;  %v4974_v60 = vsub.f32 %v9444_v33, %v4914_v36  ;;  %7005 = vpow2.f32 %v5011_v14  ;;  %v4899_v33 = vpop.xlane.xlu2 %4898 }
 0x86a   : > { %v9551_v2 = vpop.eup %6997  ;;  %v5023_v34 = vmul.f32 1.442695, %v4974_v60 }
 0x86b   : > { %v5101_v38 = vsel %vm993_vm2, %v9551_v2, 0.0  ;;  %v9556_v42 = vpop.eup %6999 }
 0x86c   : > { %5102 = vadd.xlane.f32.xlu0 %v5101_v38  ;;  %v5083_v17 = vsel %vm993_vm2, %v9556_v42, 0.0  ;;  %v9563_v10 = vpop.eup %7001  ;;  %7007 = vpow2.f32 %v5023_v34  ;;  %v4969_v34 = vsub.f32 %v9441_v30, %v4899_v33  ;;  %v4975_v30 = vsub.f32 %v9447_v51, %v9547_v37 }
 0x86d   : > { %v9565_v23 = vpop.eup %7003  ;;  %v5074_v0 = vsel %vm993_vm2, %v9563_v10, 0.0  ;;  %7009 = vpow2.f32 %v5001_v52 }
 0x86e   : > { %5057 = vadd.xlane.f32.xlu2 %v5056_v18  ;;  %v9569_v35 = vpop.eup %7005  ;;  %v5065_v53 = vsel %vm993_vm2, %v9565_v23, 0.0 }
 0x86f   : > { %v5086_v36 = vsel %vm993_vm2, %v9569_v35, 0.0 }
 0x870   : > { %5084 = vadd.xlane.f32.xlu1 %v5083_v17  ;;  %v4878_v31 = vpop.xlane.xlu0 %4877 }
 0x871   : > { %v4962_v8 = vsub.f32 %v9456_v39, %v4878_v31  ;;  %v4920_v31 = vpop.xlane.xlu1 %4919 }
 0x872   : > { %v9576_v5 = vpop.eup %7007 }
 0x873   : > { %v4999_v60 = vmul.f32 1.442695, %v4962_v8  ;;  %v5104_v39 = vsel %vm993_vm2, %v9576_v5, 0.0  ;;  %v9583_v48 = vpop.eup %7009 }
 0x874   : > { %5075 = vadd.xlane.f32.xlu0 %v5074_v0  ;;  %v5071_v17 = vsel %vm993_vm2, %v9583_v48, 0.0 }
 0x875   : > { %7011 = vpow2.f32 %v4999_v60 }
 0x876   : > { %5066 = vadd.xlane.f32.xlu2 %v5065_v53 }
 0x878   : > { %v9578_v9 = vpop.xlane.xlu2 %4934  ;;  %5087 = vadd.xlane.f32.xlu1 %v5086_v36  ;;  %v4905_v14 = vpop.xlane.xlu0 %4904 }
 0x879   : > { %v4971_v38 = vsub.f32 %v9466_v20, %v4905_v14  ;;  %v5013_v20 = vmul.f32 1.442695, %v4969_v34  ;;  %v4976_v34 = vsub.f32 %v9459_v19, %v4920_v31 }
 0x87b   : > { %v5017_v18 = vmul.f32 1.442695, %v4971_v38  ;;  %v9589_v8 = vpop.eup %7011  ;;  %v5027_v37 = vmul.f32 1.442695, %v4976_v34 }
 0x87c   : > { %5105 = vadd.xlane.f32.xlu0 %v5104_v39  ;;  %v5068_v33 = vsel %vm993_vm2, %v9589_v8, 0.0 }
 0x87d   : > { %7013 = vpow2.f32 %v5017_v18  ;;  %v5025_v18 = vmul.f32 1.442695, %v4975_v30 }
 0x880   : > { %v4902_v52 = vpop.xlane.xlu2 %4901  ;;  %5072 = vadd.xlane.f32.xlu1 %v5071_v17 }
 0x881   : > { %v4970_v0 = vsub.f32 %v9476_v29, %v4902_v52 }
 0x883   : > { %v5015_v53 = vmul.f32 1.442695, %v4970_v0  ;;  %v9591_v36 = vpop.eup %7013 }
 0x884   : > { %v5095_v14 = vsel %vm993_vm2, %v9591_v36, 0.0 }
 0x885   : > { %7015 = vpow2.f32 %v5015_v53  ;;  %5096 = vadd.xlane.f32.xlu0 %v5095_v14 }
 0x886   : > { %7017 = vpow2.f32 %v5013_v20 }
 0x888   : > { %v5401_v60 = vpop.permute.xlu1 %5400  ;;  %v4908_v29 = vpop.xlane.xlu2 %4907  ;;  %5069 = vadd.xlane.f32.xlu1 %v5068_v33 }
 0x889   : > { %v4972_v38 = vsub.f32 %v9481_v6, %v4908_v29  ;;  %5413 = vmatpush.bf16.msra.mxu2 %v5401_v60  ;;  %v4832_v60 = vpop.f32.mrf.mxu2 }
 0x88b   : > { %v9600_v39 = vpop.eup %7015  ;;  %v5019_v17 = vmul.f32 1.442695, %v4972_v38  ;;  %v5376_v52 = vpop.permute.xlu0 %5375  ;;  %v9624_v38 = vadd.f32 %v9353_v32, %v4832_v60 }
 0x88c   : > { %v9603_v0 = vpop.eup %7017  ;;  %5388 = vmatpush.bf16.msra.mxu1 %v5376_v52  ;;  %v5092_v51 = vsel %vm993_vm2, %v9600_v39, 0.0 }
 0x88d   : > { %7019 = vpow2.f32 %v5019_v17  ;;  %5093 = vadd.xlane.f32.xlu2 %v5092_v51  ;;  %v5089_v6 = vsel %vm993_vm2, %v9603_v0, 0.0  ;;  %v4945_v34 = vsel %vm993_vm2, %v9624_v38, -inf }
 0x88e   : > { %7021 = vpow2.f32 %v5025_v18 }
 0x88f   : > { %7023 = vpow2.f32 %v5027_v37 }
 0x890   : > { %v4929_v20 = vpop.xlane.xlu2 %4928  ;;  %5090 = vadd.xlane.f32.xlu1 %v5089_v6 }
 0x891   : > { %v4834_v17 = vpop.f32.mrf.mxu2 }
 0x892   : > { %v9629_v52 = vadd.f32 %v9376_v28, %v4834_v17 }
 0x893   : > { %v9609_v53 = vpop.eup %7019 }
 0x894   : > { %v9611_v19 = vpop.eup %7021  ;;  %v5098_v31 = vsel %vm993_vm2, %v9609_v53, 0.0 }
 0x895   : > { %5099 = vadd.xlane.f32.xlu2 %v5098_v31  ;;  %v5107_v14 = vsel %vm993_vm2, %v9611_v19, 0.0  ;;  %v9617_v33 = vpop.eup %7023 }
 0x896   : > { %v5110_v29 = vsel %vm993_vm2, %v9617_v33, 0.0 }
 0x898   : > { %v4932_v30 = vpop.xlane.xlu2 %4931  ;;  %5108 = vadd.xlane.f32.xlu1 %v5107_v14 }
 0x899   : > { %5450 = vrot.lane.b32.xlu0 %v7255_v58, %s7131_s11  ;;  %v4948_v58 = vsel %vm993_vm2, %v9629_v52, -inf }
 0x89d   : > { %5111 = vadd.xlane.f32.xlu2 %v5110_v29 }
 0x8a0   : > { %v5426_v18 = vpop.permute.xlu2 %5425 }
 0x8a1   : > { %5438 = vmatpush.bf16.msra.mxu3 %v5426_v18  ;;  %v4808_v18 = vpop.f32.mrf.mxu1 }
 0x8a5   : > { %4946 = vmax.xlane.f32.xlu2 %v4945_v34  ;;  %v4981_v34 = vsub.f32 %v9469_v54, %v9578_v9 }
 0x8a9   : > { %v4810_v9 = vpop.f32.mrf.mxu1 }
 0x8ad   : > { %4949 = vmax.xlane.f32.xlu2 %v4948_v58 }
 0x8b3   : > { %v9633_v51 = vpop.xlane.xlu1 %4937 }
 0x8bb   : > { %v4923_v37 = vpop.xlane.xlu1 %4922 }
 0x8bc   : > { %v4977_v6 = vsub.f32 %v9507_v59, %v4923_v37  ;;  %v5037_v59 = vmul.f32 1.442695, %v4981_v34  ;;  %v9646_v37 = vadd.f32 %v9353_v32, %v4808_v18 }
 0x8be   : > { %v5029_v31 = vmul.f32 1.442695, %v4977_v6 }
 0x8c0   : > { %7025 = vpow2.f32 %v5029_v31  ;;  %v4939_v31 = vsel %vm993_vm2, %v9646_v37, -inf }
 0x8c3   : > { %v4926_v14 = vpop.xlane.xlu1 %4925 }
 0x8c4   : > { %v4978_v60 = vsub.f32 %v9513_v15, %v4926_v14 }
 0x8c5   : > { %5500 = vrot.lane.b32.xlu2 %v7327_v1, %s7131_s11  ;;  %v4979_v1 = vsub.f32 %v9488_v49, %v4929_v20  ;;  %v4980_v49 = vsub.f32 %v9495_v57, %v4932_v30 }
 0x8c6   : > { %v9639_v29 = vpop.eup %7025  ;;  %v5031_v17 = vmul.f32 1.442695, %v4978_v60  ;;  %v9656_v60 = vadd.f32 %v9376_v28, %v4810_v9 }
 0x8c7   : > { %v5113_v58 = vsel %vm993_vm2, %v9639_v29, 0.0  ;;  %v5033_v14 = vmul.f32 1.442695, %v4979_v1 }
 0x8c8   : > { %7027 = vpow2.f32 %v5031_v17  ;;  %5114 = vadd.xlane.f32.xlu1 %v5113_v58  ;;  %v4942_v20 = vsel %vm993_vm2, %v9656_v60, -inf }
 0x8c9   : > { %7029 = vpow2.f32 %v5037_v59 }
 0x8cb   : > { %v5055_v15 = vpop.xlane.xlu1 %5054 }
 0x8ce   : > { %v9648_v6 = vpop.eup %7027 }
 0x8cf   : > { %v5116_v54 = vsel %vm993_vm2, %v9648_v6, 0.0  ;;  %v9658_v34 = vpop.eup %7029  ;;  %v5082_v58 = vpop.xlane.xlu0 %5081 }
 0x8d0   : > { %4940 = vmax.xlane.f32.xlu1 %v4939_v31  ;;  %5117 = vadd.xlane.f32.xlu0 %v5116_v54  ;;  %v5125_v17 = vsel %vm993_vm2, %v9658_v34, 0.0  ;;  %v5035_v31 = vmul.f32 1.442695, %v4980_v49 }
 0x8d3   : > { %v5064_v18 = vpop.xlane.xlu1 %5063 }
 0x8d4   : > { %7031 = vrcp.f32 %v5064_v18 }
 0x8d5   : > { %7033 = vpow2.f32 %v5033_v14 }
 0x8d8   : > { %4943 = vmax.xlane.f32.xlu1 %v4942_v20  ;;  %5126 = vadd.xlane.f32.xlu0 %v5125_v17 }
 0x8d9   : > { %v5061_v59 = vpop.xlane.xlu2 %5060 }
 0x8da   : > { %v7032_v1 = vpop.eup %7031  ;;  %7035 = vrcp.f32 %v5061_v59 }
 0x8db   : > { %v5079_v54 = vpop.xlane.xlu1 %5078  ;;  %v9665_v9 = vpop.eup %7033  ;;  %7037 = vrcp.f32 %v5055_v15  ;;  %v5184_v14 = vmul.f32 %v7032_v1, %v9530_v3 }
 0x8dc   : > { %7039 = vpow2.f32 %v5035_v31  ;;  %v5119_v57 = vsel %vm993_vm2, %v9665_v9, 0.0  ;;  %v4856_v31 = vpop.f32.mrf.mxu3 }
 0x8dd   : > { %v5216_v18 = vpack.c.bf16 %v5184_v14, %v5184_v14 }
 0x8df   : > { %v5103_v17 = vpop.xlane.xlu0 %5102  ;;  %v5273_v3 = vunpack.c.l.b16 %v5216_v18 }
 0x8e0   : > { %v7036_v30 = vpop.eup %7035  ;;  %5120 = vadd.xlane.f32.xlu0 %v5119_v57 }
 0x8e1   : > { %v5183_v20 = vmul.f32 %v7036_v30, %v9536_v26  ;;  %v5058_v7 = vpop.xlane.xlu2 %5057  ;;  %v7038_v41 = vpop.eup %7037  ;;  %v9677_v26 = vadd.f32 %v9353_v32, %v4856_v31 }
 0x8e2   : > { %7041 = vrcp.f32 %v5058_v7  ;;  %v9671_v63 = vpop.eup %7039  ;;  %v5181_v15 = vmul.f32 %v7038_v41, %v9519_v62 }
 0x8e3   : > { %v5215_v49 = vpack.c.bf16 %v5183_v20, %v5183_v20  ;;  %v5085_v59 = vpop.xlane.xlu1 %5084  ;;  %v5122_v14 = vsel %vm993_vm2, %v9671_v63, 0.0 }
 0x8e4   : > { %7043 = vrcp.f32 %v5085_v59  ;;  %v5213_v7 = vpack.c.bf16 %v5181_v15, %v5181_v15 }
 0x8e5   : > { %v5272_v1 = vunpack.c.l.b16 %v5215_v49  ;;  %7045 = vrcp.f32 %v5079_v54 }
 0x8e6   : > { %7047 = vrcp.f32 %v5082_v58  ;;  %v5247_v49 = vunpack.c.l.b16 %v5213_v7 }
 0x8e7   : > { %v5274_v11 = vpack.c.b16 %v5273_v3, %v5272_v1  ;;  %v5076_v62 = vpop.xlane.xlu0 %5075  ;;  %v4951_v3 = vsel %vm993_vm2, %v9677_v26, -inf }
 0x8e8   : > { %v7042_v57 = vpop.eup %7041  ;;  %5123 = vadd.xlane.f32.xlu0 %v5122_v14 }
 0x8e9   : > { %v5182_v30 = vmul.f32 %v7042_v57, %v9549_v46  ;;  %6509 = vmatmul.msk.bf16.vlgmr.msrb.gmra.mxu1 %vm993_vm2, %v5274_v11  ;;  %v5067_v31 = vpop.xlane.xlu2 %5066 }
 0x8ea   : > { %v7044_v20 = vpop.eup %7043 }
 0x8eb   : > { %v5214_v41 = vpack.c.bf16 %v5182_v30, %v5182_v30  ;;  %v5088_v18 = vpop.xlane.xlu1 %5087  ;;  %v5191_v15 = vmul.f32 %v7044_v20, %v9556_v42  ;;  %v7046_v46 = vpop.eup %7045 }
 0x8ec   : > { %7049 = vrcp.f32 %v5088_v18  ;;  %v7048_v1 = vpop.eup %7047  ;;  %v5189_v58 = vmul.f32 %v7046_v46, %v9539_v50 }
 0x8ed   : > { %v5248_v59 = vunpack.c.l.b16 %v5214_v41  ;;  %7051 = vrcp.f32 %v5076_v62  ;;  %v5223_v54 = vpack.c.bf16 %v5191_v15, %v5191_v15  ;;  %v5190_v30 = vmul.f32 %v7048_v1, %v9525_v47 }
 0x8ee   : > { %4952 = vmax.xlane.f32.xlu2 %v4951_v3  ;;  %v5221_v62 = vpack.c.bf16 %v5189_v58, %v5189_v58 }
 0x8ef   : > { %v5249_v32 = vpack.c.b16 %v5248_v59, %v5247_v49  ;;  %v5106_v41 = vpop.xlane.xlu0 %5105  ;;  %v5372_v18 = vunpack.c.l.b16 %v5223_v54  ;;  %v5222_v49 = vpack.c.bf16 %v5190_v30, %v5190_v30 }
 0x8f0   : > { %v5347_v3 = vunpack.c.l.b16 %v5221_v62 }
 0x8f1   : > { %6508 = vmatmul.msk.bf16.vlgmr.msrb.gmra.mxu0 %vm993_vm2, %v5249_v32  ;;  %5475 = vrot.lane.b32.xlu1 %v7287_v25, %s7131_s11  ;;  %v5348_v46 = vunpack.c.l.b16 %v5222_v49 }
 0x8f2   : > { %v7050_v11 = vpop.eup %7049 }
 0x8f3   : > { %v5192_v14 = vmul.f32 %v7050_v11, %v9569_v35  ;;  %v5073_v57 = vpop.xlane.xlu1 %5072  ;;  %v7052_v7 = vpop.eup %7051  ;;  %v5349_v1 = vpack.c.b16 %v5348_v46, %v5347_v3 }
 0x8f4   : > { %7053 = vrcp.f32 %v5073_v57  ;;  %v5188_v20 = vmul.f32 %v7052_v7, %v9563_v10 }
 0x8f5   : > { %v5224_v42 = vpack.c.bf16 %v5192_v14, %v5192_v14  ;;  %7055 = vrcp.f32 %v5067_v31 }
 0x8f6   : > { %7057 = vrcp.f32 %v5106_v41  ;;  %v5220_v35 = vpack.c.bf16 %v5188_v20, %v5188_v20 }
 0x8f7   : > { %v5373_v25 = vunpack.c.l.b16 %v5224_v42  ;;  %7059 = vrcp.f32 %v5103_v17 }
 0x8f8   : > { %v5323_v11 = vunpack.c.l.b16 %v5220_v35  ;;  %v5097_v17 = vpop.xlane.xlu0 %5096 }
 0x8f9   : > { %v5374_v59 = vpack.c.b16 %v5373_v25, %v5372_v18  ;;  %v10494_v18 = vld [vmem:[#allocation31_spill] sm:$0xff] }
 0x8fa   : > { %v7054_v50 = vpop.eup %7053 }
 0x8fb   : > { %v5187_v32 = vmul.f32 %v7054_v50, %v9583_v48  ;;  %v5070_v15 = vpop.xlane.xlu1 %5069  ;;  %6513 = vmatmul.msk.bf16.vlgmr.msra.gmra.mxu1 %vm993_vm2, %v5374_v59  ;;  %v7056_v47 = vpop.eup %7055 }
 0x8fc   : > { %7061 = vrcp.f32 %v5070_v15  ;;  %5550 = vrot.lane.b32.xlu0 %v7265_v4, %s7131_s11  ;;  %v5185_v58 = vmul.f32 %v7056_v47, %v9565_v23  ;;  %v7058_v31 = vpop.eup %7057 }
 0x8fd   : > { %v5219_v10 = vpack.c.bf16 %v5187_v32, %v5187_v32  ;;  %v7060_v57 = vpop.eup %7059  ;;  %v5198_v42 = vmul.f32 %v7058_v31, %v9576_v5  ;;  %7063 = vrcp.f32 %v5097_v17 }
 0x8fe   : > { %v5217_v30 = vpack.c.bf16 %v5185_v58, %v5185_v58  ;;  %v5197_v23 = vmul.f32 %v7060_v57, %v9551_v2 }
 0x8ff   : > { %v5322_v54 = vunpack.c.l.b16 %v5219_v10  ;;  %v5230_v25 = vpack.c.bf16 %v5198_v42, %v5198_v42 }
 0x900   : > { %v5094_v14 = vpop.xlane.xlu2 %5093  ;;  %v5297_v20 = vunpack.c.l.b16 %v5217_v30  ;;  %v5229_v50 = vpack.c.bf16 %v5197_v23, %v5197_v23  ;;  %v4858_v23 = vpop.f32.mrf.mxu3 }
 0x901   : > { %v5324_v48 = vpack.c.b16 %v5323_v11, %v5322_v54  ;;  %6512 = vmatmul.msk.bf16.vlgmr.msra.gmra.mxu0 %vm993_vm2, %v5349_v1  ;;  %v5448_v32 = vunpack.c.l.b16 %v5230_v25  ;;  %v10495_v11 = vld [vmem:[#allocation28_spill] sm:$0xff] }
 0x902   : > { %v7062_v7 = vpop.eup %7061  ;;  %v5447_v10 = vunpack.c.l.b16 %v5229_v50 }
 0x903   : > { %v5186_v4 = vmul.f32 %v7062_v7, %v9589_v8  ;;  %v5091_v41 = vpop.xlane.xlu1 %5090  ;;  %6511 = vmatmul.msk.bf16.vlgmr.msrb.gmra.mxu3 %vm993_vm2, %v5324_v48  ;;  %v7064_v5 = vpop.eup %7063  ;;  %v4982_v8 = vsub.f32 %v9500_v27, %v9633_v51 }
 0x904   : > { %7065 = vrcp.f32 %v5091_v41  ;;  %v5195_v15 = vmul.f32 %v7064_v5, %v9591_v36  ;;  %v5449_v51 = vpack.c.b16 %v5448_v32, %v5447_v10  ;;  %v10496_v5 = vld [vmem:[#allocation46_spill] sm:$0xff] }
 0x905   : > { %v5218_v62 = vpack.c.bf16 %v5186_v4, %v5186_v4  ;;  %7067 = vrcp.f32 %v5094_v14  ;;  %v5039_v46 = vmul.f32 1.442695, %v4982_v8 }
 0x906   : > { %3013 = vrot.lane.b32.xlu2 %v10494_v18, %s7132_s17  ;;  %v5227_v54 = vpack.c.bf16 %v5195_v15, %v5195_v15  ;;  %v9722_v18 = vadd.f32 %v9376_v28, %v4858_v23  ;;  %v10498_v23 = vld [vmem:[#allocation27_spill] sm:$0xff] }
 0x907   : > { %v5298_v49 = vunpack.c.l.b16 %v5218_v62 }
 0x908   : > { %v5100_v59 = vpop.xlane.xlu2 %5099  ;;  %v5422_v48 = vunpack.c.l.b16 %v5227_v54 }
 0x909   : > { %v5299_v3 = vpack.c.b16 %v5298_v49, %v5297_v20  ;;  %7069 = vrcp.f32 %v5100_v59  ;;  %v4954_v20 = vsel %vm993_vm2, %v9722_v18, -inf }
 0x90a   : > { %v7066_v35 = vpop.eup %7065  ;;  %7071 = vpow2.f32 %v5039_v46 }
 0x90b   : > { %6510 = vmatmul.msk.bf16.vlgmr.msrb.gmra.mxu2 %vm993_vm2, %v5299_v3  ;;  %v7068_v2 = vpop.eup %7067  ;;  %v5451_v47 = vpop.permute.xlu0 %5450  ;;  %v5193_v1 = vmul.f32 %v7066_v35, %v9603_v0 }
 0x90c   : > { %5463 = vmatpush.bf16.msrb.mxu0 %v5451_v47  ;;  %v5194_v58 = vmul.f32 %v7068_v2, %v9600_v39  ;;  %v5109_v49 = vpop.xlane.xlu1 %5108 }
 0x90d   : > { %v5225_v14 = vpack.c.bf16 %v5193_v1, %v5193_v1 }
 0x90e   : > { %3019 = vrot.lane.b32.xlu2 %v10495_v11, %s7132_s17  ;;  %v5226_v57 = vpack.c.bf16 %v5194_v58, %v5194_v58 }
 0x90f   : > { %v7070_v27 = vpop.eup %7069  ;;  %v5397_v7 = vunpack.c.l.b16 %v5225_v14 }
 0x910   : > { %v5196_v31 = vmul.f32 %v7070_v27, %v9609_v53  ;;  %v5112_v17 = vpop.xlane.xlu2 %5111  ;;  %v9713_v42 = vpop.eup %7071  ;;  %v5398_v4 = vunpack.c.l.b16 %v5226_v57 }
 0x911   : > { %6516 = vmatmul.msk.bf16.vlgmr.msrb.gmra.mxu0 %vm993_vm2, %v5449_v51  ;;  %v5128_v53 = vsel %vm993_vm2, %v9713_v42, 0.0 }
 0x912   : > { %v5228_v36 = vpack.c.bf16 %v5196_v31, %v5196_v31  ;;  %v5399_v39 = vpack.c.b16 %v5398_v4, %v5397_v7 }
 0x914   : > { %v5423_v0 = vunpack.c.l.b16 %v5228_v36 }
 0x916   : > { %v5424_v30 = vpack.c.b16 %v5423_v0, %v5422_v48 }
 0x918   : > { %v9715_v41 = vpop.xlane.xlu2 %4946  ;;  %6515 = vmatmul.msk.bf16.vlgmr.msra.gmra.mxu3 %vm993_vm2, %v5424_v30 }
 0x91b   : > { %5129 = vadd.xlane.f32.xlu1 %v5128_v53  ;;  %6514 = vmatmul.msk.bf16.vlgmr.msra.gmra.mxu2 %vm993_vm2, %v5399_v39 }
 0x920   : > { %v4950_v62 = vpop.xlane.xlu2 %4949 }
 0x921   : > { %v4986_v54 = vsub.f32 %v9629_v52, %v4950_v62 }
 0x923   : > { %v5047_v14 = vmul.f32 1.442695, %v4986_v54 }
 0x926   : > { %4955 = vmax.xlane.f32.xlu0 %v4954_v20  ;;  %v4985_v20 = vsub.f32 %v9624_v38, %v9715_v41 }
 0x928   : > { %v5501_v25 = vpop.permute.xlu2 %5500 }
 0x929   : > { %5513 = vmatpush.bf16.msrb.mxu2 %v5501_v25 }
 0x934   : > { %5525 = vrot.lane.b32.xlu1 %v7363_v44, %s7131_s11 }
 0x93a   : > { %4351 = vrot.lane.b32.xlu0 %v9303_v61, %s7133_s18 }
 0x93b   : > { %v5115_v59 = vpop.xlane.xlu1 %5114 }
 0x93c   : > { %3015 = vrot.lane.b32.xlu1 %v10496_v5, %s7132_s17  ;;  %7073 = vrcp.f32 %v5115_v59  ;;  %v5045_v59 = vmul.f32 1.442695, %v4985_v20  ;;  %v10504_v20 = vld [vmem:[#allocation29_spill] sm:$0xff] }
 0x942   : > { %v7074_v50 = vpop.eup %7073 }
 0x943   : > { %v4941_v28 = vpop.xlane.xlu1 %4940  ;;  %v5118_v8 = vpop.xlane.xlu0 %5117  ;;  %v5201_v3 = vmul.f32 %v7074_v50, %v9639_v29 }
 0x944   : > { %7075 = vrcp.f32 %v5118_v8  ;;  %4345 = vrot.lane.b32.xlu1 %v9298_v40, %s7133_s18  ;;  %v4983_v40 = vsub.f32 %v9646_v37, %v4941_v28 }
 0x945   : > { %v5233_v44 = vpack.c.bf16 %v5201_v3, %v5201_v3  ;;  %7077 = vrcp.f32 %v5112_v17 }
 0x947   : > { %v5497_v46 = vunpack.c.l.b16 %v5233_v44 }
 0x94a   : > { %v7076_v35 = vpop.eup %7075 }
 0x94b   : > { %v5202_v32 = vmul.f32 %v7076_v35, %v9648_v6  ;;  %v4944_v2 = vpop.xlane.xlu1 %4943  ;;  %v5127_v29 = vpop.xlane.xlu0 %5126  ;;  %v10497_v6 = vld [vmem:[#allocation32_spill] sm:$0xff] }
 0x94c   : > { %v4984_v61 = vsub.f32 %v9656_v60, %v4944_v2  ;;  %4347 = vrot.lane.b32.xlu1 %v9307_v16, %s7133_s18  ;;  %v7078_v60 = vpop.eup %7077  ;;  %v5041_v16 = vmul.f32 1.442695, %v4983_v40 }
 0x94d   : > { %v5234_v15 = vpack.c.bf16 %v5202_v32, %v5202_v32  ;;  %v5200_v58 = vmul.f32 %v7078_v60, %v9617_v33 }
 0x94e   : > { %v5043_v47 = vmul.f32 1.442695, %v4984_v61 }
 0x94f   : > { %v5498_v10 = vunpack.c.l.b16 %v5234_v15  ;;  %v5232_v31 = vpack.c.bf16 %v5200_v58, %v5200_v58 }
 0x950   : > { %7079 = vpow2.f32 %v5043_v47 }
 0x951   : > { %v5499_v1 = vpack.c.b16 %v5498_v10, %v5497_v46  ;;  %7081 = vrcp.f32 %v5109_v49  ;;  %v5473_v48 = vunpack.c.l.b16 %v5232_v31 }
 0x952   : > { %7083 = vpow2.f32 %v5041_v16  ;;  %v10500_v16 = vld [vmem:[#allocation4_spill] sm:$0xff] }
 0x953   : > { %6518 = vmatmul.msk.bf16.vlgmr.msrb.gmra.mxu2 %vm993_vm2, %v5499_v1  ;;  %v5121_v17 = vpop.xlane.xlu0 %5120  ;;  %7085 = vpow2.f32 %v5047_v14  ;;  %v10499_v1 = vld [vmem:[#allocation48_spill] sm:$0xff] }
 0x954   : > { %3017 = vrot.lane.b32.xlu1 %v10497_v6, %s7132_s17  ;;  %7087 = vpow2.f32 %v5045_v59 }
 0x955   : > { %7089 = vrcp.f32 %v5127_v29 }
 0x956   : > { %v9743_v11 = vpop.eup %7079 }
 0x957   : > { %v5134_v27 = vsel %vm993_vm2, %v9743_v11, 0.0  ;;  %v7082_v51 = vpop.eup %7081 }
 0x958   : > { %5135 = vadd.xlane.f32.xlu2 %v5134_v27  ;;  %v5199_v37 = vmul.f32 %v7082_v51, %v9611_v19  ;;  %v9752_v57 = vpop.eup %7083 }
 0x959   : > { %v5131_v52 = vsel %vm993_vm2, %v9752_v57, 0.0 }
 0x95a   : > { %v5231_v36 = vpack.c.bf16 %v5199_v37, %v5199_v37 }
 0x95b   : > { %v5124_v30 = vpop.xlane.xlu0 %5123 }
 0x95c   : > { %4349 = vrot.lane.b32.xlu1 %v9295_v56, %s7133_s18  ;;  %v5472_v7 = vunpack.c.l.b16 %v5231_v36  ;;  %v9759_v56 = vpop.eup %7085 }
 0x95d   : > { %v5140_v39 = vsel %vm993_vm2, %v9759_v56, 0.0  ;;  %v9772_v28 = vpop.eup %7087 }
 0x95e   : > { %v5474_v19 = vpack.c.b16 %v5473_v48, %v5472_v7  ;;  %v5137_v8 = vsel %vm993_vm2, %v9772_v28, 0.0  ;;  %v7090_v50 = vpop.eup %7089 }
 0x95f   : > { %v5205_v3 = vmul.f32 %v7090_v50, %v9658_v34 }
 0x961   : > { %v9754_v0 = vpop.xlane.xlu2 %4952  ;;  %v5237_v44 = vpack.c.bf16 %v5205_v3, %v5205_v3 }
 0x962   : > { %v4987_v36 = vsub.f32 %v9677_v26, %v9754_v0 }
 0x963   : > { %v5476_v33 = vpop.permute.xlu1 %5475  ;;  %v5547_v61 = vunpack.c.l.b16 %v5237_v44  ;;  %v10507_v44 = vld [vmem:[#allocation23_spill] sm:$0xff] }
 0x964   : > { %5132 = vadd.xlane.f32.xlu0 %v5131_v52  ;;  %5488 = vmatpush.bf16.msrb.mxu1 %v5476_v33  ;;  %v5049_v48 = vmul.f32 1.442695, %v4987_v36  ;;  %v10503_v52 = vld [vmem:[#allocation38_spill] sm:$0xff] }
 0x966   : > { %v5290_v49 = vpop.f32.mrf.mxu1 }
 0x967   : > { %6517 = vmatmul.msk.bf16.vlgmr.msrb.gmra.mxu1 %vm993_vm2, %v5474_v19 }
 0x969   : > { %v3014_v4 = vpop.permute.xlu2 %3013 }
 0x96a   : > { %3110 = vst.msk [vmem:[#allocation2] sm:$0xff] %vm3109_vm3, %v3014_v4 }
 0x96c   : > { %5141 = vadd.xlane.f32.xlu0 %v5140_v39  ;;  %v6568_v39 = vld [vmem:[%s10237_s4] sm:$0xff] }
 0x96e   : > { %v5551_v53 = vpop.permute.xlu0 %5550  ;;  %v5265_v25 = vpop.f32.mrf.mxu0 }
 0x96f   : > { %5563 = vmatpush.bf16.msra.mxu0 %v5551_v53  ;;  %v5292_v10 = vpop.f32.mrf.mxu1 }
 0x970   : > { %3021 = vrot.lane.b32.xlu2 %v10498_v23, %s7132_s17 }
 0x971   : > { %v3020_v62 = vpop.permute.xlu2 %3019 }
 0x972   : > { %3113 = vst.msk [vmem:[#allocation2 + $0x18] sm:$0xff] %vm3109_vm3, %v3020_v62 }
 0x976   : > { %v5267_v5 = vpop.f32.mrf.mxu0 }
 0x978   : > { %5681 = vrot.lane.b32.xlu2 %v5290_v49, %s7134_s19 }
 0x97e   : > { %v5365_v0 = vpop.f32.mrf.mxu0 }
 0x980   : > { %5679 = vrot.lane.b32.xlu2 %v5267_v5, %s7134_s19  ;;  %5677 = vrot.lane.b32.xlu0 %v5265_v25, %s7134_s19  ;;  %v10505_v25 = vld [vmem:[#allocation47_spill] sm:$0xff] }
 0x986   : > { %5138 = vadd.xlane.f32.xlu1 %v5137_v8  ;;  %v5367_v23 = vpop.f32.mrf.mxu0 }
 0x988   : > { %4355 = vrot.lane.b32.xlu2 %v9332_v45, %s7133_s18  ;;  %4353 = vrot.lane.b32.xlu0 %v9324_v21, %s7133_s18 }
 0x98e   : > { %v5315_v38 = vpop.f32.mrf.mxu2  ;;  %v5130_v41 = vpop.xlane.xlu1 %5129 }
 0x98f   : > { %7091 = vrcp.f32 %v5130_v41  ;;  %v5465_v36 = vpop.f32.mrf.mxu0 }
 0x990   : > { %5575 = vrot.lane.b32.xlu0 %v10462_v13, %s7131_s11  ;;  %7093 = vrcp.f32 %v5124_v30  ;;  %v6569_v30 = vld [vmem:[%s10237_s4 + $0x8] sm:$0xff] }
 0x991   : > { %7095 = vrcp.f32 %v5121_v17  ;;  %5928 = vmatpush.bf16.msrb.mxu0 %v6569_v30 }
 0x995   : > { %v7092_v35 = vpop.eup %7091  ;;  %5929 = vmatpush.bf16.msrb.mxu0 %v6568_v39 }
 0x996   : > { %v5206_v32 = vmul.f32 %v7092_v35, %v9713_v42  ;;  %v5317_v45 = vpop.f32.mrf.mxu2  ;;  %v7094_v2 = vpop.eup %7093  ;;  %v10506_v35 = vld [vmem:[#allocation45_spill] sm:$0xff] }
 0x997   : > { %5687 = vrot.lane.b32.xlu2 %v5317_v45, %s7134_s19  ;;  %v7096_v47 = vpop.eup %7095  ;;  %v5204_v13 = vmul.f32 %v7094_v2, %v9671_v63  ;;  %v5467_v39 = vpop.f32.mrf.mxu0 }
 0x998   : > { %v5238_v21 = vpack.c.bf16 %v5206_v32, %v5206_v32  ;;  %5600 = vrot.lane.b32.xlu0 %v10384_v43, %s7131_s11  ;;  %v5203_v46 = vmul.f32 %v7096_v47, %v9665_v9  ;;  %v10501_v9 = vld [vmem:[#allocation8_spill] sm:$0xff] }
 0x999   : > { %v5236_v42 = vpack.c.bf16 %v5204_v13, %v5204_v13  ;;  %v4956_v29 = vpop.xlane.xlu0 %4955 }
 0x99a   : > { %v5548_v15 = vunpack.c.l.b16 %v5238_v21  ;;  %v5235_v40 = vpack.c.bf16 %v5203_v46, %v5203_v46  ;;  %v4988_v51 = vsub.f32 %v9722_v18, %v4956_v29  ;;  %v5340_v18 = vpop.f32.mrf.mxu3  ;;  %v10508_v21 = vld [vmem:[#allocation33_spill] sm:$0xff] }
 0x99b   : > { %v5523_v43 = vunpack.c.l.b16 %v5236_v42 }
 0x99c   : > { %v5549_v34 = vpack.c.b16 %v5548_v15, %v5547_v61  ;;  %v5522_v6 = vunpack.c.l.b16 %v5235_v40  ;;  %v5051_v54 = vmul.f32 1.442695, %v4988_v51 }
 0x99e   : > { %6520 = vmatmul.msk.bf16.vlgmr.msra.gmra.mxu0 %vm993_vm2, %v5549_v34  ;;  %v5524_v63 = vpack.c.b16 %v5523_v43, %v5522_v6  ;;  %7097 = vpow2.f32 %v5051_v54  ;;  %v5415_v41 = vpop.f32.mrf.mxu2  ;;  %v10509_v43 = vld [vmem:[#allocation12_spill] sm:$0xff] }
 0x99f   : > { %5683 = vrot.lane.b32.xlu1 %v5292_v10, %s7134_s19  ;;  %7099 = vpow2.f32 %v5049_v48  ;;  %v10515_v48 = vld [vmem:[#allocation9_spill] sm:$0xff] }
 0x9a0   : > { %3025 = vrot.lane.b32.xlu0 %v10499_v1, %s7132_s17 }
 0x9a2   : > { %v5342_v5 = vpop.f32.mrf.mxu3 }
 0x9a4   : > { %v9807_v31 = vpop.eup %7097 }
 0x9a5   : > { %v5146_v14 = vsel %vm993_vm2, %v9807_v31, 0.0  ;;  %v9825_v26 = vpop.eup %7099 }
 0x9a6   : > { %v5526_v60 = vpop.permute.xlu1 %5525  ;;  %v5143_v4 = vsel %vm993_vm2, %v9825_v26, 0.0  ;;  %v5417_v46 = vpop.f32.mrf.mxu2 }
 0x9a7   : > { %3023 = vrot.lane.b32.xlu1 %v10500_v16, %s7132_s17  ;;  %5538 = vmatpush.bf16.msrb.mxu3 %v5526_v60 }
 0x9a8   : > { %3027 = vrot.lane.b32.xlu0 %v10501_v9, %s7132_s17 }
 0x9aa   : > { %6519 = vmatmul.msk.bf16.vlgmr.msrb.gmra.mxu3 %vm993_vm2, %v5524_v63  ;;  %v5440_v16 = vpop.f32.mrf.mxu3 }
 0x9ac   : > { %v4352_v27 = vpop.permute.xlu0 %4351 }
 0x9ad   : > { %4445 = vst.msk [vmem:[#allocation2 + $0x18] sm:$0xff] %vm4441_vm4, %v4352_v27  ;;  %v10510_v27 = vld [vmem:[#allocation44_spill] sm:$0xff] }
 0x9ae   : > { %v3016_v58 = vpop.permute.xlu1 %3015 }
 0x9af   : > { %3111 = vst.msk [vmem:[#allocation2 + $0x8] sm:$0xff] %vm3109_vm3, %v3016_v58  ;;  %5685 = vrot.lane.b32.xlu1 %v5315_v38, %s7134_s19 }
 0x9b0   : > { %4357 = vrot.lane.b32.xlu0 %v9326_v55, %s7133_s18 }
 0x9b6   : > { %v4346_v37 = vpop.permute.xlu1 %4345 }
 0x9b7   : > { %4442 = vst.msk [vmem:[#allocation2] sm:$0xff] %vm4441_vm4, %v4346_v37  ;;  %v5442_v37 = vpop.f32.mrf.mxu3 }
 0x9b8   : > { %4359 = vrot.lane.b32.xlu0 %v9336_v12, %s7133_s18  ;;  %v10502_v12 = vld [vmem:[#allocation7_spill] sm:$0xff] }
 0x9be   : > { %v4348_v17 = vpop.permute.xlu1 %4347 }
 0x9bf   : > { %4443 = vst.msk [vmem:[#allocation2 + $0x8] sm:$0xff] %vm4441_vm4, %v4348_v17 }
 0x9c0   : > { %5689 = vrot.lane.b32.xlu0 %v5340_v18, %s7134_s19  ;;  %5147 = vadd.xlane.f32.xlu2 %v5146_v14  ;;  %v10513_v14 = vld [vmem:[#allocation13_spill] sm:$0xff] }
 0x9c6   : > { %v3018_v55 = vpop.permute.xlu1 %3017 }
 0x9c7   : > { %3112 = vst.msk [vmem:[#allocation2 + $0x10] sm:$0xff] %vm3109_vm3, %v3018_v55 }
 0x9c8   : > { %3029 = vrot.lane.b32.xlu0 %v10502_v12, %s7132_s17  ;;  %v10514_v12 = vld [vmem:[#allocation20_spill] sm:$0xff] }
 0x9cb   : > { %v5136_v7 = vpop.xlane.xlu2 %5135 }
 0x9ce   : > { %v4350_v33 = vpop.permute.xlu1 %4349 }
 0x9cf   : > { %4444 = vst.msk [vmem:[#allocation2 + $0x10] sm:$0xff] %vm4441_vm4, %v4350_v33 }
 0x9d0   : > { %3031 = vrot.lane.b32.xlu0 %v10503_v52, %s7132_s17 }
 0x9d3   : > { %v3022_v19 = vpop.permute.xlu2 %3021 }
 0x9d4   : > { %3114 = vst.msk [vmem:[#allocation2 + $0x20] sm:$0xff] %vm3109_vm3, %v3022_v19  ;;  %v10516_v19 = vld [vmem:[#allocation19_spill] sm:$0xff] }
 0x9d7   : > { %v5133_v62 = vpop.xlane.xlu0 %5132 }
 0x9d8   : > { %4361 = vrot.lane.b32.xlu0 %v9315_v22, %s7133_s18  ;;  %5625 = vrot.lane.b32.xlu2 %v10460_v24, %s7131_s11  ;;  %v5390_v22 = vpop.f32.mrf.mxu1  ;;  %7101 = vrcp.f32 %v5133_v62 }
 0x9d9   : > { %5144 = vadd.xlane.f32.xlu1 %v5143_v4  ;;  %7103 = vrcp.f32 %v5136_v7 }
 0x9db   : > { %v5682_v53 = vpop.permute.xlu2 %5681 }
 0x9dc   : > { %5776 = vst.msk [vmem:[#allocation2 + $0x10] sm:$0xff] %vm5773_vm5, %v5682_v53 }
 0x9de   : > { %v7102_v38 = vpop.eup %7101 }
 0x9df   : > { %v5142_v49 = vpop.xlane.xlu0 %5141  ;;  %v7104_v50 = vpop.eup %7103  ;;  %v5207_v3 = vmul.f32 %v7102_v38, %v9752_v57 }
 0x9e0   : > { %5695 = vrot.lane.b32.xlu0 %v5367_v23, %s7134_s19  ;;  %5693 = vrot.lane.b32.xlu2 %v5365_v0, %s7134_s19  ;;  %v5392_v59 = vpop.f32.mrf.mxu1  ;;  %7105 = vrcp.f32 %v5142_v49  ;;  %v5208_v45 = vmul.f32 %v7104_v50, %v9743_v11  ;;  %v10517_v23 = vld [vmem:[#allocation21_spill] sm:$0xff] }
 0x9e1   : > { %v5239_v47 = vpack.c.bf16 %v5207_v3, %v5207_v3 }
 0x9e2   : > { %v5240_v13 = vpack.c.bf16 %v5208_v45, %v5208_v45  ;;  %v10524_v45 = vld [vmem:[#allocation5_spill] sm:$0xff] }
 0x9e3   : > { %v5680_v24 = vpop.permute.xlu2 %5679  ;;  %v5572_v42 = vunpack.c.l.b16 %v5239_v47  ;;  %v5808_v33 = vld [vmem:[#allocation2 + $0x10] sm:$0xff] }
 0x9e4   : > { %5775 = vst.msk [vmem:[#allocation2 + $0x8] sm:$0xff] %vm5773_vm5, %v5680_v24  ;;  %v5573_v1 = vunpack.c.l.b16 %v5240_v13 }
 0x9e6   : > { %v7106_v34 = vpop.eup %7105  ;;  %v5574_v6 = vpack.c.b16 %v5573_v1, %v5572_v42 }
 0x9e7   : > { %v5210_v40 = vmul.f32 %v7106_v34, %v9759_v56  ;;  %v10512_v56 = vld [vmem:[#allocation43_spill] sm:$0xff] }
 0x9e8   : > { %4365 = vrot.lane.b32.xlu0 %v10504_v20, %s7133_s18  ;;  %3035 = vrot.lane.b32.xlu2 %v10505_v25, %s7132_s17  ;;  %v5490_v24 = vpop.f32.mrf.mxu1  ;;  %v10519_v20 = vld [vmem:[#allocation11_spill] sm:$0xff] }
 0x9e9   : > { %v5242_v63 = vpack.c.bf16 %v5210_v40, %v5210_v40  ;;  %v10526_v34 = vld [vmem:[#allocation51_spill] sm:$0xff] }
 0x9eb   : > { %v5807_v15 = vld [vmem:[#allocation2 + $0x8] sm:$0xff]  ;;  %v5598_v51 = vunpack.c.l.b16 %v5242_v63  ;;  %v4356_v17 = vpop.permute.xlu2 %4355 }
 0x9f0   : > { %5699 = vrot.lane.b32.xlu0 %v5392_v59, %s7134_s19  ;;  %5697 = vrot.lane.b32.xlu2 %v5390_v22, %s7134_s19  ;;  %v10518_v22 = vld [vmem:[#allocation10_spill] sm:$0xff]  ;;  %v10520_v59 = vld [vmem:[#allocation49_spill] sm:$0xff]  ;;  %v5492_v38 = vpop.f32.mrf.mxu1 }
 0x9f2   : > { %5691 = vrot.lane.b32.xlu1 %v5342_v5, %s7134_s19  ;;  %v5678_v8 = vpop.permute.xlu0 %5677 }
 0x9f3   : > { %5774 = vst.msk [vmem:[#allocation2] sm:$0xff] %vm5773_vm5, %v5678_v8  ;;  %v5688_v4 = vpop.permute.xlu2 %5687 }
 0x9f8   : > { %4369 = vrot.lane.b32.xlu0 %v10506_v35, %s7133_s18  ;;  %3039 = vrot.lane.b32.xlu2 %v10507_v44, %s7132_s17  ;;  %v5515_v35 = vpop.f32.mrf.mxu2  ;;  %v10522_v44 = vld [vmem:[#allocation50_spill] sm:$0xff] }
 0x9f9   : > { %v5139_v32 = vpop.xlane.xlu1 %5138 }
 0x9fa   : > { %7107 = vrcp.f32 %v5139_v32  ;;  %4363 = vrot.lane.b32.xlu1 %v10508_v21, %s7133_s18  ;;  %v4354_v2 = vpop.permute.xlu0 %4353  ;;  %v5806_v61 = vld [vmem:[#allocation2] sm:$0xff]  ;;  %v10523_v32 = vld [vmem:[#allocation22_spill] sm:$0xff] }
 0x9fb   : > { %4446 = vst.msk [vmem:[#allocation2 + $0x20] sm:$0xff] %vm4441_vm4, %v4354_v2  ;;  %v5838_v57 = vpack.c.bf16 %v5807_v15, %v5806_v61  ;;  %v10525_v15 = vld [vmem:[#allocation18_spill] sm:$0xff] }
 0x9fd   : > { %6532 = vmatmul.msk.bf16.vlgmr.msrb.gmra.mxu0 %vm388_vm0, %v5838_v57 }
 0xa00   : > { %v7108_v10 = vpop.eup %7107  ;;  %5703 = vrot.lane.b32.xlu0 %v5417_v46, %s7134_s19  ;;  %5701 = vrot.lane.b32.xlu2 %v5415_v41, %s7134_s19  ;;  %v10521_v41 = vld [vmem:[#allocation14_spill] sm:$0xff]  ;;  %v5517_v61 = vpop.f32.mrf.mxu2  ;;  %v10527_v46 = vld [vmem:[#allocation37_spill] sm:$0xff] }
 0xa01   : > { %v5209_v11 = vmul.f32 %v7108_v10, %v9772_v28  ;;  %v10511_v28 = vld [vmem:[#allocation15_spill] sm:$0xff]  ;;  %v10528_v10 = vld [vmem:[#allocation6_spill] sm:$0xff] }
 0xa02   : > { %3033 = vrot.lane.b32.xlu1 %v10509_v43, %s7132_s17  ;;  %v5576_v29 = vpop.permute.xlu0 %5575 }
 0xa03   : > { %5588 = vmatpush.bf16.msra.mxu1 %v5576_v29  ;;  %v5241_v60 = vpack.c.bf16 %v5209_v11, %v5209_v11 }
 0xa05   : > { %v5597_v9 = vunpack.c.l.b16 %v5241_v60 }
 0xa06   : > { %6521 = vmatmul.msk.bf16.vlgmr.msra.gmra.mxu1 %vm993_vm2, %v5574_v6  ;;  %v10529_v6 = vld [vmem:[#allocation42_spill] sm:$0xff] }
 0xa07   : > { %v5599_v54 = vpack.c.b16 %v5598_v51, %v5597_v9 }
 0xa08   : > { %4373 = vrot.lane.b32.xlu0 %v10510_v27, %s7133_s18  ;;  %3043 = vrot.lane.b32.xlu2 %v10511_v28, %s7132_s17 }
 0xa0a   : > { %4367 = vrot.lane.b32.xlu1 %v10512_v56, %s7133_s18  ;;  %v5601_v58 = vpop.permute.xlu0 %5600 }
 0xa0b   : > { %5613 = vmatpush.bf16.msra.mxu2 %v5601_v58 }
 0xa0e   : > { %6522 = vmatmul.msk.bf16.vlgmr.msra.gmra.mxu2 %vm993_vm2, %v5599_v54  ;;  %v10530_v54 = vld [vmem:[#allocation25_spill] sm:$0xff] }
 0xa10   : > { %5707 = vrot.lane.b32.xlu0 %v5442_v37, %s7134_s19  ;;  %5705 = vrot.lane.b32.xlu2 %v5440_v16, %s7134_s19 }
 0xa11   : > { %v5684_v18 = vpop.permute.xlu1 %5683 }
 0xa12   : > { %5777 = vst.msk [vmem:[#allocation2 + $0x18] sm:$0xff] %vm5773_vm5, %v5684_v18  ;;  %3037 = vrot.lane.b32.xlu1 %v10513_v14, %s7132_s17  ;;  %v3026_v55 = vpop.permute.xlu0 %3025 }
 0xa13   : > { %3116 = vst.msk [vmem:[#allocation2 + $0x30] sm:$0xff] %vm3109_vm3, %v3026_v55  ;;  %v10533_v55 = vld [vmem:[#allocation26_spill] sm:$0xff] }
 0xa18   : > { %4377 = vrot.lane.b32.xlu0 %v10514_v12, %s7133_s18  ;;  %3047 = vrot.lane.b32.xlu2 %v10515_v48, %s7132_s17 }
 0xa19   : > { %v3024_v7 = vpop.permute.xlu1 %3023  ;;  %v5809_v52 = vld [vmem:[#allocation2 + $0x18] sm:$0xff] }
 0xa1a   : > { %3115 = vst.msk [vmem:[#allocation2 + $0x28] sm:$0xff] %vm3109_vm3, %v3024_v7  ;;  %4371 = vrot.lane.b32.xlu1 %v10516_v19, %s7133_s18  ;;  %v3028_v30 = vpop.permute.xlu0 %3027  ;;  %v5839_v0 = vpack.c.bf16 %v5809_v52, %v5808_v33  ;;  %v10534_v7 = vld [vmem:[#allocation34_spill] sm:$0xff]  ;;  %v10535_v33 = vld [vmem:[#allocation16_spill] sm:$0xff]  ;;  %v10536_v52 = vld [vmem:[#allocation53_spill] sm:$0xff] }
 0xa1b   : > { %4447 = vst.msk [vmem:[#allocation2 + $0x28] sm:$0xff] %vm4441_vm4, %v4356_v17  ;;  %v5565_v28 = vpop.f32.mrf.mxu0  ;;  %v10532_v17 = vld [vmem:[#allocation52_spill] sm:$0xff] }
 0xa1c   : > { %5779 = vst.msk [vmem:[#allocation2 + $0x28] sm:$0xff] %vm5773_vm5, %v5688_v4  ;;  %6533 = vmatmul.msk.bf16.gmra.mxu0 %vm388_vm0, %v5839_v0 }
 0xa1d   : > { %3117 = vst.msk [vmem:[#allocation2 + $0x38] sm:$0xff] %vm3109_vm3, %v3028_v30 }
 0xa20   : > { %5711 = vrot.lane.b32.xlu0 %v5467_v39, %s7134_s19  ;;  %5709 = vrot.lane.b32.xlu2 %v5465_v36, %s7134_s19 }
 0xa21   : > { %v5686_v53 = vpop.permute.xlu1 %5685 }
 0xa22   : > { %5778 = vst.msk [vmem:[#allocation2 + $0x20] sm:$0xff] %vm5773_vm5, %v5686_v53  ;;  %3041 = vrot.lane.b32.xlu1 %v10517_v23, %s7132_s17  ;;  %v4358_v62 = vpop.permute.xlu0 %4357  ;;  %v10537_v23 = vld [vmem:[#allocation39_spill] sm:$0xff] }
 0xa23   : > { %4448 = vst.msk [vmem:[#allocation2 + $0x30] sm:$0xff] %vm4441_vm4, %v4358_v62  ;;  %v5811_v49 = vld [vmem:[#allocation2 + $0x28] sm:$0xff] }
 0xa28   : > { %4381 = vrot.lane.b32.xlu0 %v10518_v22, %s7133_s18  ;;  %3051 = vrot.lane.b32.xlu2 %v10519_v20, %s7132_s17  ;;  %v9966_v20 = vld [vmem:[%s10238_s5] ss:$0 sm:$0xff] }
 0xa29   : > { %v5810_v25 = vld [vmem:[#allocation2 + $0x20] sm:$0xff] }
 0xa2a   : > { %4375 = vrot.lane.b32.xlu1 %v10520_v59, %s7133_s18  ;;  %v4360_v5 = vpop.permute.xlu0 %4359  ;;  %v5840_v8 = vpack.c.bf16 %v5811_v49, %v5810_v25  ;;  %v10538_v25 = vld [vmem:[#allocation17_spill] sm:$0xff] }
 0xa2b   : > { %4449 = vst.msk [vmem:[#allocation2 + $0x38] sm:$0xff] %vm4441_vm4, %v4360_v5 }
 0xa2c   : > { %6534 = vmatmul.msk.bf16.gmra.mxu0 %vm388_vm0, %v5840_v8 }
 0xa2d   : > { %v5540_v13 = vpop.f32.mrf.mxu3 }
 0xa30   : > { %5715 = vrot.lane.b32.xlu0 %v5492_v38, %s7134_s19  ;;  %5713 = vrot.lane.b32.xlu2 %v5490_v24, %s7134_s19 }
 0xa32   : > { %3045 = vrot.lane.b32.xlu1 %v10521_v41, %s7132_s17  ;;  %v5690_v50 = vpop.permute.xlu0 %5689 }
 0xa33   : > { %5780 = vst.msk [vmem:[#allocation2 + $0x30] sm:$0xff] %vm5773_vm5, %v5690_v50  ;;  %v5148_v3 = vpop.xlane.xlu2 %5147 }
 0xa34   : > { %7109 = vrcp.f32 %v5148_v3 }
 0xa35   : > { %v5542_v43 = vpop.f32.mrf.mxu3 }
 0xa38   : > { %4385 = vrot.lane.b32.xlu0 %v10522_v44, %s7133_s18  ;;  %3055 = vrot.lane.b32.xlu2 %v10523_v32, %s7132_s17 }
 0xa3a   : > { %4379 = vrot.lane.b32.xlu1 %v10524_v45, %s7133_s18  ;;  %v3030_v21 = vpop.permute.xlu0 %3029  ;;  %v7110_v40 = vpop.eup %7109  ;;  %v5812_v4 = vld [vmem:[#allocation2 + $0x30] sm:$0xff] }
 0xa3b   : > { %3118 = vst.msk [vmem:[#allocation2 + $0x40] sm:$0xff] %vm3109_vm3, %v3030_v21  ;;  %v5626_v2 = vpop.permute.xlu2 %5625  ;;  %v5212_v29 = vmul.f32 %v7110_v40, %v9807_v31  ;;  %v10531_v31 = vld [vmem:[#allocation30_spill] sm:$0xff]  ;;  %v10542_v40 = vld [vmem:[#allocation41_spill] sm:$0xff] }
 0xa3c   : > { %5638 = vmatpush.bf16.msra.mxu3 %v5626_v2 }
 0xa3d   : > { %v5244_v9 = vpack.c.bf16 %v5212_v29, %v5212_v29 }
 0xa3f   : > { %v5623_v56 = vunpack.c.l.b16 %v5244_v9  ;;  %v10544_v9 = vld [vmem:[#allocation56_spill] sm:$0xff] }
 0xa40   : > { %5719 = vrot.lane.b32.xlu0 %v5517_v61, %s7134_s19  ;;  %5717 = vrot.lane.b32.xlu2 %v5515_v35, %s7134_s19  ;;  %v10539_v35 = vld [vmem:[#allocation35_spill] sm:$0xff] }
 0xa42   : > { %3049 = vrot.lane.b32.xlu1 %v10525_v15, %s7132_s17  ;;  %v3032_v57 = vpop.permute.xlu0 %3031  ;;  %v10540_v15 = vld [vmem:[#allocation3_spill] sm:$0xff] }
 0xa43   : > { %3119 = vst.msk [vmem:[#allocation2 + $0x48] sm:$0xff] %vm3109_vm3, %v3032_v57  ;;  %v5694_v47 = vpop.permute.xlu2 %5693 }
 0xa48   : > { %4389 = vrot.lane.b32.xlu0 %v10526_v34, %s7133_s18  ;;  %3059 = vrot.lane.b32.xlu2 %v10527_v46, %s7132_s17  ;;  %v10541_v46 = vld [vmem:[#allocation40_spill] sm:$0xff] }
 0xa4a   : > { %4383 = vrot.lane.b32.xlu1 %v10528_v10, %s7133_s18  ;;  %v4362_v42 = vpop.permute.xlu0 %4361 }
 0xa4b   : > { %4450 = vst.msk [vmem:[#allocation2 + $0x40] sm:$0xff] %vm4441_vm4, %v4362_v42  ;;  %v3036_v11 = vpop.permute.xlu2 %3035 }
 0xa4c   : > { %5782 = vst.msk [vmem:[#allocation2 + $0x40] sm:$0xff] %vm5773_vm5, %v5694_v47  ;;  %v5145_v1 = vpop.xlane.xlu1 %5144 }
 0xa4d   : > { %3121 = vst.msk [vmem:[#allocation2 + $0x58] sm:$0xff] %vm3109_vm3, %v3036_v11  ;;  %7111 = vrcp.f32 %v5145_v1 }
 0xa50   : > { %5723 = vrot.lane.b32.xlu0 %v5542_v43, %s7134_s19  ;;  %5721 = vrot.lane.b32.xlu2 %v5540_v13, %s7134_s19 }
 0xa52   : > { %3053 = vrot.lane.b32.xlu1 %v10529_v6, %s7132_s17  ;;  %v5696_v60 = vpop.permute.xlu0 %5695  ;;  %v10543_v6 = vld [vmem:[#allocation54_spill] sm:$0xff] }
 0xa53   : > { %v7112_v16 = vpop.eup %7111  ;;  %v5698_v63 = vpop.permute.xlu2 %5697  ;;  %v5814_v50 = vld [vmem:[#allocation2 + $0x40] sm:$0xff] }
 0xa54   : > { %v5211_v27 = vmul.f32 %v7112_v16, %v9825_v26  ;;  %v5567_v26 = vpop.f32.mrf.mxu0 }
 0xa56   : > { %v5243_v51 = vpack.c.bf16 %v5211_v27, %v5211_v27 }
 0xa58   : > { %v5622_v58 = vunpack.c.l.b16 %v5243_v51  ;;  %4393 = vrot.lane.b32.xlu0 %v10530_v54, %s7133_s18  ;;  %3063 = vrot.lane.b32.xlu2 %v10531_v31, %s7132_s17 }
 0xa5a   : > { %v5624_v37 = vpack.c.b16 %v5623_v56, %v5622_v58  ;;  %4387 = vrot.lane.b32.xlu1 %v10532_v17, %s7133_s18  ;;  %v4366_v18 = vpop.permute.xlu0 %4365  ;;  %v10545_v58 = vld [vmem:[#allocation24_spill] sm:$0xff] }
 0xa5b   : > { %v3040_v14 = vpop.permute.xlu2 %3039 }
 0xa5c   : > { %3123 = vst.msk [vmem:[#allocation2 + $0x68] sm:$0xff] %vm3109_vm3, %v3040_v14  ;;  %6523 = vmatmul.msk.bf16.vlgmr.msra.gmra.mxu3 %vm993_vm2, %v5624_v37 }
 0xa60   : > { %5727 = vrot.lane.b32.xlu0 %v5567_v26, %s7134_s19  ;;  %5725 = vrot.lane.b32.xlu2 %v5565_v28, %s7134_s19 }
 0xa62   : > { %3057 = vrot.lane.b32.xlu1 %v10533_v55, %s7132_s17  ;;  %v5700_v36 = vpop.permute.xlu0 %5699  ;;  %v10547_v55 = vld [vmem:[#allocation55_spill] sm:$0xff] }
 0xa63   : > { %v5702_v12 = vpop.permute.xlu2 %5701 }
 0xa64   : > { %v5692_v48 = vpop.permute.xlu1 %5691 }
 0xa65   : > { %5781 = vst.msk [vmem:[#allocation2 + $0x38] sm:$0xff] %vm5773_vm5, %v5692_v48 }
 0xa68   : > { %4397 = vrot.lane.b32.xlu0 %v10534_v7, %s7133_s18  ;;  %3067 = vrot.lane.b32.xlu2 %v10535_v33, %s7132_s17  ;;  %v10548_v7 = vld [vmem:[#allocation57_spill] sm:$0xff] }
 0xa6a   : > { %4391 = vrot.lane.b32.xlu1 %v10536_v52, %s7133_s18  ;;  %v4370_v19 = vpop.permute.xlu0 %4369 }
 0xa6b   : > { %v3044_v30 = vpop.permute.xlu2 %3043 }
 0xa6c   : > { %3125 = vst.msk [vmem:[#allocation2 + $0x78] sm:$0xff] %vm3109_vm3, %v3044_v30  ;;  %v4364_v0 = vpop.permute.xlu1 %4363  ;;  %v5813_v39 = vld [vmem:[#allocation2 + $0x38] sm:$0xff] }
 0xa6d   : > { %4451 = vst.msk [vmem:[#allocation2 + $0x48] sm:$0xff] %vm4441_vm4, %v4364_v0  ;;  %v5841_v53 = vpack.c.bf16 %v5813_v39, %v5812_v4 }
 0xa6e   : > { %5783 = vst.msk [vmem:[#allocation2 + $0x48] sm:$0xff] %vm5773_vm5, %v5696_v60 }
 0xa6f   : > { %6535 = vmatmul.msk.bf16.gmra.mxu0 %vm388_vm0, %v5841_v53 }
 0xa72   : > { %3061 = vrot.lane.b32.xlu1 %v10537_v23, %s7132_s17  ;;  %v5704_v62 = vpop.permute.xlu0 %5703 }
 0xa73   : > { %v5706_v24 = vpop.permute.xlu2 %5705 }
 0xa74   : > { %v3034_v22 = vpop.permute.xlu1 %3033 }
 0xa75   : > { %3120 = vst.msk [vmem:[#allocation2 + $0x50] sm:$0xff] %vm3109_vm3, %v3034_v22  ;;  %v5815_v59 = vld [vmem:[#allocation2 + $0x48] sm:$0xff] }
 0xa76   : > { %4452 = vst.msk [vmem:[#allocation2 + $0x50] sm:$0xff] %vm4441_vm4, %v4366_v18  ;;  %v5842_v3 = vpack.c.bf16 %v5815_v59, %v5814_v50  ;;  %v10546_v18 = vld [vmem:[#allocation36_spill] sm:$0xff] }
 0xa77   : > { %5784 = vst.msk [vmem:[#allocation2 + $0x50] sm:$0xff] %vm5773_vm5, %v5698_v63 }
 0xa7a   : > { %4395 = vrot.lane.b32.xlu1 %v10538_v25, %s7133_s18  ;;  %v5931_v49 = vpop.f32.mrf.mxu0  ;;  %v4374_v38 = vpop.permute.xlu0 %4373 }
 0xa7b   : > { %v5932_v5 = vadd.f32 %v9966_v20, %v5931_v49  ;;  %v3048_v8 = vpop.permute.xlu2 %3047 }
 0xa7c   : > { %3127 = vst.msk [vmem:[#allocation2 + $0x88] sm:$0xff] %vm3109_vm3, %v3048_v8  ;;  %v4368_v41 = vpop.permute.xlu1 %4367 }
 0xa7d   : > { %6011 = vst.msk [vmem:[#allocation2] sm:$0xff] %vm388_vm0, %v5932_v5 }
 0xa7e   : > { %4453 = vst.msk [vmem:[#allocation2 + $0x58] sm:$0xff] %vm4441_vm4, %v4368_v41  ;;  %v5816_v10 = vld [vmem:[#allocation2 + $0x50] sm:$0xff] }
 0xa7f   : > { %5785 = vst.msk [vmem:[#allocation2 + $0x58] sm:$0xff] %vm5773_vm5, %v5700_v36  ;;  %6536 = vmatmul.msk.bf16.gmra.mxu0 %vm388_vm0, %v5842_v3 }
 0xa82   : > { %3065 = vrot.lane.b32.xlu1 %v10539_v35, %s7132_s17  ;;  %v5933_v44 = vpop.f32.mrf.mxu0  ;;  %v5708_v61 = vpop.permute.xlu0 %5707 }
 0xa83   : > { %v5934_v32 = vadd.f32 %v9966_v20, %v5933_v44  ;;  %v5710_v45 = vpop.permute.xlu2 %5709  ;;  %v5590_v21 = vpop.f32.mrf.mxu1 }
 0xa84   : > { %v3038_v2 = vpop.permute.xlu1 %3037  ;;  %5729 = vrot.lane.b32.xlu2 %v5590_v21, %s7134_s19 }
 0xa85   : > { %6012 = vst.msk [vmem:[#allocation2 + $0x8] sm:$0xff] %vm388_vm0, %v5934_v32 }
 0xa86   : > { %3122 = vst.msk [vmem:[#allocation2 + $0x60] sm:$0xff] %vm3109_vm3, %v3038_v2  ;;  %v5817_v57 = vld [vmem:[#allocation2 + $0x58] sm:$0xff] }
 0xa87   : > { %4454 = vst.msk [vmem:[#allocation2 + $0x60] sm:$0xff] %vm4441_vm4, %v4370_v19  ;;  %v5843_v42 = vpack.c.bf16 %v5817_v57, %v5816_v10 }
 0xa88   : > { %5786 = vst.msk [vmem:[#allocation2 + $0x60] sm:$0xff] %vm5773_vm5, %v5702_v12 }
 0xa8a   : > { %4399 = vrot.lane.b32.xlu1 %v10540_v15, %s7133_s18  ;;  %v4378_v11 = vpop.permute.xlu0 %4377 }
 0xa8b   : > { %v3052_v47 = vpop.permute.xlu2 %3051  ;;  %v5592_v13 = vpop.f32.mrf.mxu1 }
 0xa8c   : > { %3129 = vst.msk [vmem:[#allocation2 + $0x98] sm:$0xff] %vm3109_vm3, %v3052_v47  ;;  %v4372_v34 = vpop.permute.xlu1 %4371  ;;  %3071 = vrot.lane.b32.xlu2 %v10541_v46, %s7132_s17  ;;  %5731 = vrot.lane.b32.xlu0 %v5592_v13, %s7134_s19 }
 0xa8d   : > { %4455 = vst.msk [vmem:[#allocation2 + $0x68] sm:$0xff] %vm4441_vm4, %v4372_v34 }
 0xa8e   : > { %5787 = vst.msk [vmem:[#allocation2 + $0x68] sm:$0xff] %vm5773_vm5, %v5704_v62 }
 0xa8f   : > { %6537 = vmatmul.msk.bf16.gmra.mxu0 %vm388_vm0, %v5843_v42  ;;  %v5818_v54 = vld [vmem:[#allocation2 + $0x60] sm:$0xff] }
 0xa91   : > { %v5615_v1 = vpop.f32.mrf.mxu2 }
 0xa92   : > { %3069 = vrot.lane.b32.xlu1 %v10542_v40, %s7132_s17  ;;  %v5712_v16 = vpop.permute.xlu0 %5711 }
 0xa93   : > { %v9995_v43 = vpop.permute.xlu2 %5713 }
 0xa94   : > { %v3042_v29 = vpop.permute.xlu1 %3041  ;;  %4401 = vrot.lane.b32.xlu0 %v10543_v6, %s7133_s18  ;;  %5733 = vrot.lane.b32.xlu2 %v5615_v1, %s7134_s19 }
 0xa95   : > { %3124 = vst.msk [vmem:[#allocation2 + $0x70] sm:$0xff] %vm3109_vm3, %v3042_v29  ;;  %v5819_v27 = vld [vmem:[#allocation2 + $0x68] sm:$0xff] }
 0xa96   : > { %4456 = vst.msk [vmem:[#allocation2 + $0x70] sm:$0xff] %vm4441_vm4, %v4374_v38  ;;  %v5844_v31 = vpack.c.bf16 %v5819_v27, %v5818_v54 }
 0xa97   : > { %5788 = vst.msk [vmem:[#allocation2 + $0x70] sm:$0xff] %vm5773_vm5, %v5706_v24 }
 0xa99   : > { %v5936_v60 = vpop.f32.mrf.mxu0  ;;  %v5617_v28 = vpop.f32.mrf.mxu2 }
 0xa9a   : > { %v5937_v63 = vadd.f32 %v9966_v20, %v5936_v60  ;;  %4403 = vrot.lane.b32.xlu1 %v10544_v9, %s7133_s18  ;;  %v4382_v36 = vpop.permute.xlu0 %4381 }
 0xa9b   : > { %v3056_v51 = vpop.permute.xlu2 %3055 }
 0xa9c   : > { %6013 = vst.msk [vmem:[#allocation2 + $0x10] sm:$0xff] %vm388_vm0, %v5937_v63  ;;  %v4376_v56 = vpop.permute.xlu1 %4375  ;;  %3075 = vrot.lane.b32.xlu2 %v10545_v58, %s7132_s17  ;;  %5735 = vrot.lane.b32.xlu0 %v5617_v28, %s7134_s19 }
 0xa9d   : > { %3131 = vst.msk [vmem:[#allocation2 + $0xa8] sm:$0xff] %vm3109_vm3, %v3056_v51 }
 0xa9e   : > { %4457 = vst.msk [vmem:[#allocation2 + $0x78] sm:$0xff] %vm4441_vm4, %v4376_v56  ;;  %v5820_v30 = vld [vmem:[#allocation2 + $0x70] sm:$0xff] }
 0xa9f   : > { %5789 = vst.msk [vmem:[#allocation2 + $0x78] sm:$0xff] %vm5773_vm5, %v5708_v61  ;;  %6538 = vmatmul.msk.bf16.gmra.mxu0 %vm388_vm0, %v5844_v31 }
 0xaa1   : > { %v5938_v37 = vpop.f32.mrf.mxu0 }
 0xaa2   : > { %v5939_v17 = vadd.f32 %v9966_v20, %v5938_v37  ;;  %3073 = vrot.lane.b32.xlu1 %v10546_v18, %s7132_s17  ;;  %v5716_v39 = vpop.permute.xlu0 %5715 }
 0xaa3   : > { %v5718_v14 = vpop.permute.xlu2 %5717 }
 0xaa4   : > { %6014 = vst.msk [vmem:[#allocation2 + $0x18] sm:$0xff] %vm388_vm0, %v5939_v17  ;;  %v3046_v26 = vpop.permute.xlu1 %3045  ;;  %4405 = vrot.lane.b32.xlu0 %v10547_v55, %s7133_s18 }
 0xaa5   : > { %3126 = vst.msk [vmem:[#allocation2 + $0x80] sm:$0xff] %vm3109_vm3, %v3046_v26 }
 0xaa6   : > { %4458 = vst.msk [vmem:[#allocation2 + $0x80] sm:$0xff] %vm4441_vm4, %v4378_v11  ;;  %v5821_v33 = vld [vmem:[#allocation2 + $0x78] sm:$0xff] }
 0xaa7   : > { %5790 = vst.msk [vmem:[#allocation2 + $0x80] sm:$0xff] %vm5773_vm5, %v5710_v45  ;;  %v5845_v0 = vpack.c.bf16 %v5821_v33, %v5820_v30 }
 0xaa9   : > { %v5941_v12 = vpop.f32.mrf.mxu0 }
 0xaaa   : > { %v5942_v48 = vadd.f32 %v9966_v20, %v5941_v12  ;;  %4407 = vrot.lane.b32.xlu1 %v10548_v7, %s7133_s18  ;;  %v4386_v25 = vpop.permute.xlu0 %4385 }
 0xaab   : > { %v3060_v52 = vpop.permute.xlu2 %3059  ;;  %v6043_v4 = vld [vmem:[#allocation2] ss:$4 sm:$0xff]  ;;  %v6067_v23 = vld [vmem:[#allocation2 + $0x1] ss:$4 sm:$0xff]  ;;  %v6124_v51 = vld [vmem:[#allocation2 + $0x2] ss:$4 sm:$0xff] }
 0xaac   : > { %6015 = vst.msk [vmem:[#allocation2 + $0x20] sm:$0xff] %vm388_vm0, %v5942_v48  ;;  %v4380_v19 = vpop.permute.xlu1 %4379 }
 0xaad   : > { %3133 = vst.msk [vmem:[#allocation2 + $0xb8] sm:$0xff] %vm3109_vm3, %v3060_v52 }
 0xaae   : > { %4459 = vst.msk [vmem:[#allocation2 + $0x88] sm:$0xff] %vm4441_vm4, %v4380_v19  ;;  %v5822_v8 = vld [vmem:[#allocation2 + $0x80] sm:$0xff] }
 0xaaf   : > { %5791 = vst.msk [vmem:[#allocation2 + $0x88] sm:$0xff] %vm5773_vm5, %v5712_v16  ;;  %6539 = vmatmul.msk.bf16.gmra.mxu0 %vm388_vm0, %v5845_v0 }
 0xab0   : > { %6058 = vst.msk [vmem:[%s10033_s7] sm:$0xff] %vm388_vm0, %v6043_v4 }
 0xab1   : > { %v5943_v53 = vpop.f32.mrf.mxu0 }
 0xab2   : > { %v5944_v62 = vadd.f32 %v9966_v20, %v5943_v53  ;;  %6090 = vrot.lane.b32.xlu1 %v6067_v23, %s7135_s8  ;;  %v5720_v41 = vpop.permute.xlu0 %5719 }
 0xab3   : > { %v5722_v24 = vpop.permute.xlu2 %5721 }
 0xab4   : > { %6016 = vst.msk [vmem:[#allocation2 + $0x28] sm:$0xff] %vm388_vm0, %v5944_v62  ;;  %v3050_v22 = vpop.permute.xlu1 %3049 }
 0xab5   : > { %3128 = vst.msk [vmem:[#allocation2 + $0x90] sm:$0xff] %vm3109_vm3, %v3050_v22 }
 0xab6   : > { %4460 = vst.msk [vmem:[#allocation2 + $0x90] sm:$0xff] %vm4441_vm4, %v4382_v36  ;;  %v5823_v49 = vld [vmem:[#allocation2 + $0x88] sm:$0xff] }
 0xab7   : > { %5792 = vst.msk [vmem:[#allocation2 + $0x90] sm:$0xff] %vm5773_vm5, %v9995_v43  ;;  %v5846_v38 = vpack.c.bf16 %v5823_v49, %v5822_v8  ;;  %v6181_v43 = vld [vmem:[#allocation2 + $0x3] ss:$4 sm:$0xff] }
 0xaba   : > { %v4390_v21 = vpop.permute.xlu0 %4389 }
 0xabb   : > { %v3064_v59 = vpop.permute.xlu2 %3063 }
 0xabc   : > { %3135 = vst.msk [vmem:[#allocation2 + $0xc8] sm:$0xff] %vm3109_vm3, %v3064_v59  ;;  %v4384_v5 = vpop.permute.xlu1 %4383 }
 0xabd   : > { %4461 = vst.msk [vmem:[#allocation2 + $0x98] sm:$0xff] %vm4441_vm4, %v4384_v5 }
 0xabe   : > { %5793 = vst.msk [vmem:[#allocation2 + $0x98] sm:$0xff] %vm5773_vm5, %v5716_v39  ;;  %v5824_v45 = vld [vmem:[#allocation2 + $0x90] sm:$0xff] }
 0xabf   : > { %6540 = vmatmul.msk.bf16.gmra.mxu0 %vm388_vm0, %v5846_v38 }
 0xac2   : > { %v5724_v15 = vpop.permute.xlu0 %5723 }
 0xac3   : > { %v5726_v50 = vpop.permute.xlu2 %5725 }
 0xac4   : > { %v3054_v3 = vpop.permute.xlu1 %3053 }
 0xac5   : > { %3130 = vst.msk [vmem:[#allocation2 + $0xa0] sm:$0xff] %vm3109_vm3, %v3054_v3  ;;  %v5825_v35 = vld [vmem:[#allocation2 + $0x98] sm:$0xff] }
 0xac6   : > { %4462 = vst.msk [vmem:[#allocation2 + $0xa0] sm:$0xff] %vm4441_vm4, %v4386_v25  ;;  %v5847_v2 = vpack.c.bf16 %v5825_v35, %v5824_v45 }
 0xac7   : > { %5794 = vst.msk [vmem:[#allocation2 + $0xa0] sm:$0xff] %vm5773_vm5, %v5718_v14 }
 0xaca   : > { %v4394_v42 = vpop.permute.xlu0 %4393 }
 0xacb   : > { %v3068_v44 = vpop.permute.xlu2 %3067 }
 0xacc   : > { %3137 = vst.msk [vmem:[#allocation2 + $0xd8] sm:$0xff] %vm3109_vm3, %v3068_v44  ;;  %v4388_v32 = vpop.permute.xlu1 %4387 }
 0xacd   : > { %4463 = vst.msk [vmem:[#allocation2 + $0xa8] sm:$0xff] %vm4441_vm4, %v4388_v32 }
 0xace   : > { %5795 = vst.msk [vmem:[#allocation2 + $0xa8] sm:$0xff] %vm5773_vm5, %v5720_v41  ;;  %v5826_v13 = vld [vmem:[#allocation2 + $0xa0] sm:$0xff] }
 0xacf   : > { %6541 = vmatmul.msk.bf16.gmra.mxu0 %vm388_vm0, %v5847_v2 }
 0xad2   : > { %v5728_v6 = vpop.permute.xlu0 %5727 }
 0xad4   : > { %v3058_v61 = vpop.permute.xlu1 %3057 }
 0xad5   : > { %3132 = vst.msk [vmem:[#allocation2 + $0xb0] sm:$0xff] %vm3109_vm3, %v3058_v61  ;;  %v5827_v57 = vld [vmem:[#allocation2 + $0xa8] sm:$0xff] }
 0xad6   : > { %4464 = vst.msk [vmem:[#allocation2 + $0xb0] sm:$0xff] %vm4441_vm4, %v4390_v21  ;;  %v5848_v34 = vpack.c.bf16 %v5827_v57, %v5826_v13 }
 0xad7   : > { %5796 = vst.msk [vmem:[#allocation2 + $0xb0] sm:$0xff] %vm5773_vm5, %v5722_v24 }
 0xada   : > { %v4398_v54 = vpop.permute.xlu0 %4397 }
 0xadc   : > { %v4392_v47 = vpop.permute.xlu1 %4391 }
 0xadd   : > { %4465 = vst.msk [vmem:[#allocation2 + $0xb8] sm:$0xff] %vm4441_vm4, %v4392_v47 }
 0xade   : > { %5797 = vst.msk [vmem:[#allocation2 + $0xb8] sm:$0xff] %vm5773_vm5, %v5724_v15  ;;  %v5730_v46 = vpop.permute.xlu2 %5729  ;;  %v5828_v63 = vld [vmem:[#allocation2 + $0xb0] sm:$0xff] }
 0xadf   : > { %v5640_v10 = vpop.f32.mrf.mxu3  ;;  %6542 = vmatmul.msk.bf16.gmra.mxu0 %vm388_vm0, %v5848_v34 }
 0xae0   : > { %5737 = vrot.lane.b32.xlu2 %v5640_v10, %s7134_s19 }
 0xae4   : > { %v3062_v11 = vpop.permute.xlu1 %3061 }
 0xae5   : > { %3134 = vst.msk [vmem:[#allocation2 + $0xc0] sm:$0xff] %vm3109_vm3, %v3062_v11  ;;  %v5829_v29 = vld [vmem:[#allocation2 + $0xb8] sm:$0xff] }
 0xae6   : > { %4466 = vst.msk [vmem:[#allocation2 + $0xc0] sm:$0xff] %vm4441_vm4, %v4394_v42  ;;  %v3072_v1 = vpop.permute.xlu2 %3071  ;;  %v5849_v27 = vpack.c.bf16 %v5829_v29, %v5828_v63 }
 0xae7   : > { %5798 = vst.msk [vmem:[#allocation2 + $0xc0] sm:$0xff] %vm5773_vm5, %v5726_v50  ;;  %v5642_v40 = vpop.f32.mrf.mxu3 }
 0xae8   : > { %3139 = vst.msk [vmem:[#allocation2 + $0xe8] sm:$0xff] %vm3109_vm3, %v3072_v1  ;;  %6204 = vrot.lane.b32.xlu2 %v6181_v43, %s7121_s10  ;;  %5739 = vrot.lane.b32.xlu0 %v5642_v40, %s7134_s19 }
 0xaec   : > { %v4396_v60 = vpop.permute.xlu1 %4395  ;;  %v5946_v16 = vpop.f32.mrf.mxu0 }
 0xaed   : > { %4467 = vst.msk [vmem:[#allocation2 + $0xc8] sm:$0xff] %vm4441_vm4, %v4396_v60  ;;  %v5947_v9 = vadd.f32 %v9966_v20, %v5946_v16 }
 0xaee   : > { %5799 = vst.msk [vmem:[#allocation2 + $0xc8] sm:$0xff] %vm5773_vm5, %v5728_v6  ;;  %v5734_v28 = vpop.permute.xlu2 %5733  ;;  %v5830_v26 = vld [vmem:[#allocation2 + $0xc0] sm:$0xff] }
 0xaef   : > { %6017 = vst.msk [vmem:[#allocation2 + $0x30] sm:$0xff] %vm388_vm0, %v5947_v9  ;;  %6543 = vmatmul.msk.bf16.gmra.mxu0 %vm388_vm0, %v5849_v27 }
 0xaf0   : > { %6147 = vrot.lane.b32.xlu0 %v6124_v51, %s7123_s12 }
 0xaf4   : > { %v3066_v56 = vpop.permute.xlu1 %3065  ;;  %v5948_v58 = vpop.f32.mrf.mxu0 }
 0xaf5   : > { %3136 = vst.msk [vmem:[#allocation2 + $0xd0] sm:$0xff] %vm3109_vm3, %v3066_v56  ;;  %v5949_v31 = vadd.f32 %v9966_v20, %v5948_v58  ;;  %v5831_v17 = vld [vmem:[#allocation2 + $0xc8] sm:$0xff] }
 0xaf6   : > { %4468 = vst.msk [vmem:[#allocation2 + $0xd0] sm:$0xff] %vm4441_vm4, %v4398_v54  ;;  %v3076_v37 = vpop.permute.xlu2 %3075  ;;  %v5850_v36 = vpack.c.bf16 %v5831_v17, %v5830_v26 }
 0xaf7   : > { %5800 = vst.msk [vmem:[#allocation2 + $0xd0] sm:$0xff] %vm5773_vm5, %v5730_v46 }
 0xaf8   : > { %6018 = vst.msk [vmem:[#allocation2 + $0x38] sm:$0xff] %vm388_vm0, %v5949_v31 }
 0xaf9   : > { %3141 = vst.msk [vmem:[#allocation2 + $0xf8] sm:$0xff] %vm3109_vm3, %v3076_v37 }
 0xafc   : > { %v4400_v18 = vpop.permute.xlu1 %4399  ;;  %v5951_v14 = vpop.f32.mrf.mxu0 }
 0xafd   : > { %4469 = vst.msk [vmem:[#allocation2 + $0xd8] sm:$0xff] %vm4441_vm4, %v4400_v18  ;;  %v5952_v55 = vadd.f32 %v9966_v20, %v5951_v14 }
 0xafe   : > { %v5732_v12 = vpop.permute.xlu0 %5731  ;;  %v5832_v62 = vld [vmem:[#allocation2 + $0xd0] sm:$0xff] }
 0xaff   : > { %6019 = vst.msk [vmem:[#allocation2 + $0x40] sm:$0xff] %vm388_vm0, %v5952_v55  ;;  %v6183_v48 = vld [vmem:[#allocation2 + $0x23] ss:$4 sm:$0xff]  ;;  %v6126_v7 = vld [vmem:[#allocation2 + $0x22] ss:$4 sm:$0xff]  ;;  %6544 = vmatmul.msk.bf16.gmra.mxu0 %vm388_vm0, %v5850_v36 }
 0xb00   : > { %5801 = vst.msk [vmem:[#allocation2 + $0xd8] sm:$0xff] %vm5773_vm5, %v5732_v12  ;;  %6206 = vrot.lane.b32.xlu0 %v6183_v48, %s7121_s10  ;;  %6149 = vrot.lane.b32.xlu1 %v6126_v7, %s7123_s12  ;;  %v6069_v33 = vld [vmem:[#allocation2 + $0x21] ss:$4 sm:$0xff]  ;;  %v6045_v52 = vld [vmem:[#allocation2 + $0x20] ss:$4 sm:$0xff] }
 0xb01   : > { %6092 = vrot.lane.b32.xlu2 %v6069_v33, %s7135_s8  ;;  %6059 = vst.msk [vmem:[%s10033_s7 + $0x8] sm:$0xff] %vm388_vm0, %v6045_v52 }
 0xb04   : > { %v3070_v19 = vpop.permute.xlu1 %3069  ;;  %v5953_v30 = vpop.f32.mrf.mxu0 }
 0xb05   : > { %3138 = vst.msk [vmem:[#allocation2 + $0xe0] sm:$0xff] %vm3109_vm3, %v3070_v19  ;;  %v5954_v0 = vadd.f32 %v9966_v20, %v5953_v30 }
 0xb06   : > { %v4402_v4 = vpop.permute.xlu0 %4401 }
 0xb07   : > { %6020 = vst.msk [vmem:[#allocation2 + $0x48] sm:$0xff] %vm388_vm0, %v5954_v0  ;;  %v5833_v39 = vld [vmem:[#allocation2 + $0xd8] sm:$0xff] }
 0xb08   : > { %4470 = vst.msk [vmem:[#allocation2 + $0xe0] sm:$0xff] %vm4441_vm4, %v4402_v4  ;;  %v5851_v22 = vpack.c.bf16 %v5833_v39, %v5832_v62 }
 0xb09   : > { %5802 = vst.msk [vmem:[#allocation2 + $0xe0] sm:$0xff] %vm5773_vm5, %v5734_v28 }
 0xb0c   : > { %v4404_v53 = vpop.permute.xlu1 %4403  ;;  %v5956_v23 = vpop.f32.mrf.mxu0 }
 0xb0d   : > { %4471 = vst.msk [vmem:[#allocation2 + $0xe8] sm:$0xff] %vm4441_vm4, %v4404_v53  ;;  %v5957_v24 = vadd.f32 %v9966_v20, %v5956_v23 }
 0xb0e   : > { %v5736_v25 = vpop.permute.xlu0 %5735 }
 0xb0f   : > { %6021 = vst.msk [vmem:[#allocation2 + $0x50] sm:$0xff] %vm388_vm0, %v5957_v24  ;;  %6545 = vmatmul.msk.bf16.gmra.mxu0 %vm388_vm0, %v5851_v22 }
 0xb10   : > { %5803 = vst.msk [vmem:[#allocation2 + $0xe8] sm:$0xff] %vm5773_vm5, %v5736_v25  ;;  %v5834_v35 = vld [vmem:[#allocation2 + $0xe0] sm:$0xff] }
 0xb14   : > { %v3074_v49 = vpop.permute.xlu1 %3073  ;;  %v5958_v59 = vpop.f32.mrf.mxu0 }
 0xb15   : > { %3140 = vst.msk [vmem:[#allocation2 + $0xf0] sm:$0xff] %vm3109_vm3, %v3074_v49  ;;  %v5959_v5 = vadd.f32 %v9966_v20, %v5958_v59 }
 0xb16   : > { %v4406_v8 = vpop.permute.xlu0 %4405 }
 0xb17   : > { %6022 = vst.msk [vmem:[#allocation2 + $0x58] sm:$0xff] %vm388_vm0, %v5959_v5  ;;  %v5835_v38 = vld [vmem:[#allocation2 + $0xe8] sm:$0xff] }
 0xb18   : > { %4472 = vst.msk [vmem:[#allocation2 + $0xf0] sm:$0xff] %vm4441_vm4, %v4406_v8  ;;  %v5852_v21 = vpack.c.bf16 %v5835_v38, %v5834_v35 }
 0xb1c   : > { %v4408_v41 = vpop.permute.xlu1 %4407  ;;  %v5961_v50 = vpop.f32.mrf.mxu0 }
 0xb1d   : > { %4473 = vst.msk [vmem:[#allocation2 + $0xf8] sm:$0xff] %vm4441_vm4, %v4408_v41  ;;  %v5962_v3 = vadd.f32 %v9966_v20, %v5961_v50 }
 0xb1e   : > { %v6185_v44 = vld [vmem:[#allocation2 + $0x43] ss:$4 sm:$0xff]  ;;  %v6128_v32 = vld [vmem:[#allocation2 + $0x42] ss:$4 sm:$0xff]  ;;  %v6071_v45 = vld [vmem:[#allocation2 + $0x41] ss:$4 sm:$0xff] }
 0xb1f   : > { %6023 = vst.msk [vmem:[#allocation2 + $0x60] sm:$0xff] %vm388_vm0, %v5962_v3  ;;  %6208 = vrot.lane.b32.xlu1 %v6185_v44, %s7121_s10  ;;  %6151 = vrot.lane.b32.xlu2 %v6128_v32, %s7123_s12  ;;  %v6047_v2 = vld [vmem:[#allocation2 + $0x40] ss:$4 sm:$0xff] }
 0xb20   : > { %6094 = vrot.lane.b32.xlu0 %v6071_v45, %s7135_s8  ;;  %6546 = vmatmul.msk.bf16.gmra.mxu0 %vm388_vm0, %v5852_v21  ;;  %6060 = vst.msk [vmem:[%s10033_s7 + $0x10] sm:$0xff] %vm388_vm0, %v6047_v2 }
 0xb24   : > { %v6091_v61 = vpop.permute.xlu1 %6090  ;;  %v5963_v15 = vpop.f32.mrf.mxu0 }
 0xb25   : > { %6115 = vst.msk [vmem:[%s10033_s7] sm:$0xff] %vm6114_vm6, %v6091_v61  ;;  %v5964_v57 = vadd.f32 %v9966_v20, %v5963_v15 }
 0xb27   : > { %6024 = vst.msk [vmem:[#allocation2 + $0x68] sm:$0xff] %vm388_vm0, %v5964_v57 }
 0xb2c   : > { %v5966_v47 = vpop.f32.mrf.mxu0 }
 0xb2d   : > { %v5967_v13 = vadd.f32 %v9966_v20, %v5966_v47 }
 0xb2f   : > { %6025 = vst.msk [vmem:[#allocation2 + $0x70] sm:$0xff] %vm388_vm0, %v5967_v13 }
 0xb34   : > { %v5968_v34 = vpop.f32.mrf.mxu0 }
 0xb35   : > { %v5969_v46 = vadd.f32 %v9966_v20, %v5968_v34 }
 0xb37   : > { %6026 = vst.msk [vmem:[#allocation2 + $0x78] sm:$0xff] %vm388_vm0, %v5969_v46 }
 0xb3a   : > { %v5738_v10 = vpop.permute.xlu2 %5737 }
 0xb3b   : > { %5804 = vst.msk [vmem:[#allocation2 + $0xf0] sm:$0xff] %vm5773_vm5, %v5738_v10 }
 0xb3c   : > { %v5971_v42 = vpop.f32.mrf.mxu0 }
 0xb3d   : > { %v5972_v11 = vadd.f32 %v9966_v20, %v5971_v42 }
 0xb3e   : > { %v6187_v1 = vld [vmem:[#allocation2 + $0x63] ss:$4 sm:$0xff]  ;;  %v6130_v40 = vld [vmem:[#allocation2 + $0x62] ss:$4 sm:$0xff]  ;;  %v6073_v43 = vld [vmem:[#allocation2 + $0x61] ss:$4 sm:$0xff] }
 0xb3f   : > { %6027 = vst.msk [vmem:[#allocation2 + $0x80] sm:$0xff] %vm388_vm0, %v5972_v11  ;;  %6210 = vrot.lane.b32.xlu2 %v6187_v1, %s7121_s10  ;;  %6153 = vrot.lane.b32.xlu0 %v6130_v40, %s7123_s12  ;;  %v6049_v29 = vld [vmem:[#allocation2 + $0x60] ss:$4 sm:$0xff] }
 0xb40   : > { %6096 = vrot.lane.b32.xlu1 %v6073_v43, %s7135_s8  ;;  %6061 = vst.msk [vmem:[%s10033_s7 + $0x18] sm:$0xff] %vm388_vm0, %v6049_v29 }
 0xb42   : > { %v6205_v9 = vpop.permute.xlu2 %6204  ;;  %v5836_v26 = vld [vmem:[#allocation2 + $0xf0] sm:$0xff] }
 0xb44   : > { %v5973_v6 = vpop.f32.mrf.mxu0 }
 0xb45   : > { %v5974_v60 = vadd.f32 %v9966_v20, %v5973_v6 }
 0xb47   : > { %6028 = vst.msk [vmem:[#allocation2 + $0x88] sm:$0xff] %vm388_vm0, %v5974_v60 }
 0xb4c   : > { %v5976_v16 = vpop.f32.mrf.mxu0 }
 0xb4d   : > { %v5977_v63 = vadd.f32 %v9966_v20, %v5976_v16 }
 0xb4f   : > { %6029 = vst.msk [vmem:[#allocation2 + $0x90] sm:$0xff] %vm388_vm0, %v5977_v63 }
 0xb54   : > { %v5978_v27 = vpop.f32.mrf.mxu0 }
 0xb55   : > { %v5979_v28 = vadd.f32 %v9966_v20, %v5978_v27 }
 0xb57   : > { %6030 = vst.msk [vmem:[#allocation2 + $0x98] sm:$0xff] %vm388_vm0, %v5979_v28 }
 0xb5a   : > { %v5740_v51 = vpop.permute.xlu0 %5739 }
 0xb5b   : > { %v6093_v56 = vpop.permute.xlu2 %6092  ;;  %5805 = vst.msk [vmem:[#allocation2 + $0xf8] sm:$0xff] %vm5773_vm5, %v5740_v51 }
 0xb5c   : > { %6116 = vst.msk [vmem:[%s10033_s7 + $0x8] sm:$0xff] %vm6114_vm6, %v6093_v56  ;;  %v5981_v58 = vpop.f32.mrf.mxu0 }
 0xb5d   : > { %v5982_v54 = vadd.f32 %v9966_v20, %v5981_v58 }
 0xb5e   : > { %v6189_v31 = vld [vmem:[#allocation2 + $0x83] ss:$4 sm:$0xff]  ;;  %v6132_v37 = vld [vmem:[#allocation2 + $0x82] ss:$4 sm:$0xff]  ;;  %v6075_v17 = vld [vmem:[#allocation2 + $0x81] ss:$4 sm:$0xff] }
 0xb5f   : > { %6031 = vst.msk [vmem:[#allocation2 + $0xa0] sm:$0xff] %vm388_vm0, %v5982_v54  ;;  %6212 = vrot.lane.b32.xlu0 %v6189_v31, %s7121_s10  ;;  %6155 = vrot.lane.b32.xlu1 %v6132_v37, %s7123_s12  ;;  %v6051_v18 = vld [vmem:[#allocation2 + $0x80] ss:$4 sm:$0xff] }
 0xb60   : > { %6098 = vrot.lane.b32.xlu2 %v6075_v17, %s7135_s8  ;;  %6062 = vst.msk [vmem:[%s10033_s7 + $0x20] sm:$0xff] %vm388_vm0, %v6051_v18 }
 0xb62   : > { %v6148_v14 = vpop.permute.xlu0 %6147  ;;  %v5837_v55 = vld [vmem:[#allocation2 + $0xf8] sm:$0xff] }
 0xb63   : > { %6172 = vst.msk [vmem:[%s10033_s7] sm:$0xff] %vm6171_vm7, %v6148_v14  ;;  %v5853_v36 = vpack.c.bf16 %v5837_v55, %v5836_v26 }
 0xb64   : > { %6229 = vst.msk [vmem:[%s10033_s7] sm:$0xff] %vm6228_vm8, %v6205_v9  ;;  %v5983_v12 = vpop.f32.mrf.mxu0 }
 0xb65   : > { %v5984_v48 = vadd.f32 %v9966_v20, %v5983_v12  ;;  %6547 = vmatmul.msk.bf16.gmra.mxu0 %vm388_vm0, %v5853_v36 }
 0xb67   : > { %6032 = vst.msk [vmem:[#allocation2 + $0xa8] sm:$0xff] %vm388_vm0, %v5984_v48 }
 0xb6c   : > { %v5986_v7 = vpop.f32.mrf.mxu0 }
 0xb6d   : > { %v5987_v33 = vadd.f32 %v9966_v20, %v5986_v7 }
 0xb6f   : > { %6033 = vst.msk [vmem:[#allocation2 + $0xb0] sm:$0xff] %vm388_vm0, %v5987_v33 }
 0xb72   : > { %v6150_v52 = vpop.permute.xlu1 %6149  ;;  %v6207_v19 = vpop.permute.xlu0 %6206 }
 0xb73   : > { %6173 = vst.msk [vmem:[%s10033_s7 + $0x8] sm:$0xff] %vm6171_vm7, %v6150_v52 }
 0xb74   : > { %6230 = vst.msk [vmem:[%s10033_s7 + $0x8] sm:$0xff] %vm6228_vm8, %v6207_v19  ;;  %v5988_v30 = vpop.f32.mrf.mxu0 }
 0xb75   : > { %v5989_v0 = vadd.f32 %v9966_v20, %v5988_v30 }
 0xb77   : > { %6034 = vst.msk [vmem:[#allocation2 + $0xb8] sm:$0xff] %vm388_vm0, %v5989_v0 }
 0xb79   : > { %v6152_v5 = vpop.permute.xlu2 %6151 }
 0xb7c   : > { %v5991_v4 = vpop.f32.mrf.mxu0 }
 0xb7d   : > { %v5992_v39 = vadd.f32 %v9966_v20, %v5991_v4 }
 0xb7e   : > { %v6134_v53 = vld [vmem:[#allocation2 + $0xa2] ss:$4 sm:$0xff]  ;;  %v6077_v23 = vld [vmem:[#allocation2 + $0xa1] ss:$4 sm:$0xff]  ;;  %v6053_v62 = vld [vmem:[#allocation2 + $0xa0] ss:$4 sm:$0xff] }
 0xb7f   : > { %6035 = vst.msk [vmem:[#allocation2 + $0xc0] sm:$0xff] %vm388_vm0, %v5992_v39  ;;  %6157 = vrot.lane.b32.xlu2 %v6134_v53, %s7123_s12  ;;  %6100 = vrot.lane.b32.xlu0 %v6077_v23, %s7135_s8  ;;  %v6191_v6 = vld [vmem:[#allocation2 + $0xa3] ss:$4 sm:$0xff] }
 0xb80   : > { %6063 = vst.msk [vmem:[%s10033_s7 + $0x28] sm:$0xff] %vm388_vm0, %v6053_v62 }
 0xb84   : > { %v5993_v24 = vpop.f32.mrf.mxu0 }
 0xb85   : > { %v5994_v22 = vadd.f32 %v9966_v20, %v5993_v24 }
 0xb87   : > { %6036 = vst.msk [vmem:[#allocation2 + $0xc8] sm:$0xff] %vm388_vm0, %v5994_v22 }
 0xb8c   : > { %v5996_v25 = vpop.f32.mrf.mxu0 }
 0xb8d   : > { %v5997_v49 = vadd.f32 %v9966_v20, %v5996_v25 }
 0xb8f   : > { %6037 = vst.msk [vmem:[#allocation2 + $0xd0] sm:$0xff] %vm388_vm0, %v5997_v49 }
 0xb91   : > { %v6209_v8 = vpop.permute.xlu1 %6208 }
 0xb92   : > { %v6095_v59 = vpop.permute.xlu0 %6094 }
 0xb93   : > { %6117 = vst.msk [vmem:[%s10033_s7 + $0x10] sm:$0xff] %vm6114_vm6, %v6095_v59 }
 0xb94   : > { %6174 = vst.msk [vmem:[%s10033_s7 + $0x10] sm:$0xff] %vm6171_vm7, %v6152_v5  ;;  %v5998_v38 = vpop.f32.mrf.mxu0 }
 0xb95   : > { %6231 = vst.msk [vmem:[%s10033_s7 + $0x10] sm:$0xff] %vm6228_vm8, %v6209_v8  ;;  %v5999_v41 = vadd.f32 %v9966_v20, %v5998_v38 }
 0xb97   : > { %6038 = vst.msk [vmem:[#allocation2 + $0xd8] sm:$0xff] %vm388_vm0, %v5999_v41 }
 0xb99   : > { %v6211_v61 = vpop.permute.xlu2 %6210 }
 0xb9d   : > { %v6001_v50 = vpop.f32.mrf.mxu0 }
 0xb9e   : > { %v6002_v3 = vadd.f32 %v9966_v20, %v6001_v50  ;;  %v6136_v35 = vld [vmem:[#allocation2 + $0xc2] ss:$4 sm:$0xff]  ;;  %v6079_v44 = vld [vmem:[#allocation2 + $0xc1] ss:$4 sm:$0xff]  ;;  %v6055_v32 = vld [vmem:[#allocation2 + $0xc0] ss:$4 sm:$0xff] }
 0xb9f   : > { %6159 = vrot.lane.b32.xlu0 %v6136_v35, %s7123_s12  ;;  %6102 = vrot.lane.b32.xlu1 %v6079_v44, %s7135_s8  ;;  %6064 = vst.msk [vmem:[%s10033_s7 + $0x30] sm:$0xff] %vm388_vm0, %v6055_v32  ;;  %v6193_v60 = vld [vmem:[#allocation2 + $0xc3] ss:$4 sm:$0xff] }
 0xba0   : > { %6039 = vst.msk [vmem:[#allocation2 + $0xe0] sm:$0xff] %vm388_vm0, %v6002_v3 }
 0xba5   : > { %v6003_v45 = vpop.f32.mrf.mxu0 }
 0xba6   : > { %v6004_v21 = vadd.f32 %v9966_v20, %v6003_v45 }
 0xba8   : > { %6040 = vst.msk [vmem:[#allocation2 + $0xe8] sm:$0xff] %vm388_vm0, %v6004_v21 }
 0xbb1   : > { %v6154_v2 = vpop.permute.xlu0 %6153 }
 0xbb2   : > { %v6097_v15 = vpop.permute.xlu1 %6096 }
 0xbb3   : > { %6118 = vst.msk [vmem:[%s10033_s7 + $0x18] sm:$0xff] %vm6114_vm6, %v6097_v15 }
 0xbb4   : > { %6175 = vst.msk [vmem:[%s10033_s7 + $0x18] sm:$0xff] %vm6171_vm7, %v6154_v2 }
 0xbb5   : > { %6232 = vst.msk [vmem:[%s10033_s7 + $0x18] sm:$0xff] %vm6228_vm8, %v6211_v61 }
 0xbba   : > { %v6099_v57 = vpop.permute.xlu2 %6098 }
 0xbbb   : > { %6119 = vst.msk [vmem:[%s10033_s7 + $0x20] sm:$0xff] %vm6114_vm6, %v6099_v57 }
 0xbd1   : > { %v6156_v47 = vpop.permute.xlu1 %6155  ;;  %v6213_v13 = vpop.permute.xlu0 %6212 }
 0xbd2   : > { %6176 = vst.msk [vmem:[%s10033_s7 + $0x20] sm:$0xff] %vm6171_vm7, %v6156_v47 }
 0xbd3   : > { %6233 = vst.msk [vmem:[%s10033_s7 + $0x20] sm:$0xff] %vm6228_vm8, %v6213_v13 }
 0xbd9   : > { %v6158_v1 = vpop.permute.xlu2 %6157 }
 0xbe2   : > { %v6006_v34 = vpop.f32.mrf.mxu0 }
 0xbe3   : > { %v6007_v46 = vadd.f32 %v9966_v20, %v6006_v34 }
 0xbe5   : > { %6041 = vst.msk [vmem:[#allocation2 + $0xf0] sm:$0xff] %vm388_vm0, %v6007_v46 }
 0xbea   : > { %v6008_v10 = vpop.f32.mrf.mxu0 }
 0xbeb   : > { %v6009_v42 = vadd.f32 %v9966_v20, %v6008_v10 }
 0xbed   : > { %6042 = vst.msk [vmem:[#allocation2 + $0xf8] sm:$0xff] %vm388_vm0, %v6009_v42 }
 0xbf1   : > { %v6101_v11 = vpop.permute.xlu0 %6100 }
 0xbf2   : > { %6120 = vst.msk [vmem:[%s10033_s7 + $0x28] sm:$0xff] %vm6114_vm6, %v6101_v11 }
 0xbf3   : > { %6177 = vst.msk [vmem:[%s10033_s7 + $0x28] sm:$0xff] %vm6171_vm7, %v6158_v1 }
 0xbf4   : > { %v6195_v40 = vld [vmem:[#allocation2 + $0xe3] ss:$4 sm:$0xff]  ;;  %v6138_v43 = vld [vmem:[#allocation2 + $0xe2] ss:$4 sm:$0xff]  ;;  %v6081_v29 = vld [vmem:[#allocation2 + $0xe1] ss:$4 sm:$0xff] }
 0xbf5   : > { %6218 = vrot.lane.b32.xlu0 %v6195_v40, %s7121_s10  ;;  %6161 = vrot.lane.b32.xlu1 %v6138_v43, %s7123_s12  ;;  %v6057_v20 = vld [vmem:[#allocation2 + $0xe0] ss:$4 sm:$0xff] }
 0xbf6   : > { %6104 = vrot.lane.b32.xlu2 %v6081_v29, %s7135_s8  ;;  %6065 = vst.msk [vmem:[%s10033_s7 + $0x38] sm:$0xff] %vm388_vm0, %v6057_v20 }
 0xbfd   : > { %6214 = vrot.lane.b32.xlu1 %v6191_v6, %s7121_s10 }
 0xbfe   : > { %6216 = vrot.lane.b32.xlu2 %v6193_v60, %s7121_s10 }
 0xc11   : > { %v6103_v16 = vpop.permute.xlu1 %6102  ;;  %v6160_v63 = vpop.permute.xlu0 %6159 }
 0xc12   : > { %6121 = vst.msk [vmem:[%s10033_s7 + $0x30] sm:$0xff] %vm6114_vm6, %v6103_v16 }
 0xc13   : > { %6178 = vst.msk [vmem:[%s10033_s7 + $0x30] sm:$0xff] %vm6171_vm7, %v6160_v63 }
 0xc50   : > { %v6105_v9 = vpop.permute.xlu2 %6104 }
 0xc51   : > { %6122 = vst.msk [vmem:[%s10033_s7 + $0x38] sm:$0xff] %vm6114_vm6, %v6105_v9 }
 0xc58   : > { %v6217_v27 = vpop.permute.xlu2 %6216 }
 0xc59   : > { %6235 = vst.msk [vmem:[%s10033_s7 + $0x30] sm:$0xff] %vm6228_vm8, %v6217_v27 }
 0xc67   : > { %v6162_v28 = vpop.permute.xlu1 %6161  ;;  %v6219_v51 = vpop.permute.xlu0 %6218 }
 0xc68   : > { %6179 = vst.msk [vmem:[%s10033_s7 + $0x38] sm:$0xff] %vm6171_vm7, %v6162_v28 }
 0xc69   : > { %6236 = vst.msk [vmem:[%s10033_s7 + $0x38] sm:$0xff] %vm6228_vm8, %v6219_v51 }
 0xc6f   : > { %v6215_v56 = vpop.permute.xlu1 %6214 }
 0xc70   : > { %6234 = vst.msk [vmem:[%s10033_s7 + $0x28] sm:$0xff] %vm6228_vm8, %v6215_v56 }
 0xc71 PF: > { %s16_s21 = sadd.s32 1, %s7119_s21  }
 0xc72   : > { %p13_p5 = scmp.ge.s32.totalorder %s16_s21, 4  }
 0xc74   :  { %15 = sbr.rel (!%p13_p5) target bundleno = 1 (0x1), region = 108 }

</bundles_post_ra>
